<compile_context>
chip_gen: v5e
topology: v5e:2x2
jax: 0.10.0
libtpu: 0.0.40
codegen_flags: <defaults>
</compile_context>

<pallas_src>
import functools

import jax
import jax.numpy as jnp
from jax.experimental import pallas as pl
from jax.experimental.pallas import tpu as pltpu


def _round_up(x, m):
    return (x + m - 1) // m * m


# ----------------------------------------------------------------------------
# Fused kernel: conv1(3x3)+ReLU -> conv2(3x3) + 1x1 shortcut -> avgpool(2x2)
# ----------------------------------------------------------------------------
def _fused_block_kernel(xp_ref, w1_ref, b1_ref, w2_ref, b2sc_ref, wsc_ref,
                        mask_ref, hm_ref, out_ref, h1p_ref, *, H, W, Wp, base):
    """One image per grid step (flattened-padded-row trick, row pitch Wp).

    xp_ref   : (1, P, Ci8)  zero-padded input image, channels padded only to a
                            multiple of 8 (NOT to 128).  Padded row r starts at
                            flat index base + r*Wp.  bf16.
    w1_ref   : (9, Ci8, C)  conv1 taps ordered ky*3+kx, (Cin, Cout) layout. bf16
    b1_ref   : (1, C)       f32
    w2_ref   : (9, C, C)    conv2 taps. bf16
    b2sc_ref : (1, C)       b2 + bsc pre-summed. f32
    wsc_ref  : (Ci8, C)     1x1 shortcut weight (Cin, Cout). bf16
    mask_ref : (HW2, 1)     1.0 for valid columns (x < W), 0.0 for pitch pad.
    hm_ref   : (Wo, W)      horizontal 2:1 averaging matrix (0.25 at 2ox, 2ox+1)
    out_ref  : (1, HWo, C)  pooled block output (lane-dense, C = 128*k). bf16
    h1p_ref  : (P, C)       VMEM scratch: zero-padded conv1 activation. bf16
    """
    HW2 = H * Wp
    Wo = W // 2
    P, C = h1p_ref.shape
    interior = base + Wp + 1                 # flat offset of data pixel (0, 0)
    f32 = jnp.float32

    # ---- conv1: 9 shifted MXU matmuls (K = Ci8), f32 accumulation ------------
    # TODO(synk): kx=0/2 tap slices are sublane-misaligned (off % 8 = base+kx);
    # a full fix needs 3 pre-shifted slabs / an im2col build (also the v6e/v7x
    # K-widening), deferred to keep store traffic low on v5e.
    acc1 = jnp.dot(xp_ref[0, base:base + HW2, :], w1_ref[0],
                   preferred_element_type=f32)
    for t in range(1, 9):
        off = base + (t // 3) * Wp + (t % 3)
        acc1 = acc1 + jnp.dot(xp_ref[0, off:off + HW2, :], w1_ref[t],
                              preferred_element_type=f32)
    # bias + ReLU; the mask zeroes the pitch-pad columns so they double as the
    # left/right spatial zero padding for conv2.
    h1 = jnp.maximum(acc1 + b1_ref[...], 0.0) * mask_ref[...]

    # ---- stash h1 as a zero-padded image for conv2 (never leaves HBM) --------
    # Only the halo/base/slack rows are zeroed (small); the interior is fully
    # rewritten every grid step, so no full-scratch zero-fill is needed.
    h1p_ref[0:interior, :] = jnp.zeros((interior, C), h1p_ref.dtype)
    h1p_ref[interior + HW2:P, :] = jnp.zeros((P - interior - HW2, C),
                                             h1p_ref.dtype)
    h1p_ref[interior:interior + HW2, :] = h1.astype(h1p_ref.dtype)

    # ---- conv2 (9 taps) with the 1x1 shortcut folded into the accumulator ----
    acc2 = jnp.dot(xp_ref[0, interior:interior + HW2, :], wsc_ref[...],
                   preferred_element_type=f32)
    for t in range(9):
        off = base + (t // 3) * Wp + (t % 3)
        acc2 = acc2 + jnp.dot(h1p_ref[off:off + HW2, :], w2_ref[t],
                              preferred_element_type=f32)
    s = acc2 + b2sc_ref[...]                                 # (HW2, C) f32

    # ---- 2x2 average pool: vertical pair-sum (VPU) + tiny horizontal matmul --
    hm = hm_ref[...]                                         # (Wo, W) f32
    pooled = []
    for oy in range(H // 2):
        r0 = s[(2 * oy) * Wp:(2 * oy) * Wp + W, :]           # aligned (Wp%8==0)
        r1 = s[(2 * oy + 1) * Wp:(2 * oy + 1) * Wp + W, :]
        pooled.append(jnp.dot(hm, r0 + r1, preferred_element_type=f32))
    out_ref[0] = jnp.concatenate(pooled, axis=0).astype(out_ref.dtype)


# ----------------------------------------------------------------------------
# Wrappers
# ----------------------------------------------------------------------------
def biggan_discriminator_block_nhwc(x, params, out_dtype=jnp.bfloat16):
    """x: (N, H, W, Cin) -> (N, H//2, W//2, Cpad), Cpad = round_up(Cout, 128).

    Output channels [Cout:Cpad] are exactly zero (weights/biases zero-padded),
    so a stacked network can keep the padded slab and skip the channel slice.
    """
    N, H, W, Cin = x.shape
    Cout = params["w1"].shape[0]                 # wide=True -> hidden == out
    if H % 2 or W % 2:
        raise ValueError("H and W must be even (AvgPool2d(2) semantics).")
    f32, bf16 = jnp.float32, jnp.bfloat16

    C = _round_up(Cout, 128)                     # lane-dense hidden/out width
    Ci8 = _round_up(Cin, 8)                      # input channels: NO pad to 128
    Wp = _round_up(W + 2, 8)                     # sublane-friendly row pitch
    base = (-(Wp + 1)) % 16                      # 16-aligns the interior offset
    rows = (H + 2) * Wp
    HW2 = H * Wp
    Ho, Wo = H // 2, W // 2
    HWo = Ho * Wo
    P = _round_up(base + rows + 2, 16)           # +slack for the ky=kx=2 tap

    # ---- input slab: spatial pad -> pitch pad -> flatten (bf16) --------------
    # Channel pad only to a multiple of 8 -> no Cin->128 HBM inflation.
    xp = jnp.pad(x, ((0, 0), (1, 1), (1, Wp - W - 1), (0, Ci8 - Cin)))
    xflat = jnp.pad(xp.reshape(N, rows, Ci8),
                    ((0, 0), (base, P - base - rows), (0, 0))).astype(bf16)
    # TODO(synk): for a fully HBM-traffic-free path, DMA the raw NHWC rows in
    # kernel via memory_space=pl.ANY + pltpu.make_async_copy and pad there.

    # ---- parameters: pad out-channels to lane width, bf16 matmul operands ----
    def prep3x3(w, ci_pad):
        w9 = jnp.transpose(w, (2, 3, 1, 0))                  # (3, 3, ci, co)
        w9 = jnp.pad(w9, ((0, 0), (0, 0),
                          (0, ci_pad - w.shape[1]), (0, C - w.shape[0])))
        return w9.reshape(9, ci_pad, C).astype(bf16)

    w1 = prep3x3(params["w1"], Ci8)
    w2 = prep3x3(params["w2"], C)
    wsc = jnp.pad(params["wsc"].reshape(Cout, Cin).T,
                  ((0, Ci8 - Cin), (0, C - Cout))).astype(bf16)
    b1 = jnp.pad(params["b1"], (0, C - Cout)).reshape(1, C).astype(f32)
    b2sc = jnp.pad(params["b2"] + params["bsc"],
                   (0, C - Cout)).reshape(1, C).astype(f32)

    # column-validity mask (pitch-pad columns double as conv2's spatial pad)
    mask = (jnp.arange(HW2) % Wp < W).astype(f32).reshape(HW2, 1)
    # tiny horizontal 2:1 averaging matrix (replaces the old dense pool matrix)
    hm = (jnp.arange(W)[None, :] // 2 ==
          jnp.arange(Wo)[:, None]).astype(f32) * 0.25        # (Wo, W)

    # ---- generation-aware VMEM budget ----------------------------------------
    out_isz = jnp.dtype(out_dtype).itemsize
    vmem_bytes = (2 * P * Ci8 * 2 + 2 * HWo * C * out_isz          # pipelined I/O
                  + 2 * (9 * Ci8 * C + 9 * C * C + Ci8 * C) * 2    # weights (x2)
                  + 2 * (2 * C * 4 + HW2 * 4 + Wo * W * 4)         # bias/mask/hm
                  + P * C * 2                                      # h1p scratch
                  + 3 * HW2 * C * 4)                               # f32 temps
    # v5e/v6e could go toward ~100 MiB once tiles grow; keep <= 48 MiB for v7x.
    vmem_limit = int(min(max(2 * vmem_bytes, 32 * 1024 * 1024),
                         48 * 1024 * 1024))

    out = pl.pallas_call(
        functools.partial(_fused_block_kernel, H=H, W=W, Wp=Wp, base=base),
        out_shape=jax.ShapeDtypeStruct((N, HWo, C), out_dtype),
        grid=(N,),
        in_specs=[
            pl.BlockSpec((1, P, Ci8), lambda n: (n, 0, 0)),
            pl.BlockSpec((9, Ci8, C), lambda n: (0, 0, 0)),
            pl.BlockSpec((1, C), lambda n: (0, 0)),
            pl.BlockSpec((9, C, C), lambda n: (0, 0, 0)),
            pl.BlockSpec((1, C), lambda n: (0, 0)),
            pl.BlockSpec((Ci8, C), lambda n: (0, 0)),
            pl.BlockSpec((HW2, 1), lambda n: (0, 0)),
            pl.BlockSpec((Wo, W), lambda n: (0, 0)),
        ],
        out_specs=pl.BlockSpec((1, HWo, C), lambda n: (n, 0, 0)),
        scratch_shapes=[pltpu.VMEM((P, C), bf16)],
        compiler_params=pltpu.CompilerParams(
            dimension_semantics=("parallel",),
            vmem_limit_bytes=vmem_limit),
    )(xflat, w1, b1, w2, b2sc, wsc, mask, hm)

    # TODO(synk): production BigGAN shapes (C up to 1536, H=W up to 128) need a
    # row-tile grid axis with 2-row halos and a 256-wide Cout tile axis (weight
    # index_map constant along the row axis, pipeline_mode=pl.Buffered(1) on
    # the constant operands) to fit v7x's 64 MiB per-TC VMEM and to give
    # megacore a parallel axis even at batch 1.
    # TODO(synk): on v6e/v7x, widen MXU K by concatenating the three kx taps
    # per ky into an (HW2, 3*C) slab with (3*C, C) weights; skip on v5e.
    return out.reshape(N, Ho, Wo, C)


def biggan_discriminator_block(x_nchw, params):
    """NCHW wrapper matching the PyTorch module interface.

    h = conv1(x); h = conv2(relu(h)); out = avgpool2(h) + avgpool2(conv_sc(x))
                                          = avgpool2(h + conv_sc(x))
    The transposes / channel slice exist only at the module boundary; a stacked
    network should stay NHWC, call biggan_discriminator_block_nhwc directly and
    keep the padded-channel slab (padded channels are exactly zero).
    """
    Cout = params["w1"].shape[0]
    x = jnp.transpose(x_nchw, (0, 2, 3, 1))
    out = biggan_discriminator_block_nhwc(x, params)
    return jnp.transpose(out[..., :Cout], (0, 3, 1, 2))


# ----------------------------------------------------------------------------
# Parameter prep (plain JAX glue) and pure-XLA reference
# ----------------------------------------------------------------------------
def spectral_normalize(w, u, eps=1e-12):
    """One power iteration, matching torch.nn.utils.spectral_norm training step."""
    co = w.shape[0]
    wm = w.reshape(co, -1)
    v = wm.T @ u
    v = v / jnp.maximum(jnp.linalg.norm(v), eps)
    u2 = wm @ v
    u2 = u2 / jnp.maximum(jnp.linalg.norm(u2), eps)
    sigma = jnp.dot(u2, wm @ v)
    return w / sigma


def reference_forward(x_nchw, params):
    hp = jax.lax.Precision.HIGHEST
    dn = ("NCHW", "OIHW", "NCHW")

    def conv(x, w, b, pad):
        y = jax.lax.conv_general_dilated(x, w, (1, 1), pad,
                                         dimension_numbers=dn, precision=hp)
        return y + b[None, :, None, None]

    def avgpool2(x):
        s = jax.lax.reduce_window(x, 0.0, jax.lax.add,
                                  (1, 1, 2, 2), (1, 1, 2, 2), "VALID")
        return s / 4.0

    h = conv(x_nchw, params["w1"], params["b1"], ((1, 1), (1, 1)))
    h = conv(jax.nn.relu(h), params["w2"], params["b2"], ((1, 1), (1, 1)))
    h = avgpool2(h)
    sc = avgpool2(conv(x_nchw, params["wsc"], params["bsc"], ((0, 0), (0, 0))))
    return h + sc


# ----------------------------------------------------------------------------
if __name__ == "__main__":
    key = jax.random.PRNGKey(0)
    N, Cin, H, W = 2, 4, 16, 16
    Cout = 8

    ks = jax.random.split(key, 10)
    x = jax.random.normal(ks[0], (N, Cin, H, W), jnp.float32)

    def norm_u(k, n):
        u = jax.random.normal(k, (n,), jnp.float32)
        return u / jnp.maximum(jnp.linalg.norm(u), 1e-12)

    w1 = 0.2 * jax.random.normal(ks[1], (Cout, Cin, 3, 3), jnp.float32)
    b1 = 0.1 * jax.random.normal(ks[2], (Cout,), jnp.float32)
    w2 = 0.2 * jax.random.normal(ks[3], (Cout, Cout, 3, 3), jnp.float32)
    b2 = 0.1 * jax.random.normal(ks[4], (Cout,), jnp.float32)
    wsc = 0.2 * jax.random.normal(ks[5], (Cout, Cin, 1, 1), jnp.float32)
    bsc = 0.1 * jax.random.normal(ks[6], (Cout,), jnp.float32)

    params = {
        "w1": spectral_normalize(w1, norm_u(ks[7], Cout)),
        "b1": b1,
        "w2": spectral_normalize(w2, norm_u(ks[8], Cout)),
        "b2": b2,
        "wsc": spectral_normalize(wsc, norm_u(ks[9], Cout)),
        "bsc": bsc,
    }

    out = biggan_discriminator_block(x, params)
    out = jax.block_until_ready(out)

    ref = reference_forward(x, params)
    max_err = float(jnp.max(jnp.abs(out.astype(jnp.float32) - ref)))
    # bf16 matmul operands / bf16 intermediate / bf16 output -> ~1e-2 max abs err
    if out.shape != (N, Cout, H // 2, W // 2) or not (max_err < 5e-2):
        raise AssertionError(f"mismatch: shape={out.shape} max_abs_err={max_err}")

    print("KERNEL_OK")
</pallas_src>

<mosaic_0001>
module attributes {stable_mosaic.version = 11 : i64} {
  func.func @_fused_block_kernel(%arg0: i32, %arg1: memref<1x448x8xbf16, #tpu.memory_space<vmem>>, %arg2: memref<9x8x128xbf16, #tpu.memory_space<vmem>>, %arg3: memref<1x128xf32, #tpu.memory_space<vmem>>, %arg4: memref<9x128x128xbf16, #tpu.memory_space<vmem>>, %arg5: memref<1x128xf32, #tpu.memory_space<vmem>>, %arg6: memref<8x128xbf16, #tpu.memory_space<vmem>>, %arg7: memref<384x1xf32, #tpu.memory_space<vmem>>, %arg8: memref<8x16xf32, #tpu.memory_space<vmem>>, %arg9: memref<1x64x128xbf16, #tpu.memory_space<vmem>>, %arg10: memref<448x128xbf16, #tpu.memory_space<vmem>>) attributes {dimension_semantics = [#tpu.dimension_semantics<parallel>], iteration_bounds = array<i64: 2>, scalar_prefetch = 0 : i64, scratch_operands = 1 : i64, tpu.core_type = #tpu.core_type<tc>, window_params = [{transform_indices = @transform_0, window_bounds = array<i64: 1, 448, 8>}, {pipeline_mode = #tpu.pipeline_mode<synchronous>, transform_indices = @transform_1, window_bounds = array<i64: 9, 8, 128>}, {pipeline_mode = #tpu.pipeline_mode<synchronous>, transform_indices = @transform_2, window_bounds = array<i64: 1, 128>}, {pipeline_mode = #tpu.pipeline_mode<synchronous>, transform_indices = @transform_3, window_bounds = array<i64: 9, 128, 128>}, {pipeline_mode = #tpu.pipeline_mode<synchronous>, transform_indices = @transform_4, window_bounds = array<i64: 1, 128>}, {pipeline_mode = #tpu.pipeline_mode<synchronous>, transform_indices = @transform_5, window_bounds = array<i64: 8, 128>}, {pipeline_mode = #tpu.pipeline_mode<synchronous>, transform_indices = @transform_6, window_bounds = array<i64: 384, 1>}, {pipeline_mode = #tpu.pipeline_mode<synchronous>, transform_indices = @transform_7, window_bounds = array<i64: 8, 16>}, {transform_indices = @transform_8, window_bounds = array<i64: 1, 64, 128>}]} {
    %c0 = arith.constant 0 : index
    %c7 = arith.constant 7 : index
    %c0_0 = arith.constant 0 : index
    %0 = vector.load %arg1[%c0, %c7, %c0_0] : memref<1x448x8xbf16, #tpu.memory_space<vmem>>, vector<1x384x8xbf16>
    %1 = vector.shape_cast %0 : vector<1x384x8xbf16> to vector<384x8xbf16>
    %c0_1 = arith.constant 0 : index
    %c0_2 = arith.constant 0 : index
    %c0_3 = arith.constant 0 : index
    %2 = vector.load %arg2[%c0_1, %c0_2, %c0_3] : memref<9x8x128xbf16, #tpu.memory_space<vmem>>, vector<1x8x128xbf16>
    %3 = vector.shape_cast %2 : vector<1x8x128xbf16> to vector<8x128xbf16>
    %cst = arith.constant dense<0.000000e+00> : vector<384x128xf32>
    %4 = tpu.matmul %1, %3, %cst {dimension_numbers = #tpu.dot_dimension_numbers<[1], [0], [0], [1], [0, 0, 1, 1], [], []>} : vector<384x8xbf16>, vector<8x128xbf16>, vector<384x128xf32> -> vector<384x128xf32>
    %c0_4 = arith.constant 0 : index
    %c8 = arith.constant 8 : index
    %c0_5 = arith.constant 0 : index
    %5 = vector.load %arg1[%c0_4, %c8, %c0_5] : memref<1x448x8xbf16, #tpu.memory_space<vmem>>, vector<1x384x8xbf16>
    %6 = vector.shape_cast %5 : vector<1x384x8xbf16> to vector<384x8xbf16>
    %c1 = arith.constant 1 : index
    %c0_6 = arith.constant 0 : index
    %c0_7 = arith.constant 0 : index
    %7 = vector.load %arg2[%c1, %c0_6, %c0_7] : memref<9x8x128xbf16, #tpu.memory_space<vmem>>, vector<1x8x128xbf16>
    %8 = vector.shape_cast %7 : vector<1x8x128xbf16> to vector<8x128xbf16>
    %cst_8 = arith.constant dense<0.000000e+00> : vector<384x128xf32>
    %9 = tpu.matmul %6, %8, %cst_8 {dimension_numbers = #tpu.dot_dimension_numbers<[1], [0], [0], [1], [0, 0, 1, 1], [], []>} : vector<384x8xbf16>, vector<8x128xbf16>, vector<384x128xf32> -> vector<384x128xf32>
    %10 = arith.addf %4, %9 : vector<384x128xf32>
    %c0_9 = arith.constant 0 : index
    %c9 = arith.constant 9 : index
    %c0_10 = arith.constant 0 : index
    %11 = vector.load %arg1[%c0_9, %c9, %c0_10] : memref<1x448x8xbf16, #tpu.memory_space<vmem>>, vector<1x384x8xbf16>
    %12 = vector.shape_cast %11 : vector<1x384x8xbf16> to vector<384x8xbf16>
    %c2 = arith.constant 2 : index
    %c0_11 = arith.constant 0 : index
    %c0_12 = arith.constant 0 : index
    %13 = vector.load %arg2[%c2, %c0_11, %c0_12] : memref<9x8x128xbf16, #tpu.memory_space<vmem>>, vector<1x8x128xbf16>
    %14 = vector.shape_cast %13 : vector<1x8x128xbf16> to vector<8x128xbf16>
    %cst_13 = arith.constant dense<0.000000e+00> : vector<384x128xf32>
    %15 = tpu.matmul %12, %14, %cst_13 {dimension_numbers = #tpu.dot_dimension_numbers<[1], [0], [0], [1], [0, 0, 1, 1], [], []>} : vector<384x8xbf16>, vector<8x128xbf16>, vector<384x128xf32> -> vector<384x128xf32>
    %16 = arith.addf %10, %15 : vector<384x128xf32>
    %c0_14 = arith.constant 0 : index
    %c31 = arith.constant 31 : index
    %c0_15 = arith.constant 0 : index
    %17 = vector.load %arg1[%c0_14, %c31, %c0_15] : memref<1x448x8xbf16, #tpu.memory_space<vmem>>, vector<1x384x8xbf16>
    %18 = vector.shape_cast %17 : vector<1x384x8xbf16> to vector<384x8xbf16>
    %c3 = arith.constant 3 : index
    %c0_16 = arith.constant 0 : index
    %c0_17 = arith.constant 0 : index
    %19 = vector.load %arg2[%c3, %c0_16, %c0_17] : memref<9x8x128xbf16, #tpu.memory_space<vmem>>, vector<1x8x128xbf16>
    %20 = vector.shape_cast %19 : vector<1x8x128xbf16> to vector<8x128xbf16>
    %cst_18 = arith.constant dense<0.000000e+00> : vector<384x128xf32>
    %21 = tpu.matmul %18, %20, %cst_18 {dimension_numbers = #tpu.dot_dimension_numbers<[1], [0], [0], [1], [0, 0, 1, 1], [], []>} : vector<384x8xbf16>, vector<8x128xbf16>, vector<384x128xf32> -> vector<384x128xf32>
    %22 = arith.addf %16, %21 : vector<384x128xf32>
    %c0_19 = arith.constant 0 : index
    %c32 = arith.constant 32 : index
    %c0_20 = arith.constant 0 : index
    %23 = vector.load %arg1[%c0_19, %c32, %c0_20] : memref<1x448x8xbf16, #tpu.memory_space<vmem>>, vector<1x384x8xbf16>
    %24 = vector.shape_cast %23 : vector<1x384x8xbf16> to vector<384x8xbf16>
    %c4 = arith.constant 4 : index
    %c0_21 = arith.constant 0 : index
    %c0_22 = arith.constant 0 : index
    %25 = vector.load %arg2[%c4, %c0_21, %c0_22] : memref<9x8x128xbf16, #tpu.memory_space<vmem>>, vector<1x8x128xbf16>
    %26 = vector.shape_cast %25 : vector<1x8x128xbf16> to vector<8x128xbf16>
    %cst_23 = arith.constant dense<0.000000e+00> : vector<384x128xf32>
    %27 = tpu.matmul %24, %26, %cst_23 {dimension_numbers = #tpu.dot_dimension_numbers<[1], [0], [0], [1], [0, 0, 1, 1], [], []>} : vector<384x8xbf16>, vector<8x128xbf16>, vector<384x128xf32> -> vector<384x128xf32>
    %28 = arith.addf %22, %27 : vector<384x128xf32>
    %c0_24 = arith.constant 0 : index
    %c33 = arith.constant 33 : index
    %c0_25 = arith.constant 0 : index
    %29 = vector.load %arg1[%c0_24, %c33, %c0_25] : memref<1x448x8xbf16, #tpu.memory_space<vmem>>, vector<1x384x8xbf16>
    %30 = vector.shape_cast %29 : vector<1x384x8xbf16> to vector<384x8xbf16>
    %c5 = arith.constant 5 : index
    %c0_26 = arith.constant 0 : index
    %c0_27 = arith.constant 0 : index
    %31 = vector.load %arg2[%c5, %c0_26, %c0_27] : memref<9x8x128xbf16, #tpu.memory_space<vmem>>, vector<1x8x128xbf16>
    %32 = vector.shape_cast %31 : vector<1x8x128xbf16> to vector<8x128xbf16>
    %cst_28 = arith.constant dense<0.000000e+00> : vector<384x128xf32>
    %33 = tpu.matmul %30, %32, %cst_28 {dimension_numbers = #tpu.dot_dimension_numbers<[1], [0], [0], [1], [0, 0, 1, 1], [], []>} : vector<384x8xbf16>, vector<8x128xbf16>, vector<384x128xf32> -> vector<384x128xf32>
    %34 = arith.addf %28, %33 : vector<384x128xf32>
    %c0_29 = arith.constant 0 : index
    %c55 = arith.constant 55 : index
    %c0_30 = arith.constant 0 : index
    %35 = vector.load %arg1[%c0_29, %c55, %c0_30] : memref<1x448x8xbf16, #tpu.memory_space<vmem>>, vector<1x384x8xbf16>
    %36 = vector.shape_cast %35 : vector<1x384x8xbf16> to vector<384x8xbf16>
    %c6 = arith.constant 6 : index
    %c0_31 = arith.constant 0 : index
    %c0_32 = arith.constant 0 : index
    %37 = vector.load %arg2[%c6, %c0_31, %c0_32] : memref<9x8x128xbf16, #tpu.memory_space<vmem>>, vector<1x8x128xbf16>
    %38 = vector.shape_cast %37 : vector<1x8x128xbf16> to vector<8x128xbf16>
    %cst_33 = arith.constant dense<0.000000e+00> : vector<384x128xf32>
    %39 = tpu.matmul %36, %38, %cst_33 {dimension_numbers = #tpu.dot_dimension_numbers<[1], [0], [0], [1], [0, 0, 1, 1], [], []>} : vector<384x8xbf16>, vector<8x128xbf16>, vector<384x128xf32> -> vector<384x128xf32>
    %40 = arith.addf %34, %39 : vector<384x128xf32>
    %c0_34 = arith.constant 0 : index
    %c56 = arith.constant 56 : index
    %c0_35 = arith.constant 0 : index
    %41 = vector.load %arg1[%c0_34, %c56, %c0_35] : memref<1x448x8xbf16, #tpu.memory_space<vmem>>, vector<1x384x8xbf16>
    %42 = vector.shape_cast %41 : vector<1x384x8xbf16> to vector<384x8xbf16>
    %c7_36 = arith.constant 7 : index
    %c0_37 = arith.constant 0 : index
    %c0_38 = arith.constant 0 : index
    %43 = vector.load %arg2[%c7_36, %c0_37, %c0_38] : memref<9x8x128xbf16, #tpu.memory_space<vmem>>, vector<1x8x128xbf16>
    %44 = vector.shape_cast %43 : vector<1x8x128xbf16> to vector<8x128xbf16>
    %cst_39 = arith.constant dense<0.000000e+00> : vector<384x128xf32>
    %45 = tpu.matmul %42, %44, %cst_39 {dimension_numbers = #tpu.dot_dimension_numbers<[1], [0], [0], [1], [0, 0, 1, 1], [], []>} : vector<384x8xbf16>, vector<8x128xbf16>, vector<384x128xf32> -> vector<384x128xf32>
    %46 = arith.addf %40, %45 : vector<384x128xf32>
    %c0_40 = arith.constant 0 : index
    %c57 = arith.constant 57 : index
    %c0_41 = arith.constant 0 : index
    %47 = vector.load %arg1[%c0_40, %c57, %c0_41] : memref<1x448x8xbf16, #tpu.memory_space<vmem>>, vector<1x384x8xbf16>
    %48 = vector.shape_cast %47 : vector<1x384x8xbf16> to vector<384x8xbf16>
    %c8_42 = arith.constant 8 : index
    %c0_43 = arith.constant 0 : index
    %c0_44 = arith.constant 0 : index
    %49 = vector.load %arg2[%c8_42, %c0_43, %c0_44] : memref<9x8x128xbf16, #tpu.memory_space<vmem>>, vector<1x8x128xbf16>
    %50 = vector.shape_cast %49 : vector<1x8x128xbf16> to vector<8x128xbf16>
    %cst_45 = arith.constant dense<0.000000e+00> : vector<384x128xf32>
    %51 = tpu.matmul %48, %50, %cst_45 {dimension_numbers = #tpu.dot_dimension_numbers<[1], [0], [0], [1], [0, 0, 1, 1], [], []>} : vector<384x8xbf16>, vector<8x128xbf16>, vector<384x128xf32> -> vector<384x128xf32>
    %52 = arith.addf %46, %51 : vector<384x128xf32>
    %c0_46 = arith.constant 0 : index
    %c0_47 = arith.constant 0 : index
    %53 = vector.load %arg3[%c0_46, %c0_47] : memref<1x128xf32, #tpu.memory_space<vmem>>, vector<1x128xf32>
    %54 = vector.broadcast %53 : vector<1x128xf32> to vector<384x128xf32>
    %55 = arith.addf %52, %54 : vector<384x128xf32>
    %cst_48 = arith.constant 0.000000e+00 : f32
    %56 = vector.broadcast %cst_48 : f32 to vector<384x128xf32>
    %57 = arith.maximumf %55, %56 : vector<384x128xf32>
    %c0_49 = arith.constant 0 : index
    %c0_50 = arith.constant 0 : index
    %58 = vector.load %arg7[%c0_49, %c0_50] : memref<384x1xf32, #tpu.memory_space<vmem>>, vector<384x1xf32>
    %59 = vector.broadcast %58 : vector<384x1xf32> to vector<384x128xf32>
    %60 = arith.mulf %57, %59 : vector<384x128xf32>
    %cst_51 = arith.constant 0.000000e+00 : bf16
    %61 = vector.broadcast %cst_51 : bf16 to vector<32x128xbf16>
    %c0_52 = arith.constant 0 : index
    %c0_53 = arith.constant 0 : index
    %62 = vector.load %arg10[%c0_52, %c0_53] : memref<448x128xbf16, #tpu.memory_space<vmem>>, vector<32x128xbf16>
    tpu.vector_store %arg10[%c0_52, %c0_53], %61 {strides = array<i32>} : memref<448x128xbf16, #tpu.memory_space<vmem>>, vector<32x128xbf16>,
    %cst_54 = arith.constant 0.000000e+00 : bf16
    %63 = vector.broadcast %cst_54 : bf16 to vector<32x128xbf16>
    %c416 = arith.constant 416 : index
    %c0_55 = arith.constant 0 : index
    %64 = vector.load %arg10[%c416, %c0_55] : memref<448x128xbf16, #tpu.memory_space<vmem>>, vector<32x128xbf16>
    tpu.vector_store %arg10[%c416, %c0_55], %63 {strides = array<i32>} : memref<448x128xbf16, #tpu.memory_space<vmem>>, vector<32x128xbf16>,
    %65 = arith.truncf %60 : vector<384x128xf32> to vector<384x128xbf16>
    %c32_56 = arith.constant 32 : index
    %c0_57 = arith.constant 0 : index
    %66 = vector.load %arg10[%c32_56, %c0_57] : memref<448x128xbf16, #tpu.memory_space<vmem>>, vector<384x128xbf16>
    tpu.vector_store %arg10[%c32_56, %c0_57], %65 {strides = array<i32>} : memref<448x128xbf16, #tpu.memory_space<vmem>>, vector<384x128xbf16>,
    %c0_58 = arith.constant 0 : index
    %c32_59 = arith.constant 32 : index
    %c0_60 = arith.constant 0 : index
    %67 = vector.load %arg1[%c0_58, %c32_59, %c0_60] : memref<1x448x8xbf16, #tpu.memory_space<vmem>>, vector<1x384x8xbf16>
    %68 = vector.shape_cast %67 : vector<1x384x8xbf16> to vector<384x8xbf16>
    %c0_61 = arith.constant 0 : index
    %c0_62 = arith.constant 0 : index
    %69 = vector.load %arg6[%c0_61, %c0_62] : memref<8x128xbf16, #tpu.memory_space<vmem>>, vector<8x128xbf16>
    %cst_63 = arith.constant dense<0.000000e+00> : vector<384x128xf32>
    %70 = tpu.matmul %68, %69, %cst_63 {dimension_numbers = #tpu.dot_dimension_numbers<[1], [0], [0], [1], [0, 0, 1, 1], [], []>} : vector<384x8xbf16>, vector<8x128xbf16>, vector<384x128xf32> -> vector<384x128xf32>
    %c7_64 = arith.constant 7 : index
    %c0_65 = arith.constant 0 : index
    %71 = vector.load %arg10[%c7_64, %c0_65] : memref<448x128xbf16, #tpu.memory_space<vmem>>, vector<384x128xbf16>
    %c0_66 = arith.constant 0 : index
    %c0_67 = arith.constant 0 : index
    %c0_68 = arith.constant 0 : index
    %72 = vector.load %arg4[%c0_66, %c0_67, %c0_68] : memref<9x128x128xbf16, #tpu.memory_space<vmem>>, vector<1x128x128xbf16>
    %73 = vector.shape_cast %72 : vector<1x128x128xbf16> to vector<128x128xbf16>
    %cst_69 = arith.constant dense<0.000000e+00> : vector<384x128xf32>
    %74 = tpu.matmul %71, %73, %cst_69 {dimension_numbers = #tpu.dot_dimension_numbers<[1], [0], [0], [1], [0, 0, 1, 1], [], []>} : vector<384x128xbf16>, vector<128x128xbf16>, vector<384x128xf32> -> vector<384x128xf32>
    %75 = arith.addf %70, %74 : vector<384x128xf32>
    %c8_70 = arith.constant 8 : index
    %c0_71 = arith.constant 0 : index
    %76 = vector.load %arg10[%c8_70, %c0_71] : memref<448x128xbf16, #tpu.memory_space<vmem>>, vector<384x128xbf16>
    %c1_72 = arith.constant 1 : index
    %c0_73 = arith.constant 0 : index
    %c0_74 = arith.constant 0 : index
    %77 = vector.load %arg4[%c1_72, %c0_73, %c0_74] : memref<9x128x128xbf16, #tpu.memory_space<vmem>>, vector<1x128x128xbf16>
    %78 = vector.shape_cast %77 : vector<1x128x128xbf16> to vector<128x128xbf16>
    %cst_75 = arith.constant dense<0.000000e+00> : vector<384x128xf32>
    %79 = tpu.matmul %76, %78, %cst_75 {dimension_numbers = #tpu.dot_dimension_numbers<[1], [0], [0], [1], [0, 0, 1, 1], [], []>} : vector<384x128xbf16>, vector<128x128xbf16>, vector<384x128xf32> -> vector<384x128xf32>
    %80 = arith.addf %75, %79 : vector<384x128xf32>
    %c9_76 = arith.constant 9 : index
    %c0_77 = arith.constant 0 : index
    %81 = vector.load %arg10[%c9_76, %c0_77] : memref<448x128xbf16, #tpu.memory_space<vmem>>, vector<384x128xbf16>
    %c2_78 = arith.constant 2 : index
    %c0_79 = arith.constant 0 : index
    %c0_80 = arith.constant 0 : index
    %82 = vector.load %arg4[%c2_78, %c0_79, %c0_80] : memref<9x128x128xbf16, #tpu.memory_space<vmem>>, vector<1x128x128xbf16>
    %83 = vector.shape_cast %82 : vector<1x128x128xbf16> to vector<128x128xbf16>
    %cst_81 = arith.constant dense<0.000000e+00> : vector<384x128xf32>
    %84 = tpu.matmul %81, %83, %cst_81 {dimension_numbers = #tpu.dot_dimension_numbers<[1], [0], [0], [1], [0, 0, 1, 1], [], []>} : vector<384x128xbf16>, vector<128x128xbf16>, vector<384x128xf32> -> vector<384x128xf32>
    %85 = arith.addf %80, %84 : vector<384x128xf32>
    %c31_82 = arith.constant 31 : index
    %c0_83 = arith.constant 0 : index
    %86 = vector.load %arg10[%c31_82, %c0_83] : memref<448x128xbf16, #tpu.memory_space<vmem>>, vector<384x128xbf16>
    %c3_84 = arith.constant 3 : index
    %c0_85 = arith.constant 0 : index
    %c0_86 = arith.constant 0 : index
    %87 = vector.load %arg4[%c3_84, %c0_85, %c0_86] : memref<9x128x128xbf16, #tpu.memory_space<vmem>>, vector<1x128x128xbf16>
    %88 = vector.shape_cast %87 : vector<1x128x128xbf16> to vector<128x128xbf16>
    %cst_87 = arith.constant dense<0.000000e+00> : vector<384x128xf32>
    %89 = tpu.matmul %86, %88, %cst_87 {dimension_numbers = #tpu.dot_dimension_numbers<[1], [0], [0], [1], [0, 0, 1, 1], [], []>} : vector<384x128xbf16>, vector<128x128xbf16>, vector<384x128xf32> -> vector<384x128xf32>
    %90 = arith.addf %85, %89 : vector<384x128xf32>
    %c32_88 = arith.constant 32 : index
    %c0_89 = arith.constant 0 : index
    %91 = vector.load %arg10[%c32_88, %c0_89] : memref<448x128xbf16, #tpu.memory_space<vmem>>, vector<384x128xbf16>
    %c4_90 = arith.constant 4 : index
    %c0_91 = arith.constant 0 : index
    %c0_92 = arith.constant 0 : index
    %92 = vector.load %arg4[%c4_90, %c0_91, %c0_92] : memref<9x128x128xbf16, #tpu.memory_space<vmem>>, vector<1x128x128xbf16>
    %93 = vector.shape_cast %92 : vector<1x128x128xbf16> to vector<128x128xbf16>
    %cst_93 = arith.constant dense<0.000000e+00> : vector<384x128xf32>
    %94 = tpu.matmul %91, %93, %cst_93 {dimension_numbers = #tpu.dot_dimension_numbers<[1], [0], [0], [1], [0, 0, 1, 1], [], []>} : vector<384x128xbf16>, vector<128x128xbf16>, vector<384x128xf32> -> vector<384x128xf32>
    %95 = arith.addf %90, %94 : vector<384x128xf32>
    %c33_94 = arith.constant 33 : index
    %c0_95 = arith.constant 0 : index
    %96 = vector.load %arg10[%c33_94, %c0_95] : memref<448x128xbf16, #tpu.memory_space<vmem>>, vector<384x128xbf16>
    %c5_96 = arith.constant 5 : index
    %c0_97 = arith.constant 0 : index
    %c0_98 = arith.constant 0 : index
    %97 = vector.load %arg4[%c5_96, %c0_97, %c0_98] : memref<9x128x128xbf16, #tpu.memory_space<vmem>>, vector<1x128x128xbf16>
    %98 = vector.shape_cast %97 : vector<1x128x128xbf16> to vector<128x128xbf16>
    %cst_99 = arith.constant dense<0.000000e+00> : vector<384x128xf32>
    %99 = tpu.matmul %96, %98, %cst_99 {dimension_numbers = #tpu.dot_dimension_numbers<[1], [0], [0], [1], [0, 0, 1, 1], [], []>} : vector<384x128xbf16>, vector<128x128xbf16>, vector<384x128xf32> -> vector<384x128xf32>
    %100 = arith.addf %95, %99 : vector<384x128xf32>
    %c55_100 = arith.constant 55 : index
    %c0_101 = arith.constant 0 : index
    %101 = vector.load %arg10[%c55_100, %c0_101] : memref<448x128xbf16, #tpu.memory_space<vmem>>, vector<384x128xbf16>
    %c6_102 = arith.constant 6 : index
    %c0_103 = arith.constant 0 : index
    %c0_104 = arith.constant 0 : index
    %102 = vector.load %arg4[%c6_102, %c0_103, %c0_104] : memref<9x128x128xbf16, #tpu.memory_space<vmem>>, vector<1x128x128xbf16>
    %103 = vector.shape_cast %102 : vector<1x128x128xbf16> to vector<128x128xbf16>
    %cst_105 = arith.constant dense<0.000000e+00> : vector<384x128xf32>
    %104 = tpu.matmul %101, %103, %cst_105 {dimension_numbers = #tpu.dot_dimension_numbers<[1], [0], [0], [1], [0, 0, 1, 1], [], []>} : vector<384x128xbf16>, vector<128x128xbf16>, vector<384x128xf32> -> vector<384x128xf32>
    %105 = arith.addf %100, %104 : vector<384x128xf32>
    %c56_106 = arith.constant 56 : index
    %c0_107 = arith.constant 0 : index
    %106 = vector.load %arg10[%c56_106, %c0_107] : memref<448x128xbf16, #tpu.memory_space<vmem>>, vector<384x128xbf16>
    %c7_108 = arith.constant 7 : index
    %c0_109 = arith.constant 0 : index
    %c0_110 = arith.constant 0 : index
    %107 = vector.load %arg4[%c7_108, %c0_109, %c0_110] : memref<9x128x128xbf16, #tpu.memory_space<vmem>>, vector<1x128x128xbf16>
    %108 = vector.shape_cast %107 : vector<1x128x128xbf16> to vector<128x128xbf16>
    %cst_111 = arith.constant dense<0.000000e+00> : vector<384x128xf32>
    %109 = tpu.matmul %106, %108, %cst_111 {dimension_numbers = #tpu.dot_dimension_numbers<[1], [0], [0], [1], [0, 0, 1, 1], [], []>} : vector<384x128xbf16>, vector<128x128xbf16>, vector<384x128xf32> -> vector<384x128xf32>
    %110 = arith.addf %105, %109 : vector<384x128xf32>
    %c57_112 = arith.constant 57 : index
    %c0_113 = arith.constant 0 : index
    %111 = vector.load %arg10[%c57_112, %c0_113] : memref<448x128xbf16, #tpu.memory_space<vmem>>, vector<384x128xbf16>
    %c8_114 = arith.constant 8 : index
    %c0_115 = arith.constant 0 : index
    %c0_116 = arith.constant 0 : index
    %112 = vector.load %arg4[%c8_114, %c0_115, %c0_116] : memref<9x128x128xbf16, #tpu.memory_space<vmem>>, vector<1x128x128xbf16>
    %113 = vector.shape_cast %112 : vector<1x128x128xbf16> to vector<128x128xbf16>
    %cst_117 = arith.constant dense<0.000000e+00> : vector<384x128xf32>
    %114 = tpu.matmul %111, %113, %cst_117 {dimension_numbers = #tpu.dot_dimension_numbers<[1], [0], [0], [1], [0, 0, 1, 1], [], []>} : vector<384x128xbf16>, vector<128x128xbf16>, vector<384x128xf32> -> vector<384x128xf32>
    %115 = arith.addf %110, %114 : vector<384x128xf32>
    %c0_118 = arith.constant 0 : index
    %c0_119 = arith.constant 0 : index
    %116 = vector.load %arg5[%c0_118, %c0_119] : memref<1x128xf32, #tpu.memory_space<vmem>>, vector<1x128xf32>
    %117 = vector.broadcast %116 : vector<1x128xf32> to vector<384x128xf32>
    %118 = arith.addf %115, %117 : vector<384x128xf32>
    %c0_120 = arith.constant 0 : index
    %c0_121 = arith.constant 0 : index
    %119 = vector.load %arg8[%c0_120, %c0_121] : memref<8x16xf32, #tpu.memory_space<vmem>>, vector<8x16xf32>
    %120 = vector.extract_strided_slice %118 {offsets = [0, 0], sizes = [16, 128], strides = [1, 1]} : vector<384x128xf32> to vector<16x128xf32>
    %121 = vector.extract_strided_slice %118 {offsets = [24, 0], sizes = [16, 128], strides = [1, 1]} : vector<384x128xf32> to vector<16x128xf32>
    %122 = arith.addf %120, %121 : vector<16x128xf32>
    %cst_122 = arith.constant dense<0.000000e+00> : vector<8x128xf32>
    %123 = tpu.matmul %119, %122, %cst_122 {dimension_numbers = #tpu.dot_dimension_numbers<[1], [0], [0], [1], [0, 0, 1, 1], [], []>} : vector<8x16xf32>, vector<16x128xf32>, vector<8x128xf32> -> vector<8x128xf32>
    %124 = vector.extract_strided_slice %118 {offsets = [48, 0], sizes = [16, 128], strides = [1, 1]} : vector<384x128xf32> to vector<16x128xf32>
    %125 = vector.extract_strided_slice %118 {offsets = [72, 0], sizes = [16, 128], strides = [1, 1]} : vector<384x128xf32> to vector<16x128xf32>
    %126 = arith.addf %124, %125 : vector<16x128xf32>
    %cst_123 = arith.constant dense<0.000000e+00> : vector<8x128xf32>
    %127 = tpu.matmul %119, %126, %cst_123 {dimension_numbers = #tpu.dot_dimension_numbers<[1], [0], [0], [1], [0, 0, 1, 1], [], []>} : vector<8x16xf32>, vector<16x128xf32>, vector<8x128xf32> -> vector<8x128xf32>
    %128 = vector.extract_strided_slice %118 {offsets = [96, 0], sizes = [16, 128], strides = [1, 1]} : vector<384x128xf32> to vector<16x128xf32>
    %129 = vector.extract_strided_slice %118 {offsets = [120, 0], sizes = [16, 128], strides = [1, 1]} : vector<384x128xf32> to vector<16x128xf32>
    %130 = arith.addf %128, %129 : vector<16x128xf32>
    %cst_124 = arith.constant dense<0.000000e+00> : vector<8x128xf32>
    %131 = tpu.matmul %119, %130, %cst_124 {dimension_numbers = #tpu.dot_dimension_numbers<[1], [0], [0], [1], [0, 0, 1, 1], [], []>} : vector<8x16xf32>, vector<16x128xf32>, vector<8x128xf32> -> vector<8x128xf32>
    %132 = vector.extract_strided_slice %118 {offsets = [144, 0], sizes = [16, 128], strides = [1, 1]} : vector<384x128xf32> to vector<16x128xf32>
    %133 = vector.extract_strided_slice %118 {offsets = [168, 0], sizes = [16, 128], strides = [1, 1]} : vector<384x128xf32> to vector<16x128xf32>
    %134 = arith.addf %132, %133 : vector<16x128xf32>
    %cst_125 = arith.constant dense<0.000000e+00> : vector<8x128xf32>
    %135 = tpu.matmul %119, %134, %cst_125 {dimension_numbers = #tpu.dot_dimension_numbers<[1], [0], [0], [1], [0, 0, 1, 1], [], []>} : vector<8x16xf32>, vector<16x128xf32>, vector<8x128xf32> -> vector<8x128xf32>
    %136 = vector.extract_strided_slice %118 {offsets = [192, 0], sizes = [16, 128], strides = [1, 1]} : vector<384x128xf32> to vector<16x128xf32>
    %137 = vector.extract_strided_slice %118 {offsets = [216, 0], sizes = [16, 128], strides = [1, 1]} : vector<384x128xf32> to vector<16x128xf32>
    %138 = arith.addf %136, %137 : vector<16x128xf32>
    %cst_126 = arith.constant dense<0.000000e+00> : vector<8x128xf32>
    %139 = tpu.matmul %119, %138, %cst_126 {dimension_numbers = #tpu.dot_dimension_numbers<[1], [0], [0], [1], [0, 0, 1, 1], [], []>} : vector<8x16xf32>, vector<16x128xf32>, vector<8x128xf32> -> vector<8x128xf32>
    %140 = vector.extract_strided_slice %118 {offsets = [240, 0], sizes = [16, 128], strides = [1, 1]} : vector<384x128xf32> to vector<16x128xf32>
    %141 = vector.extract_strided_slice %118 {offsets = [264, 0], sizes = [16, 128], strides = [1, 1]} : vector<384x128xf32> to vector<16x128xf32>
    %142 = arith.addf %140, %141 : vector<16x128xf32>
    %cst_127 = arith.constant dense<0.000000e+00> : vector<8x128xf32>
    %143 = tpu.matmul %119, %142, %cst_127 {dimension_numbers = #tpu.dot_dimension_numbers<[1], [0], [0], [1], [0, 0, 1, 1], [], []>} : vector<8x16xf32>, vector<16x128xf32>, vector<8x128xf32> -> vector<8x128xf32>
    %144 = vector.extract_strided_slice %118 {offsets = [288, 0], sizes = [16, 128], strides = [1, 1]} : vector<384x128xf32> to vector<16x128xf32>
    %145 = vector.extract_strided_slice %118 {offsets = [312, 0], sizes = [16, 128], strides = [1, 1]} : vector<384x128xf32> to vector<16x128xf32>
    %146 = arith.addf %144, %145 : vector<16x128xf32>
    %cst_128 = arith.constant dense<0.000000e+00> : vector<8x128xf32>
    %147 = tpu.matmul %119, %146, %cst_128 {dimension_numbers = #tpu.dot_dimension_numbers<[1], [0], [0], [1], [0, 0, 1, 1], [], []>} : vector<8x16xf32>, vector<16x128xf32>, vector<8x128xf32> -> vector<8x128xf32>
    %148 = vector.extract_strided_slice %118 {offsets = [336, 0], sizes = [16, 128], strides = [1, 1]} : vector<384x128xf32> to vector<16x128xf32>
    %149 = vector.extract_strided_slice %118 {offsets = [360, 0], sizes = [16, 128], strides = [1, 1]} : vector<384x128xf32> to vector<16x128xf32>
    %150 = arith.addf %148, %149 : vector<16x128xf32>
    %cst_129 = arith.constant dense<0.000000e+00> : vector<8x128xf32>
    %151 = tpu.matmul %119, %150, %cst_129 {dimension_numbers = #tpu.dot_dimension_numbers<[1], [0], [0], [1], [0, 0, 1, 1], [], []>} : vector<8x16xf32>, vector<16x128xf32>, vector<8x128xf32> -> vector<8x128xf32>
    %152 = tpu.concatenate %123, %127, %131, %135, %139, %143, %147, %151 in 0 : vector<8x128xf32>, vector<8x128xf32>, vector<8x128xf32>, vector<8x128xf32>, vector<8x128xf32>, vector<8x128xf32>, vector<8x128xf32>, vector<8x128xf32> -> vector<64x128xf32>
    %153 = arith.truncf %152 : vector<64x128xf32> to vector<64x128xbf16>
    %c0_130 = arith.constant 0 : index
    %c0_131 = arith.constant 0 : index
    %c0_132 = arith.constant 0 : index
    %154 = vector.load %arg9[%c0_130, %c0_131, %c0_132] : memref<1x64x128xbf16, #tpu.memory_space<vmem>>, vector<1x64x128xbf16>
    %155 = vector.shape_cast %154 : vector<1x64x128xbf16> to vector<64x128xbf16>
    %156 = vector.shape_cast %153 : vector<64x128xbf16> to vector<1x64x128xbf16>
    tpu.vector_store %arg9[%c0_130, %c0_131, %c0_132], %156 {strides = array<i32>} : memref<1x64x128xbf16, #tpu.memory_space<vmem>>, vector<1x64x128xbf16>,
    return
  }
  func.func @transform_0(%arg0: i32) -> (i32, i32, i32) {
    %c0_i32 = arith.constant 0 : i32
    %c0_i32_0 = arith.constant 0 : i32
    %c0_i32_1 = arith.constant 0 : i32
    return %arg0, %c0_i32, %c0_i32_0 : i32, i32, i32
  }
  func.func @transform_1(%arg0: i32) -> (i32, i32, i32) {
    %c0_i32 = arith.constant 0 : i32
    %c0_i32_0 = arith.constant 0 : i32
    %c0_i32_1 = arith.constant 0 : i32
    %c0_i32_2 = arith.constant 0 : i32
    return %c0_i32, %c0_i32_0, %c0_i32_1 : i32, i32, i32
  }
  func.func @transform_2(%arg0: i32) -> (i32, i32) {
    %c0_i32 = arith.constant 0 : i32
    %c0_i32_0 = arith.constant 0 : i32
    %c0_i32_1 = arith.constant 0 : i32
    return %c0_i32, %c0_i32_0 : i32, i32
  }
  func.func @transform_3(%arg0: i32) -> (i32, i32, i32) {
    %c0_i32 = arith.constant 0 : i32
    %c0_i32_0 = arith.constant 0 : i32
    %c0_i32_1 = arith.constant 0 : i32
    %c0_i32_2 = arith.constant 0 : i32
    return %c0_i32, %c0_i32_0, %c0_i32_1 : i32, i32, i32
  }
  func.func @transform_4(%arg0: i32) -> (i32, i32) {
    %c0_i32 = arith.constant 0 : i32
    %c0_i32_0 = arith.constant 0 : i32
    %c0_i32_1 = arith.constant 0 : i32
    return %c0_i32, %c0_i32_0 : i32, i32
  }
  func.func @transform_5(%arg0: i32) -> (i32, i32) {
    %c0_i32 = arith.constant 0 : i32
    %c0_i32_0 = arith.constant 0 : i32
    %c0_i32_1 = arith.constant 0 : i32
    return %c0_i32, %c0_i32_0 : i32, i32
  }
  func.func @transform_6(%arg0: i32) -> (i32, i32) {
    %c0_i32 = arith.constant 0 : i32
    %c0_i32_0 = arith.constant 0 : i32
    %c0_i32_1 = arith.constant 0 : i32
    return %c0_i32, %c0_i32_0 : i32, i32
  }
  func.func @transform_7(%arg0: i32) -> (i32, i32) {
    %c0_i32 = arith.constant 0 : i32
    %c0_i32_0 = arith.constant 0 : i32
    %c0_i32_1 = arith.constant 0 : i32
    return %c0_i32, %c0_i32_0 : i32, i32
  }
  func.func @transform_8(%arg0: i32) -> (i32, i32, i32) {
    %c0_i32 = arith.constant 0 : i32
    %c0_i32_0 = arith.constant 0 : i32
    %c0_i32_1 = arith.constant 0 : i32
    return %arg0, %c0_i32, %c0_i32_0 : i32, i32, i32
  }
}

</mosaic_0001>

<bundles_post_ra>
// kernel: tpu_custom_call.1
= control target key start
LH: loop header
LB: loop body
LE: loop exit
PB: predicated region body
PF: predicated region fallthrough
CT: control target
= control target key end

     0   :  { %13 = vsyncpa [#allocation4], 0  ;;  %s17431_s0 = inlined_call_operand.vmem [shape: bf16[2,448,8], index: 0, kind: input, shape index: {}]   ;;  %s17432_s1 = inlined_call_operand.vmem [shape: bf16[9,8,128], index: 1, kind: input, shape index: {}]   ;;  %s17433_s2 = inlined_call_operand.vmem [shape: f32[1,128], index: 2, kind: input, shape index: {}]   ;;  %s17434_s3 = inlined_call_operand.vmem [shape: bf16[9,128,128], index: 3, kind: input, shape index: {}]   ;;  %s17435_s4 = inlined_call_operand.vmem [shape: f32[1,128], index: 4, kind: input, shape index: {}]   ;;  %s17436_s5 = inlined_call_operand.vmem [shape: bf16[8,128], index: 5, kind: input, shape index: {}]   ;;  %s17437_s6 = inlined_call_operand.vmem [shape: f32[384,1], index: 6, kind: input, shape index: {}]   ;;  %s17438_s7 = inlined_call_operand.vmem [shape: f32[8,16], index: 7, kind: input, shape index: {}]   ;;  %s17439_s8 = inlined_call_operand.hbm [shape: bf16[2,64,128], index: 8, kind: output, shape index: {}]  }
   0x1   :  { %15 = vsyncpa [#allocation4 + $0x1], 0  ;;  %s14086_s27 = smov 0   ;;  %s14088_s28 = smov 0  }
   0x2   :  { %s14090_s29 = smov 0   ;;  %s14092_s30 = smov 0  }
   0x3 LB: > { %s14107_s9 = sadd.s32 4294967295, %s14036_s30   ;;  %s10507_s10 = sadd.s32 4294967294, %s14036_s30   ;;  %s14036_s30 = sphi %s14092_s30, %s17629_s30   ;;  %s14032_s29 = sphi %s14090_s29, %s17628_s29   ;;  %s14028_s28 = sphi %s14088_s28, %s17627_s28   ;;  %s14024_s27 = sphi %s14086_s27, %s17626_s27  }
   0x4   : > { %s14111_s11 = sadd.s32 1, %s14036_s30   ;;  %s201_s12 = sadd.s32 1, %s14032_s29 }
   0x5   : > { %s198_s13 = ssub.s32 %s14036_s30, %s14111_s11  ;;  %p211_p0 = scmp.ne.s32.totalorder %s14032_s29, %s14028_s28 }
   0x6   : > { %p199_p1 = scmp.eq.s32.totalorder %s198_s13, 0  ;;  %p212_p2 = scmp.eq.s32.totalorder %s14107_s9, 1 }
   0x7   : > { %p217_p3 = scmp.ne.s32.totalorder %s14028_s28, %s14024_s27  ;;  %p218_p4 = scmp.eq.s32.totalorder %s10507_s10, 1 }
   0x8   : > { %s14122_s14 = scalar_select %p199_p1, %s14032_s29, %s201_s12  }
   0x9   : > { %p14124_p5 = por %p212_p2, %p211_p0  ;;  %p14128_p6 = por %p218_p4, %p217_p3 }
   0xa   : > { %p10510_p7 = scmp.ge.s32.totalorder %s14036_s30, 1  ;;  %p265_p8 = scmp.lt.s32.totalorder %s14036_s30, 3 }
   0xc   : > { %p266_p9 = pnand %p10510_p7, %p265_p8 }
   0xe   : > { %269 = sbr.rel (%p266_p9) target bundleno = 2278 (0x8e6), region = 52 }
  0x13   : > { %v10513_v0 = vld [vmem:[%s17432_s1 + $0x4] sm:$0xf]  ;;  %vm550_vm0 = vcmask 1043456   ;;  %p299_p10 = scmp.lt.s32.totalorder %s14107_s9, 1  ;;  %v10562_v2 = vld [vmem:[%s17432_s1 + $0x8] sm:$0xf] }
  0x14   : > { %v552_v1 = vsel %vm550_vm0, %v10513_v0, 0  ;;  %v354_v3 = vld [vmem:[%s17432_s1] sm:$0xf]  ;;  %v1583_v4 = vsel %vm550_vm0, %v10562_v2, 0  ;;  %vm477_vm1 = vcmask 64512   ;;  %vm10235_vm4 = vcmask 130048  }
  0x15   : > { %13780 = vmatpush.bf16.msra.mxu3 %v552_v1  ;;  %561 = vmatpush.bf16.msra.mxu0 %v552_v1  ;;  %s300_s23 = scalar_select %p299_p10, %s14107_s9, 1  ;;  %v1008_v5 = vsel %vm550_vm0, %v354_v3, 0  ;;  %vm1313_vm2 = vsmask.f32 7424  ;;  %vm710_vm3 = vsmask.f32 4352 }
  0x16   : > { %1592 = vmatpush.bf16.msra.mxu2 %v1583_v4  ;;  %1017 = vmatpush.bf16.msra.mxu1 %v1008_v5  ;;  %s296_s19 = sand.u32 1, %s14028_s28   ;;  %s12102_s21 = sshll.u32 %s14107_s9, 5 }
  0x17   : > { %s13921_s24 = smul.u32 224, %s300_s23  ;;  %s10511_s20 = sshll.u32 %s296_s19, 5 }
  0x18   : > { %s10430_s12 = scalar_lea.sflag [#allocation4], %s296_s19 }
  0x19   : > { %13781 = vmatpush.bf16.msrb.mxu3 %v1008_v5  ;;  %s14151_s10 = scalar_lea.vmem %s17431_s0, %s13921_s24  ;;  %s10441_s24 = scalar_lea.hbm %s17439_s8, %s12102_s21 }
  0x1a   : > { %v13821_v6 = vld [vmem:[%s14151_s10 + $0x9c] sm:$0xff]   ;;  %v306_v8 = vld [vmem:[%s14151_s10 + $0x4] sm:$0xf]  ;;  %v12803_v9 = vld [vmem:[%s14151_s10 + $0x8] sm:$0xff]   ;;  %s10444_s26 = sshll.u32 %s10441_s24, 4  ;;  %s10445_s26 = int_to_ptr.hbm [resolvable:$true] %s10444_s26 }
  0x1b   : > { %v305_v7 = vld [vmem:[%s14151_s10] sm:$0x8]  ;;  %v405_v10 = vunpack.c.l.b16 %v306_v8  ;;  %v11862_v12 = vld [vmem:[%s14151_s10 + $0x4] sm:$0xff]  ;;  %v11863_v13 = vld [vmem:[%s14151_s10 + $0xc] sm:$0xff]  ;;  %10533 = vmatmul.msk.bf16.vlgmr.msra.gmra.mxu3 %vm477_vm1, %v13821_v6  ;;  %v12105_v14 = vunpack.c.l.b16 %v12803_v9  ;;  %v720_v15 = vshrl.u32 %v12803_v9, 16  ;;  %v723_v16 = vshll.u32 %v12803_v9, 16 }
  0x1c   : > { %v684_v11 = vunpack.c.l.b16 %v305_v7  ;;  %v1315_v18 = vshrl.u32 %v11862_v12, 16  ;;  %v1317_v19 = vshll.u32 %v11862_v12, 16  ;;  %v1322_v20 = vshll.u32 %v11863_v13, 16  ;;  %v12804_v34 = vld [vmem:[%s14151_s10 + $0x10] sm:$0xff]   ;;  %v13823_v39 = vld [vmem:[%s14151_s10 + $0xa4] sm:$0xff]   ;;  %v12805_v50 = vld [vmem:[%s14151_s10 + $0x18] sm:$0xff]  }
  0x1d   : > { %13782 = vmatpush.bf16.msra.mxu3 %v1583_v4  ;;  %v453_v21 = vpack.c.b16 %v12105_v14, %v405_v10  ;;  %v722_v22 = vrot.slane %v720_v15, 3  ;;  %v725_v23 = vrot.slane %v723_v16, 4  ;;  %v11864_v36 = vld [vmem:[%s14151_s10 + $0x14] sm:$0xff]  ;;  %v729_v37 = vshrl.u32 %v12804_v34, 16  ;;  %v13785_v44 = vld [vmem:[%s14151_s10 + $0xc] sm:$0xff]   ;;  %v11865_v51 = vld [vmem:[%s14151_s10 + $0x1c] sm:$0xff] }
  0x1e   : > { %v685_v17 = vpack.c.b16 %v405_v10, %v684_v11  ;;  %v1319_v24 = vrot.slane %v1317_v19, 1  ;;  %v1324_v25 = vrot.slane %v1322_v20, 1  ;;  %v732_v38 = vshll.u32 %v12804_v34, 16  ;;  %v13825_v54 = vld [vmem:[%s14151_s10 + $0xac] sm:$0xff]   ;;  %v13787_v59 = vld [vmem:[%s14151_s10 + $0x14] sm:$0xff]   ;;  %v12806_v1 = vld [vmem:[%s14151_s10 + $0x20] sm:$0xff]  }
  0x1f   : > { %10514 = vmatmul.msk.bf16.vlgmr.msra.gmra.mxu0 %vm477_vm1, %v453_v21  ;;  %v726_v31 = vor.u32 %v725_v23, %v722_v22  ;;  %v1326_v40 = vshrl.u32 %v11863_v13, 16  ;;  %v1330_v41 = vshll.u32 %v11864_v36, 16  ;;  %v731_v42 = vrot.slane %v729_v37, 3  ;;  %v11866_v2 = vld [vmem:[%s14151_s10 + $0x24] sm:$0xff]  ;;  %v13826_v5 = vld [vmem:[%s14151_s10 + $0xb4] sm:$0xff]   ;;  %v13789_v10 = vld [vmem:[%s14151_s10 + $0x1c] sm:$0xff]  }
  0x20   : > { %v712_v26 = vshrl.u32 %v685_v17, 16  ;;  %v715_v27 = vshll.u32 %v685_v17, 16  ;;  %v1320_v28 = vor.u32 %v1319_v24, %v1315_v18  ;;  %v734_v43 = vrot.slane %v732_v38, 4  ;;  %v14193_v15 = vld [vmem:[%s14151_s10 + $0xb8] sm:$0xff]   ;;  %v353_v16 = vld [vmem:[%s14151_s10 + $0xc0] sm:$0xf] }
  0x21   : > { %v1328_v45 = vor.u32 %v1326_v40, %v1324_v25  ;;  %v1332_v46 = vrot.slane %v1330_v41, 1  ;;  %v738_v52 = vshrl.u32 %v12805_v50, 16  ;;  %v741_v53 = vshll.u32 %v12805_v50, 16  ;;  %v11867_v20 = vld [vmem:[%s14151_s10 + $0x2c] sm:$0xff]  ;;  %s13988_s13 = sshra.s32 %s10445_s26, 4  ;;  %s13989_s13 = int_to_ptr.hbm [resolvable:$true] %s13988_s13 }
  0x22   : > { %v714_v29 = vrot.slane %v712_v26, 3  ;;  %v717_v30 = vrot.slane %v715_v27, 4  ;;  %v1325_v32 = vsel %vm1313_vm2, %v1320_v28, %v1324_v25  ;;  %v735_v47 = vor.u32 %v734_v43, %v731_v42  ;;  %v12807_v21 = vld [vmem:[%s14151_s10 + $0x28] sm:$0xff]   ;;  %v12821_v27 = vld [vmem:[%s14151_s10 + $0x98] sm:$0xff]   ;;  %v12822_v28 = vld [vmem:[%s14151_s10 + $0xa0] sm:$0xff]   ;;  %s13990_s17 = scalar_lea.hbm %s13989_s13, 32  ;;  %p13995_p0 = scmp.lt.s32.totalorder %s13989_s13, %s17439_s8 }
  0x23   : > { %10659 = vmatmul.msk.bf16.vlgmr.msra.gmra.mxu2 %vm477_vm1, %v1325_v32  ;;  %v1333_v48 = vsel %vm1313_vm2, %v1328_v45, %v1332_v46  ;;  %v1334_v55 = vshrl.u32 %v11864_v36, 16  ;;  %v1338_v56 = vshll.u32 %v11865_v51, 16  ;;  %v740_v57 = vrot.slane %v738_v52, 3  ;;  %v12808_v45 = vld [vmem:[%s14151_s10 + $0x30] sm:$0xff]   ;;  %p13991_p11 = scmp.ne.s32.totalorder %s13989_s13, %s13990_s17 }
  0x24   : > { %v718_v33 = vor.u32 %v717_v30, %v714_v29  ;;  %v736_v49 = vsel %vm710_vm3, %v726_v31, %v735_v47  ;;  %v743_v58 = vrot.slane %v741_v53, 4  ;;  %v747_v3 = vshrl.u32 %v12806_v1, 16 }
  0x25   : > { %v1336_v60 = vor.u32 %v1334_v55, %v1332_v46  ;;  %v1340_v61 = vrot.slane %v1338_v56, 1  ;;  %v750_v4 = vshll.u32 %v12806_v1, 16  ;;  %v1342_v6 = vshrl.u32 %v11865_v51, 16  ;;  %v10708_v46 = vld [vmem:[%s17432_s1 + $0x10] sm:$0xf]  ;;  %v12823_v56 = vld [vmem:[%s14151_s10 + $0xa8] sm:$0xff]   ;;  %p13992_p12 = pnand %p13991_p11, %p14124_p5 }
  0x26   : > { %v727_v35 = vsel %vm710_vm3, %v718_v33, %v726_v31  ;;  %v744_v62 = vor.u32 %v743_v58, %v740_v57  ;;  %v1346_v7 = vshll.u32 %v11866_v2, 16  ;;  %v749_v8 = vrot.slane %v747_v3, 3  ;;  %v13791_v31 = vld [vmem:[%s14151_s10 + $0x24] sm:$0xff]  }
  0x27   : > { %10538 = vmatmul.msk.bf16.vlgmr.msra.gmra.mxu1 %vm477_vm1, %v727_v35  ;;  %v1341_v63 = vsel %vm1313_vm2, %v1336_v60, %v1340_v61  ;;  %v752_v9 = vrot.slane %v750_v4, 4  ;;  %v1344_v11 = vor.u32 %v1342_v6, %v1340_v61  ;;  %v12194_v18 = vunpack.c.h.b16 %v14193_v15  ;;  %p13993_p13 = pneg %p13992_p12 }
  0x28   : > { %v745_v0 = vsel %vm710_vm3, %v735_v47, %v744_v62  ;;  %v1348_v12 = vrot.slane %v1346_v7, 1  ;;  %v14199_v19 = vunpack.c.l.b16 %v353_v16  ;;  %v756_v22 = vshrl.u32 %v12807_v21, 16  ;;  %v11869_v7 = vld [vmem:[%s14151_s10 + $0x3c] sm:$0xff] }
  0x29   : > { %v753_v13 = vor.u32 %v752_v9, %v749_v8  ;;  %v759_v23 = vshll.u32 %v12807_v21, 16  ;;  %v1350_v25 = vshrl.u32 %v11866_v2, 16  ;;  %v1354_v26 = vshll.u32 %v11867_v20, 16 }
  0x2a   : > { %v1349_v14 = vsel %vm1313_vm2, %v1344_v11, %v1348_v12  ;;  %v476_v24 = vpack.c.b16 %v14199_v19, %v12194_v18  ;;  %v758_v29 = vrot.slane %v756_v22, 3  ;;  %v882_v34 = vshrl.u32 %v12821_v27, 16 }
  0x2b   : > { %10534 = vmatmul.msk.bf16.gmra.mxu3 %vm477_vm1, %v13823_v39  ;;  %v754_v17 = vsel %vm710_vm3, %v744_v62, %v753_v13  ;;  %v761_v30 = vrot.slane %v759_v23, 4  ;;  %v1352_v32 = vor.u32 %v1350_v25, %v1348_v12  ;;  %v1356_v33 = vrot.slane %v1354_v26, 1 }
  0x2c   : > { %v885_v35 = vshll.u32 %v12821_v27, 16  ;;  %v891_v36 = vshrl.u32 %v12822_v28, 16  ;;  %v894_v37 = vshll.u32 %v12822_v28, 16  ;;  %v884_v40 = vrot.slane %v882_v34, 3  ;;  %v12810_v28 = vld [vmem:[%s14151_s10 + $0x40] sm:$0xff]  }
  0x2d   : > { %v762_v38 = vor.u32 %v761_v30, %v758_v29  ;;  %v1357_v39 = vsel %vm1313_vm2, %v1352_v32, %v1356_v33  ;;  %v2511_v50 = vsel %vm550_vm0, %v10708_v46, 0  ;;  %v765_v51 = vshrl.u32 %v12808_v45, 16  ;;  %v11870_v30 = vld [vmem:[%s14151_s10 + $0x44] sm:$0xff] }
  0x2e   : > { %v887_v41 = vrot.slane %v885_v35, 4  ;;  %v893_v42 = vrot.slane %v891_v36, 3  ;;  %v896_v43 = vrot.slane %v894_v37, 4  ;;  %2520 = vmatpush.bf16.msrb.mxu0 %v2511_v50  ;;  %v768_v52 = vshll.u32 %v12808_v45, 16 }
  0x2f   : > { %10515 = vmatmul.msk.bf16.gmra.mxu0 %vm477_vm1, %v13785_v44  ;;  %v763_v44 = vsel %vm710_vm3, %v753_v13, %v762_v38  ;;  %v767_v57 = vrot.slane %v765_v51, 3  ;;  %v900_v62 = vshrl.u32 %v12823_v56, 16  ;;  %v1370_v12 = vshll.u32 %v11869_v7, 16  ;;  %v12824_v13 = vld [vmem:[%s14151_s10 + $0xb0] sm:$0xff]  }
  0x30   : > { %v14217_v47 = vor.u32 %v887_v41, %v884_v40  ;;  %v770_v58 = vrot.slane %v768_v52, 4  ;;  %v909_v21 = vshrl.u32 %v12824_v13, 16  ;;  %v912_v22 = vshll.u32 %v12824_v13, 16  ;;  %v11871_v51 = vld [vmem:[%s14151_s10 + $0x4c] sm:$0xff] }
  0x31   : > { %v902_v2 = vrot.slane %v900_v62, 3  ;;  %v786_v32 = vshll.u32 %v12810_v28, 16  ;;  %v1374_v34 = vshrl.u32 %v11869_v7, 16  ;;  %v1378_v35 = vshll.u32 %v11870_v30, 16 }
  0x32   : > { %v911_v25 = vrot.slane %v909_v21, 3  ;;  %v914_v26 = vrot.slane %v912_v22, 4  ;;  %v918_v41 = vshrl.u32 %v14193_v15, 16  ;;  %v11881_v22 = vld [vmem:[%s14151_s10 + $0x9c] sm:$0xff] }
  0x33   : > { %10660 = vmatmul.msk.bf16.gmra.mxu2 %vm477_vm1, %v1333_v48  ;;  %v897_v48 = vor.u32 %v896_v43, %v893_v42  ;;  %v788_v37 = vrot.slane %v786_v32, 4  ;;  %v1380_v40 = vrot.slane %v1378_v35, 1  ;;  %v921_v42 = vshll.u32 %v14193_v15, 16 }
  0x34   : > { %v915_v29 = vor.u32 %v914_v26, %v911_v25  ;;  %v920_v45 = vrot.slane %v918_v41, 3  ;;  %v709_v15 = vpack.c.b16 %v14199_v19, %v14199_v19  ;;  %v1466_v32 = vshll.u32 %v11881_v22, 16 }
  0x35   : > { %v898_v53 = vsel %vm710_vm3, %v14217_v47, %v897_v48  ;;  %v923_v46 = vrot.slane %v921_v42, 4 }
  0x37   : > { %10539 = vmatmul.msk.bf16.gmra.mxu1 %vm477_vm1, %v736_v49  ;;  %v11868_v49 = vld [vmem:[%s14151_s10 + $0x34] sm:$0xff]  ;;  %v924_v50 = vor.u32 %v923_v46, %v920_v45 }
  0x38   : > { %v1362_v55 = vshll.u32 %v11868_v49, 16  ;;  %v1366_v11 = vshrl.u32 %v11868_v49, 16  ;;  %v12811_v49 = vld [vmem:[%s14151_s10 + $0x48] sm:$0xff]  }
  0x39   : > { %v792_v52 = vshrl.u32 %v12811_v49, 16 }
  0x3a   : > { %v1364_v61 = vrot.slane %v1362_v55, 1  ;;  %v1382_v55 = vshrl.u32 %v11870_v30, 16 }
  0x3b   : > { %10535 = vmatmul.msk.bf16.gmra.mxu3 %vm477_vm1, %v13825_v54  ;;  %v1358_v54 = vshrl.u32 %v11867_v20, 16  ;;  %v1372_v20 = vrot.slane %v1370_v12, 1 }
  0x3c   : > { %v1368_v18 = vor.u32 %v1366_v11, %v1364_v61  ;;  %v11872_v11 = vld [vmem:[%s14151_s10 + $0x54] sm:$0xff] }
  0x3d   : > { %v1360_v60 = vor.u32 %v1358_v54, %v1356_v33  ;;  %v925_v54 = vsel %vm710_vm3, %v915_v29, %v924_v50  ;;  %v1394_v21 = vshll.u32 %v11872_v11, 16 }
  0x3f   : > { %10516 = vmatmul.msk.bf16.gmra.mxu0 %vm477_vm1, %v13787_v59  ;;  %v13793_v59 = vld [vmem:[%s14151_s10 + $0x2c] sm:$0xff]   ;;  %v1365_v1 = vsel %vm1313_vm2, %v1360_v60, %v1364_v61  ;;  %v1384_v61 = vor.u32 %v1382_v55, %v1380_v40  ;;  %v1396_v30 = vrot.slane %v1394_v21, 1  ;;  %v1398_v55 = vshrl.u32 %v11872_v11, 16 }
  0x43   : > { %10661 = vmatmul.msk.bf16.gmra.mxu2 %vm477_vm1, %v1341_v63  ;;  %v903_v63 = vshll.u32 %v12823_v56, 16  ;;  %v1386_v56 = vshll.u32 %v11871_v51, 16 }
  0x45   : > { %v905_v3 = vrot.slane %v903_v63, 4  ;;  %v1388_v62 = vrot.slane %v1386_v56, 1  ;;  %v927_v63 = vshrl.u32 %v709_v15, 16 }
  0x47   : > { %10540 = vmatmul.msk.bf16.gmra.mxu1 %vm477_vm1, %v745_v0  ;;  %v771_v0 = vor.u32 %v770_v58, %v767_v57  ;;  %v906_v6 = vor.u32 %v905_v3, %v902_v2  ;;  %v794_v57 = vrot.slane %v792_v52, 3  ;;  %v1389_v19 = vsel %vm1313_vm2, %v1384_v61, %v1388_v62  ;;  %v13803_v61 = vld [vmem:[%s14151_s10 + $0x54] sm:$0xff]  }
  0x48   : > { %v929_v3 = vrot.slane %v927_v63, 3  ;;  %v1400_v63 = vor.u32 %v1398_v55, %v1396_v30 }
  0x49   : > { %v772_v4 = vsel %vm710_vm3, %v762_v38, %v771_v0  ;;  %v916_v33 = vsel %vm710_vm3, %v906_v6, %v915_v29  ;;  %v13797_v38 = vld [vmem:[%s14151_s10 + $0x3c] sm:$0xff]  }
  0x4b   : > { %10536 = vmatmul.msk.bf16.gmra.mxu3 %vm477_vm1, %v13826_v5  ;;  %v12809_v5 = vld [vmem:[%s14151_s10 + $0x38] sm:$0xff]  }
  0x4c   : > { %v774_v8 = vshrl.u32 %v12809_v5, 16  ;;  %v777_v9 = vshll.u32 %v12809_v5, 16 }
  0x4e   : > { %v779_v16 = vrot.slane %v777_v9, 4 }
  0x4f   : > { %10517 = vmatmul.msk.bf16.gmra.mxu0 %vm477_vm1, %v13789_v10  ;;  %v907_v10 = vsel %vm710_vm3, %v897_v48, %v906_v6 }
  0x53   : > { %10662 = vmatmul.msk.bf16.gmra.mxu2 %vm477_vm1, %v1349_v14  ;;  %v776_v14 = vrot.slane %v774_v8, 3  ;;  %v12812_v8 = vld [vmem:[%s14151_s10 + $0x50] sm:$0xff]  }
  0x55   : > { %v780_v23 = vor.u32 %v779_v16, %v776_v14  ;;  %v801_v14 = vshrl.u32 %v12812_v8, 16  ;;  %v804_v16 = vshll.u32 %v12812_v8, 16 }
  0x57   : > { %10541 = vmatmul.msk.bf16.gmra.mxu1 %vm477_vm1, %v754_v17  ;;  %v13795_v17 = vld [vmem:[%s14151_s10 + $0x34] sm:$0xff]   ;;  %v781_v27 = vsel %vm710_vm3, %v771_v0, %v780_v23  ;;  %v930_v0 = vshll.u32 %v709_v15, 16  ;;  %v806_v25 = vrot.slane %v804_v16, 4 }
  0x5b   : > { %10537 = vmatmul.msk.bf16.gmra.mxu3 %vm477_vm1, %v476_v24  ;;  %v1373_v24 = vsel %vm1313_vm2, %v1368_v18, %v1372_v20 }
  0x5f   : > { %10518 = vmatmul.msk.bf16.gmra.mxu0 %vm477_vm1, %v13791_v31  ;;  %v783_v31 = vshrl.u32 %v12810_v28, 16 }
  0x61   : > { %v785_v36 = vrot.slane %v783_v31, 3  ;;  %v11882_v31 = vld [vmem:[%s14151_s10 + $0xa4] sm:$0xff] }
  0x63   : > { %10663 = vmatmul.msk.bf16.gmra.mxu2 %vm477_vm1, %v1357_v39  ;;  %v1376_v39 = vor.u32 %v1374_v34, %v1372_v20  ;;  %v789_v43 = vor.u32 %v788_v37, %v785_v36  ;;  %v1390_v20 = vshrl.u32 %v11871_v51, 16 }
  0x65   : > { %v790_v48 = vsel %vm710_vm3, %v780_v23, %v789_v43  ;;  %v1392_v29 = vor.u32 %v1390_v20, %v1388_v62  ;;  %v11874_v20 = vld [vmem:[%s14151_s10 + $0x64] sm:$0xff] }
  0x67   : > { %10542 = vmatmul.msk.bf16.gmra.mxu1 %vm477_vm1, %v763_v44  ;;  %v1381_v44 = vsel %vm1313_vm2, %v1376_v39, %v1380_v40  ;;  %v1397_v37 = vsel %vm1313_vm2, %v1392_v29, %v1396_v30  ;;  %v1470_v39 = vshrl.u32 %v11881_v22, 16  ;;  %v1474_v40 = vshll.u32 %v11882_v31, 16 }
  0x6b   : > { %10557 = vmatmul.msk.bf16.vlgmr.msrb.gmra.mxu3 %vm477_vm1, %v898_v53  ;;  %v795_v53 = vshll.u32 %v12811_v49, 16  ;;  %v11873_v49 = vld [vmem:[%s14151_s10 + $0x5c] sm:$0xff] }
  0x6c   : > { %v1402_v56 = vshll.u32 %v11873_v49, 16 }
  0x6d   : > { %v797_v58 = vrot.slane %v795_v53, 4 }
  0x6f   : > { %10519 = vmatmul.msk.bf16.gmra.mxu0 %vm477_vm1, %v13793_v59  ;;  %v13799_v59 = vld [vmem:[%s14151_s10 + $0x44] sm:$0xff]   ;;  %v798_v2 = vor.u32 %v797_v58, %v794_v57 }
  0x71   : > { %v799_v6 = vsel %vm710_vm3, %v789_v43, %v798_v2 }
  0x73   : > { %10664 = vmatmul.msk.bf16.gmra.mxu2 %vm477_vm1, %v1365_v1 }
  0x77   : > { %10543 = vmatmul.msk.bf16.gmra.mxu1 %vm477_vm1, %v772_v4  ;;  %v932_v4 = vrot.slane %v930_v0, 4  ;;  %v1404_v0 = vrot.slane %v1402_v56, 1 }
  0x7b   : > { %10558 = vmatmul.msk.bf16.gmra.mxu3 %vm477_vm1, %v907_v10  ;;  %v933_v10 = vor.u32 %v932_v4, %v929_v3 }
  0x7d   : > { %v934_v18 = vsel %vm710_vm3, %v924_v50, %v933_v10 }
  0x7f   : > { %10520 = vmatmul.msk.bf16.gmra.mxu0 %vm477_vm1, %v13795_v17 }
  0x83   : > { %10665 = vmatmul.msk.bf16.gmra.mxu2 %vm477_vm1, %v1373_v24  ;;  %v803_v24 = vrot.slane %v801_v14, 3 }
  0x85   : > { %v807_v35 = vor.u32 %v806_v25, %v803_v24 }
  0x87   : > { %10544 = vmatmul.msk.bf16.gmra.mxu1 %vm477_vm1, %v781_v27  ;;  %v13801_v27 = vld [vmem:[%s14151_s10 + $0x4c] sm:$0xff]   ;;  %v808_v42 = vsel %vm710_vm3, %v798_v2, %v807_v35 }
  0x88   : > { %v11883_v2 = vld [vmem:[%s14151_s10 + $0xac] sm:$0xff] }
  0x89   : > { %v1482_v8 = vshll.u32 %v11883_v2, 16 }
  0x8b   : > { %10559 = vmatmul.msk.bf16.gmra.mxu3 %vm477_vm1, %v916_v33 }
  0x8f   : > { %10521 = vmatmul.msk.bf16.gmra.mxu0 %vm477_vm1, %v13797_v38  ;;  %v14286_v38 = vrot.slane %v1466_v32, 1 }
  0x91   : > { %v1472_v46 = vor.u32 %v1470_v39, %v14286_v38 }
  0x93   : > { %10666 = vmatmul.msk.bf16.gmra.mxu2 %vm477_vm1, %v1381_v44  ;;  %v12813_v44 = vld [vmem:[%s14151_s10 + $0x58] sm:$0xff]  }
  0x94   : > { %v810_v52 = vshrl.u32 %v12813_v44, 16  ;;  %v813_v53 = vshll.u32 %v12813_v44, 16 }
  0x96   : > { %v812_v58 = vrot.slane %v810_v52, 3 }
  0x97   : > { %10545 = vmatmul.msk.bf16.gmra.mxu1 %vm477_vm1, %v790_v48  ;;  %v1476_v48 = vrot.slane %v1474_v40, 1  ;;  %v11884_v40 = vld [vmem:[%s14151_s10 + $0xb4] sm:$0xff] }
  0x9b   : > { %10560 = vmatmul.msk.bf16.gmra.mxu3 %vm477_vm1, %v925_v54  ;;  %v1477_v54 = vsel %vm1313_vm2, %v1472_v46, %v1476_v48  ;;  %v1486_v46 = vshrl.u32 %v11883_v2, 16 }
  0x9c   : > { %v563_v60 = vpop.f32.mrf.mxu0 }
  0x9e   : > { %v14262_v1 = vpop.f32.mrf.mxu3 }
  0x9f   : > { %10522 = vmatmul.msk.bf16.gmra.mxu0 %vm477_vm1, %v13799_v59  ;;  %v815_v59 = vrot.slane %v813_v53, 4  ;;  %v12815_v53 = vld [vmem:[%s14151_s10 + $0x68] sm:$0xff]  }
  0xa1   : > { %v816_v4 = vor.u32 %v815_v59, %v812_v58 }
  0xa3   : > { %10667 = vmatmul.msk.bf16.gmra.mxu2 %vm477_vm1, %v1389_v19  ;;  %v817_v10 = vsel %vm710_vm3, %v807_v35, %v816_v4 }
  0xa4   : > { %v1019_v5 = vpop.f32.mrf.mxu1  ;;  %v565_v9 = vpop.f32.mrf.mxu0 }
  0xa5   : > { %v1020_v7 = vadd.f32 %v1019_v5, %v563_v60 }
  0xa6   : > { %v1594_v12 = vpop.f32.mrf.mxu2  ;;  %v14271_v13 = vpop.f32.mrf.mxu3 }
  0xa7   : > { %10546 = vmatmul.msk.bf16.gmra.mxu1 %vm477_vm1, %v799_v6  ;;  %v14273_v17 = vadd.f32 %v1594_v12, %v1020_v7  ;;  %v1405_v6 = vsel %vm1313_vm2, %v1400_v63, %v1404_v0  ;;  %v1478_v7 = vshrl.u32 %v11882_v31, 16  ;;  %v12814_v12 = vld [vmem:[%s14151_s10 + $0x60] sm:$0xff]  }
  0xa8   : > { %v822_v24 = vshll.u32 %v12814_v12, 16 }
  0xa9   : > { %v1480_v16 = vor.u32 %v1478_v7, %v1476_v48  ;;  %v1490_v48 = vshll.u32 %v11884_v40, 16 }
  0xaa   : > { %v824_v31 = vrot.slane %v822_v24, 4 }
  0xab   : > { %10561 = vmatmul.msk.bf16.gmra.mxu3 %vm477_vm1, %v934_v18  ;;  %v1484_v18 = vrot.slane %v1482_v8, 1  ;;  %v1492_v56 = vrot.slane %v1490_v48, 1  ;;  %v13807_v8 = vld [vmem:[%s14151_s10 + $0x64] sm:$0xff]  }
  0xac   : > { %v1021_v23 = vpop.f32.mrf.mxu1  ;;  %v568_v28 = vpop.f32.mrf.mxu0 }
  0xad   : > { %v1022_v26 = vadd.f32 %v1021_v23, %v565_v9  ;;  %v819_v23 = vshrl.u32 %v12814_v12, 16  ;;  %v1488_v55 = vor.u32 %v1486_v46, %v1484_v18  ;;  %v10683_v46 = vld [vmem:[%s17432_s1 + $0xc] sm:$0xf] }
  0xae   : > { %v1596_v33 = vpop.f32.mrf.mxu2  ;;  %v14280_v34 = vpop.f32.mrf.mxu3 }
  0xaf   : > { %10523 = vmatmul.msk.bf16.gmra.mxu0 %vm477_vm1, %v13801_v27  ;;  %v14283_v36 = vadd.f32 %v1596_v33, %v1022_v26  ;;  %v1485_v26 = vsel %vm1313_vm2, %v1480_v16, %v1484_v18  ;;  %v1406_v27 = vshrl.u32 %v11873_v49, 16  ;;  %v821_v30 = vrot.slane %v819_v23, 3  ;;  %v13805_v33 = vld [vmem:[%s14151_s10 + $0x5c] sm:$0xff]  }
  0xb0   : > { %v1493_v63 = vsel %vm1313_vm2, %v1488_v55, %v1492_v56 }
  0xb3   : > { %10668 = vmatmul.msk.bf16.gmra.mxu2 %vm477_vm1, %v1397_v37  ;;  %v1408_v37 = vor.u32 %v1406_v27, %v1404_v0  ;;  %v1414_v0 = vshrl.u32 %v11874_v20, 16 }
  0xb4   : > { %v1024_v41 = vpop.f32.mrf.mxu1  ;;  %v570_v45 = vpop.f32.mrf.mxu0 }
  0xb5   : > { %v1025_v43 = vadd.f32 %v1024_v41, %v568_v28  ;;  %v1410_v28 = vshll.u32 %v11874_v20, 16 }
  0xb6   : > { %v1599_v50 = vpop.f32.mrf.mxu2  ;;  %v14294_v51 = vpop.f32.mrf.mxu3 }
  0xb7   : > { %10547 = vmatmul.msk.bf16.gmra.mxu1 %vm477_vm1, %v808_v42  ;;  %v14296_v15 = vadd.f32 %v1599_v50, %v1025_v43  ;;  %v1412_v39 = vrot.slane %v1410_v28, 1  ;;  %v825_v43 = vor.u32 %v824_v31, %v821_v30  ;;  %v12816_v31 = vld [vmem:[%s14151_s10 + $0x70] sm:$0xff]  }
  0xb9   : > { %v826_v50 = vsel %vm710_vm3, %v816_v4, %v825_v43 }
  0xbb   : > { %10678 = vmatmul.msk.bf16.vlgmr.msra.gmra.mxu3 %vm477_vm1, %v1477_v54 }
  0xbc   : > { %v1026_v57 = vpop.f32.mrf.mxu1  ;;  %v573_v62 = vpop.f32.mrf.mxu0 }
  0xbd   : > { %v1027_v60 = vadd.f32 %v1026_v57, %v570_v45  ;;  %v1413_v45 = vsel %vm1313_vm2, %v1408_v37, %v1412_v39  ;;  %v11875_v57 = vld [vmem:[%s14151_s10 + $0x6c] sm:$0xff] }
  0xbe   : > { %v1601_v19 = vpop.f32.mrf.mxu2  ;;  %v14302_v3 = vpop.f32.mrf.mxu3  ;;  %v1418_v2 = vshll.u32 %v11875_v57, 16  ;;  %v1422_v48 = vshrl.u32 %v11875_v57, 16 }
  0xbf   : > { %10524 = vmatmul.msk.bf16.gmra.mxu0 %vm477_vm1, %v13803_v61  ;;  %v14305_v5 = vadd.f32 %v1601_v19, %v1027_v60  ;;  %v828_v60 = vshrl.u32 %v12815_v53, 16  ;;  %v831_v61 = vshll.u32 %v12815_v53, 16 }
  0xc0   : > { %v1420_v12 = vrot.slane %v1418_v2, 1 }
  0xc1   : > { %v830_v4 = vrot.slane %v828_v60, 3 }
  0xc3   : > { %10669 = vmatmul.msk.bf16.gmra.mxu2 %vm477_vm1, %v1405_v6  ;;  %v833_v6 = vrot.slane %v831_v61, 4  ;;  %v1424_v61 = vor.u32 %v1422_v48, %v1420_v12 }
  0xc4   : > { %v1029_v9 = vpop.f32.mrf.mxu1  ;;  %v575_v14 = vpop.f32.mrf.mxu0 }
  0xc5   : > { %v1030_v11 = vadd.f32 %v1029_v9, %v573_v62  ;;  %v11885_v9 = vld [vmem:[%s14151_s10 + $0xbc] sm:$0xff]  ;;  %v834_v18 = vor.u32 %v833_v6, %v830_v4 }
  0xc6   : > { %v1604_v21 = vpop.f32.mrf.mxu2  ;;  %v14313_v22 = vpop.f32.mrf.mxu3  ;;  %v1498_v23 = vshll.u32 %v11885_v9, 16 }
  0xc7   : > { %10548 = vmatmul.msk.bf16.gmra.mxu1 %vm477_vm1, %v817_v10  ;;  %v14315_v25 = vadd.f32 %v1604_v21, %v1030_v11  ;;  %v1416_v11 = vor.u32 %v1414_v0, %v1412_v39  ;;  %v1494_v21 = vshrl.u32 %v11884_v40, 16  ;;  %v835_v27 = vsel %vm710_vm3, %v825_v43, %v834_v18 }
  0xc8   : > { %v1500_v30 = vrot.slane %v1498_v23, 1  ;;  %v837_v40 = vshrl.u32 %v12816_v31, 16  ;;  %v10854_v23 = vld [vmem:[%s17432_s1 + $0x18] sm:$0xf] }
  0xc9   : > { %v1421_v24 = vsel %vm1313_vm2, %v1416_v11, %v1420_v12 }
  0xcb   : > { %10679 = vmatmul.msk.bf16.gmra.mxu3 %vm477_vm1, %v1485_v26 }
  0xcc   : > { %v1031_v29 = vpop.f32.mrf.mxu1  ;;  %v578_v35 = vpop.f32.mrf.mxu0 }
  0xcd   : > { %v1032_v32 = vadd.f32 %v1031_v29, %v575_v14  ;;  %v1496_v29 = vor.u32 %v1494_v21, %v1492_v56  ;;  %v12817_v21 = vld [vmem:[%s14151_s10 + $0x78] sm:$0xff]  }
  0xce   : > { %v1606_v41 = vpop.f32.mrf.mxu2  ;;  %v14321_v42 = vpop.f32.mrf.mxu3 }
  0xcf   : > { %10525 = vmatmul.msk.bf16.gmra.mxu0 %vm477_vm1, %v13805_v33  ;;  %v14324_v44 = vadd.f32 %v1606_v41, %v1032_v32  ;;  %v14350_v33 = vld [vmem:[%s14151_s10 + $0x74] sm:$0xff]  ;;  %v840_v41 = vshll.u32 %v12816_v31, 16  ;;  %v1501_v43 = vsel %vm1313_vm2, %v1496_v29, %v1500_v30 }
  0xd1   : > { %v842_v55 = vrot.slane %v840_v41, 4  ;;  %v10733_v41 = vld [vmem:[%s17432_s1 + $0x14] sm:$0xf] }
  0xd3   : > { %10670 = vmatmul.msk.bf16.gmra.mxu2 %vm477_vm1, %v1413_v45 }
  0xd4   : > { %v1034_v49 = vpop.f32.mrf.mxu1  ;;  %v580_v54 = vpop.f32.mrf.mxu0 }
  0xd5   : > { %v1035_v52 = vadd.f32 %v1034_v49, %v578_v35  ;;  %v1187_v35 = vld [vmem:[%s14151_s10 + $0xc4] sm:$0x1]  ;;  %v1426_v49 = vshll.u32 %v14350_v33, 16 }
  0xd6   : > { %v1609_v58 = vpop.f32.mrf.mxu2  ;;  %v14332_v59 = vpop.f32.mrf.mxu3 }
  0xd7   : > { %10549 = vmatmul.msk.bf16.gmra.mxu1 %vm477_vm1, %v826_v50  ;;  %v14334_v62 = vadd.f32 %v1609_v58, %v1035_v52  ;;  %v1287_v50 = vunpack.c.l.b16 %v1187_v35  ;;  %v2233_v52 = vsel %vm550_vm0, %v10683_v46, 0  ;;  %v13809_v58 = vld [vmem:[%s14151_s10 + $0x6c] sm:$0xff]   ;;  %v849_v35 = vshll.u32 %v12817_v21, 16  ;;  %v13830_v46 = vld [vmem:[%s14151_s10 + $0x14] sm:$0xff]  }
  0xd8   : > { %2242 = vmatpush.bf16.msrb.mxu3 %v2233_v52 }
  0xd9   : > { %v1312_v0 = vpack.c.b16 %v1287_v50, %v1287_v50 }
  0xdb   : > { %10680 = vmatmul.msk.bf16.gmra.mxu3 %vm477_vm1, %v1493_v63  ;;  %v1428_v63 = vrot.slane %v1426_v49, 1  ;;  %v3133_v49 = vsel %vm550_vm0, %v10733_v41, 0 }
  0xdc   : > { %v1036_v19 = vpop.f32.mrf.mxu1  ;;  %v583_v10 = vpop.f32.mrf.mxu0  ;;  %3142 = vmatpush.bf16.msrb.mxu1 %v3133_v49  ;;  %v13832_v49 = vld [vmem:[%s14151_s10 + $0x1c] sm:$0xff]  }
  0xdd   : > { %v1037_v7 = vadd.f32 %v1036_v19, %v580_v54  ;;  %v839_v54 = vrot.slane %v837_v40, 3  ;;  %v1429_v6 = vsel %vm1313_vm2, %v1424_v61, %v1428_v63  ;;  %v1430_v40 = vshrl.u32 %v14350_v33, 16  ;;  %v13811_v33 = vld [vmem:[%s14151_s10 + $0x74] sm:$0xff]  }
  0xde   : > { %v1611_v14 = vpop.f32.mrf.mxu2  ;;  %v14340_v16 = vpop.f32.mrf.mxu3 }
  0xdf   : > { %10526 = vmatmul.msk.bf16.gmra.mxu0 %vm477_vm1, %v13807_v8  ;;  %v14343_v20 = vadd.f32 %v1611_v14, %v1037_v7  ;;  %v843_v19 = vor.u32 %v842_v55, %v839_v54  ;;  %v1502_v7 = vshrl.u32 %v11885_v9, 16  ;;  %v1506_v8 = vshll.u32 %v1312_v0, 16  ;;  %v14375_v14 = vld [vmem:[%s14151_s10 + $0x7c] sm:$0xff] }
  0xe0   : > { %v3783_v9 = vsel %vm550_vm0, %v10854_v23, 0  ;;  %v1432_v55 = vor.u32 %v1430_v40, %v1428_v63  ;;  %v1945_v0 = vshrl.u32 %v13830_v46, 16 }
  0xe1   : > { %v844_v11 = vsel %vm710_vm3, %v834_v18, %v843_v19  ;;  %v13828_v18 = vld [vmem:[%s14151_s10 + $0xc] sm:$0xf0]   ;;  %3792 = vmatpush.bf16.msrb.mxu2 %v3783_v9  ;;  %v12818_v9 = vld [vmem:[%s14151_s10 + $0x80] sm:$0xff]  }
  0xe2   : > { %v858_v41 = vshll.u32 %v12818_v9, 16 }
  0xe3   : > { %10671 = vmatmul.msk.bf16.gmra.mxu2 %vm477_vm1, %v1421_v24 }
  0xe4   : > { %v1039_v26 = vpop.f32.mrf.mxu1  ;;  %v585_v32 = vpop.f32.mrf.mxu0 }
  0xe5   : > { %v1040_v28 = vadd.f32 %v1039_v26, %v583_v10  ;;  %v1504_v26 = vor.u32 %v1502_v7, %v1500_v30  ;;  %v1434_v30 = vshll.u32 %v14375_v14, 16 }
  0xe6   : > { %v1614_v37 = vpop.f32.mrf.mxu2  ;;  %v14354_v39 = vpop.f32.mrf.mxu3 }
  0xe7   : > { %10550 = vmatmul.msk.bf16.gmra.mxu1 %vm477_vm1, %v835_v27  ;;  %v14356_v45 = vadd.f32 %v1614_v37, %v1040_v28  ;;  %v1508_v27 = vrot.slane %v1506_v8, 1  ;;  %v13412_v28 = vld [vmem:[%s14151_s10 + $0xc] sm:$0x8] }
  0xe8   : > { %v13413_v48 = vor.u32 %v13828_v18, %v13412_v28 }
  0xea   : > { %v1940_v61 = vshll.u32 %v13413_v48, 16 }
  0xeb   : > { %10681 = vmatmul.msk.bf16.gmra.mxu3 %vm477_vm1, %v1501_v43  ;;  %v1509_v43 = vsel %vm1313_vm2, %v1504_v26, %v1508_v27 }
  0xec   : > { %v1041_v53 = vpop.f32.mrf.mxu1  ;;  %v588_v60 = vpop.f32.mrf.mxu0  ;;  %v1942_v63 = vrot.slane %v1940_v61, 4  ;;  %v1954_v61 = vshrl.u32 %v13832_v49, 16 }
  0xed   : > { %v1042_v56 = vadd.f32 %v1041_v53, %v585_v32  ;;  %v846_v32 = vshrl.u32 %v12817_v21, 16  ;;  %v851_v53 = vrot.slane %v849_v35, 4  ;;  %v1947_v21 = vrot.slane %v1945_v0, 3 }
  0xee   : > { %v1616_v57 = vpop.f32.mrf.mxu2  ;;  %v14366_v2 = vpop.f32.mrf.mxu3  ;;  %v1957_v0 = vshll.u32 %v13832_v49, 16  ;;  %v13834_v49 = vld [vmem:[%s14151_s10 + $0x24] sm:$0xff]  }
  0xef   : > { %10527 = vmatmul.msk.bf16.gmra.mxu0 %vm477_vm1, %v13809_v58  ;;  %v14369_v4 = vadd.f32 %v1616_v57, %v1042_v56  ;;  %v848_v52 = vrot.slane %v846_v32, 3  ;;  %v1436_v56 = vrot.slane %v1434_v30, 1  ;;  %v1948_v57 = vshll.u32 %v13830_v46, 16  ;;  %v11878_v32 = vld [vmem:[%s14151_s10 + $0x84] sm:$0xff] }
  0xf0   : > { %v855_v30 = vshrl.u32 %v12818_v9, 16  ;;  %v1438_v46 = vshrl.u32 %v14375_v14, 16 }
  0xf1   : > { %v852_v8 = vor.u32 %v851_v53, %v848_v52  ;;  %v1950_v23 = vrot.slane %v1948_v57, 4  ;;  %v860_v53 = vrot.slane %v858_v41, 4 }
  0xf2   : > { %v857_v52 = vrot.slane %v855_v30, 3 }
  0xf3   : > { %10672 = vmatmul.msk.bf16.gmra.mxu2 %vm477_vm1, %v1429_v6  ;;  %v853_v26 = vsel %vm710_vm3, %v843_v19, %v852_v8 }
  0xf4   : > { %v1044_v10 = vpop.f32.mrf.mxu1  ;;  %v590_v24 = vpop.f32.mrf.mxu0  ;;  %v861_v14 = vor.u32 %v860_v53, %v857_v52 }
  0xf5   : > { %v1045_v12 = vadd.f32 %v1044_v10, %v588_v60  ;;  %v1937_v60 = vshrl.u32 %v13413_v48, 16  ;;  %v1442_v48 = vshll.u32 %v11878_v32, 16 }
  0xf6   : > { %v1619_v29 = vpop.f32.mrf.mxu2  ;;  %v14385_v31 = vpop.f32.mrf.mxu3 }
  0xf7   : > { %10551 = vmatmul.msk.bf16.gmra.mxu1 %vm477_vm1, %v844_v11  ;;  %v14387_v37 = vadd.f32 %v1619_v29, %v1045_v12  ;;  %v1437_v11 = vsel %vm1313_vm2, %v1432_v55, %v1436_v56  ;;  %v1939_v12 = vrot.slane %v1937_v60, 3  ;;  %v1951_v29 = vor.u32 %v1950_v23, %v1947_v21 }
  0xf8   : > { %v1444_v60 = vrot.slane %v1442_v48, 1  ;;  %v1959_v21 = vrot.slane %v1957_v0, 4  ;;  %v1963_v0 = vshrl.u32 %v13834_v49, 16 }
  0xf9   : > { %v1943_v18 = vor.u32 %v1942_v63, %v1939_v12  ;;  %v1956_v63 = vrot.slane %v1954_v61, 3 }
  0xfb   : > { %10682 = vmatmul.msk.bf16.gmra.mxu3 %vm477_vm1, %v1509_v43  ;;  %v1952_v19 = vsel %vm710_vm3, %v1943_v18, %v1951_v29  ;;  %v1960_v9 = vor.u32 %v1959_v21, %v1956_v63 }
  0xfc   : > { %v1046_v50 = vpop.f32.mrf.mxu1  ;;  %v593_v58 = vpop.f32.mrf.mxu0 }
  0xfd   : > { %v1047_v54 = vadd.f32 %v1046_v50, %v590_v24 }
  0xfe   : > { %v1621_v6 = vpop.f32.mrf.mxu2  ;;  %v14399_v7 = vpop.f32.mrf.mxu3 }
  0xff   : > { %10528 = vmatmul.msk.bf16.gmra.mxu0 %vm477_vm1, %v13811_v33  ;;  %v14402_v10 = vadd.f32 %v1621_v6, %v1047_v54  ;;  %v13813_v33 = vld [vmem:[%s14151_s10 + $0x7c] sm:$0xff]  }
 0x103   : > { %10673 = vmatmul.msk.bf16.gmra.mxu2 %vm477_vm1, %v1437_v11 }
 0x104   : > { %v1049_v24 = vpop.f32.mrf.mxu1  ;;  %v595_v28 = vpop.f32.mrf.mxu0 }
 0x105   : > { %v1050_v27 = vadd.f32 %v1049_v24, %v593_v58  ;;  %v1440_v58 = vor.u32 %v1438_v46, %v1436_v56  ;;  %v862_v56 = vsel %vm710_vm3, %v852_v8, %v861_v14  ;;  %v1961_v8 = vsel %vm710_vm3, %v1951_v29, %v1960_v9 }
 0x106   : > { %v1624_v35 = vpop.f32.mrf.mxu2  ;;  %v14410_v40 = vpop.f32.mrf.mxu3  ;;  %v1446_v46 = vshrl.u32 %v11878_v32, 16 }
 0x107   : > { %10552 = vmatmul.msk.bf16.gmra.mxu1 %vm477_vm1, %v853_v26  ;;  %v14412_v43 = vadd.f32 %v1624_v35, %v1050_v27  ;;  %v1445_v12 = vsel %vm1313_vm2, %v1440_v58, %v1444_v60  ;;  %v12819_v26 = vld [vmem:[%s14151_s10 + $0x88] sm:$0xff]  }
 0x108   : > { %v864_v30 = vshrl.u32 %v12819_v26, 16  ;;  %v867_v41 = vshll.u32 %v12819_v26, 16  ;;  %v1448_v58 = vor.u32 %v1446_v46, %v1444_v60 }
 0x10a   : > { %v866_v52 = vrot.slane %v864_v30, 3  ;;  %v869_v53 = vrot.slane %v867_v41, 4  ;;  %v11880_v41 = vld [vmem:[%s14151_s10 + $0x94] sm:$0xff] }
 0x10b   : > { %10684 = vmatmul.msk.bf16.vlgmr.msrb.gmra.mxu3 %vm477_vm1, %v1952_v19 }
 0x10c   : > { %v1051_v50 = vpop.f32.mrf.mxu1  ;;  %v598_v55 = vpop.f32.mrf.mxu0  ;;  %v870_v29 = vor.u32 %v869_v53, %v866_v52  ;;  %v1458_v53 = vshll.u32 %v11880_v41, 16 }
 0x10d   : > { %v1052_v54 = vadd.f32 %v1051_v50, %v595_v28  ;;  %v11879_v28 = vld [vmem:[%s14151_s10 + $0x8c] sm:$0xff] }
 0x10e   : > { %v1626_v57 = vpop.f32.mrf.mxu2  ;;  %v14419_v6 = vpop.f32.mrf.mxu3  ;;  %v1450_v48 = vshll.u32 %v11879_v28, 16  ;;  %v871_v60 = vsel %vm710_vm3, %v861_v14, %v870_v29  ;;  %v1454_v52 = vshrl.u32 %v11879_v28, 16 }
 0x10f   : > { %10529 = vmatmul.msk.bf16.gmra.mxu0 %vm477_vm1, %v13813_v33  ;;  %v14422_v11 = vadd.f32 %v1626_v57, %v1052_v54  ;;  %v13815_v33 = vld [vmem:[%s14151_s10 + $0x84] sm:$0xff]   ;;  %v1966_v57 = vshll.u32 %v13834_v49, 16 }
 0x110   : > { %v1452_v61 = vrot.slane %v1450_v48, 1 }
 0x112   : > { %v1453_v21 = vsel %vm1313_vm2, %v1448_v58, %v1452_v61 }
 0x113   : > { %10674 = vmatmul.msk.bf16.gmra.mxu2 %vm477_vm1, %v1445_v12 }
 0x114   : > { %v1054_v23 = vpop.f32.mrf.mxu1  ;;  %v600_v27 = vpop.f32.mrf.mxu0 }
 0x115   : > { %v1055_v24 = vadd.f32 %v1054_v23, %v598_v55  ;;  %v1965_v23 = vrot.slane %v1963_v0, 3 }
 0x116   : > { %v1629_v18 = vpop.f32.mrf.mxu2  ;;  %v14430_v35 = vpop.f32.mrf.mxu3 }
 0x117   : > { %10553 = vmatmul.msk.bf16.gmra.mxu1 %vm477_vm1, %v862_v56  ;;  %v14432_v19 = vadd.f32 %v1629_v18, %v1055_v24  ;;  %v1968_v56 = vrot.slane %v1966_v57, 4  ;;  %v13817_v57 = vld [vmem:[%s14151_s10 + $0x8c] sm:$0xff]  }
 0x119   : > { %v1969_v30 = vor.u32 %v1968_v56, %v1965_v23  ;;  %v1460_v23 = vrot.slane %v1458_v53, 1 }
 0x11b   : > { %10685 = vmatmul.msk.bf16.gmra.mxu3 %vm477_vm1, %v1961_v8  ;;  %v1970_v14 = vsel %vm710_vm3, %v1960_v9, %v1969_v30 }
 0x11c   : > { %v1056_v50 = vpop.f32.mrf.mxu1  ;;  %v603_v55 = vpop.f32.mrf.mxu0 }
 0x11d   : > { %v1057_v54 = vadd.f32 %v1056_v50, %v600_v27  ;;  %v12820_v27 = vld [vmem:[%s14151_s10 + $0x90] sm:$0xff]  }
 0x11e   : > { %v1631_v12 = vpop.f32.mrf.mxu2  ;;  %v14438_v63 = vpop.f32.mrf.mxu3  ;;  %v873_v48 = vshrl.u32 %v12820_v27, 16  ;;  %v876_v49 = vshll.u32 %v12820_v27, 16 }
 0x11f   : > { %10530 = vmatmul.msk.bf16.gmra.mxu0 %vm477_vm1, %v13815_v33  ;;  %v14441_v32 = vadd.f32 %v1631_v12, %v1057_v54  ;;  %v13836_v54 = vld [vmem:[%s14151_s10 + $0x2c] sm:$0xff]  }
 0x120   : > { %v878_v58 = vrot.slane %v876_v49, 4  ;;  %v1972_v56 = vshrl.u32 %v13836_v54, 16 }
 0x123   : > { %10675 = vmatmul.msk.bf16.gmra.mxu2 %vm477_vm1, %v1453_v21  ;;  %v1456_v21 = vor.u32 %v1454_v52, %v1452_v61 }
 0x124   : > { %v1059_v24 = vpop.f32.mrf.mxu1  ;;  %v605_v18 = vpop.f32.mrf.mxu0 }
 0x125   : > { %v1060_v26 = vadd.f32 %v1059_v24, %v603_v55  ;;  %v875_v55 = vrot.slane %v873_v48, 3  ;;  %v1975_v24 = vshll.u32 %v13836_v54, 16  ;;  %v1461_v28 = vsel %vm1313_vm2, %v1456_v21, %v1460_v23  ;;  %v14474_v21 = vld [vmem:[%s14151_s10 + $0x1c] sm:$0xf] }
 0x126   : > { %v1634_v8 = vpop.f32.mrf.mxu2  ;;  %v14449_v46 = vpop.f32.mrf.mxu3  ;;  %17447 = vst [vmem:[#allocation6_spill] sm:$0xff] %v14474_v21 }
 0x127   : > { %10554 = vmatmul.msk.bf16.gmra.mxu1 %vm477_vm1, %v871_v60  ;;  %v14451_v50 = vadd.f32 %v1634_v8, %v1060_v26  ;;  %v879_v27 = vor.u32 %v878_v58, %v875_v55  ;;  %v1977_v8 = vrot.slane %v1975_v24, 4  ;;  %v13838_v55 = vld [vmem:[%s14151_s10 + $0x34] sm:$0xff]  }
 0x128   : > { %v1981_v24 = vshrl.u32 %v13838_v55, 16 }
 0x129   : > { %v880_v61 = vsel %vm710_vm3, %v870_v29, %v879_v27 }
 0x12b   : > { %10686 = vmatmul.msk.bf16.gmra.mxu3 %vm477_vm1, %v1970_v14 }
 0x12c   : > { %v1061_v33 = vpop.f32.mrf.mxu1  ;;  %v608_v12 = vpop.f32.mrf.mxu0 }
 0x12d   : > { %v1062_v0 = vadd.f32 %v1061_v33, %v605_v18  ;;  %v1974_v18 = vrot.slane %v1972_v56, 3  ;;  %v13819_v56 = vld [vmem:[%s14151_s10 + $0x94] sm:$0xff]  }
 0x12e   : > { %v1636_v60 = vpop.f32.mrf.mxu2  ;;  %v14457_v26 = vpop.f32.mrf.mxu3 }
 0x12f   : > { %10531 = vmatmul.msk.bf16.gmra.mxu0 %vm477_vm1, %v13817_v57  ;;  %v14460_v9 = vadd.f32 %v1636_v60, %v1062_v0  ;;  %v1978_v52 = vor.u32 %v1977_v8, %v1974_v18  ;;  %v1462_v0 = vshrl.u32 %v11880_v41, 16  ;;  %v3312_v57 = vld [vmem:[%s14151_s10 + $0x18] sm:$0x8]  ;;  %v1984_v60 = vshll.u32 %v13838_v55, 16 }
 0x130   : > { %v3412_v8 = vunpack.c.l.b16 %v3312_v57  ;;  %v11886_v57 = vld [vmem:[%s14151_s10 + $0x10] sm:$0xff] }
 0x131   : > { %v1979_v58 = vsel %vm710_vm3, %v1969_v30, %v1978_v52  ;;  %v1464_v18 = vor.u32 %v1462_v0, %v1460_v23  ;;  %v1115_v30 = vadd.f32 %v14366_v2, %v14262_v1  ;;  %v14491_v0 = vld [vmem:[%s14151_s10 + $0x20] sm:$0xff]   ;;  %v889_v2 = vsel %vm710_vm3, %v879_v27, %v14217_v47  ;;  %v14503_v27 = vld [vmem:[%s14151_s10 + $0x18] sm:$0xff] }
 0x133   : > { %10676 = vmatmul.msk.bf16.gmra.mxu2 %vm477_vm1, %v1461_v28  ;;  %v1469_v23 = vsel %vm1313_vm2, %v1464_v18, %v14286_v38  ;;  %v3495_v38 = vshrl.u32 %v14491_v0, 16  ;;  %v3498_v18 = vshll.u32 %v14491_v0, 16 }
 0x134   : > { %v1064_v48 = vpop.f32.mrf.mxu1  ;;  %v610_v14 = vpop.f32.mrf.mxu0 }
 0x135   : > { %v1065_v49 = vadd.f32 %v1064_v48, %v608_v12  ;;  %v17440_v48 = vunpack.c.l.b16 %v14474_v21 }
 0x136   : > { %v1639_v53 = vpop.f32.mrf.mxu2  ;;  %v14466_v54 = vpop.f32.mrf.mxu3 }
 0x137   : > { %10555 = vmatmul.msk.bf16.gmra.mxu1 %vm477_vm1, %v880_v61  ;;  %v14468_v33 = vadd.f32 %v1639_v53, %v1065_v49  ;;  %v1983_v53 = vrot.slane %v1981_v24, 3  ;;  %v3461_v55 = vpack.c.b16 %v17440_v48, %v3412_v8  ;;  %v1117_v8 = vadd.f32 %v14385_v31, %v14271_v13  ;;  %v13840_v48 = vld [vmem:[%s14151_s10 + $0x3c] sm:$0xff]  }
 0x138   : > { %v2865_v31 = vshrl.u32 %v11886_v57, 16 }
 0x139   : > { %v3487_v24 = vshrl.u32 %v3461_v55, 16 }
 0x13b   : > { %10687 = vmatmul.msk.bf16.gmra.mxu3 %vm477_vm1, %v1979_v58  ;;  %v1986_v58 = vrot.slane %v1984_v60, 4  ;;  %v3490_v60 = vshll.u32 %v3461_v55, 16  ;;  %v3497_v55 = vrot.slane %v3495_v38, 3 }
 0x13c   : > { %v1066_v29 = vpop.f32.mrf.mxu1  ;;  %v613_v28 = vpop.f32.mrf.mxu0 }
 0x13d   : > { %v1067_v12 = vadd.f32 %v1066_v29, %v610_v14 }
 0x13e   : > { %v1641_v41 = vpop.f32.mrf.mxu2  ;;  %v1689_v61 = vpop.f32.mrf.mxu3 }
 0x13f   : > { %10532 = vmatmul.msk.bf16.gmra.mxu0 %vm477_vm1, %v13819_v56  ;;  %v14482_v49 = vadd.f32 %v1641_v41, %v1067_v12  ;;  %v14484_v14 = vadd.f32 %v1689_v61, %v1115_v30  ;;  %v1987_v12 = vor.u32 %v1986_v58, %v1983_v53  ;;  %v3489_v58 = vrot.slane %v3487_v24, 3 }
 0x140   : > { %v1120_v24 = vadd.f32 %v14399_v7, %v14280_v34 }
 0x141   : > { %17448 = vst [vmem:[#allocation7_spill] sm:$0xff] %v14482_v49  ;;  %v1988_v53 = vsel %vm710_vm3, %v1978_v52, %v1987_v12  ;;  %v1993_v52 = vshll.u32 %v13840_v48, 16 }
 0x142   : > { %17449 = vst [vmem:[#allocation8_spill] sm:$0xff] %v14484_v14  ;;  %v2872_v14 = vshll.u32 %v14503_v27, 16 }
 0x143   : > { %10677 = vmatmul.msk.bf16.gmra.mxu2 %vm477_vm1, %v1469_v23  ;;  %v3492_v23 = vrot.slane %v3490_v60, 4 }
 0x144   : > { %v1069_v1 = vpop.f32.mrf.mxu1  ;;  %v615_v56 = vpop.f32.mrf.mxu0 }
 0x145   : > { %v1070_v29 = vadd.f32 %v1069_v1, %v613_v28  ;;  %v2867_v28 = vshll.u32 %v11886_v57, 16  ;;  %v3500_v1 = vrot.slane %v3498_v18, 4  ;;  %v2874_v57 = vrot.slane %v2872_v14, 1 }
 0x146   : > { %v1644_v30 = vpop.f32.mrf.mxu2  ;;  %v1691_v47 = vpop.f32.mrf.mxu3 }
 0x147   : > { %10556 = vmatmul.msk.bf16.gmra.mxu1 %vm477_vm1, %v889_v2  ;;  %v14505_v41 = vadd.f32 %v1644_v30, %v1070_v29  ;;  %v14507_v61 = vadd.f32 %v1691_v47, %v1117_v8  ;;  %v2869_v2 = vrot.slane %v2867_v28, 1  ;;  %v12826_v29 = vld [vmem:[%s14151_s10 + $0x10] sm:$0xff]   ;;  %v3493_v8 = vor.u32 %v3492_v23, %v3489_v58 }
 0x148   : > { %v3501_v30 = vor.u32 %v3500_v1, %v3497_v55  ;;  %v1990_v47 = vshrl.u32 %v13840_v48, 16  ;;  %v1995_v23 = vrot.slane %v1993_v52, 4  ;;  %v14523_v55 = vld [vmem:[%s14151_s10 + $0x28] sm:$0xff]  }
 0x149   : > { %17450 = vst [vmem:[#allocation9_spill] sm:$0xff] %v14507_v61  ;;  %v2870_v18 = vor.u32 %v2869_v2, %v2865_v31  ;;  %v3504_v1 = vshrl.u32 %v14523_v55, 16  ;;  %v1122_v31 = vadd.f32 %v14410_v40, %v14294_v51 }
 0x14a   : > { %v1992_v58 = vrot.slane %v1990_v47, 3 }
 0x14b   : > { %10688 = vmatmul.msk.bf16.gmra.mxu3 %vm477_vm1, %v1988_v53  ;;  %v3502_v53 = vsel %vm710_vm3, %v3493_v8, %v3501_v30  ;;  %v2875_v34 = vsel %vm1313_vm2, %v2870_v18, %v2874_v57  ;;  %v11888_v8 = vld [vmem:[%s14151_s10 + $0x20] sm:$0xff] }
 0x14c   : > { %v1071_v13 = vpop.f32.mrf.mxu1  ;;  %v618_v49 = vpop.f32.mrf.mxu0  ;;  %v1996_v14 = vor.u32 %v1995_v23, %v1992_v58  ;;  %v2880_v58 = vshll.u32 %v11888_v8, 16  ;;  %v12827_v23 = vld [vmem:[%s14151_s10 + $0x18] sm:$0xff]  }
 0x14d   : > { %v1072_v21 = vadd.f32 %v1071_v13, %v615_v56  ;;  %v3507_v13 = vshll.u32 %v14523_v55, 16 }
 0x14e   : > { %v1646_v60 = vpop.f32.mrf.mxu2  ;;  %v1694_v38 = vpop.f32.mrf.mxu3  ;;  %v1997_v52 = vsel %vm710_vm3, %v1987_v12, %v1996_v14 }
 0x14f   : > { %v14516_v28 = vadd.f32 %v1646_v60, %v1072_v21  ;;  %10709 = vmatmul.msk.bf16.vlgmr.msrb.gmra.mxu0 %vm477_vm1, %v12826_v29  ;;  %v14519_v56 = vadd.f32 %v1694_v38, %v1120_v24  ;;  %v3506_v24 = vrot.slane %v3504_v1, 3  ;;  %v3509_v60 = vrot.slane %v3507_v13, 4  ;;  %v13842_v38 = vld [vmem:[%s14151_s10 + $0x44] sm:$0xff]  }
 0x151   : > { %17451 = vst [vmem:[#allocation10_spill] sm:$0xff] %v14519_v56 }
 0x153   : > { %10855 = vmatmul.msk.bf16.vlgmr.msrb.gmra.mxu2 %vm477_vm1, %v3502_v53  ;;  %v2876_v53 = vshrl.u32 %v14503_v27, 16 }
 0x154   : > { %v1074_v48 = vpop.f32.mrf.mxu1  ;;  %v620_v21 = vpop.f32.mrf.mxu0 }
 0x155   : > { %v1075_v7 = vadd.f32 %v1074_v48, %v618_v49  ;;  %v3510_v48 = vor.u32 %v3509_v60, %v3506_v24  ;;  %v2878_v13 = vor.u32 %v2876_v53, %v2874_v57  ;;  %v14551_v60 = vld [vmem:[%s14151_s10 + $0x30] sm:$0xff]  }
 0x156   : > { %v1649_v2 = vpop.f32.mrf.mxu2  ;;  %v1696_v29 = vpop.f32.mrf.mxu3  ;;  %v3513_v53 = vshrl.u32 %v14551_v60, 16 }
 0x157   : > { %10830 = vmatmul.msk.bf16.vlgmr.msrb.gmra.mxu1 %vm477_vm1, %v2875_v34  ;;  %v14533_v47 = vadd.f32 %v1649_v2, %v1075_v7  ;;  %v14535_v49 = vadd.f32 %v1696_v29, %v1122_v31  ;;  %v1999_v34 = vshrl.u32 %v13842_v38, 16  ;;  %v2002_v7 = vshll.u32 %v13842_v38, 16 }
 0x158   : > { %v1125_v31 = vadd.f32 %v14419_v6, %v14302_v3  ;;  %v2882_v2 = vrot.slane %v2880_v58, 1  ;;  %v3516_v58 = vshll.u32 %v14551_v60, 16 }
 0x159   : > { %17452 = vst [vmem:[#allocation11_spill] sm:$0xff] %v14535_v49  ;;  %v2004_v24 = vrot.slane %v2002_v7, 4 }
 0x15a   : > { %v2883_v3 = vsel %vm1313_vm2, %v2878_v13, %v2882_v2  ;;  %v13844_v13 = vld [vmem:[%s14151_s10 + $0x4c] sm:$0xff]  }
 0x15b   : > { %10689 = vmatmul.msk.bf16.gmra.mxu3 %vm477_vm1, %v1997_v52  ;;  %v2001_v52 = vrot.slane %v1999_v34, 3  ;;  %v11889_v34 = vld [vmem:[%s14151_s10 + $0x28] sm:$0xff] }
 0x15c   : > { %v1076_v18 = vpop.f32.mrf.mxu1  ;;  %v623_v40 = vpop.f32.mrf.mxu0 }
 0x15d   : > { %v1077_v51 = vadd.f32 %v1076_v18, %v620_v21  ;;  %v3511_v21 = vsel %vm710_vm3, %v3501_v30, %v3510_v48  ;;  %v2005_v18 = vor.u32 %v2004_v24, %v2001_v52  ;;  %v1127_v30 = vadd.f32 %v14430_v35, %v14313_v22 }
 0x15e   : > { %v1651_v12 = vpop.f32.mrf.mxu2  ;;  %v1699_v1 = vpop.f32.mrf.mxu3  ;;  %v2884_v52 = vshrl.u32 %v11888_v8, 16  ;;  %v2888_v24 = vshll.u32 %v11889_v34, 16 }
 0x15f   : > { %v14544_v29 = vadd.f32 %v1651_v12, %v1077_v51  ;;  %10710 = vmatmul.msk.bf16.gmra.mxu0 %vm477_vm1, %v12827_v23  ;;  %v14547_v27 = vadd.f32 %v1699_v1, %v1125_v31  ;;  %v2006_v31 = vsel %vm710_vm3, %v1996_v14, %v2005_v18  ;;  %v3515_v12 = vrot.slane %v3513_v53, 3 }
 0x160   : > { %v3518_v1 = vrot.slane %v3516_v58, 4  ;;  %v2886_v14 = vor.u32 %v2884_v52, %v2882_v2  ;;  %v2890_v53 = vrot.slane %v2888_v24, 1  ;;  %v11890_v24 = vld [vmem:[%s14151_s10 + $0x30] sm:$0xff] }
 0x161   : > { %17453 = vst [vmem:[#allocation12_spill] sm:$0xff] %v14547_v27  ;;  %v2011_v27 = vshll.u32 %v13844_v13, 16 }
 0x162   : > { %v3519_v35 = vor.u32 %v3518_v1, %v3515_v12  ;;  %v14578_v12 = vld [vmem:[%s14151_s10 + $0x38] sm:$0xff]  }
 0x163   : > { %10856 = vmatmul.msk.bf16.gmra.mxu2 %vm477_vm1, %v3511_v21 }
 0x164   : > { %v1079_v38 = vpop.f32.mrf.mxu1  ;;  %v625_v57 = vpop.f32.mrf.mxu0 }
 0x165   : > { %v1080_v6 = vadd.f32 %v1079_v38, %v623_v40 }
 0x166   : > { %v1654_v51 = vpop.f32.mrf.mxu2  ;;  %v1701_v23 = vpop.f32.mrf.mxu3 }
 0x167   : > { %10831 = vmatmul.msk.bf16.gmra.mxu1 %vm477_vm1, %v2883_v3  ;;  %v14561_v7 = vadd.f32 %v1654_v51, %v1080_v6  ;;  %v14563_v40 = vadd.f32 %v1701_v23, %v1127_v30  ;;  %v2008_v3 = vshrl.u32 %v13844_v13, 16  ;;  %v1130_v6 = vadd.f32 %v14438_v63, %v14321_v42 }
 0x168   : > { %v2891_v42 = vsel %vm1313_vm2, %v2886_v14, %v2890_v53 }
 0x169   : > { %17454 = vst [vmem:[#allocation13_spill] sm:$0xff] %v14563_v40  ;;  %v2010_v23 = vrot.slane %v2008_v3, 3 }
 0x16b   : > { %10690 = vmatmul.msk.bf16.gmra.mxu3 %vm477_vm1, %v2006_v31  ;;  %v2013_v31 = vrot.slane %v2011_v27, 4 }
 0x16c   : > { %v1081_v21 = vpop.f32.mrf.mxu1  ;;  %v628_v22 = vpop.f32.mrf.mxu0 }
 0x16d   : > { %v1082_v38 = vadd.f32 %v1081_v21, %v625_v57  ;;  %v3520_v57 = vsel %vm710_vm3, %v3510_v48, %v3519_v35  ;;  %v2014_v13 = vor.u32 %v2013_v31, %v2010_v23  ;;  %v3525_v21 = vshll.u32 %v14578_v12, 16 }
 0x16e   : > { %v1656_v30 = vpop.f32.mrf.mxu2  ;;  %v1704_v51 = vpop.f32.mrf.mxu3  ;;  %v1132_v48 = vadd.f32 %v14449_v46, %v14332_v59  ;;  %v2896_v23 = vshll.u32 %v11890_v24, 16 }
 0x16f   : > { %v14570_v58 = vadd.f32 %v1656_v30, %v1082_v38  ;;  %10711 = vmatmul.msk.bf16.gmra.mxu0 %vm477_vm1, %v14491_v0  ;;  %v14574_v8 = vadd.f32 %v1704_v51, %v1130_v6  ;;  %v3522_v0 = vshrl.u32 %v14578_v12, 16  ;;  %v2015_v3 = vsel %vm710_vm3, %v2005_v18, %v2014_v13  ;;  %v13846_v51 = vld [vmem:[%s14151_s10 + $0x54] sm:$0xff]  }
 0x170   : > { %v3527_v30 = vrot.slane %v3525_v21, 4 }
 0x171   : > { %17455 = vst [vmem:[#allocation14_spill] sm:$0xff] %v14574_v8  ;;  %v3524_v6 = vrot.slane %v3522_v0, 3  ;;  %v2898_v0 = vrot.slane %v2896_v23, 1 }
 0x173   : > { %10857 = vmatmul.msk.bf16.gmra.mxu2 %vm477_vm1, %v3520_v57  ;;  %v2892_v57 = vshrl.u32 %v11889_v34, 16  ;;  %v3528_v46 = vor.u32 %v3527_v30, %v3524_v6  ;;  %v14605_v6 = vld [vmem:[%s14151_s10 + $0x40] sm:$0xff]  }
 0x174   : > { %v1084_v1 = vpop.f32.mrf.mxu1  ;;  %v630_v2 = vpop.f32.mrf.mxu0 }
 0x175   : > { %v1085_v63 = vadd.f32 %v1084_v1, %v628_v22  ;;  %v2017_v1 = vshrl.u32 %v13846_v51, 16  ;;  %v2894_v18 = vor.u32 %v2892_v57, %v2890_v53 }
 0x176   : > { %v1659_v27 = vpop.f32.mrf.mxu2  ;;  %v1706_v52 = vpop.f32.mrf.mxu3 }
 0x177   : > { %10832 = vmatmul.msk.bf16.gmra.mxu1 %vm477_vm1, %v2891_v42  ;;  %v14588_v38 = vadd.f32 %v1659_v27, %v1085_v63  ;;  %v14590_v22 = vadd.f32 %v1706_v52, %v1132_v48  ;;  %v2020_v42 = vshll.u32 %v13846_v51, 16  ;;  %v1135_v63 = vadd.f32 %v14457_v26, %v14340_v16 }
 0x178   : > { %v2019_v52 = vrot.slane %v2017_v1, 3  ;;  %v2899_v16 = vsel %vm1313_vm2, %v2894_v18, %v2898_v0 }
 0x179   : > { %17456 = vst [vmem:[#allocation15_spill] sm:$0xff] %v14590_v22 }
 0x17b   : > { %10691 = vmatmul.msk.bf16.gmra.mxu3 %vm477_vm1, %v2015_v3  ;;  %v2022_v3 = vrot.slane %v2020_v42, 4 }
 0x17c   : > { %v1086_v14 = vpop.f32.mrf.mxu1  ;;  %v633_v59 = vpop.f32.mrf.mxu0 }
 0x17d   : > { %v1087_v31 = vadd.f32 %v1086_v14, %v630_v2  ;;  %v3529_v2 = vsel %vm710_vm3, %v3519_v35, %v3528_v46  ;;  %v2023_v51 = vor.u32 %v2022_v3, %v2019_v52  ;;  %v3534_v14 = vshll.u32 %v14605_v6, 16 }
 0x17e   : > { %v1661_v48 = vpop.f32.mrf.mxu2  ;;  %v1709_v27 = vpop.f32.mrf.mxu3  ;;  %v1137_v35 = vadd.f32 %v14466_v54, %v14354_v39 }
 0x17f   : > { %v14597_v21 = vadd.f32 %v1661_v48, %v1087_v31  ;;  %10712 = vmatmul.msk.bf16.gmra.mxu0 %vm477_vm1, %v14523_v55  ;;  %v14601_v34 = vadd.f32 %v1709_v27, %v1135_v63  ;;  %v3531_v55 = vshrl.u32 %v14605_v6, 16  ;;  %v14615_v31 = vld [vmem:[%s14151_s10 + $0x38] sm:$0xff]  ;;  %v2024_v42 = vsel %vm710_vm3, %v2014_v13, %v2023_v51 }
 0x180   : > { %v3536_v48 = vrot.slane %v3534_v14, 4  ;;  %v13848_v27 = vld [vmem:[%s14151_s10 + $0x5c] sm:$0xff]   ;;  %v2904_v52 = vshll.u32 %v14615_v31, 16 }
 0x181   : > { %17457 = vst [vmem:[#allocation16_spill] sm:$0xff] %v14601_v34  ;;  %v3533_v63 = vrot.slane %v3531_v55, 3 }
 0x183   : > { %10858 = vmatmul.msk.bf16.gmra.mxu2 %vm477_vm1, %v3529_v2  ;;  %v2900_v2 = vshrl.u32 %v11890_v24, 16  ;;  %v3537_v3 = vor.u32 %v3536_v48, %v3533_v63  ;;  %v2906_v24 = vrot.slane %v2904_v52, 1  ;;  %v14638_v48 = vld [vmem:[%s14151_s10 + $0x48] sm:$0xff]  }
 0x184   : > { %v1089_v30 = vpop.f32.mrf.mxu1  ;;  %v635_v53 = vpop.f32.mrf.mxu0 }
 0x185   : > { %v1090_v26 = vadd.f32 %v1089_v30, %v633_v59  ;;  %v2026_v30 = vshrl.u32 %v13848_v27, 16 }
 0x186   : > { %v1664_v57 = vpop.f32.mrf.mxu2  ;;  %v1711_v23 = vpop.f32.mrf.mxu3 }
 0x187   : > { %10833 = vmatmul.msk.bf16.gmra.mxu1 %vm477_vm1, %v2899_v16  ;;  %v14617_v1 = vadd.f32 %v1664_v57, %v1090_v26  ;;  %v14619_v59 = vadd.f32 %v1711_v23, %v1137_v35  ;;  %v2029_v16 = vshll.u32 %v13848_v27, 16  ;;  %v10879_v26 = vld [vmem:[%s17432_s1 + $0x1c] sm:$0xf]  ;;  %v2902_v35 = vor.u32 %v2900_v2, %v2898_v0 }
 0x188   : > { %v4061_v13 = vsel %vm550_vm0, %v10879_v26, 0  ;;  %v3538_v23 = vsel %vm710_vm3, %v3528_v46, %v3537_v3  ;;  %v10904_v46 = vld [vmem:[%s17432_s1 + $0x20] sm:$0xf] }
 0x189   : > { %17458 = vst [vmem:[#allocation17_spill] sm:$0xff] %v14619_v59  ;;  %4070 = vmatpush.bf16.msra.mxu3 %v4061_v13  ;;  %v2031_v63 = vrot.slane %v2029_v16, 4  ;;  %v2907_v0 = vsel %vm1313_vm2, %v2902_v35, %v2906_v24 }
 0x18b   : > { %10692 = vmatmul.msk.bf16.gmra.mxu3 %vm477_vm1, %v2024_v42  ;;  %v2028_v42 = vrot.slane %v2026_v30, 3 }
 0x18c   : > { %v1091_v18 = vpop.f32.mrf.mxu1  ;;  %v638_v54 = vpop.f32.mrf.mxu0 }
 0x18d   : > { %v1092_v39 = vadd.f32 %v1091_v18, %v635_v53  ;;  %v2032_v52 = vor.u32 %v2031_v63, %v2028_v42  ;;  %v2908_v63 = vshrl.u32 %v14615_v31, 16 }
 0x18e   : > { %v1666_v55 = vpop.f32.mrf.mxu2  ;;  %v2244_v14 = vpop.f32.mrf.mxu3 }
 0x18f   : > { %v14629_v57 = vadd.f32 %v1666_v55, %v1092_v39  ;;  %10713 = vmatmul.msk.bf16.gmra.mxu0 %vm477_vm1, %v14551_v60  ;;  %v14634_v53 = vadd.f32 %v2244_v14, %v14273_v17  ;;  %v3540_v60 = vshrl.u32 %v14638_v48, 16  ;;  %v3543_v17 = vshll.u32 %v14638_v48, 16 }
 0x190   : > { %v4683_v39 = vsel %vm550_vm0, %v10904_v46, 0  ;;  %v2033_v55 = vsel %vm710_vm3, %v2023_v51, %v2032_v52 }
 0x191   : > { %4692 = vmatpush.bf16.msra.mxu0 %v4683_v39  ;;  %v3542_v14 = vrot.slane %v3540_v60, 3  ;;  %v3545_v35 = vrot.slane %v3543_v17, 4 }
 0x193   : > { %10859 = vmatmul.msk.bf16.gmra.mxu2 %vm477_vm1, %v3538_v23  ;;  %v13850_v23 = vld [vmem:[%s14151_s10 + $0x64] sm:$0xff]   ;;  %v3546_v39 = vor.u32 %v3545_v35, %v3542_v14 }
 0x194   : > { %v1094_v27 = vpop.f32.mrf.mxu1  ;;  %v640_v2 = vpop.f32.mrf.mxu0 }
 0x195   : > { %v1095_v18 = vadd.f32 %v1094_v27, %v638_v54  ;;  %v11892_v54 = vld [vmem:[%s14151_s10 + $0x40] sm:$0xff] }
 0x196   : > { %v1669_v30 = vpop.f32.mrf.mxu2  ;;  %v2246_v16 = vpop.f32.mrf.mxu3  ;;  %v2912_v27 = vshll.u32 %v11892_v54, 16 }
 0x197   : > { %10834 = vmatmul.msk.bf16.gmra.mxu1 %vm477_vm1, %v2907_v0  ;;  %v14650_v26 = vadd.f32 %v1669_v30, %v1095_v18  ;;  %v14653_v13 = vadd.f32 %v2246_v16, %v14283_v36  ;;  %v2035_v18 = vshrl.u32 %v13850_v23, 16  ;;  %v2038_v30 = vshll.u32 %v13850_v23, 16 }
 0x198   : > { %v2910_v16 = vor.u32 %v2908_v63, %v2906_v24  ;;  %v2914_v34 = vrot.slane %v2912_v27, 1  ;;  %v11893_v63 = vld [vmem:[%s14151_s10 + $0x48] sm:$0xff] }
 0x199   : > { %v2037_v60 = vrot.slane %v2035_v18, 3  ;;  %v2040_v17 = vrot.slane %v2038_v30, 4 }
 0x19a   : > { %v2915_v35 = vsel %vm1313_vm2, %v2910_v16, %v2914_v34 }
 0x19b   : > { %10693 = vmatmul.msk.bf16.gmra.mxu3 %vm477_vm1, %v2033_v55  ;;  %v14668_v55 = vld [vmem:[%s14151_s10 + $0x50] sm:$0xff]   ;;  %v2041_v23 = vor.u32 %v2040_v17, %v2037_v60  ;;  %v2920_v60 = vshll.u32 %v11893_v63, 16 }
 0x19c   : > { %v1096_v42 = vpop.f32.mrf.mxu1  ;;  %v643_v46 = vpop.f32.mrf.mxu0 }
 0x19d   : > { %v1097_v0 = vadd.f32 %v1096_v42, %v640_v2  ;;  %v3547_v2 = vsel %vm710_vm3, %v3537_v3, %v3546_v39 }
 0x19e   : > { %v1671_v59 = vpop.f32.mrf.mxu2  ;;  %v2249_v36 = vpop.f32.mrf.mxu3 }
 0x19f   : > { %v14659_v51 = vadd.f32 %v1671_v59, %v1097_v0  ;;  %10714 = vmatmul.msk.bf16.gmra.mxu0 %vm477_vm1, %v14578_v12  ;;  %v14664_v31 = vadd.f32 %v2249_v36, %v14296_v15  ;;  %v3549_v12 = vshrl.u32 %v14668_v55, 16  ;;  %v3552_v15 = vshll.u32 %v14668_v55, 16  ;;  %v13852_v36 = vld [vmem:[%s14151_s10 + $0x6c] sm:$0xff]  }
 0x1a0   : > { %v2044_v22 = vshrl.u32 %v13852_v36, 16 }
 0x1a1   : > { %v3551_v18 = vrot.slane %v3549_v12, 3  ;;  %v3554_v30 = vrot.slane %v3552_v15, 4  ;;  %v14693_v15 = vld [vmem:[%s14151_s10 + $0x58] sm:$0xff]  }
 0x1a3   : > { %10860 = vmatmul.msk.bf16.gmra.mxu2 %vm477_vm1, %v3547_v2  ;;  %v2916_v2 = vshrl.u32 %v11892_v54, 16 }
 0x1a4   : > { %v1099_v14 = vpop.f32.mrf.mxu1  ;;  %v645_v59 = vpop.f32.mrf.mxu0 }
 0x1a5   : > { %v1100_v24 = vadd.f32 %v1099_v14, %v643_v46  ;;  %v2042_v46 = vsel %vm710_vm3, %v2032_v52, %v2041_v23 }
 0x1a6   : > { %v1674_v3 = vpop.f32.mrf.mxu2  ;;  %v2251_v42 = vpop.f32.mrf.mxu3 }
 0x1a7   : > { %10835 = vmatmul.msk.bf16.gmra.mxu1 %vm477_vm1, %v2915_v35  ;;  %v14676_v27 = vadd.f32 %v1674_v3, %v1100_v24  ;;  %v14679_v0 = vadd.f32 %v2251_v42, %v14305_v5  ;;  %v3555_v35 = vor.u32 %v3554_v30, %v3551_v18  ;;  %v2047_v24 = vshll.u32 %v13852_v36, 16 }
 0x1a8   : > { %v2918_v5 = vor.u32 %v2916_v2, %v2914_v34  ;;  %v2922_v42 = vrot.slane %v2920_v60, 1 }
 0x1a9   : > { %v3556_v54 = vsel %vm710_vm3, %v3546_v39, %v3555_v35  ;;  %v2049_v12 = vrot.slane %v2047_v24, 4  ;;  %v11894_v39 = vld [vmem:[%s14151_s10 + $0x50] sm:$0xff] }
 0x1aa   : > { %v2923_v18 = vsel %vm1313_vm2, %v2918_v5, %v2922_v42  ;;  %v13854_v24 = vld [vmem:[%s14151_s10 + $0x74] sm:$0xff]   ;;  %v2924_v5 = vshrl.u32 %v11893_v63, 16 }
 0x1ab   : > { %10694 = vmatmul.msk.bf16.gmra.mxu3 %vm477_vm1, %v2042_v46 }
 0x1ac   : > { %v1101_v16 = vpop.f32.mrf.mxu1  ;;  %v648_v14 = vpop.f32.mrf.mxu0 }
 0x1ad   : > { %v1102_v17 = vadd.f32 %v1101_v16, %v645_v59  ;;  %v2046_v59 = vrot.slane %v2044_v22, 3 }
 0x1ae   : > { %v1676_v3 = vpop.f32.mrf.mxu2  ;;  %v2254_v8 = vpop.f32.mrf.mxu3 }
 0x1af   : > { %v14684_v40 = vadd.f32 %v1676_v3, %v1102_v17  ;;  %10715 = vmatmul.msk.bf16.gmra.mxu0 %vm477_vm1, %v14605_v6  ;;  %v14689_v52 = vadd.f32 %v2254_v8, %v14315_v25  ;;  %v2050_v36 = vor.u32 %v2049_v12, %v2046_v59  ;;  %v3558_v6 = vshrl.u32 %v14693_v15, 16 }
 0x1b0   : > { %v3561_v25 = vshll.u32 %v14693_v15, 16 }
 0x1b1   : > { %v2051_v60 = vsel %vm710_vm3, %v2041_v23, %v2050_v36  ;;  %v3560_v17 = vrot.slane %v3558_v6, 3 }
 0x1b3   : > { %10861 = vmatmul.msk.bf16.gmra.mxu2 %vm477_vm1, %v3556_v54  ;;  %v2928_v54 = vshll.u32 %v11894_v39, 16 }
 0x1b4   : > { %v1104_v46 = vpop.f32.mrf.mxu1  ;;  %v650_v30 = vpop.f32.mrf.mxu0 }
 0x1b5   : > { %v1105_v34 = vadd.f32 %v1104_v46, %v648_v14  ;;  %v3563_v14 = vrot.slane %v3561_v25, 4  ;;  %v14718_v25 = vld [vmem:[%s14151_s10 + $0x60] sm:$0xff]  }
 0x1b6   : > { %v1679_v8 = vpop.f32.mrf.mxu2  ;;  %v2256_v22 = vpop.f32.mrf.mxu3 }
 0x1b7   : > { %10836 = vmatmul.msk.bf16.gmra.mxu1 %vm477_vm1, %v2923_v18  ;;  %v14701_v16 = vadd.f32 %v1679_v8, %v1105_v34  ;;  %v14704_v2 = vadd.f32 %v2256_v22, %v14324_v44  ;;  %v3564_v46 = vor.u32 %v3563_v14, %v3560_v17  ;;  %v2053_v18 = vshrl.u32 %v13854_v24, 16 }
 0x1b8   : > { %v2056_v34 = vshll.u32 %v13854_v24, 16  ;;  %v2926_v44 = vor.u32 %v2924_v5, %v2922_v42  ;;  %v2930_v22 = vrot.slane %v2928_v54, 1 }
 0x1b9   : > { %v3565_v63 = vsel %vm710_vm3, %v3555_v35, %v3564_v46 }
 0x1ba   : > { %v2058_v6 = vrot.slane %v2056_v34, 4  ;;  %v2931_v17 = vsel %vm1313_vm2, %v2926_v44, %v2930_v22  ;;  %v13856_v34 = vld [vmem:[%s14151_s10 + $0x7c] sm:$0xff]   ;;  %v2932_v44 = vshrl.u32 %v11894_v39, 16 }
 0x1bb   : > { %10695 = vmatmul.msk.bf16.gmra.mxu3 %vm477_vm1, %v2051_v60 }
 0x1bc   : > { %v1106_v3 = vpop.f32.mrf.mxu1  ;;  %v653_v12 = vpop.f32.mrf.mxu0  ;;  %v2934_v61 = vor.u32 %v2932_v44, %v2930_v22 }
 0x1bd   : > { %v1107_v59 = vadd.f32 %v1106_v3, %v650_v30  ;;  %v2055_v30 = vrot.slane %v2053_v18, 3  ;;  %v11895_v3 = vld [vmem:[%s14151_s10 + $0x58] sm:$0xff] }
 0x1be   : > { %v1681_v8 = vpop.f32.mrf.mxu2  ;;  %v2259_v49 = vpop.f32.mrf.mxu3 }
 0x1bf   : > { %v14709_v56 = vadd.f32 %v1681_v8, %v1107_v59  ;;  %10716 = vmatmul.msk.bf16.gmra.mxu0 %vm477_vm1, %v14638_v48  ;;  %v14714_v23 = vadd.f32 %v2259_v49, %v14334_v62  ;;  %v2059_v24 = vor.u32 %v2058_v6, %v2055_v30  ;;  %v3567_v48 = vshrl.u32 %v14718_v25, 16 }
 0x1c0   : > { %v3570_v62 = vshll.u32 %v14718_v25, 16 }
 0x1c1   : > { %v2060_v59 = vsel %vm710_vm3, %v2050_v36, %v2059_v24 }
 0x1c2   : > { %v3572_v18 = vrot.slane %v3570_v62, 4 }
 0x1c3   : > { %10862 = vmatmul.msk.bf16.gmra.mxu2 %vm477_vm1, %v3565_v63  ;;  %v2936_v63 = vshll.u32 %v11895_v3, 16 }
 0x1c4   : > { %v1109_v60 = vpop.f32.mrf.mxu1  ;;  %v655_v14 = vpop.f32.mrf.mxu0 }
 0x1c5   : > { %v1110_v42 = vadd.f32 %v1109_v60, %v653_v12  ;;  %v3569_v12 = vrot.slane %v3567_v48, 3  ;;  %v2938_v36 = vrot.slane %v2936_v63, 1 }
 0x1c6   : > { %v1684_v49 = vpop.f32.mrf.mxu2  ;;  %v2261_v35 = vpop.f32.mrf.mxu3 }
 0x1c7   : > { %10837 = vmatmul.msk.bf16.gmra.mxu1 %vm477_vm1, %v2931_v17  ;;  %v14726_v5 = vadd.f32 %v1684_v49, %v1110_v42  ;;  %v14729_v54 = vadd.f32 %v2261_v35, %v14343_v20  ;;  %v3573_v60 = vor.u32 %v3572_v18, %v3569_v12  ;;  %v2062_v17 = vshrl.u32 %v13856_v34, 16  ;;  %v14744_v12 = vld [vmem:[%s14151_s10 + $0x68] sm:$0xff]  }
 0x1c8   : > { %v2065_v42 = vshll.u32 %v13856_v34, 16  ;;  %v2939_v18 = vsel %vm1313_vm2, %v2934_v61, %v2938_v36 }
 0x1c9   : > { %v2064_v62 = vrot.slane %v2062_v17, 3 }
 0x1cb   : > { %10696 = vmatmul.msk.bf16.gmra.mxu3 %vm477_vm1, %v2060_v59  ;;  %v2067_v59 = vrot.slane %v2065_v42, 4 }
 0x1cc   : > { %v1111_v8 = vpop.f32.mrf.mxu1  ;;  %v2522_v6 = vpop.f32.mrf.mxu0 }
 0x1cd   : > { %v1112_v30 = vadd.f32 %v1111_v8, %v655_v14  ;;  %v2642_v49 = vadd.f32 %v2522_v6, %v14634_v53  ;;  %v3574_v14 = vsel %vm710_vm3, %v3564_v46, %v3573_v60  ;;  %v2068_v8 = vor.u32 %v2067_v59, %v2064_v62 }
 0x1ce   : > { %v1686_v20 = vpop.f32.mrf.mxu2  ;;  %v2264_v35 = vpop.f32.mrf.mxu3 }
 0x1cf   : > { %v14735_v48 = vadd.f32 %v1686_v20, %v1112_v30  ;;  %10717 = vmatmul.msk.bf16.gmra.mxu0 %vm477_vm1, %v14668_v55  ;;  %v14740_v39 = vadd.f32 %v2264_v35, %v14356_v45  ;;  %v3576_v55 = vshrl.u32 %v14744_v12, 16  ;;  %v3579_v45 = vshll.u32 %v14744_v12, 16  ;;  %v11896_v30 = vld [vmem:[%s14151_s10 + $0x60] sm:$0xff] }
 0x1d0   : > { %v2069_v17 = vsel %vm710_vm3, %v2059_v24, %v2068_v8  ;;  %v13858_v20 = vld [vmem:[%s14151_s10 + $0x84] sm:$0xff]   ;;  %v2944_v62 = vshll.u32 %v11896_v30, 16 }
 0x1d1   : > { %v3578_v42 = vrot.slane %v3576_v55, 3 }
 0x1d2   : > { %v2946_v24 = vrot.slane %v2944_v62, 1 }
 0x1d3   : > { %10863 = vmatmul.msk.bf16.gmra.mxu2 %vm477_vm1, %v3574_v14  ;;  %v2940_v14 = vshrl.u32 %v11895_v3, 16 }
 0x1d4   : > { %v3144_v53 = vpop.f32.mrf.mxu1  ;;  %v2524_v34 = vpop.f32.mrf.mxu0 }
 0x1d5   : > { %v3264_v22 = vadd.f32 %v3144_v53, %v2642_v49  ;;  %v2643_v46 = vadd.f32 %v2524_v34, %v14653_v13  ;;  %v3581_v49 = vrot.slane %v3579_v45, 4 }
 0x1d6   : > { %v3794_v44 = vpop.f32.mrf.mxu2  ;;  %v2266_v63 = vpop.f32.mrf.mxu3 }
 0x1d7   : > { %10838 = vmatmul.msk.bf16.gmra.mxu1 %vm477_vm1, %v2939_v18  ;;  %v14753_v6 = vadd.f32 %v3794_v44, %v3264_v22  ;;  %v14756_v61 = vadd.f32 %v2266_v63, %v14369_v4  ;;  %v3582_v53 = vor.u32 %v3581_v49, %v3578_v42  ;;  %v2071_v18 = vshrl.u32 %v13858_v20, 16  ;;  %v14771_v42 = vld [vmem:[%s14151_s10 + $0x70] sm:$0xff]  }
 0x1d8   : > { %v2074_v22 = vshll.u32 %v13858_v20, 16  ;;  %v2942_v63 = vor.u32 %v2940_v14, %v2938_v36 }
 0x1d9   : > { %v3583_v45 = vsel %vm710_vm3, %v3573_v60, %v3582_v53 }
 0x1da   : > { %v2947_v49 = vsel %vm1313_vm2, %v2942_v63, %v2946_v24 }
 0x1db   : > { %10697 = vmatmul.msk.bf16.gmra.mxu3 %vm477_vm1, %v2069_v17  ;;  %v2076_v17 = vrot.slane %v2074_v22, 4 }
 0x1dc   : > { %v3146_v35 = vpop.f32.mrf.mxu1  ;;  %v2527_v13 = vpop.f32.mrf.mxu0 }
 0x1dd   : > { %v3265_v59 = vadd.f32 %v3146_v35, %v2643_v46  ;;  %v2644_v34 = vadd.f32 %v2527_v13, %v14664_v31  ;;  %v2073_v46 = vrot.slane %v2071_v18, 3  ;;  %v3585_v35 = vshrl.u32 %v14771_v42, 16 }
 0x1de   : > { %v3796_v4 = vpop.f32.mrf.mxu2  ;;  %v2269_v44 = vpop.f32.mrf.mxu3 }
 0x1df   : > { %10718 = vmatmul.msk.bf16.gmra.mxu0 %vm477_vm1, %v14693_v15  ;;  %v14764_v55 = vadd.f32 %v3796_v4, %v3265_v59  ;;  %v14767_v3 = vadd.f32 %v2269_v44, %v14387_v37  ;;  %v2077_v20 = vor.u32 %v2076_v17, %v2073_v46  ;;  %v3588_v37 = vshll.u32 %v14771_v42, 16  ;;  %v11897_v59 = vld [vmem:[%s14151_s10 + $0x68] sm:$0xff] }
 0x1e0   : > { %v13860_v44 = vld [vmem:[%s14151_s10 + $0x8c] sm:$0xff]   ;;  %v2952_v46 = vshll.u32 %v11897_v59, 16 }
 0x1e1   : > { %v2078_v22 = vsel %vm710_vm3, %v2068_v8, %v2077_v20  ;;  %v3590_v4 = vrot.slane %v3588_v37, 4 }
 0x1e2   : > { %v2954_v8 = vrot.slane %v2952_v46, 1 }
 0x1e3   : > { %10864 = vmatmul.msk.bf16.gmra.mxu2 %vm477_vm1, %v3583_v45  ;;  %v2948_v45 = vshrl.u32 %v11896_v30, 16 }
 0x1e4   : > { %v3149_v31 = vpop.f32.mrf.mxu1  ;;  %v2529_v15 = vpop.f32.mrf.mxu0 }
 0x1e5   : > { %v3266_v36 = vadd.f32 %v3149_v31, %v2644_v34  ;;  %v2645_v60 = vadd.f32 %v2529_v15, %v14679_v0  ;;  %v3587_v34 = vrot.slane %v3585_v35, 3 }
 0x1e6   : > { %v3799_v14 = vpop.f32.mrf.mxu2  ;;  %v2271_v62 = vpop.f32.mrf.mxu3 }
 0x1e7   : > { %10839 = vmatmul.msk.bf16.gmra.mxu1 %vm477_vm1, %v2947_v49  ;;  %v14780_v13 = vadd.f32 %v3799_v14, %v3266_v36  ;;  %v14783_v18 = vadd.f32 %v2271_v62, %v14402_v10  ;;  %v3591_v31 = vor.u32 %v3590_v4, %v3587_v34  ;;  %v2080_v49 = vshrl.u32 %v13860_v44, 16  ;;  %v14798_v34 = vld [vmem:[%s14151_s10 + $0x78] sm:$0xff]  }
 0x1e8   : > { %v2083_v36 = vshll.u32 %v13860_v44, 16  ;;  %v2950_v62 = vor.u32 %v2948_v45, %v2946_v24 }
 0x1e9   : > { %v3592_v37 = vsel %vm710_vm3, %v3582_v53, %v3591_v31 }
 0x1ea   : > { %v2955_v4 = vsel %vm1313_vm2, %v2950_v62, %v2954_v8 }
 0x1eb   : > { %10698 = vmatmul.msk.bf16.gmra.mxu3 %vm477_vm1, %v2078_v22  ;;  %v2085_v22 = vrot.slane %v2083_v36, 4 }
 0x1ec   : > { %v3151_v63 = vpop.f32.mrf.mxu1  ;;  %v2532_v0 = vpop.f32.mrf.mxu0 }
 0x1ed   : > { %v3267_v17 = vadd.f32 %v3151_v63, %v2645_v60  ;;  %v2646_v15 = vadd.f32 %v2532_v0, %v14689_v52  ;;  %v2082_v60 = vrot.slane %v2080_v49, 3  ;;  %v3594_v63 = vshrl.u32 %v14798_v34, 16 }
 0x1ee   : > { %v3801_v10 = vpop.f32.mrf.mxu2  ;;  %v2274_v14 = vpop.f32.mrf.mxu3 }
 0x1ef   : > { %10719 = vmatmul.msk.bf16.gmra.mxu0 %vm477_vm1, %v14718_v25  ;;  %v14791_v35 = vadd.f32 %v3801_v10, %v3267_v17  ;;  %v14794_v30 = vadd.f32 %v2274_v14, %v14412_v43  ;;  %v2086_v44 = vor.u32 %v2085_v22, %v2082_v60  ;;  %v3597_v43 = vshll.u32 %v14798_v34, 16  ;;  %v11898_v17 = vld [vmem:[%s14151_s10 + $0x70] sm:$0xff] }
 0x1f0   : > { %v13862_v14 = vld [vmem:[%s14151_s10 + $0x94] sm:$0xff]   ;;  %v2960_v60 = vshll.u32 %v11898_v17, 16 }
 0x1f1   : > { %v2087_v36 = vsel %vm710_vm3, %v2077_v20, %v2086_v44  ;;  %v3599_v10 = vrot.slane %v3597_v43, 4 }
 0x1f2   : > { %v2962_v20 = vrot.slane %v2960_v60, 1 }
 0x1f3   : > { %10865 = vmatmul.msk.bf16.gmra.mxu2 %vm477_vm1, %v3592_v37  ;;  %v2956_v37 = vshrl.u32 %v11897_v59, 16 }
 0x1f4   : > { %v3154_v52 = vpop.f32.mrf.mxu1  ;;  %v2534_v25 = vpop.f32.mrf.mxu0 }
 0x1f5   : > { %v3268_v24 = vadd.f32 %v3154_v52, %v2646_v15  ;;  %v2647_v53 = vadd.f32 %v2534_v25, %v14704_v2  ;;  %v3596_v15 = vrot.slane %v3594_v63, 3 }
 0x1f6   : > { %v3804_v45 = vpop.f32.mrf.mxu2  ;;  %v2276_v46 = vpop.f32.mrf.mxu3 }
 0x1f7   : > { %10840 = vmatmul.msk.bf16.gmra.mxu1 %vm477_vm1, %v2955_v4  ;;  %v14807_v0 = vadd.f32 %v3804_v45, %v3268_v24  ;;  %v14810_v49 = vadd.f32 %v2276_v46, %v14422_v11  ;;  %v3600_v52 = vor.u32 %v3599_v10, %v3596_v15  ;;  %v2089_v4 = vshrl.u32 %v13862_v14, 16  ;;  %v14825_v15 = vld [vmem:[%s14151_s10 + $0x80] sm:$0xff]  }
 0x1f8   : > { %v2092_v24 = vshll.u32 %v13862_v14, 16  ;;  %v2958_v46 = vor.u32 %v2956_v37, %v2954_v8 }
 0x1f9   : > { %v3601_v43 = vsel %vm710_vm3, %v3591_v31, %v3600_v52 }
 0x1fa   : > { %v2963_v10 = vsel %vm1313_vm2, %v2958_v46, %v2962_v20 }
 0x1fb   : > { %10699 = vmatmul.msk.bf16.gmra.mxu3 %vm477_vm1, %v2087_v36  ;;  %v2094_v36 = vrot.slane %v2092_v24, 4 }
 0x1fc   : > { %v3156_v62 = vpop.f32.mrf.mxu1  ;;  %v2537_v2 = vpop.f32.mrf.mxu0 }
 0x1fd   : > { %v3269_v22 = vadd.f32 %v3156_v62, %v2647_v53  ;;  %v2648_v25 = vadd.f32 %v2537_v2, %v14714_v23  ;;  %v2091_v53 = vrot.slane %v2089_v4, 3  ;;  %v3603_v62 = vshrl.u32 %v14825_v15, 16 }
 0x1fe   : > { %v3806_v11 = vpop.f32.mrf.mxu2  ;;  %v2279_v45 = vpop.f32.mrf.mxu3 }
 0x1ff   : > { %10720 = vmatmul.msk.bf16.gmra.mxu0 %vm477_vm1, %v14744_v12  ;;  %v14818_v63 = vadd.f32 %v3806_v11, %v3269_v22  ;;  %v14821_v59 = vadd.f32 %v2279_v45, %v14432_v19  ;;  %v2095_v14 = vor.u32 %v2094_v36, %v2091_v53  ;;  %v3606_v19 = vshll.u32 %v14825_v15, 16  ;;  %v11899_v22 = vld [vmem:[%s14151_s10 + $0x78] sm:$0xff] }
 0x200   : > { %v13864_v45 = vld [vmem:[%s14151_s10 + $0x9c] sm:$0xff]   ;;  %v2968_v53 = vshll.u32 %v11899_v22, 16 }
 0x201   : > { %v2096_v24 = vsel %vm710_vm3, %v2086_v44, %v2095_v14  ;;  %v3608_v11 = vrot.slane %v3606_v19, 4 }
 0x202   : > { %v2970_v44 = vrot.slane %v2968_v53, 1 }
 0x203   : > { %10866 = vmatmul.msk.bf16.gmra.mxu2 %vm477_vm1, %v3601_v43  ;;  %v2964_v43 = vshrl.u32 %v11898_v17, 16 }
 0x204   : > { %v3159_v23 = vpop.f32.mrf.mxu1  ;;  %v2539_v12 = vpop.f32.mrf.mxu0 }
 0x205   : > { %v3270_v8 = vadd.f32 %v3159_v23, %v2648_v25  ;;  %v2649_v31 = vadd.f32 %v2539_v12, %v14729_v54  ;;  %v3605_v25 = vrot.slane %v3603_v62, 3 }
 0x206   : > { %v3809_v37 = vpop.f32.mrf.mxu2  ;;  %v2281_v60 = vpop.f32.mrf.mxu3 }
 0x207   : > { %10841 = vmatmul.msk.bf16.gmra.mxu1 %vm477_vm1, %v2963_v10  ;;  %v14834_v2 = vadd.f32 %v3809_v37, %v3270_v8  ;;  %v14837_v4 = vadd.f32 %v2281_v60, %v14441_v32  ;;  %v3609_v23 = vor.u32 %v3608_v11, %v3605_v25  ;;  %v2098_v10 = vshrl.u32 %v13864_v45, 16  ;;  %v14852_v25 = vld [vmem:[%s14151_s10 + $0x88] sm:$0xff]  }
 0x208   : > { %v2101_v8 = vshll.u32 %v13864_v45, 16  ;;  %v2966_v60 = vor.u32 %v2964_v43, %v2962_v20 }
 0x209   : > { %v3610_v19 = vsel %vm710_vm3, %v3600_v52, %v3609_v23 }
 0x20a   : > { %v2971_v11 = vsel %vm1313_vm2, %v2966_v60, %v2970_v44 }
 0x20b   : > { %10700 = vmatmul.msk.bf16.gmra.mxu3 %vm477_vm1, %v2096_v24  ;;  %v2103_v24 = vrot.slane %v2101_v8, 4 }
 0x20c   : > { %v3161_v46 = vpop.f32.mrf.mxu1  ;;  %v2542_v54 = vpop.f32.mrf.mxu0 }
 0x20d   : > { %v3271_v36 = vadd.f32 %v3161_v46, %v2649_v31  ;;  %v2650_v12 = vadd.f32 %v2542_v54, %v14740_v39  ;;  %v2100_v31 = vrot.slane %v2098_v10, 3  ;;  %v3612_v46 = vshrl.u32 %v14852_v25, 16 }
 0x20e   : > { %v3811_v32 = vpop.f32.mrf.mxu2  ;;  %v2284_v37 = vpop.f32.mrf.mxu3 }
 0x20f   : > { %10721 = vmatmul.msk.bf16.gmra.mxu0 %vm477_vm1, %v14771_v42  ;;  %v14845_v62 = vadd.f32 %v3811_v32, %v3271_v36  ;;  %v14848_v17 = vadd.f32 %v2284_v37, %v14451_v50  ;;  %v2104_v45 = vor.u32 %v2103_v24, %v2100_v31  ;;  %v3615_v50 = vshll.u32 %v14852_v25, 16  ;;  %v14861_v36 = vld [vmem:[%s14151_s10 + $0x80] sm:$0xff] }
 0x210   : > { %v13866_v37 = vld [vmem:[%s14151_s10 + $0xa4] sm:$0xff]  }
 0x211   : > { %v2105_v8 = vsel %vm710_vm3, %v2095_v14, %v2104_v45  ;;  %v3617_v32 = vrot.slane %v3615_v50, 4 }
 0x213   : > { %10867 = vmatmul.msk.bf16.gmra.mxu2 %vm477_vm1, %v3610_v19  ;;  %v2972_v19 = vshrl.u32 %v11899_v22, 16 }
 0x214   : > { %v3164_v39 = vpop.f32.mrf.mxu1  ;;  %v2544_v42 = vpop.f32.mrf.mxu0 }
 0x215   : > { %v3272_v20 = vadd.f32 %v3164_v39, %v2650_v12  ;;  %v2651_v52 = vadd.f32 %v2544_v42, %v14756_v61  ;;  %v3614_v12 = vrot.slane %v3612_v46, 3  ;;  %v2976_v61 = vshll.u32 %v14861_v36, 16 }
 0x216   : > { %v3814_v43 = vpop.f32.mrf.mxu2  ;;  %v2286_v53 = vpop.f32.mrf.mxu3  ;;  %v2974_v14 = vor.u32 %v2972_v19, %v2970_v44 }
 0x217   : > { %10842 = vmatmul.msk.bf16.gmra.mxu1 %vm477_vm1, %v2971_v11  ;;  %v14863_v54 = vadd.f32 %v3814_v43, %v3272_v20  ;;  %v14866_v10 = vadd.f32 %v2286_v53, %v14460_v9  ;;  %v3618_v39 = vor.u32 %v3617_v32, %v3614_v12  ;;  %v2107_v11 = vshrl.u32 %v13866_v37, 16  ;;  %v14882_v12 = vld [vmem:[%s14151_s10 + $0x90] sm:$0xff]  }
 0x218   : > { %v2110_v20 = vshll.u32 %v13866_v37, 16  ;;  %v2978_v46 = vrot.slane %v2976_v61, 1 }
 0x219   : > { %v2109_v53 = vrot.slane %v2107_v11, 3  ;;  %v11901_v11 = vld [vmem:[%s14151_s10 + $0x88] sm:$0xff] }
 0x21a   : > { %v2979_v32 = vsel %vm1313_vm2, %v2974_v14, %v2978_v46 }
 0x21b   : > { %10701 = vmatmul.msk.bf16.gmra.mxu3 %vm477_vm1, %v2105_v8  ;;  %v2112_v8 = vrot.slane %v2110_v20, 4 }
 0x21c   : > { %v3166_v60 = vpop.f32.mrf.mxu1  ;;  %v2547_v24 = vpop.f32.mrf.mxu0 }
 0x21d   : > { %v3273_v31 = vadd.f32 %v3166_v60, %v2651_v52  ;;  %v2652_v9 = vadd.f32 %v2547_v24, %v14767_v3  ;;  %v3619_v52 = vsel %vm710_vm3, %v3609_v23, %v3618_v39  ;;  %v3621_v23 = vshrl.u32 %v14882_v12, 16 }
 0x21e   : > { %v3816_v42 = vpop.f32.mrf.mxu2  ;;  %v2289_v43 = vpop.f32.mrf.mxu3  ;;  %v3624_v60 = vshll.u32 %v14882_v12, 16 }
 0x21f   : > { %10722 = vmatmul.msk.bf16.gmra.mxu0 %vm477_vm1, %v14798_v34  ;;  %v14875_v22 = vadd.f32 %v3816_v42, %v3273_v31  ;;  %v14878_v50 = vadd.f32 %v2289_v43, %v14468_v33  ;;  %v5450_v34 = vld [vmem:[%s17436_s5] sm:$0xf]  ;;  %v2113_v33 = vor.u32 %v2112_v8, %v2109_v53  ;;  %v11965_v43 = vld [vmem:[%s17434_s3 + $0x38] sm:$0xff] }
 0x220   : > { %v6241_v19 = vsel %vm550_vm0, %v5450_v34, 0  ;;  %v3626_v53 = vrot.slane %v3624_v60, 4  ;;  %5935 = vmatpush.bf16.msra.mxu1 %v11965_v43 }
 0x221   : > { %6250 = vmatpush.bf16.msra.mxu2 %v6241_v19  ;;  %v2114_v14 = vsel %vm710_vm3, %v2104_v45, %v2113_v33 }
 0x223   : > { %10868 = vmatmul.msk.bf16.gmra.mxu2 %vm477_vm1, %v3619_v52  ;;  %v3623_v52 = vrot.slane %v3621_v23, 3 }
 0x224   : > { %v3169_v3 = vpop.f32.mrf.mxu1  ;;  %v2549_v37 = vpop.f32.mrf.mxu0 }
 0x225   : > { %v3274_v44 = vadd.f32 %v3169_v3, %v2652_v9  ;;  %v2653_v61 = vadd.f32 %v2549_v37, %v14783_v18  ;;  %v17459_v9 = vld [vmem:[#allocation7_spill] sm:$0xff]  ;;  %v2980_v3 = vshrl.u32 %v14861_v36, 16  ;;  %v3627_v37 = vor.u32 %v3626_v53, %v3623_v52  ;;  %v14917_v53 = vld [vmem:[%s14151_s10 + $0x98] sm:$0xff]  }
 0x226   : > { %v3819_v31 = vpop.f32.mrf.mxu2  ;;  %v2291_v24 = vpop.f32.mrf.mxu3  ;;  %v13868_v18 = vld [vmem:[%s14151_s10 + $0xac] sm:$0xff]  }
 0x227   : > { %10843 = vmatmul.msk.bf16.gmra.mxu1 %vm477_vm1, %v2979_v32  ;;  %v14895_v20 = vadd.f32 %v3819_v31, %v3274_v44  ;;  %v14898_v42 = vadd.f32 %v2291_v24, %v17459_v9  ;;  %v2984_v32 = vshll.u32 %v11901_v11, 16  ;;  %v2116_v19 = vshrl.u32 %v13868_v18, 16 }
 0x228   : > { %v2119_v31 = vshll.u32 %v13868_v18, 16  ;;  %v2982_v23 = vor.u32 %v2980_v3, %v2978_v46  ;;  %v3630_v3 = vshrl.u32 %v14917_v53, 16 }
 0x229   : > { %v2986_v60 = vrot.slane %v2984_v32, 1 }
 0x22a   : > { %v2121_v52 = vrot.slane %v2119_v31, 4 }
 0x22b   : > { %10702 = vmatmul.msk.bf16.gmra.mxu3 %vm477_vm1, %v2114_v14  ;;  %v2118_v14 = vrot.slane %v2116_v19, 3  ;;  %v2987_v18 = vsel %vm1313_vm2, %v2982_v23, %v2986_v60  ;;  %v13870_v23 = vld [vmem:[%s14151_s10 + $0xb4] sm:$0xff]  }
 0x22c   : > { %v3171_v8 = vpop.f32.mrf.mxu1  ;;  %v2552_v44 = vpop.f32.mrf.mxu0 }
 0x22d   : > { %v3275_v34 = vadd.f32 %v3171_v8, %v2653_v61  ;;  %v2654_v24 = vadd.f32 %v2552_v44, %v14794_v30  ;;  %v3628_v61 = vsel %vm710_vm3, %v3618_v39, %v3627_v37  ;;  %v2122_v8 = vor.u32 %v2121_v52, %v2118_v14  ;;  %v14926_v44 = vld [vmem:[%s14151_s10 + $0x90] sm:$0xff] }
 0x22e   : > { %v3821_v9 = vpop.f32.mrf.mxu2  ;;  %v2294_v45 = vpop.f32.mrf.mxu3  ;;  %v2988_v14 = vshrl.u32 %v11901_v11, 16 }
 0x22f   : > { %10723 = vmatmul.msk.bf16.gmra.mxu0 %vm477_vm1, %v14825_v15  ;;  %v14910_v43 = vadd.f32 %v3821_v9, %v3275_v34  ;;  %v14913_v36 = vadd.f32 %v2294_v45, %v14505_v41  ;;  %v3633_v41 = vshll.u32 %v14917_v53, 16  ;;  %v3632_v9 = vrot.slane %v3630_v3, 3 }
 0x230   : > { %v2990_v3 = vor.u32 %v2988_v14, %v2986_v60 }
 0x231   : > { %v3635_v45 = vrot.slane %v3633_v41, 4 }
 0x233   : > { %10869 = vmatmul.msk.bf16.gmra.mxu2 %vm477_vm1, %v3628_v61 }
 0x234   : > { %v3174_v30 = vpop.f32.mrf.mxu1  ;;  %v2554_v15 = vpop.f32.mrf.mxu0 }
 0x235   : > { %v3276_v46 = vadd.f32 %v3174_v30, %v2654_v24  ;;  %v2655_v39 = vadd.f32 %v2554_v15, %v14810_v49  ;;  %v2123_v24 = vsel %vm710_vm3, %v2113_v33, %v2122_v8  ;;  %v2992_v49 = vshll.u32 %v14926_v44, 16 }
 0x236   : > { %v3824_v32 = vpop.f32.mrf.mxu2  ;;  %v2296_v34 = vpop.f32.mrf.mxu3  ;;  %v2128_v15 = vshll.u32 %v13870_v23, 16 }
 0x237   : > { %10844 = vmatmul.msk.bf16.gmra.mxu1 %vm477_vm1, %v2987_v18  ;;  %v14928_v19 = vadd.f32 %v3824_v32, %v3276_v46  ;;  %v14931_v31 = vadd.f32 %v2296_v34, %v14516_v28  ;;  %v14937_v18 = vor.u32 %v3635_v45, %v3632_v9  ;;  %v2125_v46 = vshrl.u32 %v13870_v23, 16  ;;  %v14950_v45 = vld [vmem:[%s14151_s10 + $0xa0] sm:$0xff]  }
 0x238   : > { %v2994_v41 = vrot.slane %v2992_v49, 1  ;;  %v2130_v9 = vrot.slane %v2128_v15, 4  ;;  %v3642_v14 = vshll.u32 %v14950_v45, 16 }
 0x239   : > { %v3637_v34 = vsel %vm710_vm3, %v3627_v37, %v14937_v18 }
 0x23a   : > { %v2995_v60 = vsel %vm1313_vm2, %v2990_v3, %v2994_v41  ;;  %v13872_v3 = vld [vmem:[%s14151_s10 + $0xbc] sm:$0xff]  }
 0x23b   : > { %10703 = vmatmul.msk.bf16.gmra.mxu3 %vm477_vm1, %v2123_v24  ;;  %v2127_v24 = vrot.slane %v2125_v46, 3 }
 0x23c   : > { %v3176_v61 = vpop.f32.mrf.mxu1  ;;  %v2557_v30 = vpop.f32.mrf.mxu0 }
 0x23d   : > { %v3277_v52 = vadd.f32 %v3176_v61, %v2655_v39  ;;  %v2656_v28 = vadd.f32 %v2557_v30, %v14821_v59  ;;  %v14954_v61 = vor.u32 %v2130_v9, %v2127_v24  ;;  %v14961_v30 = vld [vmem:[%s14151_s10 + $0x98] sm:$0xff]  ;;  %v2996_v24 = vshrl.u32 %v14926_v44, 16 }
 0x23e   : > { %v3826_v32 = vpop.f32.mrf.mxu2  ;;  %v2299_v33 = vpop.f32.mrf.mxu3  ;;  %v3000_v9 = vshll.u32 %v14961_v30, 16 }
 0x23f   : > { %10724 = vmatmul.msk.bf16.gmra.mxu0 %vm477_vm1, %v14852_v25  ;;  %v14942_v11 = vadd.f32 %v3826_v32, %v3277_v52  ;;  %v14945_v39 = vadd.f32 %v2299_v33, %v14533_v47  ;;  %v3639_v47 = vshrl.u32 %v14950_v45, 16  ;;  %v3644_v33 = vrot.slane %v3642_v14, 4 }
 0x241   : > { %v3641_v32 = vrot.slane %v3639_v47, 3 }
 0x243   : > { %10870 = vmatmul.msk.bf16.gmra.mxu2 %vm477_vm1, %v3637_v34  ;;  %v14038_v34 = vmov 0  }
 0x244   : > { %v3179_v59 = vpop.f32.mrf.mxu1  ;;  %v2559_v25 = vpop.f32.mrf.mxu0  ;;  %13964 = vset.pattern.permute.xlu0 %v14038_v34  ;;  %5298 = vst [vmem:[#allocation2] sm:$0xf] %v14038_v34  ;;  %13965 = vset.pattern.permute.xlu1 %v14038_v34 }
 0x245   : > { %v3278_v23 = vadd.f32 %v3179_v59, %v2656_v28  ;;  %v2657_v37 = vadd.f32 %v2559_v25, %v14837_v4  ;;  %v2132_v28 = vsel %vm710_vm3, %v2122_v8, %v14954_v61  ;;  %5299 = vst [vmem:[#allocation2 + $0x4] sm:$0xf] %v14038_v34  ;;  %13966 = vset.pattern.permute.xlu2 %v14038_v34  ;;  %v4962_v8 = vld [vmem:[%s17437_s6] sm:$0xff]  ;;  %v2137_v25 = vshll.u32 %v13872_v3, 16 }
 0x246   : > { %v3829_v49 = vpop.f32.mrf.mxu2  ;;  %v2301_v52 = vpop.f32.mrf.mxu3  ;;  %5300 = vst [vmem:[#allocation2 + $0x8] sm:$0xf] %v14038_v34  ;;  %5012 = vperm.xlu0 %13964, %v4962_v8  }
 0x247   : > { %10845 = vmatmul.msk.bf16.gmra.mxu1 %vm477_vm1, %v2995_v60  ;;  %v14963_v46 = vadd.f32 %v3829_v49, %v3278_v23  ;;  %v14966_v15 = vadd.f32 %v2301_v52, %v14544_v29  ;;  %5301 = vst [vmem:[#allocation2 + $0xc] sm:$0xf] %v14038_v34  ;;  %v14977_v60 = vor.u32 %v3644_v33, %v3641_v32  ;;  %v2134_v23 = vshrl.u32 %v13872_v3, 16  ;;  %v14991_v3 = vld [vmem:[%s14151_s10 + $0xa8] sm:$0xff]  }
 0x248   : > { %5302 = vst [vmem:[#allocation2 + $0xd0] sm:$0xf] %v14038_v34  ;;  %v3002_v49 = vrot.slane %v3000_v9, 1  ;;  %v2139_v33 = vrot.slane %v2137_v25, 4  ;;  %v3651_v9 = vshll.u32 %v14991_v3, 16 }
 0x249   : > { %5303 = vst [vmem:[#allocation2 + $0xd4] sm:$0xf] %v14038_v34  ;;  %v3646_v32 = vsel %vm710_vm3, %v14937_v18, %v14977_v60  ;;  %v3648_v18 = vshrl.u32 %v14991_v3, 16 }
 0x24a   : > { %5304 = vst [vmem:[#allocation2 + $0xd8] sm:$0xf] %v14038_v34 }
 0x24b   : > { %10704 = vmatmul.msk.bf16.gmra.mxu3 %vm477_vm1, %v2132_v28  ;;  %5305 = vst [vmem:[#allocation2 + $0xdc] sm:$0xf] %v14038_v34 }
 0x24c   : > { %v3181_v4 = vpop.f32.mrf.mxu1  ;;  %v2562_v59 = vpop.f32.mrf.mxu0 }
 0x24d   : > { %v3279_v29 = vadd.f32 %v3181_v4, %v2657_v37  ;;  %v2658_v44 = vadd.f32 %v2562_v59, %v14848_v17  ;;  %v2998_v37 = vor.u32 %v2996_v24, %v2994_v41  ;;  %v2136_v17 = vrot.slane %v2134_v23, 3  ;;  %v15005_v23 = vld [vmem:[%s14151_s10 + $0xa0] sm:$0xff] }
 0x24e   : > { %v3831_v47 = vpop.f32.mrf.mxu2  ;;  %v2304_v14 = vpop.f32.mrf.mxu3 }
 0x24f   : > { %10725 = vmatmul.msk.bf16.gmra.mxu0 %vm477_vm1, %v14882_v12  ;;  %v14982_v52 = vadd.f32 %v3831_v47, %v3279_v29  ;;  %v14985_v28 = vadd.f32 %v2304_v14, %v14561_v7  ;;  %v3003_v4 = vsel %vm1313_vm2, %v2998_v37, %v3002_v49  ;;  %v4963_v7 = vld [vmem:[%s17437_s6 + $0x8] sm:$0xff]  ;;  %v14998_v34 = vor.u32 %v2139_v33, %v2136_v17  ;;  %v11964_v47 = vld [vmem:[%s17434_s3 + $0x30] sm:$0xff] }
 0x250   : > { %5017 = vperm.xlu0 %13964, %v4963_v7   ;;  %v3653_v37 = vrot.slane %v3651_v9, 4  ;;  %5936 = vmatpush.bf16.msra.mxu1 %v11964_v47  ;;  %v3004_v33 = vshrl.u32 %v14961_v30, 16 }
 0x251   : > { %v2141_v14 = vsel %vm710_vm3, %v14954_v61, %v14998_v34  ;;  %v4968_v61 = vld [vmem:[%s17437_s6 + $0x30] sm:$0xff] }
 0x253   : > { %10871 = vmatmul.msk.bf16.gmra.mxu2 %vm477_vm1, %v3646_v32  ;;  %v13873_v32 = vld [vmem:[%s14151_s10 + $0xc4] sm:$0xff]  }
 0x254   : > { %v3184_v41 = vpop.f32.mrf.mxu1  ;;  %v2564_v12 = vpop.f32.mrf.mxu0  ;;  %v2146_v30 = vshll.u32 %v13873_v32, 16 }
 0x255   : > { %v3280_v24 = vadd.f32 %v3184_v41, %v2658_v44  ;;  %v2659_v29 = vadd.f32 %v2564_v12, %v14866_v10  ;;  %v3650_v10 = vrot.slane %v3648_v18, 3  ;;  %v3008_v41 = vshll.u32 %v15005_v23, 16 }
 0x256   : > { %v3834_v8 = vpop.f32.mrf.mxu2  ;;  %v2306_v59 = vpop.f32.mrf.mxu3  ;;  %v2143_v12 = vshrl.u32 %v13873_v32, 16  ;;  %v2148_v32 = vrot.slane %v2146_v30, 4 }
 0x257   : > { %10846 = vmatmul.msk.bf16.gmra.mxu1 %vm477_vm1, %v3003_v4  ;;  %v15007_v25 = vadd.f32 %v3834_v8, %v3280_v24  ;;  %v15010_v44 = vadd.f32 %v2306_v59, %v14570_v58  ;;  %v4964_v58 = vld [vmem:[%s17437_s6 + $0x10] sm:$0xff]  ;;  %v15028_v7 = vor.u32 %v3653_v37, %v3650_v10  ;;  %v3006_v8 = vor.u32 %v3004_v33, %v3002_v49 }
 0x258   : > { %5022 = vperm.xlu1 %13965, %v4964_v58   ;;  %5042 = vperm.xlu0 %13964, %v4968_v61   ;;  %v3010_v59 = vrot.slane %v3008_v41, 1  ;;  %v2145_v37 = vrot.slane %v2143_v12, 3 }
 0x259   : > { %v3655_v10 = vsel %vm710_vm3, %v14977_v60, %v15028_v7  ;;  %v4971_v60 = vld [vmem:[%s17437_s6 + $0x48] sm:$0xff] }
 0x25a   : > { %v3011_v33 = vsel %vm1313_vm2, %v3006_v8, %v3010_v59 }
 0x25b   : > { %10705 = vmatmul.msk.bf16.gmra.mxu3 %vm477_vm1, %v2141_v14 }
 0x25c   : > { %v3186_v17 = vpop.f32.mrf.mxu1  ;;  %v2567_v24 = vpop.f32.mrf.mxu0 }
 0x25d   : > { %v3281_v4 = vadd.f32 %v3186_v17, %v2659_v29  ;;  %v2660_v18 = vadd.f32 %v2567_v24, %v14878_v50  ;;  %v15042_v17 = vld [vmem:[%s14151_s10 + $0xb0] sm:$0xff]   ;;  %v15045_v50 = vld [vmem:[%s14151_s10 + $0xc8] sm:$0xff]  }
 0x25e   : > { %v3836_v9 = vpop.f32.mrf.mxu2  ;;  %v2309_v29 = vpop.f32.mrf.mxu3  ;;  %v3657_v58 = vshrl.u32 %v15042_v17, 16  ;;  %v3660_v61 = vshll.u32 %v15042_v17, 16  ;;  %v12290_v24 = vunpack.c.h.b16 %v15045_v50 }
 0x25f   : > { %10726 = vmatmul.msk.bf16.gmra.mxu0 %vm477_vm1, %v14917_v53  ;;  %v15033_v47 = vadd.f32 %v3836_v9, %v3281_v4  ;;  %v15036_v14 = vadd.f32 %v2309_v29, %v14588_v38  ;;  %v4965_v38 = vld [vmem:[%s17437_s6 + $0x18] sm:$0xff]  ;;  %v2149_v4 = vor.u32 %v2148_v32, %v2145_v37  ;;  %v15061_v9 = vld [vmem:[%s14151_s10 + $0xa8] sm:$0xff] }
 0x260   : > { %5027 = vperm.xlu1 %13965, %v4965_v38   ;;  %5057 = vperm.xlu0 %13964, %v4971_v60   ;;  %v3659_v37 = vrot.slane %v3657_v58, 3  ;;  %v3662_v32 = vrot.slane %v3660_v61, 4 }
 0x263   : > { %10872 = vmatmul.msk.bf16.gmra.mxu2 %vm477_vm1, %v3655_v10  ;;  %v2150_v10 = vsel %vm710_vm3, %v14998_v34, %v2149_v4 }
 0x264   : > { %v3189_v49 = vpop.f32.mrf.mxu1  ;;  %v2569_v41 = vpop.f32.mrf.mxu0 }
 0x265   : > { %v3282_v53 = vadd.f32 %v3189_v49, %v2660_v18  ;;  %v2661_v12 = vadd.f32 %v2569_v41, %v14898_v42  ;;  %v1935_v49 = vpack.c.b16 %v12290_v24, %v12290_v24  ;;  %v3012_v42 = vshrl.u32 %v15005_v23, 16 }
 0x266   : > { %v3839_v30 = vpop.f32.mrf.mxu2  ;;  %v2311_v18 = vpop.f32.mrf.mxu3  ;;  %v3663_v41 = vor.u32 %v3662_v32, %v3659_v37 }
 0x267   : > { %10847 = vmatmul.msk.bf16.gmra.mxu1 %vm477_vm1, %v3011_v33  ;;  %v15063_v29 = vadd.f32 %v3839_v30, %v3282_v53  ;;  %v15066_v8 = vadd.f32 %v2311_v18, %v14597_v21  ;;  %v3016_v33 = vshll.u32 %v15061_v9, 16  ;;  %v4969_v53 = vld [vmem:[%s17437_s6 + $0x38] sm:$0xff]  ;;  %v4974_v21 = vld [vmem:[%s17437_s6 + $0x60] sm:$0xff]  ;;  %v2152_v58 = vshrl.u32 %v1935_v49, 16 }
 0x268   : > { %v2155_v61 = vshll.u32 %v1935_v49, 16  ;;  %5047 = vperm.xlu1 %13965, %v4969_v53   ;;  %5072 = vperm.xlu0 %13964, %v4974_v21   ;;  %v3014_v30 = vor.u32 %v3012_v42, %v3010_v59  ;;  %v3664_v37 = vsel %vm710_vm3, %v15028_v7, %v3663_v41  ;;  %v15090_v53 = vld [vmem:[%s14151_s10 + $0xb8] sm:$0xff]  }
 0x269   : > { %v3018_v18 = vrot.slane %v3016_v33, 1  ;;  %v2154_v32 = vrot.slane %v2152_v58, 3  ;;  %v3669_v21 = vshll.u32 %v15090_v53, 16 }
 0x26a   : > { %v2157_v49 = vrot.slane %v2155_v61, 4 }
 0x26b   : > { %10706 = vmatmul.msk.bf16.gmra.mxu3 %vm477_vm1, %v2150_v10  ;;  %v3019_v59 = vsel %vm1313_vm2, %v3014_v30, %v3018_v18 }
 0x26c   : > { %v3191_v38 = vpop.f32.mrf.mxu1  ;;  %v2572_v34 = vpop.f32.mrf.mxu0  ;;  %v2158_v33 = vor.u32 %v2157_v49, %v2154_v32  ;;  %v3671_v32 = vrot.slane %v3669_v21, 4 }
 0x26d   : > { %v3283_v60 = vadd.f32 %v3191_v38, %v2661_v12  ;;  %v2662_v23 = vadd.f32 %v2572_v34, %v14913_v36 }
 0x26e   : > { %v3841_v24 = vpop.f32.mrf.mxu2  ;;  %v2314_v12 = vpop.f32.mrf.mxu3  ;;  %v2159_v30 = vsel %vm710_vm3, %v2149_v4, %v2158_v33 }
 0x26f   : > { %10727 = vmatmul.msk.bf16.gmra.mxu0 %vm477_vm1, %v14950_v45  ;;  %v15082_v10 = vadd.f32 %v3841_v24, %v3283_v60  ;;  %v15085_v38 = vadd.f32 %v2314_v12, %v14617_v1  ;;  %v4972_v45 = vld [vmem:[%s17437_s6 + $0x50] sm:$0xff]  ;;  %v4977_v1 = vld [vmem:[%s17437_s6 + $0x78] sm:$0xff]  ;;  %v3666_v60 = vshrl.u32 %v15090_v53, 16 }
 0x270   : > { %5062 = vperm.xlu1 %13965, %v4972_v45   ;;  %5087 = vperm.xlu0 %13964, %v4977_v1  }
 0x273   : > { %10873 = vmatmul.msk.bf16.gmra.mxu2 %vm477_vm1, %v3664_v37  ;;  %v3668_v37 = vrot.slane %v3666_v60, 3 }
 0x274   : > { %v3194_v36 = vpop.f32.mrf.mxu1  ;;  %v2574_v7 = vpop.f32.mrf.mxu0 }
 0x275   : > { %v3284_v42 = vadd.f32 %v3194_v36, %v2662_v23  ;;  %v2663_v34 = vadd.f32 %v2574_v7, %v14931_v31  ;;  %v15105_v23 = vld [vmem:[%s14151_s10 + $0xb0] sm:$0xff]  ;;  %v3020_v36 = vshrl.u32 %v15061_v9, 16 }
 0x276   : > { %v3844_v58 = vpop.f32.mrf.mxu2  ;;  %v2316_v61 = vpop.f32.mrf.mxu3  ;;  %v3024_v31 = vshll.u32 %v15105_v23, 16 }
 0x277   : > { %10848 = vmatmul.msk.bf16.gmra.mxu1 %vm477_vm1, %v3019_v59  ;;  %v15107_v24 = vadd.f32 %v3844_v58, %v3284_v42  ;;  %v15110_v12 = vadd.f32 %v2316_v61, %v14629_v57  ;;  %v4975_v59 = vld [vmem:[%s17437_s6 + $0x68] sm:$0xff]  ;;  %v4980_v57 = vld [vmem:[%s17437_s6 + $0x90] sm:$0xff]  ;;  %v3672_v42 = vor.u32 %v3671_v32, %v3668_v37  ;;  %v3022_v33 = vor.u32 %v3020_v36, %v3018_v18  ;;  %v15132_v61 = vld [vmem:[%s14151_s10 + $0xc0] sm:$0xff]  }
 0x278   : > { %5077 = vperm.xlu1 %13965, %v4975_v59   ;;  %5102 = vperm.xlu0 %13964, %v4980_v57   ;;  %v3026_v60 = vrot.slane %v3024_v31, 1  ;;  %v3675_v36 = vshrl.u32 %v15132_v61, 16  ;;  %v3678_v31 = vshll.u32 %v15132_v61, 16 }
 0x279   : > { %v3673_v58 = vsel %vm710_vm3, %v3663_v41, %v3672_v42  ;;  %v4983_v41 = vld [vmem:[%s17437_s6 + $0xa8] sm:$0xff] }
 0x27a   : > { %v3027_v37 = vsel %vm1313_vm2, %v3022_v33, %v3026_v60 }
 0x27b   : > { %10707 = vmatmul.msk.bf16.gmra.mxu3 %vm477_vm1, %v2159_v30 }
 0x27c   : > { %v3196_v49 = vpop.f32.mrf.mxu1  ;;  %v2577_v4 = vpop.f32.mrf.mxu0 }
 0x27d   : > { %v3285_v45 = vadd.f32 %v3196_v49, %v2663_v34  ;;  %v2664_v9 = vadd.f32 %v2577_v4, %v14945_v39  ;;  %v13969_v39 = vld [vmem:[%s14151_s10 + $0x20] sm:$0xff]   ;;  %v15151_v4 = vld [vmem:[%s14151_s10 + $0xb8] sm:$0xff] }
 0x27e   : > { %v3846_v1 = vpop.f32.mrf.mxu2  ;;  %v2319_v7 = vpop.f32.mrf.mxu3  ;;  %v12293_v32 = vunpack.c.l.b16 %v13969_v39  ;;  %v3680_v39 = vrot.slane %v3678_v31, 4 }
 0x27f   : > { %10728 = vmatmul.msk.bf16.gmra.mxu0 %vm477_vm1, %v14991_v3  ;;  %v15125_v21 = vadd.f32 %v3846_v1, %v3285_v45  ;;  %v15128_v34 = vadd.f32 %v2319_v7, %v14650_v26  ;;  %v4966_v3 = vld [vmem:[%s17437_s6 + $0x20] sm:$0xff] }
 0x280   : > { %v4978_v26 = vld [vmem:[%s17437_s6 + $0x80] sm:$0xff]  ;;  %5032 = vperm.xlu2 %13966, %v4966_v3   ;;  %5117 = vperm.xlu0 %13964, %v4983_v41   ;;  %v3028_v3 = vshrl.u32 %v15105_v23, 16 }
 0x281   : > { %5092 = vperm.xlu1 %13965, %v4978_v26   ;;  %v17460_v7 = vld [vmem:[#allocation6_spill] sm:$0xff]  ;;  %v3032_v26 = vshll.u32 %v15151_v4, 16 }
 0x282   : > { %v17461_v33 = vunpack.c.l.b16 %v17460_v7  ;;  %v4986_v41 = vld [vmem:[%s17437_s6 + $0xc0] sm:$0xff] }
 0x283   : > { %10874 = vmatmul.msk.bf16.gmra.mxu2 %vm477_vm1, %v3673_v58 }
 0x284   : > { %v3199_v30 = vpop.f32.mrf.mxu1  ;;  %v2579_v49 = vpop.f32.mrf.mxu0  ;;  %v3964_v58 = vpack.c.b16 %v12293_v32, %v17461_v33  ;;  %v4981_v32 = vld [vmem:[%s17437_s6 + $0x98] sm:$0xff] }
 0x285   : > { %v3286_v18 = vadd.f32 %v3199_v30, %v2664_v9  ;;  %v2665_v45 = vadd.f32 %v2579_v49, %v14966_v15  ;;  %v11963_v30 = vld [vmem:[%s17434_s3 + $0x28] sm:$0xff]  ;;  %v3677_v15 = vrot.slane %v3675_v36, 3 }
 0x286   : > { %v3849_v59 = vpop.f32.mrf.mxu2  ;;  %v2321_v57 = vpop.f32.mrf.mxu3  ;;  %5937 = vmatpush.bf16.msra.mxu1 %v11963_v30 }
 0x287   : > { %10849 = vmatmul.msk.bf16.gmra.mxu1 %vm477_vm1, %v3027_v37  ;;  %v15153_v9 = vadd.f32 %v3849_v59, %v3286_v18  ;;  %v15156_v1 = vadd.f32 %v2321_v57, %v14659_v51  ;;  %v4967_v51 = vld [vmem:[%s17437_s6 + $0x28] sm:$0xff]  ;;  %v3681_v36 = vor.u32 %v3680_v39, %v3677_v15  ;;  %v3030_v59 = vor.u32 %v3028_v3, %v3026_v60  ;;  %v4970_v60 = vld [vmem:[%s17437_s6 + $0x40] sm:$0xff] }
 0x288   : > { %5037 = vperm.xlu2 %13966, %v4967_v51   ;;  %5132 = vperm.xlu0 %13964, %v4986_v41   ;;  %v3034_v57 = vrot.slane %v3032_v26, 1  ;;  %v3684_v39 = vshrl.u32 %v15045_v50, 16  ;;  %v15200_v51 = vld [vmem:[%s14151_s10 + $0xc0] sm:$0xff] }
 0x289   : > { %5107 = vperm.xlu1 %13965, %v4981_v32  }
 0x28a   : > { %v3035_v15 = vsel %vm1313_vm2, %v3030_v59, %v3034_v57  ;;  %v3036_v59 = vshrl.u32 %v15151_v4, 16 }
 0x28b   : > { %10880 = vmatmul.msk.bf16.vlgmr.msra.gmra.mxu3 %vm477_vm1, %v3964_v58  ;;  %v3682_v58 = vsel %vm710_vm3, %v3672_v42, %v3681_v36 }
 0x28c   : > { %v3201_v37 = vpop.f32.mrf.mxu1  ;;  %v2582_v49 = vpop.f32.mrf.mxu0 }
 0x28d   : > { %v3287_v18 = vadd.f32 %v3201_v37, %v2665_v45  ;;  %v2666_v23 = vadd.f32 %v2582_v49, %v14985_v28  ;;  %v3687_v37 = vshll.u32 %v15045_v50, 16  ;;  %v13531_v49 = vld [vmem:[%s14151_s10 + $0x24] sm:$0xff]  }
 0x28e   : > { %v3851_v31 = vpop.f32.mrf.mxu2  ;;  %v2324_v45 = vpop.f32.mrf.mxu3 }
 0x28f   : > { %10729 = vmatmul.msk.bf16.gmra.mxu0 %vm477_vm1, %v15042_v17  ;;  %v15178_v7 = vadd.f32 %v3851_v31, %v3287_v18  ;;  %v15181_v33 = vadd.f32 %v2324_v45, %v14676_v27  ;;  %v4984_v17 = vld [vmem:[%s17437_s6 + $0xb0] sm:$0xff]  ;;  %v4989_v27 = vld [vmem:[%s17437_s6 + $0xd8] sm:$0xff]  ;;  %v3689_v31 = vrot.slane %v3687_v37, 4 }
 0x290   : > { %5052 = vperm.xlu2 %13966, %v4970_v60   ;;  %5147 = vperm.xlu0 %13964, %v4989_v27  }
 0x291   : > { %5122 = vperm.xlu1 %13965, %v4984_v17  }
 0x293   : > { %10875 = vmatmul.msk.bf16.gmra.mxu2 %vm477_vm1, %v3682_v58 }
 0x294   : > { %v3204_v30 = vpop.f32.mrf.mxu1  ;;  %v2584_v42 = vpop.f32.mrf.mxu0 }
 0x295   : > { %v3288_v28 = vadd.f32 %v3204_v30, %v2666_v23  ;;  %v2667_v3 = vadd.f32 %v2584_v42, %v15010_v44  ;;  %v3686_v23 = vrot.slane %v3684_v39, 3  ;;  %v3040_v44 = vshll.u32 %v15200_v51, 16  ;;  %v4973_v30 = vld [vmem:[%s17437_s6 + $0x58] sm:$0xff] }
 0x296   : > { %v3854_v26 = vpop.f32.mrf.mxu2  ;;  %v2326_v18 = vpop.f32.mrf.mxu3  ;;  %v3038_v42 = vor.u32 %v3036_v59, %v3034_v57  ;;  %v4976_v57 = vld [vmem:[%s17437_s6 + $0x70] sm:$0xff] }
 0x297   : > { %10850 = vmatmul.msk.bf16.gmra.mxu1 %vm477_vm1, %v3035_v15  ;;  %v15202_v32 = vadd.f32 %v3854_v26, %v3288_v28  ;;  %v15205_v41 = vadd.f32 %v2326_v18, %v14684_v40  ;;  %v4987_v40 = vld [vmem:[%s17437_s6 + $0xc8] sm:$0xff]  ;;  %v4992_v15 = vld [vmem:[%s17437_s6 + $0xf0] sm:$0xff]  ;;  %v3690_v4 = vor.u32 %v3689_v31, %v3686_v23  ;;  %v3042_v39 = vrot.slane %v3040_v44, 1 }
 0x298   : > { %5067 = vperm.xlu2 %13966, %v4973_v30   ;;  %5162 = vperm.xlu0 %13964, %v4992_v15   ;;  %v12872_v18 = vld [vmem:[%s14151_s10 + $0xd0] sm:$0xff]   ;;  %v15244_v30 = vld [vmem:[%s14151_s10 + $0xc8] sm:$0xff] }
 0x299   : > { %5137 = vperm.xlu1 %13965, %v4987_v40   ;;  %v3691_v26 = vsel %vm710_vm3, %v3681_v36, %v3690_v4  ;;  %v3043_v23 = vsel %vm1313_vm2, %v3038_v42, %v3042_v39  ;;  %v3693_v31 = vshrl.u32 %v12872_v18, 16 }
 0x29b   : > { %10881 = vmatmul.msk.bf16.gmra.mxu3 %vm477_vm1, %v13531_v49 }
 0x29c   : > { %v3206_v45 = vpop.f32.mrf.mxu1  ;;  %v2587_v28 = vpop.f32.mrf.mxu0 }
 0x29d   : > { %v3289_v58 = vadd.f32 %v3206_v45, %v2667_v3  ;;  %v2668_v60 = vadd.f32 %v2587_v28, %v15036_v14  ;;  %v3696_v45 = vshll.u32 %v12872_v18, 16  ;;  %v13533_v28 = vld [vmem:[%s14151_s10 + $0x2c] sm:$0xff]  }
 0x29e   : > { %v3856_v17 = vpop.f32.mrf.mxu2  ;;  %v2329_v27 = vpop.f32.mrf.mxu3 }
 0x29f   : > { %10730 = vmatmul.msk.bf16.gmra.mxu0 %vm477_vm1, %v15090_v53  ;;  %v15223_v37 = vadd.f32 %v3856_v17, %v3289_v58  ;;  %v15226_v3 = vadd.f32 %v2329_v27, %v14701_v16  ;;  %v4990_v16 = vld [vmem:[%s17437_s6 + $0xe0] sm:$0xff]  ;;  %v4995_v53 = vld [vmem:[%s17437_s6 + $0x108] sm:$0xff]  ;;  %v3698_v17 = vrot.slane %v3696_v45, 4  ;;  %v3360_v27 = vld [vmem:[%s14151_s10 + $0xd8] sm:$0xf] }
 0x2a0   : > { %5082 = vperm.xlu2 %13966, %v4976_v57   ;;  %5177 = vperm.xlu0 %13964, %v4995_v53   ;;  %v15267_v57 = vunpack.c.l.b16 %v3360_v27 }
 0x2a1   : > { %5152 = vperm.xlu1 %13965, %v4990_v16  }
 0x2a3   : > { %10876 = vmatmul.msk.bf16.gmra.mxu2 %vm477_vm1, %v3691_v26  ;;  %v3044_v26 = vshrl.u32 %v15200_v51, 16 }
 0x2a4   : > { %v3209_v49 = vpop.f32.mrf.mxu1  ;;  %v2589_v36 = vpop.f32.mrf.mxu0 }
 0x2a5   : > { %v3290_v14 = vadd.f32 %v3209_v49, %v2668_v60  ;;  %v2669_v59 = vadd.f32 %v2589_v36, %v15066_v8  ;;  %v3695_v60 = vrot.slane %v3693_v31, 3  ;;  %v3048_v8 = vshll.u32 %v15244_v30, 16  ;;  %v4979_v49 = vld [vmem:[%s17437_s6 + $0x88] sm:$0xff] }
 0x2a6   : > { %v3859_v44 = vpop.f32.mrf.mxu2  ;;  %v2331_v58 = vpop.f32.mrf.mxu3  ;;  %v3046_v31 = vor.u32 %v3044_v26, %v3042_v39 }
 0x2a7   : > { %10851 = vmatmul.msk.bf16.gmra.mxu1 %vm477_vm1, %v3043_v23  ;;  %v15246_v40 = vadd.f32 %v3859_v44, %v3290_v14  ;;  %v15249_v15 = vadd.f32 %v2331_v58, %v14709_v56  ;;  %v4993_v56 = vld [vmem:[%s17437_s6 + $0xf8] sm:$0xff]  ;;  %v4998_v23 = vld [vmem:[%s17437_s6 + $0x120] sm:$0xff]  ;;  %v15265_v51 = vor.u32 %v3698_v17, %v3695_v60  ;;  %v3050_v45 = vrot.slane %v3048_v8, 1  ;;  %v2738_v58 = vld [vmem:[%s14151_s10 + $0xd0] sm:$0x1] }
 0x2a8   : > { %5097 = vperm.xlu2 %13966, %v4979_v49   ;;  %5192 = vperm.xlu0 %13964, %v4998_v23   ;;  %v2838_v39 = vunpack.c.l.b16 %v2738_v58 }
 0x2a9   : > { %5167 = vperm.xlu1 %13965, %v4993_v56   ;;  %v3051_v17 = vsel %vm1313_vm2, %v3046_v31, %v3050_v45 }
 0x2aa   : > { %v2863_v23 = vpack.c.b16 %v2838_v39, %v2838_v39  ;;  %v5004_v39 = vld [vmem:[%s17437_s6 + $0x150] sm:$0xff] }
 0x2ab   : > { %10882 = vmatmul.msk.bf16.gmra.mxu3 %vm477_vm1, %v13533_v28  ;;  %v3700_v28 = vsel %vm710_vm3, %v3690_v4, %v15265_v51  ;;  %v5001_v4 = vld [vmem:[%s17437_s6 + $0x138] sm:$0xff] }
 0x2ac   : > { %v3211_v42 = vpop.f32.mrf.mxu1  ;;  %v2592_v14 = vpop.f32.mrf.mxu0 }
 0x2ad   : > { %v3291_v18 = vadd.f32 %v3211_v42, %v2669_v59  ;;  %v2670_v16 = vadd.f32 %v2592_v14, %v15085_v38  ;;  %v3485_v38 = vpack.c.b16 %v15267_v57, %v15267_v57 }
 0x2ae   : > { %v3861_v53 = vpop.f32.mrf.mxu2  ;;  %v2334_v36 = vpop.f32.mrf.mxu3 }
 0x2af   : > { %10731 = vmatmul.msk.bf16.gmra.mxu0 %vm477_vm1, %v15132_v61  ;;  %v15272_v59 = vadd.f32 %v3861_v53, %v3291_v18  ;;  %v15275_v44 = vadd.f32 %v2334_v36, %v14726_v5  ;;  %v4982_v61 = vld [vmem:[%s17437_s6 + $0xa0] sm:$0xff]  ;;  %v4996_v5 = vld [vmem:[%s17437_s6 + $0x110] sm:$0xff]  ;;  %v3702_v26 = vshrl.u32 %v3485_v38, 16  ;;  %v3705_v8 = vshll.u32 %v3485_v38, 16 }
 0x2b0   : > { %5112 = vperm.xlu2 %13966, %v4982_v61   ;;  %5207 = vperm.xlu0 %13964, %v5001_v4   ;;  %v13535_v53 = vld [vmem:[%s14151_s10 + $0x34] sm:$0xff]   ;;  %v11962_v36 = vld [vmem:[%s17434_s3 + $0x20] sm:$0xff]  ;;  %v3056_v38 = vshll.u32 %v2863_v23, 16 }
 0x2b1   : > { %5182 = vperm.xlu1 %13965, %v4996_v5   ;;  %v3704_v31 = vrot.slane %v3702_v26, 3  ;;  %v3707_v58 = vrot.slane %v3705_v8, 4  ;;  %5938 = vmatpush.bf16.msra.mxu1 %v11962_v36 }
 0x2b2   : > { %v3058_v8 = vrot.slane %v3056_v38, 1 }
 0x2b3   : > { %10877 = vmatmul.msk.bf16.gmra.mxu2 %vm477_vm1, %v3700_v28  ;;  %v3052_v28 = vshrl.u32 %v15244_v30, 16  ;;  %v3708_v61 = vor.u32 %v3707_v58, %v3704_v31  ;;  %v11910_v30 = vld [vmem:[%s14151_s10 + $0x1c] sm:$0xff] }
 0x2b4   : > { %v3214_v60 = vpop.f32.mrf.mxu1  ;;  %v2594_v42 = vpop.f32.mrf.mxu0  ;;  %v4417_v36 = vshll.u32 %v11910_v30, 16 }
 0x2b5   : > { %v3292_v27 = vadd.f32 %v3214_v60, %v2670_v16  ;;  %v2671_v18 = vadd.f32 %v2594_v42, %v15110_v12  ;;  %v3054_v26 = vor.u32 %v3052_v28, %v3050_v45  ;;  %v3709_v23 = vsel %vm710_vm3, %v15265_v51, %v3708_v61  ;;  %v5002_v45 = vld [vmem:[%s17437_s6 + $0x140] sm:$0xff]  ;;  %v5007_v51 = vld [vmem:[%s17437_s6 + $0x168] sm:$0xff]  ;;  %v17464_v61 = vld [vmem:[#allocation9_spill] sm:$0xff] }
 0x2b6   : > { %v3864_v49 = vpop.f32.mrf.mxu2  ;;  %v2336_v56 = vpop.f32.mrf.mxu3  ;;  %v4415_v28 = vshrl.u32 %v11910_v30, 16  ;;  %v4419_v38 = vrot.slane %v4417_v36, 1 }
 0x2b7   : > { %10852 = vmatmul.msk.bf16.gmra.mxu1 %vm477_vm1, %v3051_v17  ;;  %v15295_v14 = vadd.f32 %v3864_v49, %v3292_v27  ;;  %v15298_v16 = vadd.f32 %v2336_v56, %v14735_v48  ;;  %v4985_v48 = vld [vmem:[%s17437_s6 + $0xb8] sm:$0xff]  ;;  %v4999_v17 = vld [vmem:[%s17437_s6 + $0x128] sm:$0xff]  ;;  %v17463_v49 = vld [vmem:[#allocation8_spill] sm:$0xff] }
 0x2b8   : > { %5127 = vperm.xlu2 %13966, %v4985_v48   ;;  %5222 = vperm.xlu0 %13964, %v5004_v39  }
 0x2b9   : > { %5197 = vperm.xlu1 %13965, %v4999_v17  }
 0x2bb   : > { %10883 = vmatmul.msk.bf16.gmra.mxu3 %vm477_vm1, %v13535_v53  ;;  %v11911_v53 = vld [vmem:[%s14151_s10 + $0x24] sm:$0xff] }
 0x2bc   : > { %v3216_v12 = vpop.f32.mrf.mxu1  ;;  %v2597_v27 = vpop.f32.mrf.mxu0 }
 0x2bd   : > { %v3293_v60 = vadd.f32 %v3216_v12, %v2671_v18  ;;  %v2672_v5 = vadd.f32 %v2597_v27, %v15128_v34  ;;  %v3059_v34 = vsel %vm1313_vm2, %v3054_v26, %v3058_v8 }
 0x2be   : > { %v3866_v4 = vpop.f32.mrf.mxu2  ;;  %v2339_v42 = vpop.f32.mrf.mxu3 }
 0x2bf   : > { %10732 = vmatmul.msk.bf16.gmra.mxu0 %vm477_vm1, %v15045_v50  ;;  %v15319_v18 = vadd.f32 %v3866_v4, %v3293_v60  ;;  %v15322_v56 = vadd.f32 %v2339_v42, %v17463_v49  ;;  %v4988_v50 = vld [vmem:[%s17437_s6 + $0xd0] sm:$0xff]  ;;  %v4422_v60 = vshll.u32 %v11911_v53, 16  ;;  %v13537_v4 = vld [vmem:[%s14151_s10 + $0x3c] sm:$0xff]   ;;  %v4420_v42 = vor.u32 %v4419_v38, %v4415_v28 }
 0x2c0   : > { %5142 = vperm.xlu2 %13966, %v4988_v50   ;;  %5237 = vperm.xlu0 %13964, %v5007_v51   ;;  %v5005_v49 = vld [vmem:[%s17437_s6 + $0x158] sm:$0xff]  ;;  %v11912_v28 = vld [vmem:[%s14151_s10 + $0x2c] sm:$0xff] }
 0x2c1   : > { %17462 = vst [vmem:[#allocation7_spill] sm:$0xff] %v15319_v18  ;;  %5212 = vperm.xlu1 %13965, %v5002_v45   ;;  %v4424_v26 = vrot.slane %v4422_v60, 1  ;;  %v17466_v45 = vld [vmem:[#allocation10_spill] sm:$0xff] }
 0x2c3   : > { %10878 = vmatmul.msk.bf16.gmra.mxu2 %vm477_vm1, %v3709_v23  ;;  %v4425_v36 = vsel %vm1313_vm2, %v4420_v42, %v4424_v26 }
 0x2c4   : > { %v3219_v31 = vpop.f32.mrf.mxu1  ;;  %v2599_v12 = vpop.f32.mrf.mxu0 }
 0x2c5   : > { %v3294_v58 = vadd.f32 %v3219_v31, %v2672_v5  ;;  %v2673_v48 = vadd.f32 %v2599_v12, %v15156_v1  ;;  %v4991_v1 = vld [vmem:[%s17437_s6 + $0xe8] sm:$0xff]  ;;  %v11934_v12 = vld [vmem:[%s14151_s10 + $0x10] sm:$0xff] }
 0x2c6   : > { %v3869_v17 = vpop.f32.mrf.mxu2  ;;  %v2341_v39 = vpop.f32.mrf.mxu3 }
 0x2c7   : > { %10853 = vmatmul.msk.bf16.gmra.mxu1 %vm477_vm1, %v3059_v34  ;;  %v15340_v27 = vadd.f32 %v3869_v17, %v3294_v58  ;;  %v15343_v5 = vadd.f32 %v2341_v39, %v17464_v61  ;;  %v4426_v39 = vshrl.u32 %v11911_v53, 16  ;;  %v4430_v61 = vshll.u32 %v11912_v28, 16 }
 0x2c8   : > { %5157 = vperm.xlu2 %13966, %v4991_v1   ;;  %v17467_v1 = vld [vmem:[#allocation11_spill] sm:$0xff] }
 0x2c9   : > { %5227 = vperm.xlu1 %13965, %v5005_v49  }
 0x2cb   : > { %10884 = vmatmul.msk.bf16.gmra.mxu3 %vm477_vm1, %v13537_v4 }
 0x2cc   : > { %v3221_v30 = vpop.f32.mrf.mxu1  ;;  %v2602_v23 = vpop.f32.mrf.mxu0 }
 0x2cd   : > { %v3295_v8 = vadd.f32 %v3221_v30, %v2673_v48  ;;  %v2674_v31 = vadd.f32 %v2602_v23, %v15181_v33  ;;  %v4994_v33 = vld [vmem:[%s17437_s6 + $0x100] sm:$0xff]  ;;  %v5008_v48 = vld [vmem:[%s17437_s6 + $0x170] sm:$0xff] }
 0x2ce   : > { %v3871_v34 = vpop.f32.mrf.mxu2  ;;  %v2344_v58 = vpop.f32.mrf.mxu3  ;;  %v13539_v23 = vld [vmem:[%s14151_s10 + $0x44] sm:$0xff]  }
 0x2cf   : > { %v15355_v50 = vadd.f32 %v3871_v34, %v3295_v8  ;;  %11001 = vmatmul.msk.bf16.vlgmr.msra.gmra.mxu0 %vm477_vm1, %v4425_v36  ;;  %v15359_v51 = vadd.f32 %v2344_v58, %v17466_v45  ;;  %v4428_v36 = vor.u32 %v4426_v39, %v4424_v26  ;;  %v17469_v26 = vld [vmem:[#allocation12_spill] sm:$0xff] }
 0x2d0   : > { %5172 = vperm.xlu2 %13966, %v4994_v33   ;;  %v11913_v39 = vld [vmem:[%s14151_s10 + $0x34] sm:$0xff] }
 0x2d1   : > { %17465 = vst [vmem:[#allocation6_spill] sm:$0xff] %v15355_v50  ;;  %5242 = vperm.xlu1 %13965, %v5008_v48  }
 0x2d3   : > { %11153 = vmatmul.msk.bf16.vlgmr.msra.gmra.mxu2 %vm477_vm1, %v11934_v12 }
 0x2d4   : > { %v3224_v38 = vpop.f32.mrf.mxu1  ;;  %v2604_v17 = vpop.f32.mrf.mxu0 }
 0x2d5   : > { %v3296_v60 = vadd.f32 %v3224_v38, %v2674_v31  ;;  %v2675_v4 = vadd.f32 %v2604_v17, %v15205_v41  ;;  %v4432_v31 = vrot.slane %v4430_v61, 1  ;;  %v4997_v41 = vld [vmem:[%s17437_s6 + $0x118] sm:$0xff] }
 0x2d6   : > { %v3874_v42 = vpop.f32.mrf.mxu2  ;;  %v2346_v30 = vpop.f32.mrf.mxu3  ;;  %v11935_v17 = vld [vmem:[%s14151_s10 + $0x18] sm:$0xff] }
 0x2d7   : > { %v15371_v8 = vadd.f32 %v3874_v42, %v3296_v60  ;;  %v15374_v49 = vadd.f32 %v2346_v30, %v17467_v1  ;;  %v4433_v45 = vsel %vm1313_vm2, %v4428_v36, %v4432_v31  ;;  %v4434_v30 = vshrl.u32 %v11912_v28, 16 }
 0x2d8   : > { %5187 = vperm.xlu2 %13966, %v4997_v41   ;;  %v4438_v1 = vshll.u32 %v11913_v39, 16  ;;  %v17470_v41 = vld [vmem:[#allocation13_spill] sm:$0xff] }
 0x2db   : > { %10885 = vmatmul.msk.bf16.gmra.mxu3 %vm477_vm1, %v13539_v23 }
 0x2dc   : > { %v3226_v34 = vpop.f32.mrf.mxu1  ;;  %v2607_v53 = vpop.f32.mrf.mxu0 }
 0x2dd   : > { %v3297_v58 = vadd.f32 %v3226_v34, %v2675_v4  ;;  %v2676_v12 = vadd.f32 %v2607_v53, %v15226_v3  ;;  %v5000_v3 = vld [vmem:[%s17437_s6 + $0x130] sm:$0xff] }
 0x2de   : > { %v3876_v38 = vpop.f32.mrf.mxu2  ;;  %v2349_v60 = vpop.f32.mrf.mxu3 }
 0x2df   : > { %v15383_v33 = vadd.f32 %v3876_v38, %v3297_v58  ;;  %11002 = vmatmul.msk.bf16.gmra.mxu0 %vm477_vm1, %v4433_v45  ;;  %v15387_v48 = vadd.f32 %v2349_v60, %v17469_v26  ;;  %v13541_v45 = vld [vmem:[%s14151_s10 + $0x4c] sm:$0xff]   ;;  %v4436_v38 = vor.u32 %v4434_v30, %v4432_v31  ;;  %v4440_v60 = vrot.slane %v4438_v1, 1  ;;  %v17472_v30 = vld [vmem:[#allocation14_spill] sm:$0xff] }
 0x2e0   : > { %5202 = vperm.xlu2 %13966, %v5000_v3  }
 0x2e1   : > { %17468 = vst [vmem:[#allocation8_spill] sm:$0xff] %v15383_v33 }
 0x2e3   : > { %11154 = vmatmul.msk.bf16.gmra.mxu2 %vm477_vm1, %v11935_v17 }
 0x2e4   : > { %v3229_v61 = vpop.f32.mrf.mxu1  ;;  %v2609_v42 = vpop.f32.mrf.mxu0 }
 0x2e5   : > { %v3298_v4 = vadd.f32 %v3229_v61, %v2676_v12  ;;  %v2677_v23 = vadd.f32 %v2609_v42, %v15249_v15  ;;  %v11961_v12 = vld [vmem:[%s17434_s3 + $0x18] sm:$0xff]  ;;  %v5003_v15 = vld [vmem:[%s17437_s6 + $0x148] sm:$0xff]  ;;  %v4441_v61 = vsel %vm1313_vm2, %v4436_v38, %v4440_v60 }
 0x2e6   : > { %v3879_v36 = vpop.f32.mrf.mxu2  ;;  %v2351_v34 = vpop.f32.mrf.mxu3  ;;  %5939 = vmatpush.bf16.msra.mxu1 %v11961_v12  ;;  %v4442_v12 = vshrl.u32 %v11913_v39, 16 }
 0x2e7   : > { %v15396_v58 = vadd.f32 %v3879_v36, %v3298_v4  ;;  %v15399_v53 = vadd.f32 %v2351_v34, %v17470_v41  ;;  %v11914_v36 = vld [vmem:[%s14151_s10 + $0x3c] sm:$0xff] }
 0x2e8   : > { %5217 = vperm.xlu2 %13966, %v5003_v15   ;;  %v4446_v38 = vshll.u32 %v11914_v36, 16 }
 0x2eb   : > { %10886 = vmatmul.msk.bf16.gmra.mxu3 %vm477_vm1, %v13541_v45 }
 0x2ec   : > { %v3231_v28 = vpop.f32.mrf.mxu1  ;;  %v2612_v17 = vpop.f32.mrf.mxu0 }
 0x2ed   : > { %v3299_v26 = vadd.f32 %v3231_v28, %v2677_v23  ;;  %v2678_v4 = vadd.f32 %v2612_v17, %v15275_v44  ;;  %v11936_v23 = vld [vmem:[%s14151_s10 + $0x20] sm:$0xff] }
 0x2ee   : > { %v3881_v3 = vpop.f32.mrf.mxu2  ;;  %v2354_v31 = vpop.f32.mrf.mxu3  ;;  %v5006_v44 = vld [vmem:[%s17437_s6 + $0x160] sm:$0xff] }
 0x2ef   : > { %v15411_v42 = vadd.f32 %v3881_v3, %v3299_v26  ;;  %11003 = vmatmul.msk.bf16.gmra.mxu0 %vm477_vm1, %v4441_v61  ;;  %v15415_v1 = vadd.f32 %v2354_v31, %v17472_v30  ;;  %v17473_v61 = vld [vmem:[#allocation15_spill] sm:$0xff]  ;;  %v4444_v31 = vor.u32 %v4442_v12, %v4440_v60  ;;  %v4448_v30 = vrot.slane %v4446_v38, 1  ;;  %v17475_v60 = vld [vmem:[#allocation16_spill] sm:$0xff] }
 0x2f0   : > { %5232 = vperm.xlu2 %13966, %v5006_v44   ;;  %v11937_v38 = vld [vmem:[%s14151_s10 + $0x28] sm:$0xff] }
 0x2f1   : > { %17471 = vst [vmem:[#allocation9_spill] sm:$0xff] %v15411_v42 }
 0x2f3   : > { %11155 = vmatmul.msk.bf16.gmra.mxu2 %vm477_vm1, %v11936_v23 }
 0x2f4   : > { %v3234_v34 = vpop.f32.mrf.mxu1  ;;  %v2614_v45 = vpop.f32.mrf.mxu0 }
 0x2f5   : > { %v3300_v41 = vadd.f32 %v3234_v34, %v2678_v4  ;;  %v2679_v28 = vadd.f32 %v2614_v45, %v15298_v16  ;;  %v13543_v4 = vld [vmem:[%s14151_s10 + $0x54] sm:$0xff]  }
 0x2f6   : > { %v3884_v26 = vpop.f32.mrf.mxu2  ;;  %v2356_v15 = vpop.f32.mrf.mxu3  ;;  %v5009_v16 = vld [vmem:[%s17437_s6 + $0x178] sm:$0xff] }
 0x2f7   : > { %v15424_v17 = vadd.f32 %v3884_v26, %v3300_v41  ;;  %v15427_v3 = vadd.f32 %v2356_v15, %v17473_v61  ;;  %v4449_v41 = vsel %vm1313_vm2, %v4444_v31, %v4448_v30 }
 0x2f8   : > { %5247 = vperm.xlu2 %13966, %v5009_v16  }
 0x2fb   : > { %10887 = vmatmul.msk.bf16.gmra.mxu3 %vm477_vm1, %v13543_v4 }
 0x2fc   : > { %v3236_v23 = vpop.f32.mrf.mxu1  ;;  %v2617_v39 = vpop.f32.mrf.mxu0 }
 0x2fd   : > { %v3301_v34 = vadd.f32 %v3236_v23, %v2679_v28  ;;  %v2680_v44 = vadd.f32 %v2617_v39, %v15322_v56  ;;  %v11915_v28 = vld [vmem:[%s14151_s10 + $0x44] sm:$0xff]  ;;  %v4450_v23 = vshrl.u32 %v11914_v36, 16 }
 0x2fe   : > { %v3886_v45 = vpop.f32.mrf.mxu2  ;;  %v2359_v26 = vpop.f32.mrf.mxu3  ;;  %v4454_v16 = vshll.u32 %v11915_v28, 16 }
 0x2ff   : > { %v15436_v15 = vadd.f32 %v3886_v45, %v3301_v34  ;;  %11004 = vmatmul.msk.bf16.gmra.mxu0 %vm477_vm1, %v4449_v41  ;;  %v15440_v12 = vadd.f32 %v2359_v26, %v17475_v60  ;;  %v13545_v26 = vld [vmem:[%s14151_s10 + $0x5c] sm:$0xff]   ;;  %v4452_v60 = vor.u32 %v4450_v23, %v4448_v30  ;;  %v11938_v30 = vld [vmem:[%s14151_s10 + $0x30] sm:$0xff] }
 0x300   : > { %v4456_v42 = vrot.slane %v4454_v16, 1  ;;  %v11916_v23 = vld [vmem:[%s14151_s10 + $0x4c] sm:$0xff] }
 0x301   : > { %17474 = vst [vmem:[#allocation10_spill] sm:$0xff] %v15436_v15  ;;  %v17477_v15 = vld [vmem:[#allocation17_spill] sm:$0xff] }
 0x303   : > { %11156 = vmatmul.msk.bf16.gmra.mxu2 %vm477_vm1, %v11937_v38  ;;  %v4457_v38 = vsel %vm1313_vm2, %v4452_v60, %v4456_v42  ;;  %v4462_v60 = vshll.u32 %v11916_v23, 16 }
 0x304   : > { %v3239_v61 = vpop.f32.mrf.mxu1  ;;  %v2619_v31 = vpop.f32.mrf.mxu0 }
 0x305   : > { %v3302_v4 = vadd.f32 %v3239_v61, %v2680_v44  ;;  %v2681_v56 = vadd.f32 %v2619_v31, %v15343_v5 }
 0x306   : > { %v3889_v39 = vpop.f32.mrf.mxu2  ;;  %v2361_v34 = vpop.f32.mrf.mxu3 }
 0x307   : > { %v15446_v45 = vadd.f32 %v3889_v39, %v3302_v4  ;;  %v15449_v41 = vadd.f32 %v2361_v34, %v17477_v15 }
 0x309   : > { %17476 = vst [vmem:[#allocation11_spill] sm:$0xff] %v15446_v45 }
 0x30b   : > { %10888 = vmatmul.msk.bf16.gmra.mxu3 %vm477_vm1, %v13545_v26  ;;  %v4458_v26 = vshrl.u32 %v11915_v28, 16 }
 0x30c   : > { %v3241_v44 = vpop.f32.mrf.mxu1  ;;  %v2622_v36 = vpop.f32.mrf.mxu0 }
 0x30d   : > { %v3303_v61 = vadd.f32 %v3241_v44, %v2681_v56  ;;  %v2682_v5 = vadd.f32 %v2622_v36, %v15359_v51 }
 0x30e   : > { %v3891_v31 = vpop.f32.mrf.mxu2  ;;  %v4072_v4 = vpop.f32.mrf.mxu3 }
 0x30f   : > { %v15455_v39 = vadd.f32 %v3891_v31, %v3303_v61  ;;  %11005 = vmatmul.msk.bf16.gmra.mxu0 %vm477_vm1, %v4457_v38  ;;  %v15459_v15 = vadd.f32 %v4072_v4, %v14753_v6  ;;  %v13547_v38 = vld [vmem:[%s14151_s10 + $0x64] sm:$0xff]   ;;  %v11960_v6 = vld [vmem:[%s17434_s3 + $0x10] sm:$0xff]  ;;  %v4464_v31 = vrot.slane %v4462_v60, 1 }
 0x310   : > { %5940 = vmatpush.bf16.msra.mxu1 %v11960_v6  ;;  %v11917_v60 = vld [vmem:[%s14151_s10 + $0x54] sm:$0xff] }
 0x311   : > { %17478 = vst [vmem:[#allocation12_spill] sm:$0xff] %v15455_v39 }
 0x313   : > { %11157 = vmatmul.msk.bf16.gmra.mxu2 %vm477_vm1, %v11938_v30 }
 0x314   : > { %v3244_v16 = vpop.f32.mrf.mxu1  ;;  %v2624_v34 = vpop.f32.mrf.mxu0 }
 0x315   : > { %v3304_v56 = vadd.f32 %v3244_v16, %v2682_v5  ;;  %v2683_v51 = vadd.f32 %v2624_v34, %v15374_v49  ;;  %v4460_v5 = vor.u32 %v4458_v26, %v4456_v42  ;;  %v11939_v26 = vld [vmem:[%s14151_s10 + $0x38] sm:$0xff] }
 0x316   : > { %v3894_v44 = vpop.f32.mrf.mxu2  ;;  %v15465_v36 = vpop.f32.mrf.mxu3 }
 0x317   : > { %v15467_v61 = vadd.f32 %v3894_v44, %v3304_v56  ;;  %v4465_v30 = vsel %vm1313_vm2, %v4460_v5, %v4464_v31  ;;  %v4466_v5 = vshrl.u32 %v11916_v23, 16 }
 0x319   : > { %17479 = vst [vmem:[#allocation13_spill] sm:$0xff] %v15467_v61  ;;  %v11958_v61 = vld [vmem:[%s17434_s3] sm:$0xff] }
 0x31b   : > { %10889 = vmatmul.msk.bf16.gmra.mxu3 %vm477_vm1, %v13547_v38 }
 0x31c   : > { %v3246_v4 = vpop.f32.mrf.mxu1  ;;  %v2627_v49 = vpop.f32.mrf.mxu0 }
 0x31d   : > { %v3305_v28 = vadd.f32 %v3246_v4, %v2683_v51  ;;  %v2684_v16 = vadd.f32 %v2627_v49, %v15387_v48  ;;  %v4470_v4 = vshll.u32 %v11917_v60, 16 }
 0x31e   : > { %v3896_v56 = vpop.f32.mrf.mxu2  ;;  %v4077_v34 = vpop.f32.mrf.mxu3 }
 0x31f   : > { %v15476_v44 = vadd.f32 %v3896_v56, %v3305_v28  ;;  %11006 = vmatmul.msk.bf16.gmra.mxu0 %vm477_vm1, %v4465_v30  ;;  %v15480_v42 = vadd.f32 %v4077_v34, %v14780_v13  ;;  %v13549_v30 = vld [vmem:[%s14151_s10 + $0x6c] sm:$0xff]   ;;  %v4468_v56 = vor.u32 %v4466_v5, %v4464_v31  ;;  %v4472_v13 = vrot.slane %v4470_v4, 1 }
 0x320   : > { %v11959_v31 = vld [vmem:[%s17434_s3 + $0x8] sm:$0xff] }
 0x321   : > { %17480 = vst [vmem:[#allocation14_spill] sm:$0xff] %v15476_v44  ;;  %v5451_v44 = vld [vmem:[#allocation2] sm:$0x8]  ;;  %v13007_v4 = vld [vmem:[#allocation2 + $0x8] sm:$0xff]   ;;  %5941 = vmatpush.bf16.msra.mxu1 %v11959_v31 }
 0x322   : > { %v5565_v23 = vunpack.c.l.b16 %v5451_v44 }
 0x323   : > { %11158 = vmatmul.msk.bf16.gmra.mxu2 %vm477_vm1, %v11939_v26 }
 0x324   : > { %v3249_v51 = vpop.f32.mrf.mxu1  ;;  %v2629_v38 = vpop.f32.mrf.mxu0 }
 0x325   : > { %v3306_v6 = vadd.f32 %v3249_v51, %v2684_v16  ;;  %v2685_v48 = vadd.f32 %v2629_v38, %v15399_v53  ;;  %v15492_v16 = vld [vmem:[#allocation2 + $0x4] sm:$0xf]  ;;  %v4473_v53 = vsel %vm1313_vm2, %v4468_v56, %v4472_v13  ;;  %v5651_v56 = vshll.u32 %v13007_v4, 16  ;;  %5942 = vmatpush.bf16.msra.mxu1 %v11958_v61 }
 0x326   : > { %v3899_v49 = vpop.f32.mrf.mxu2  ;;  %v15486_v39 = vpop.f32.mrf.mxu3  ;;  %v17442_v51 = vunpack.c.l.b16 %v15492_v16 }
 0x327   : > { %v15488_v28 = vadd.f32 %v3899_v49, %v3306_v6 }
 0x329   : > { %17481 = vst [vmem:[#allocation15_spill] sm:$0xff] %v15488_v28 }
 0x32b   : > { %10890 = vmatmul.msk.bf16.gmra.mxu3 %vm477_vm1, %v13549_v30  ;;  %v11940_v30 = vld [vmem:[%s14151_s10 + $0x40] sm:$0xff] }
 0x32c   : > { %v3251_v34 = vpop.f32.mrf.mxu1  ;;  %v2632_v26 = vpop.f32.mrf.mxu0 }
 0x32d   : > { %v3307_v33 = vadd.f32 %v3251_v34, %v2685_v48  ;;  %v2686_v6 = vadd.f32 %v2632_v26, %v15415_v1  ;;  %v5614_v48 = vpack.c.b16 %v17442_v51, %v5565_v23  ;;  %v5648_v1 = vshrl.u32 %v13007_v4, 16  ;;  %v11918_v34 = vld [vmem:[%s14151_s10 + $0x5c] sm:$0xff] }
 0x32e   : > { %v3901_v38 = vpop.f32.mrf.mxu2  ;;  %v4082_v5 = vpop.f32.mrf.mxu3  ;;  %v5653_v23 = vrot.slane %v5651_v56, 4  ;;  %v4478_v4 = vshll.u32 %v11918_v34, 16 }
 0x32f   : > { %v15502_v49 = vadd.f32 %v3901_v38, %v3307_v33  ;;  %11007 = vmatmul.msk.bf16.gmra.mxu0 %vm477_vm1, %v4473_v53  ;;  %v15506_v44 = vadd.f32 %v4082_v5, %v14807_v0  ;;  %v5640_v26 = vshrl.u32 %v5614_v48, 16  ;;  %v5643_v28 = vshll.u32 %v5614_v48, 16 }
 0x330   : > { %v5650_v50 = vrot.slane %v5648_v1, 3  ;;  %v4474_v5 = vshrl.u32 %v11917_v60, 16  ;;  %v4480_v61 = vrot.slane %v4478_v4, 1 }
 0x331   : > { %17482 = vst [vmem:[#allocation16_spill] sm:$0xff] %v15502_v49  ;;  %v5642_v38 = vrot.slane %v5640_v26, 3  ;;  %v5645_v53 = vrot.slane %v5643_v28, 4  ;;  %v13551_v28 = vld [vmem:[%s14151_s10 + $0x74] sm:$0xff]  }
 0x332   : > { %v15514_v0 = vor.u32 %v5653_v23, %v5650_v50  ;;  %v4476_v50 = vor.u32 %v4474_v5, %v4472_v13  ;;  %v11941_v13 = vld [vmem:[%s14151_s10 + $0x48] sm:$0xff]  ;;  %v4482_v5 = vshrl.u32 %v11918_v34, 16 }
 0x333   : > { %11159 = vmatmul.msk.bf16.gmra.mxu2 %vm477_vm1, %v11940_v30  ;;  %v5646_v48 = vor.u32 %v5645_v53, %v5642_v38  ;;  %v11919_v38 = vld [vmem:[%s14151_s10 + $0x64] sm:$0xff] }
 0x334   : > { %v3254_v33 = vpop.f32.mrf.mxu1  ;;  %v2634_v31 = vpop.f32.mrf.mxu0  ;;  %v4486_v4 = vshll.u32 %v11919_v38, 16 }
 0x335   : > { %v3308_v51 = vadd.f32 %v3254_v33, %v2686_v6  ;;  %v2687_v49 = vadd.f32 %v2634_v31, %v15427_v3  ;;  %v5655_v1 = vsel %vm710_vm3, %v5646_v48, %v15514_v0  ;;  %v4481_v3 = vsel %vm1313_vm2, %v4476_v50, %v4480_v61  ;;  %v13553_v50 = vld [vmem:[%s14151_s10 + $0x7c] sm:$0xff]  }
 0x336   : > { %v3904_v45 = vpop.f32.mrf.mxu2  ;;  %v15517_v18 = vpop.f32.mrf.mxu3  ;;  %5943 = vmatmul.bf16.vlgmr.msra.gmra.mxu1 %v5655_v1 }
 0x337   : > { %v15521_v56 = vadd.f32 %v3904_v45, %v3308_v51 }
 0x33b   : > { %10891 = vmatmul.msk.bf16.gmra.mxu3 %vm477_vm1, %v13551_v28 }
 0x33c   : > { %v3256_v6 = vpop.f32.mrf.mxu1  ;;  %v2637_v30 = vpop.f32.mrf.mxu0 }
 0x33d   : > { %v3309_v60 = vadd.f32 %v3256_v6, %v2687_v49  ;;  %v2688_v26 = vadd.f32 %v2637_v30, %v15440_v12  ;;  %v4488_v6 = vrot.slane %v4486_v4, 1 }
 0x33e   : > { %v3906_v23 = vpop.f32.mrf.mxu2  ;;  %v4087_v33 = vpop.f32.mrf.mxu3 }
 0x33f   : > { %v15527_v45 = vadd.f32 %v3906_v23, %v3309_v60  ;;  %11008 = vmatmul.msk.bf16.gmra.mxu0 %vm477_vm1, %v4481_v3  ;;  %v15531_v51 = vadd.f32 %v4087_v33, %v14834_v2  ;;  %v4484_v2 = vor.u32 %v4482_v5, %v4480_v61  ;;  %v15548_v33 = vld [vmem:[%s17433_s2] ss:$0 sm:$0xff]  ;;  %v4193_v5 = vadd.f32 %v15465_v36, %v14764_v55 }
 0x341   : > { %v4489_v34 = vsel %vm1313_vm2, %v4484_v2, %v4488_v6 }
 0x343   : > { %11160 = vmatmul.msk.bf16.gmra.mxu2 %vm477_vm1, %v11941_v13 }
 0x344   : > { %v3259_v49 = vpop.f32.mrf.mxu1  ;;  %v2639_v31 = vpop.f32.mrf.mxu0 }
 0x345   : > { %v3310_v53 = vadd.f32 %v3259_v49, %v2688_v26  ;;  %v2689_v12 = vadd.f32 %v2639_v31, %v15449_v41  ;;  %v11942_v49 = vld [vmem:[%s14151_s10 + $0x50] sm:$0xff] }
 0x346   : > { %v3909_v48 = vpop.f32.mrf.mxu2  ;;  %v15537_v1 = vpop.f32.mrf.mxu3  ;;  %v11920_v31 = vld [vmem:[%s14151_s10 + $0x6c] sm:$0xff] }
 0x347   : > { %v15539_v28 = vadd.f32 %v3909_v48, %v3310_v53  ;;  %v5013_v53 = vpop.permute.xlu0 %5012  ;;  %v4494_v48 = vshll.u32 %v11920_v31, 16 }
 0x34b   : > { %10892 = vmatmul.msk.bf16.gmra.mxu3 %vm477_vm1, %v13553_v50 }
 0x34c   : > { %v3261_v60 = vpop.f32.mrf.mxu1  ;;  %v4694_v3 = vpop.f32.mrf.mxu0 }
 0x34d   : > { %v3311_v30 = vadd.f32 %v3261_v60, %v2689_v12  ;;  %v4814_v41 = vadd.f32 %v4694_v3, %v15459_v15  ;;  %v4490_v12 = vshrl.u32 %v11919_v38, 16  ;;  %v13555_v3 = vld [vmem:[%s14151_s10 + $0x84] sm:$0xff]  }
 0x34e   : > { %v3911_v26 = vpop.f32.mrf.mxu2  ;;  %v4092_v23 = vpop.f32.mrf.mxu3 }
 0x34f   : > { %v15550_v13 = vadd.f32 %v3911_v26, %v3311_v30  ;;  %11009 = vmatmul.msk.bf16.gmra.mxu0 %vm477_vm1, %v4489_v34  ;;  %v15554_v61 = vadd.f32 %v4092_v23, %v14863_v54  ;;  %v4866_v15 = vadd.f32 %v15548_v33, %v4814_v41  ;;  %v4492_v34 = vor.u32 %v4490_v12, %v4488_v6  ;;  %v5018_v36 = vpop.permute.xlu0 %5017 }
 0x350   : > { %v4496_v26 = vrot.slane %v4494_v48, 1 }
 0x351   : > { %v4914_v54 = vmax.f32 %v4866_v15, 0.0 }
 0x353   : > { %11161 = vmatmul.msk.bf16.gmra.mxu2 %vm477_vm1, %v11942_v49  ;;  %v5250_v23 = vmul.f32 %v5013_v53, %v4914_v54  ;;  %v4497_v49 = vsel %vm1313_vm2, %v4492_v34, %v4496_v26  ;;  %v11943_v53 = vld [vmem:[%s14151_s10 + $0x58] sm:$0xff]  ;;  %v5023_v54 = vpop.permute.xlu1 %5022 }
 0x354   : > { %v4696_v4 = vpop.f32.mrf.mxu0 }
 0x355   : > { %v4815_v50 = vadd.f32 %v4696_v4, %v4193_v5 }
 0x356   : > { %v15562_v2 = vpop.f32.mrf.mxu2  ;;  %v15564_v60 = vpop.f32.mrf.mxu3 }
 0x357   : > { %v4867_v30 = vadd.f32 %v15548_v33, %v4815_v50 }
 0x359   : > { %v4915_v55 = vmax.f32 %v4867_v30, 0.0  ;;  %v11921_v30 = vld [vmem:[%s14151_s10 + $0x74] sm:$0xff] }
 0x35b   : > { %v5251_v41 = vmul.f32 %v5018_v36, %v4915_v55  ;;  %10893 = vmatmul.msk.bf16.gmra.mxu3 %vm477_vm1, %v13555_v3  ;;  %v4195_v55 = vadd.f32 %v15486_v39, %v14791_v35  ;;  %v13557_v35 = vld [vmem:[%s14151_s10 + $0x8c] sm:$0xff]  }
 0x35c   : > { %v4699_v38 = vpop.f32.mrf.mxu0 }
 0x35d   : > { %v12386_v5 = vpack.c.bf16 %v5251_v41, %v5250_v23  ;;  %v4816_v50 = vadd.f32 %v4699_v38, %v15480_v42  ;;  %v4498_v41 = vshrl.u32 %v11920_v31, 16 }
 0x35e   : > { %v15570_v4 = vpop.f32.mrf.mxu2  ;;  %v4097_v15 = vpop.f32.mrf.mxu3 }
 0x35f   : > { %12983 = vst [vmem:[#allocation2 + $0x10] sm:$0xff] %v12386_v5   ;;  %11010 = vmatmul.msk.bf16.gmra.mxu0 %vm477_vm1, %v4497_v49  ;;  %v15575_v6 = vadd.f32 %v4097_v15, %v14895_v20  ;;  %v5657_v12 = vshrl.u32 %v12386_v5, 16  ;;  %v5660_v48 = vshll.u32 %v12386_v5, 16  ;;  %v4868_v36 = vadd.f32 %v15548_v33, %v4816_v50 }
 0x360   : > { %v4502_v20 = vshll.u32 %v11921_v30, 16  ;;  %v4500_v39 = vor.u32 %v4498_v41, %v4496_v26 }
 0x361   : > { %v5659_v3 = vrot.slane %v5657_v12, 3  ;;  %v5662_v34 = vrot.slane %v5660_v48, 4  ;;  %v4916_v12 = vmax.f32 %v4868_v36, 0.0 }
 0x362   : > { %v4504_v50 = vrot.slane %v4502_v20, 1 }
 0x363   : > { %11162 = vmatmul.msk.bf16.gmra.mxu2 %vm477_vm1, %v11943_v53  ;;  %v5663_v42 = vor.u32 %v5662_v34, %v5659_v3  ;;  %v5028_v3 = vpop.permute.xlu1 %5027  ;;  %v5252_v34 = vmul.f32 %v5023_v54, %v4916_v12  ;;  %v11944_v54 = vld [vmem:[%s14151_s10 + $0x60] sm:$0xff] }
 0x364   : > { %v4701_v23 = vpop.f32.mrf.mxu0  ;;  %v11922_v12 = vld [vmem:[%s14151_s10 + $0x7c] sm:$0xff] }
 0x365   : > { %v4817_v38 = vadd.f32 %v4701_v23, %v4195_v55  ;;  %v5664_v49 = vsel %vm710_vm3, %v15514_v0, %v5663_v42  ;;  %v4505_v0 = vsel %vm1313_vm2, %v4500_v39, %v4504_v50  ;;  %v4197_v39 = vadd.f32 %v15517_v18, %v14818_v63  ;;  %v13559_v63 = vld [vmem:[%s14151_s10 + $0x94] sm:$0xff]  }
 0x366   : > { %v6257_v5 = vpop.f32.mrf.mxu2  ;;  %v15585_v15 = vpop.f32.mrf.mxu3  ;;  %5948 = vmatmul.bf16.gmra.mxu1 %v5664_v49 }
 0x367   : > { %v4869_v48 = vadd.f32 %v15548_v33, %v4817_v38  ;;  %v5033_v49 = vpop.permute.xlu2 %5032 }
 0x369   : > { %v4917_v53 = vmax.f32 %v4869_v48, 0.0 }
 0x36b   : > { %v5253_v31 = vmul.f32 %v5028_v3, %v4917_v53  ;;  %10894 = vmatmul.msk.bf16.gmra.mxu3 %vm477_vm1, %v13557_v35 }
 0x36c   : > { %v4704_v55 = vpop.f32.mrf.mxu0 }
 0x36d   : > { %v12391_v23 = vpack.c.bf16 %v5253_v31, %v5252_v34  ;;  %v4818_v38 = vadd.f32 %v4704_v55, %v15506_v44  ;;  %v4506_v34 = vshrl.u32 %v11921_v30, 16 }
 0x36e   : > { %v15591_v5 = vpop.f32.mrf.mxu2  ;;  %v4102_v36 = vpop.f32.mrf.mxu3 }
 0x36f   : > { %12984 = vst [vmem:[#allocation2 + $0x18] sm:$0xff] %v12391_v23   ;;  %11011 = vmatmul.msk.bf16.gmra.mxu0 %vm477_vm1, %v4505_v0  ;;  %v15596_v26 = vadd.f32 %v4102_v36, %v14928_v19  ;;  %v5666_v41 = vshrl.u32 %v12391_v23, 16  ;;  %v5669_v20 = vshll.u32 %v12391_v23, 16  ;;  %v4870_v53 = vadd.f32 %v15548_v33, %v4818_v38 }
 0x370   : > { %v4510_v19 = vshll.u32 %v11922_v12, 16  ;;  %v4508_v18 = vor.u32 %v4506_v34, %v4504_v50  ;;  %v11945_v34 = vld [vmem:[%s14151_s10 + $0x68] sm:$0xff] }
 0x371   : > { %v5668_v48 = vrot.slane %v5666_v41, 3  ;;  %v5671_v35 = vrot.slane %v5669_v20, 4  ;;  %v4918_v36 = vmax.f32 %v4870_v53, 0.0  ;;  %v5038_v20 = vpop.permute.xlu2 %5037 }
 0x372   : > { %v4512_v38 = vrot.slane %v4510_v19, 1 }
 0x373   : > { %11163 = vmatmul.msk.bf16.gmra.mxu2 %vm477_vm1, %v11944_v54  ;;  %v5672_v44 = vor.u32 %v5671_v35, %v5668_v48  ;;  %v5254_v30 = vmul.f32 %v5033_v49, %v4918_v36 }
 0x374   : > { %v4706_v3 = vpop.f32.mrf.mxu0  ;;  %v4513_v35 = vsel %vm1313_vm2, %v4508_v18, %v4512_v38 }
 0x375   : > { %v4819_v31 = vadd.f32 %v4706_v3, %v4197_v39  ;;  %v5673_v55 = vsel %vm710_vm3, %v5663_v42, %v5672_v44 }
 0x376   : > { %v15605_v0 = vpop.f32.mrf.mxu2  ;;  %v15607_v23 = vpop.f32.mrf.mxu3  ;;  %5952 = vmatmul.bf16.gmra.mxu1 %v5673_v55 }
 0x377   : > { %v4871_v41 = vadd.f32 %v15548_v33, %v4819_v31  ;;  %v11923_v31 = vld [vmem:[%s14151_s10 + $0x84] sm:$0xff] }
 0x379   : > { %v4919_v54 = vmax.f32 %v4871_v41, 0.0 }
 0x37b   : > { %v5255_v48 = vmul.f32 %v5038_v20, %v4919_v54  ;;  %10895 = vmatmul.msk.bf16.gmra.mxu3 %vm477_vm1, %v13559_v63  ;;  %v4199_v63 = vadd.f32 %v15537_v1, %v14845_v62  ;;  %v4514_v20 = vshrl.u32 %v11922_v12, 16  ;;  %v13561_v62 = vld [vmem:[%s14151_s10 + $0x9c] sm:$0xff]  }
 0x37c   : > { %v4709_v42 = vpop.f32.mrf.mxu0 }
 0x37d   : > { %v12396_v39 = vpack.c.bf16 %v5255_v48, %v5254_v30  ;;  %v4820_v53 = vadd.f32 %v4709_v42, %v15531_v51  ;;  %v4518_v30 = vshll.u32 %v11923_v31, 16  ;;  %v4516_v1 = vor.u32 %v4514_v20, %v4512_v38 }
 0x37e   : > { %v6263_v3 = vpop.f32.mrf.mxu2  ;;  %v4107_v55 = vpop.f32.mrf.mxu3 }
 0x37f   : > { %12985 = vst [vmem:[#allocation2 + $0x20] sm:$0xff] %v12396_v39   ;;  %11012 = vmatmul.msk.bf16.gmra.mxu0 %vm477_vm1, %v4513_v35  ;;  %v15616_v50 = vadd.f32 %v4107_v55, %v14963_v46  ;;  %v5675_v19 = vshrl.u32 %v12396_v39, 16  ;;  %v5678_v49 = vshll.u32 %v12396_v39, 16  ;;  %v4872_v18 = vadd.f32 %v15548_v33, %v4820_v53 }
 0x380   : > { %v4520_v55 = vrot.slane %v4518_v30, 1 }
 0x381   : > { %v5677_v36 = vrot.slane %v5675_v19, 3  ;;  %v5680_v41 = vrot.slane %v5678_v49, 4  ;;  %v4920_v39 = vmax.f32 %v4872_v18, 0.0  ;;  %v5048_v19 = vpop.permute.xlu1 %5047 }
 0x383   : > { %11164 = vmatmul.msk.bf16.gmra.mxu2 %vm477_vm1, %v11945_v34  ;;  %v5681_v51 = vor.u32 %v5680_v41, %v5677_v36  ;;  %v5043_v34 = vpop.permute.xlu0 %5042  ;;  %v4521_v36 = vsel %vm1313_vm2, %v4516_v1, %v4520_v55 }
 0x384   : > { %v4711_v54 = vpop.f32.mrf.mxu0  ;;  %v5256_v12 = vmul.f32 %v5043_v34, %v4920_v39 }
 0x385   : > { %v4821_v46 = vadd.f32 %v4711_v54, %v4199_v63  ;;  %v5682_v48 = vsel %vm710_vm3, %v5672_v44, %v5681_v51  ;;  %v15635_v54 = vld [vmem:[#allocation2 + $0x1c] sm:$0xf] }
 0x386   : > { %v15625_v42 = vpop.f32.mrf.mxu2  ;;  %v15627_v35 = vpop.f32.mrf.mxu3  ;;  %5956 = vmatmul.bf16.gmra.mxu1 %v5682_v48  ;;  %17483 = vst [vmem:[#allocation17_spill] sm:$0xff] %v15635_v54  ;;  %v13164_v38 = vld [vmem:[#allocation2 + $0x20] sm:$0xff]  }
 0x387   : > { %v4873_v3 = vadd.f32 %v15548_v33, %v4821_v46  ;;  %v11946_v46 = vld [vmem:[%s14151_s10 + $0x70] sm:$0xff]  ;;  %v12693_v34 = vunpack.c.l.b16 %v13164_v38 }
 0x389   : > { %v4921_v53 = vmax.f32 %v4873_v3, 0.0  ;;  %v15644_v3 = vld [vmem:[%s14151_s10 + $0x8c] sm:$0xff] }
 0x38b   : > { %v5257_v49 = vmul.f32 %v5048_v19, %v4921_v53  ;;  %10896 = vmatmul.msk.bf16.gmra.mxu3 %vm477_vm1, %v13561_v62  ;;  %v17443_v53 = vunpack.c.l.b16 %v15635_v54  ;;  %v4201_v19 = vadd.f32 %v15564_v60, %v14875_v22  ;;  %v11974_v54 = vld [vmem:[#allocation2 + $0x4] sm:$0xff] }
 0x38c   : > { %v4714_v44 = vpop.f32.mrf.mxu0 }
 0x38d   : > { %v12401_v41 = vpack.c.bf16 %v5257_v49, %v5256_v12  ;;  %v4822_v20 = vadd.f32 %v4714_v44, %v15554_v61  ;;  %v15653_v12 = vpack.c.b16 %v12693_v34, %v17443_v53  ;;  %v4522_v44 = vshrl.u32 %v11923_v31, 16  ;;  %v5053_v34 = vpop.permute.xlu2 %5052 }
 0x38e   : > { %v15633_v63 = vpop.f32.mrf.mxu2  ;;  %v4112_v18 = vpop.f32.mrf.mxu3 }
 0x38f   : > { %12986 = vst [vmem:[#allocation2 + $0x28] sm:$0xff] %v12401_v41   ;;  %11013 = vmatmul.msk.bf16.gmra.mxu0 %vm477_vm1, %v4521_v36  ;;  %v15640_v30 = vadd.f32 %v4112_v18, %v15007_v25  ;;  %v5684_v48 = vshrl.u32 %v12401_v41, 16  ;;  %v5687_v39 = vshll.u32 %v12401_v41, 16  ;;  %v4874_v61 = vadd.f32 %v15548_v33, %v4822_v20  ;;  %v13563_v20 = vld [vmem:[%s14151_s10 + $0xa4] sm:$0xff]  }
 0x390   : > { %17484 = vst [vmem:[#allocation18_spill] sm:$0xff] %v15653_v12  ;;  %v4526_v36 = vshll.u32 %v15644_v3, 16 }
 0x391   : > { %v5686_v62 = vrot.slane %v5684_v48, 3  ;;  %v5689_v1 = vrot.slane %v5687_v39, 4  ;;  %v4922_v22 = vmax.f32 %v4874_v61, 0.0 }
 0x392   : > { %v4528_v39 = vrot.slane %v4526_v36, 1  ;;  %v11947_v36 = vld [vmem:[%s14151_s10 + $0x78] sm:$0xff] }
 0x393   : > { %11165 = vmatmul.msk.bf16.gmra.mxu2 %vm477_vm1, %v11946_v46  ;;  %v5690_v25 = vor.u32 %v5689_v1, %v5686_v62  ;;  %v4524_v46 = vor.u32 %v4522_v44, %v4520_v55  ;;  %v5058_v1 = vpop.permute.xlu0 %5057  ;;  %v5258_v31 = vmul.f32 %v5053_v34, %v4922_v22  ;;  %v15672_v22 = vld [vmem:[%s14151_s10 + $0x94] sm:$0xff]  ;;  %v4530_v34 = vshrl.u32 %v15644_v3, 16 }
 0x394   : > { %v4716_v49 = vpop.f32.mrf.mxu0 }
 0x395   : > { %v4823_v41 = vadd.f32 %v4716_v49, %v4201_v19  ;;  %v5691_v18 = vsel %vm710_vm3, %v5681_v51, %v5690_v25  ;;  %v4529_v19 = vsel %vm1313_vm2, %v4524_v46, %v4528_v39 }
 0x396   : > { %v6270_v38 = vpop.f32.mrf.mxu2  ;;  %v15657_v48 = vpop.f32.mrf.mxu3  ;;  %5961 = vmatmul.bf16.gmra.mxu1 %v5691_v18 }
 0x397   : > { %v4875_v60 = vadd.f32 %v15548_v33, %v4823_v41 }
 0x399   : > { %v4923_v62 = vmax.f32 %v4875_v60, 0.0 }
 0x39b   : > { %v5259_v53 = vmul.f32 %v5058_v1, %v4923_v62  ;;  %10897 = vmatmul.msk.bf16.gmra.mxu3 %vm477_vm1, %v13563_v20  ;;  %v12021_v62 = vld [vmem:[%s17434_s3 + $0x138] sm:$0xff] }
 0x39c   : > { %v4719_v51 = vpop.f32.mrf.mxu0  ;;  %7959 = vmatpush.bf16.msrb.mxu2 %v12021_v62 }
 0x39d   : > { %v12406_v49 = vpack.c.bf16 %v5259_v53, %v5258_v31  ;;  %v4824_v55 = vadd.f32 %v4719_v51, %v15575_v6  ;;  %v4203_v53 = vadd.f32 %v15585_v15, %v14910_v43  ;;  %v4534_v31 = vshll.u32 %v15672_v22, 16 }
 0x39e   : > { %v15663_v18 = vpop.f32.mrf.mxu2  ;;  %v4117_v61 = vpop.f32.mrf.mxu3 }
 0x39f   : > { %12987 = vst [vmem:[#allocation2 + $0x30] sm:$0xff] %v12406_v49   ;;  %11014 = vmatmul.msk.bf16.gmra.mxu0 %vm477_vm1, %v4529_v19  ;;  %v15668_v44 = vadd.f32 %v4117_v61, %v15063_v29  ;;  %v5693_v41 = vshrl.u32 %v12406_v49, 16  ;;  %v5696_v38 = vshll.u32 %v12406_v49, 16  ;;  %v4876_v46 = vadd.f32 %v15548_v33, %v4824_v55  ;;  %v11973_v29 = vld [vmem:[%s17434_s3 + $0x78] sm:$0xff]  ;;  %v13565_v55 = vld [vmem:[%s14151_s10 + $0xac] sm:$0xff]  }
 0x3a0   : > { %6469 = vmatpush.bf16.msrb.mxu3 %v11973_v29 }
 0x3a1   : > { %v5695_v60 = vrot.slane %v5693_v41, 3  ;;  %v5698_v20 = vrot.slane %v5696_v38, 4  ;;  %v4924_v49 = vmax.f32 %v4876_v46, 0.0  ;;  %v4536_v41 = vrot.slane %v4534_v31, 1  ;;  %v5063_v38 = vpop.permute.xlu1 %5062 }
 0x3a3   : > { %11166 = vmatmul.msk.bf16.gmra.mxu2 %vm477_vm1, %v11947_v36  ;;  %v5699_v6 = vor.u32 %v5698_v20, %v5695_v60  ;;  %v4532_v36 = vor.u32 %v4530_v34, %v4528_v39  ;;  %v5068_v60 = vpop.permute.xlu2 %5067  ;;  %v5260_v20 = vmul.f32 %v5063_v38, %v4924_v49  ;;  %v11948_v34 = vld [vmem:[%s14151_s10 + $0x80] sm:$0xff]  ;;  %v12005_v49 = vld [vmem:[%s17434_s3 + $0xb8] sm:$0xff] }
 0x3a4   : > { %v4721_v1 = vpop.f32.mrf.mxu0  ;;  %7071 = vmatpush.bf16.msrb.mxu0 %v12005_v49 }
 0x3a5   : > { %v4825_v43 = vadd.f32 %v4721_v1, %v4203_v53  ;;  %v5700_v15 = vsel %vm710_vm3, %v5690_v25, %v5699_v6  ;;  %v4537_v29 = vsel %vm1313_vm2, %v4532_v36, %v4536_v41 }
 0x3a6   : > { %v15687_v51 = vpop.f32.mrf.mxu2  ;;  %v15689_v19 = vpop.f32.mrf.mxu3  ;;  %5965 = vmatmul.bf16.gmra.mxu1 %v5700_v15 }
 0x3a7   : > { %v4877_v61 = vadd.f32 %v15548_v33, %v4825_v43 }
 0x3a9   : > { %v4925_v3 = vmax.f32 %v4877_v61, 0.0  ;;  %v12013_v61 = vld [vmem:[%s17434_s3 + $0xf8] sm:$0xff]  ;;  %v5078_v49 = vpop.permute.xlu1 %5077 }
 0x3aa   : > { %7701 = vmatpush.bf16.msrb.mxu1 %v12013_v61 }
 0x3ab   : > { %v5261_v53 = vmul.f32 %v5068_v60, %v4925_v3  ;;  %10898 = vmatmul.msk.bf16.gmra.mxu3 %vm477_vm1, %v13565_v55  ;;  %v11926_v55 = vld [vmem:[%s14151_s10 + $0x9c] sm:$0xff] }
 0x3ac   : > { %v4724_v25 = vpop.f32.mrf.mxu0 }
 0x3ad   : > { %v12411_v62 = vpack.c.bf16 %v5261_v53, %v5260_v20  ;;  %v4826_v43 = vadd.f32 %v4724_v25, %v15596_v26  ;;  %v4538_v20 = vshrl.u32 %v15672_v22, 16  ;;  %v4542_v53 = vshll.u32 %v11926_v55, 16 }
 0x3ae   : > { %v6276_v1 = vpop.f32.mrf.mxu2  ;;  %v4122_v46 = vpop.f32.mrf.mxu3 }
 0x3af   : > { %12988 = vst [vmem:[#allocation2 + $0x38] sm:$0xff] %v12411_v62   ;;  %11015 = vmatmul.msk.bf16.gmra.mxu0 %vm477_vm1, %v4537_v29  ;;  %v15698_v39 = vadd.f32 %v4122_v46, %v15107_v24  ;;  %v5702_v31 = vshrl.u32 %v12411_v62, 16  ;;  %v5705_v15 = vshll.u32 %v12411_v62, 16  ;;  %v4205_v24 = vadd.f32 %v15607_v23, %v14942_v11  ;;  %v13567_v23 = vld [vmem:[%s14151_s10 + $0xb4] sm:$0xff]  }
 0x3b0   : > { %v4878_v26 = vadd.f32 %v15548_v33, %v4826_v43  ;;  %v4540_v43 = vor.u32 %v4538_v20, %v4536_v41  ;;  %v11949_v20 = vld [vmem:[%s14151_s10 + $0x88] sm:$0xff] }
 0x3b1   : > { %v5704_v36 = vrot.slane %v5702_v31, 3  ;;  %v5707_v3 = vrot.slane %v5705_v15, 4  ;;  %v4544_v31 = vrot.slane %v4542_v53, 1  ;;  %v5073_v15 = vpop.permute.xlu0 %5072 }
 0x3b2   : > { %v4926_v46 = vmax.f32 %v4878_v26, 0.0 }
 0x3b3   : > { %11167 = vmatmul.msk.bf16.gmra.mxu2 %vm477_vm1, %v11948_v34  ;;  %v5708_v38 = vor.u32 %v5707_v3, %v5704_v36  ;;  %v4545_v36 = vsel %vm1313_vm2, %v4540_v43, %v4544_v31 }
 0x3b4   : > { %v4726_v60 = vpop.f32.mrf.mxu0  ;;  %v5262_v22 = vmul.f32 %v5073_v15, %v4926_v46  ;;  %v4546_v15 = vshrl.u32 %v11926_v55, 16 }
 0x3b5   : > { %v4827_v25 = vadd.f32 %v4726_v60, %v4205_v24  ;;  %v5709_v29 = vsel %vm710_vm3, %v5699_v6, %v5708_v38 }
 0x3b6   : > { %v15714_v62 = vpop.f32.mrf.mxu2  ;;  %v15716_v1 = vpop.f32.mrf.mxu3  ;;  %5969 = vmatmul.bf16.gmra.mxu1 %v5709_v29  ;;  %v15731_v29 = vld [vmem:[%s14151_s10 + $0xa4] sm:$0xff] }
 0x3b7   : > { %v4879_v11 = vadd.f32 %v15548_v33, %v4827_v25 }
 0x3b9   : > { %v4927_v34 = vmax.f32 %v4879_v11, 0.0 }
 0x3bb   : > { %v5263_v61 = vmul.f32 %v5078_v49, %v4927_v34  ;;  %10899 = vmatmul.msk.bf16.gmra.mxu3 %vm477_vm1, %v13567_v23  ;;  %v4207_v23 = vadd.f32 %v15627_v35, %v14982_v52  ;;  %v13569_v52 = vld [vmem:[%s14151_s10 + $0xbc] sm:$0xff]   ;;  %v4548_v35 = vor.u32 %v4546_v15, %v4544_v31  ;;  %v11950_v15 = vld [vmem:[%s14151_s10 + $0x90] sm:$0xff] }
 0x3bc   : > { %v4729_v6 = vpop.f32.mrf.mxu0 }
 0x3bd   : > { %v12416_v3 = vpack.c.bf16 %v5263_v61, %v5262_v22  ;;  %v4828_v41 = vadd.f32 %v4729_v6, %v15616_v50 }
 0x3be   : > { %v15722_v24 = vpop.f32.mrf.mxu2  ;;  %v4127_v26 = vpop.f32.mrf.mxu3 }
 0x3bf   : > { %12989 = vst [vmem:[#allocation2 + $0x40] sm:$0xff] %v12416_v3   ;;  %11016 = vmatmul.msk.bf16.gmra.mxu0 %vm477_vm1, %v4545_v36  ;;  %v15727_v60 = vadd.f32 %v4127_v26, %v15153_v9  ;;  %v5711_v53 = vshrl.u32 %v12416_v3, 16  ;;  %v5714_v25 = vshll.u32 %v12416_v3, 16  ;;  %v4880_v43 = vadd.f32 %v15548_v33, %v4828_v41 }
 0x3c0   : > { %v4550_v9 = vshll.u32 %v15731_v29, 16 }
 0x3c1   : > { %v5713_v46 = vrot.slane %v5711_v53, 3  ;;  %v5716_v11 = vrot.slane %v5714_v25, 4  ;;  %v4928_v36 = vmax.f32 %v4880_v43, 0.0  ;;  %v5083_v53 = vpop.permute.xlu2 %5082 }
 0x3c2   : > { %v4552_v26 = vrot.slane %v4550_v9, 1  ;;  %v15753_v9 = vpop.f32.mrf.mxu1 }
 0x3c3   : > { %11168 = vmatmul.msk.bf16.gmra.mxu2 %vm477_vm1, %v11949_v20  ;;  %v5717_v50 = vor.u32 %v5716_v11, %v5713_v46  ;;  %v5088_v20 = vpop.permute.xlu0 %5087  ;;  %v5264_v55 = vmul.f32 %v5083_v53, %v4928_v36  ;;  %v15759_v36 = vld [vmem:[%s14151_s10 + $0xac] sm:$0xff] }
 0x3c4   : > { %v4731_v34 = vpop.f32.mrf.mxu0  ;;  %v4553_v46 = vsel %vm1313_vm2, %v4548_v35, %v4552_v26 }
 0x3c5   : > { %v4829_v49 = vadd.f32 %v4731_v34, %v4207_v23  ;;  %v5718_v22 = vsel %vm710_vm3, %v5708_v38, %v5717_v50 }
 0x3c6   : > { %v6283_v61 = vpop.f32.mrf.mxu2  ;;  %v15739_v6 = vpop.f32.mrf.mxu3  ;;  %5974 = vmatmul.bf16.gmra.mxu1 %v5718_v22 }
 0x3c7   : > { %v4881_v3 = vadd.f32 %v15548_v33, %v4829_v49  ;;  %v11972_v61 = vld [vmem:[%s17434_s3 + $0x70] sm:$0xff] }
 0x3c8   : > { %6470 = vmatpush.bf16.msrb.mxu3 %v11972_v61  ;;  %v5093_v61 = vpop.permute.xlu1 %5092 }
 0x3c9   : > { %v4929_v41 = vmax.f32 %v4881_v3, 0.0 }
 0x3cb   : > { %v5265_v25 = vmul.f32 %v5088_v20, %v4929_v41  ;;  %10900 = vmatmul.msk.bf16.gmra.mxu3 %vm477_vm1, %v13569_v52  ;;  %v12020_v41 = vld [vmem:[%s17434_s3 + $0x130] sm:$0xff]  ;;  %v11971_v20 = vld [vmem:[%s17434_s3 + $0x68] sm:$0xff] }
 0x3cc   : > { %v4734_v38 = vpop.f32.mrf.mxu0  ;;  %7960 = vmatpush.bf16.msrb.mxu2 %v12020_v41  ;;  %6471 = vmatpush.bf16.msrb.mxu3 %v11971_v20 }
 0x3cd   : > { %v12421_v11 = vpack.c.bf16 %v5265_v25, %v5264_v55  ;;  %v4830_v31 = vadd.f32 %v4734_v38, %v15640_v30  ;;  %v4209_v30 = vadd.f32 %v15657_v48, %v15033_v47  ;;  %v4554_v55 = vshrl.u32 %v15731_v29, 16  ;;  %v11970_v29 = vld [vmem:[%s17434_s3 + $0x60] sm:$0xff] }
 0x3ce   : > { %v15745_v23 = vpop.f32.mrf.mxu2  ;;  %v4132_v43 = vpop.f32.mrf.mxu3  ;;  %v4558_v25 = vshll.u32 %v15759_v36, 16 }
 0x3cf   : > { %12990 = vst [vmem:[#allocation2 + $0x48] sm:$0xff] %v12421_v11   ;;  %11017 = vmatmul.msk.bf16.gmra.mxu0 %vm477_vm1, %v4553_v46  ;;  %v15750_v34 = vadd.f32 %v4132_v43, %v15202_v32  ;;  %v5720_v49 = vshrl.u32 %v12421_v11, 16  ;;  %v5723_v22 = vshll.u32 %v12421_v11, 16  ;;  %v4882_v32 = vadd.f32 %v15548_v33, %v4830_v31  ;;  %v13571_v31 = vld [vmem:[%s14151_s10 + $0xc4] sm:$0xff]  }
 0x3d0   : > { %6472 = vmatpush.bf16.msrb.mxu3 %v11970_v29  ;;  %v12012_v29 = vld [vmem:[%s17434_s3 + $0xf0] sm:$0xff] }
 0x3d1   : > { %v5722_v3 = vrot.slane %v5720_v49, 3  ;;  %v5725_v52 = vrot.slane %v5723_v22, 4  ;;  %v4930_v11 = vmax.f32 %v4882_v32, 0.0  ;;  %v4560_v49 = vrot.slane %v4558_v25, 1  ;;  %v11969_v32 = vld [vmem:[%s17434_s3 + $0x58] sm:$0xff]  ;;  %7702 = vmatpush.bf16.msrb.mxu1 %v12012_v29 }
 0x3d2   : > { %v11951_v25 = vld [vmem:[%s14151_s10 + $0x98] sm:$0xff] }
 0x3d3   : > { %11169 = vmatmul.msk.bf16.gmra.mxu2 %vm477_vm1, %v11950_v15  ;;  %v5726_v35 = vor.u32 %v5725_v52, %v5722_v3  ;;  %v4556_v15 = vor.u32 %v4554_v55, %v4552_v26  ;;  %v5098_v3 = vpop.permute.xlu2 %5097  ;;  %v5266_v52 = vmul.f32 %v5093_v61, %v4930_v11 }
 0x3d4   : > { %v4736_v53 = vpop.f32.mrf.mxu0  ;;  %6473 = vmatpush.bf16.msrb.mxu3 %v11969_v32  ;;  %v11967_v32 = vld [vmem:[%s17434_s3 + $0x48] sm:$0xff] }
 0x3d5   : > { %v4831_v47 = vadd.f32 %v4736_v53, %v4209_v30  ;;  %v5727_v48 = vsel %vm710_vm3, %v5717_v50, %v5726_v35  ;;  %v15783_v50 = vpop.f32.mrf.mxu1  ;;  %v4561_v26 = vsel %vm1313_vm2, %v4556_v15, %v4560_v49  ;;  %v11968_v15 = vld [vmem:[%s17434_s3 + $0x50] sm:$0xff] }
 0x3d6   : > { %v15774_v38 = vpop.f32.mrf.mxu2  ;;  %v15776_v46 = vpop.f32.mrf.mxu3  ;;  %5978 = vmatmul.bf16.gmra.mxu1 %v5727_v48 }
 0x3d7   : > { %v4883_v43 = vadd.f32 %v15548_v33, %v4831_v47 }
 0x3d8   : > { %6474 = vmatpush.bf16.msrb.mxu3 %v11968_v15  ;;  %v5103_v15 = vpop.permute.xlu0 %5102 }
 0x3d9   : > { %v4931_v22 = vmax.f32 %v4883_v43, 0.0 }
 0x3db   : > { %v5267_v30 = vmul.f32 %v5098_v3, %v4931_v22  ;;  %10901 = vmatmul.msk.bf16.gmra.mxu3 %vm477_vm1, %v13571_v31  ;;  %v12004_v31 = vld [vmem:[%s17434_s3 + $0xb0] sm:$0xff] }
 0x3dc   : > { %v4739_v41 = vpop.f32.mrf.mxu0  ;;  %7072 = vmatpush.bf16.msrb.mxu0 %v12004_v31  ;;  %6475 = vmatpush.bf16.msrb.mxu3 %v11967_v32 }
 0x3dd   : > { %v12426_v20 = vpack.c.bf16 %v5267_v30, %v5266_v52  ;;  %v4832_v47 = vadd.f32 %v4739_v41, %v15668_v44  ;;  %v15806_v44 = vld [vmem:[%s14151_s10 + $0xb4] sm:$0xff] }
 0x3de   : > { %v6289_v53 = vpop.f32.mrf.mxu2  ;;  %v4137_v55 = vpop.f32.mrf.mxu3 }
 0x3df   : > { %12991 = vst [vmem:[#allocation2 + $0x50] sm:$0xff] %v12426_v20   ;;  %11018 = vmatmul.msk.bf16.gmra.mxu0 %vm477_vm1, %v4561_v26  ;;  %v15794_v48 = vadd.f32 %v4137_v55, %v15246_v40  ;;  %v5729_v11 = vshrl.u32 %v12426_v20, 16  ;;  %v5732_v43 = vshll.u32 %v12426_v20, 16  ;;  %v4211_v40 = vadd.f32 %v15689_v19, %v15082_v10 }
 0x3e0   : > { %v4884_v3 = vadd.f32 %v15548_v33, %v4832_v47  ;;  %v4562_v26 = vshrl.u32 %v15759_v36, 16  ;;  %v4566_v20 = vshll.u32 %v15806_v44, 16 }
 0x3e1   : > { %v5731_v22 = vrot.slane %v5729_v11, 3  ;;  %v5734_v61 = vrot.slane %v5732_v43, 4  ;;  %v13572_v11 = vld [vmem:[%s14151_s10 + $0xcc] sm:$0xff]   ;;  %v11966_v43 = vld [vmem:[%s17434_s3 + $0x40] sm:$0xff] }
 0x3e2   : > { %v4564_v36 = vor.u32 %v4562_v26, %v4560_v49  ;;  %v4568_v31 = vrot.slane %v4566_v20, 1  ;;  %6476 = vmatpush.bf16.msrb.mxu3 %v11966_v43 }
 0x3e3   : > { %11170 = vmatmul.msk.bf16.gmra.mxu2 %vm477_vm1, %v11951_v25  ;;  %v5949_v52 = vpop.f32.mrf.mxu1  ;;  %v5735_v30 = vor.u32 %v5734_v61, %v5731_v22  ;;  %v4932_v25 = vmax.f32 %v4884_v3, 0.0 }
 0x3e4   : > { %v4741_v41 = vpop.f32.mrf.mxu0  ;;  %v4569_v52 = vsel %vm1313_vm2, %v4564_v36, %v4568_v31  ;;  %v4213_v36 = vadd.f32 %v15716_v1, %v15125_v21 }
 0x3e5   : > { %v4833_v53 = vadd.f32 %v4741_v41, %v4211_v40  ;;  %v5736_v55 = vsel %vm710_vm3, %v5726_v35, %v5735_v30  ;;  %v5108_v35 = vpop.permute.xlu1 %5107  ;;  %v5268_v22 = vmul.f32 %v5103_v15, %v4932_v25  ;;  %v13970_v15 = vld [vmem:[%s14151_s10 + $0xd0] sm:$0xff]  }
 0x3e6   : > { %v15818_v10 = vpop.f32.mrf.mxu2  ;;  %v15820_v19 = vpop.f32.mrf.mxu3  ;;  %5982 = vmatmul.bf16.gmra.mxu1 %v5736_v55 }
 0x3e7   : > { %v4885_v47 = vadd.f32 %v15548_v33, %v4833_v53  ;;  %v11952_v53 = vld [vmem:[%s14151_s10 + $0xa0] sm:$0xff] }
 0x3e9   : > { %v4933_v29 = vmax.f32 %v4885_v47, 0.0  ;;  %v15840_v47 = vld [vmem:[%s14151_s10 + $0xbc] sm:$0xff] }
 0x3eb   : > { %v5269_v61 = vmul.f32 %v5108_v35, %v4933_v29  ;;  %10902 = vmatmul.msk.bf16.gmra.mxu3 %vm477_vm1, %v13572_v11  ;;  %v15828_v40 = vpop.f32.mrf.mxu1  ;;  %v12382_v35 = vunpack.c.h.b16 %v13970_v15 }
 0x3ec   : > { %v4744_v3 = vpop.f32.mrf.mxu0 }
 0x3ed   : > { %v12431_v32 = vpack.c.bf16 %v5269_v61, %v5268_v22  ;;  %v4834_v26 = vadd.f32 %v4744_v3, %v15698_v39  ;;  %v4570_v61 = vshrl.u32 %v15806_v44, 16  ;;  %v4574_v3 = vshll.u32 %v15840_v47, 16  ;;  %v5113_v44 = vpop.permute.xlu2 %5112 }
 0x3ee   : > { %v15831_v41 = vpop.f32.mrf.mxu2  ;;  %v4142_v49 = vpop.f32.mrf.mxu3 }
 0x3ef   : > { %12992 = vst [vmem:[#allocation2 + $0x58] sm:$0xff] %v12431_v32   ;;  %11019 = vmatmul.msk.bf16.gmra.mxu0 %vm477_vm1, %v4569_v52  ;;  %v15836_v20 = vadd.f32 %v4142_v49, %v15295_v14  ;;  %v5738_v55 = vshrl.u32 %v12431_v32, 16  ;;  %v5741_v25 = vshll.u32 %v12431_v32, 16  ;;  %v4886_v29 = vadd.f32 %v15548_v33, %v4834_v26 }
 0x3f0   : > { %v3987_v26 = vpack.c.b16 %v15267_v57, %v12382_v35  ;;  %v11953_v35 = vld [vmem:[%s14151_s10 + $0xa8] sm:$0xff] }
 0x3f1   : > { %v5740_v11 = vrot.slane %v5738_v55, 3  ;;  %v5743_v43 = vrot.slane %v5741_v25, 4  ;;  %v4934_v21 = vmax.f32 %v4886_v29, 0.0  ;;  %v4576_v25 = vrot.slane %v4574_v3, 1 }
 0x3f3   : > { %11171 = vmatmul.msk.bf16.gmra.mxu2 %vm477_vm1, %v11952_v53  ;;  %v15846_v39 = vpop.f32.mrf.mxu1  ;;  %v5744_v14 = vor.u32 %v5743_v43, %v5740_v11  ;;  %v4572_v53 = vor.u32 %v4570_v61, %v4568_v31  ;;  %v5118_v43 = vpop.permute.xlu0 %5117  ;;  %v5270_v15 = vmul.f32 %v5113_v44, %v4934_v21  ;;  %v15867_v21 = vld [vmem:[%s14151_s10 + $0xc4] sm:$0xff] }
 0x3f4   : > { %v4746_v22 = vpop.f32.mrf.mxu0 }
 0x3f5   : > { %v4835_v52 = vadd.f32 %v4746_v22, %v4213_v36  ;;  %v5745_v32 = vsel %vm710_vm3, %v5735_v30, %v5744_v14 }
 0x3f6   : > { %v6296_v49 = vpop.f32.mrf.mxu2  ;;  %v15852_v55 = vpop.f32.mrf.mxu3  ;;  %5987 = vmatmul.bf16.gmra.mxu1 %v5745_v32  ;;  %v4577_v32 = vsel %vm1313_vm2, %v4572_v53, %v4576_v25  ;;  %v4215_v53 = vadd.f32 %v15739_v6, %v15178_v7 }
 0x3f7   : > { %v4887_v1 = vadd.f32 %v15548_v33, %v4835_v52 }
 0x3f9   : > { %v4935_v11 = vmax.f32 %v4887_v1, 0.0 }
 0x3fb   : > { %v5271_v36 = vmul.f32 %v5118_v43, %v4935_v11  ;;  %10903 = vmatmul.msk.bf16.gmra.mxu3 %vm477_vm1, %v3987_v26  ;;  %v5955_v30 = vpop.f32.mrf.mxu1  ;;  %v13971_v43 = vld [vmem:[#allocation2 + $0x8] sm:$0xff]  }
 0x3fc   : > { %v4749_v22 = vpop.f32.mrf.mxu0  ;;  %v12505_v44 = vunpack.c.l.b16 %v13971_v43  ;;  %v4578_v30 = vshrl.u32 %v15840_v47, 16 }
 0x3fd   : > { %v12436_v29 = vpack.c.bf16 %v5271_v36, %v5270_v15  ;;  %v4836_v57 = vadd.f32 %v4749_v22, %v15727_v60  ;;  %v12019_v15 = vld [vmem:[%s17434_s3 + $0x128] sm:$0xff]  ;;  %v4582_v22 = vshll.u32 %v15867_v21, 16 }
 0x3fe   : > { %v15858_v49 = vpop.f32.mrf.mxu2  ;;  %v4147_v52 = vpop.f32.mrf.mxu3  ;;  %7961 = vmatpush.bf16.msrb.mxu2 %v12019_v15 }
 0x3ff   : > { %12993 = vst [vmem:[#allocation2 + $0x60] sm:$0xff] %v12436_v29   ;;  %11020 = vmatmul.msk.bf16.gmra.mxu0 %vm477_vm1, %v4577_v32  ;;  %v15863_v31 = vadd.f32 %v4147_v52, %v15340_v27  ;;  %v5747_v61 = vshrl.u32 %v12436_v29, 16  ;;  %v5750_v3 = vshll.u32 %v12436_v29, 16  ;;  %v4888_v11 = vadd.f32 %v15548_v33, %v4836_v57 }
 0x401   : > { %v5749_v1 = vrot.slane %v5747_v61, 3  ;;  %v5752_v26 = vrot.slane %v5750_v3, 4  ;;  %v4936_v52 = vmax.f32 %v4888_v11, 0.0  ;;  %v4580_v3 = vor.u32 %v4578_v30, %v4576_v25 }
 0x403   : > { %11172 = vmatmul.msk.bf16.gmra.mxu2 %vm477_vm1, %v11953_v35  ;;  %v15873_v60 = vpop.f32.mrf.mxu1  ;;  %v5753_v27 = vor.u32 %v5752_v26, %v5749_v1  ;;  %v17486_v35 = vunpack.c.l.b16 %v15492_v16  ;;  %v4584_v1 = vrot.slane %v4582_v22, 1  ;;  %v5123_v26 = vpop.permute.xlu1 %5122 }
 0x404   : > { %v4751_v36 = vpop.f32.mrf.mxu0  ;;  %v5272_v43 = vmul.f32 %v5123_v26, %v4936_v52  ;;  %v12003_v52 = vld [vmem:[%s17434_s3 + $0xa8] sm:$0xff] }
 0x405   : > { %v4837_v32 = vadd.f32 %v4751_v36, %v4215_v53  ;;  %v5754_v7 = vsel %vm710_vm3, %v5744_v14, %v5753_v27  ;;  %v6373_v61 = vpack.c.b16 %v12505_v44, %v17486_v35  ;;  %v5128_v53 = vpop.permute.xlu2 %5127  ;;  %v4585_v11 = vsel %vm1313_vm2, %v4580_v3, %v4584_v1  ;;  %v11954_v44 = vld [vmem:[%s14151_s10 + $0xb0] sm:$0xff]  ;;  %7073 = vmatpush.bf16.msrb.mxu0 %v12003_v52 }
 0x406   : > { %v15881_v6 = vpop.f32.mrf.mxu2  ;;  %v15883_v29 = vpop.f32.mrf.mxu3  ;;  %5991 = vmatmul.bf16.gmra.mxu1 %v5754_v7  ;;  %v15904_v35 = vld [vmem:[%s14151_s10 + $0xcc] sm:$0xff] }
 0x407   : > { %17485 = vst [vmem:[#allocation19_spill] sm:$0xff] %v15881_v6  ;;  %v4889_v57 = vadd.f32 %v15548_v33, %v4837_v32 }
 0x409   : > { %v4937_v47 = vmax.f32 %v4889_v57, 0.0  ;;  %v12011_v57 = vld [vmem:[%s17434_s3 + $0xe8] sm:$0xff] }
 0x40a   : > { %7703 = vmatpush.bf16.msrb.mxu1 %v12011_v57 }
 0x40b   : > { %v5273_v14 = vmul.f32 %v5128_v53, %v4937_v47  ;;  %6477 = vmatmul.bf16.vlgmr.msrb.gmra.mxu3 %v6373_v61  ;;  %v15888_v15 = vpop.f32.mrf.mxu1  ;;  %v4586_v53 = vshrl.u32 %v15867_v21, 16 }
 0x40c   : > { %v4754_v36 = vpop.f32.mrf.mxu0 }
 0x40d   : > { %v12441_v7 = vpack.c.bf16 %v5273_v14, %v5272_v43  ;;  %v4838_v16 = vadd.f32 %v4754_v36, %v15750_v34  ;;  %v4590_v43 = vshll.u32 %v15904_v35, 16 }
 0x40e   : > { %v6302_v32 = vpop.f32.mrf.mxu2  ;;  %v4152_v12 = vpop.f32.mrf.mxu3 }
 0x40f   : > { %12994 = vst [vmem:[#allocation2 + $0x68] sm:$0xff] %v12441_v7   ;;  %11021 = vmatmul.msk.bf16.gmra.mxu0 %vm477_vm1, %v4585_v11  ;;  %v15894_v25 = vadd.f32 %v4152_v12, %v15371_v8  ;;  %v5756_v30 = vshrl.u32 %v12441_v7, 16  ;;  %v5759_v22 = vshll.u32 %v12441_v7, 16  ;;  %v4217_v8 = vadd.f32 %v15776_v46, %v15223_v37 }
 0x410   : > { %v4890_v12 = vadd.f32 %v15548_v33, %v4838_v16  ;;  %v15920_v33 = vld [vmem:[%s17433_s2] ss:$0 sm:$0xff]  ;;  %v4588_v32 = vor.u32 %v4586_v53, %v4584_v1  ;;  %v4592_v21 = vrot.slane %v4590_v43, 1 }
 0x411   : > { %v5758_v61 = vrot.slane %v5756_v30, 3  ;;  %v5761_v34 = vrot.slane %v5759_v22, 4  ;;  %v5133_v30 = vpop.permute.xlu0 %5132  ;;  %v5138_v22 = vpop.permute.xlu1 %5137  ;;  %v12018_v53 = vld [vmem:[%s17434_s3 + $0x120] sm:$0xff] }
 0x412   : > { %v4938_v37 = vmax.f32 %v4890_v12, 0.0  ;;  %7962 = vmatpush.bf16.msrb.mxu2 %v12018_v53 }
 0x413   : > { %11173 = vmatmul.msk.bf16.gmra.mxu2 %vm477_vm1, %v11954_v44  ;;  %v5962_v3 = vpop.f32.mrf.mxu1  ;;  %v5762_v47 = vor.u32 %v5761_v34, %v5758_v61  ;;  %v13575_v44 = vld [vmem:[#allocation2 + $0xc] sm:$0xff]  }
 0x414   : > { %v4756_v26 = vpop.f32.mrf.mxu0  ;;  %v5274_v52 = vmul.f32 %v5133_v30, %v4938_v37  ;;  %v12000_v30 = vld [vmem:[%s17434_s3 + $0x90] sm:$0xff] }
 0x415   : > { %v4839_v14 = vadd.f32 %v4756_v26, %v4217_v8  ;;  %v5763_v36 = vsel %vm710_vm3, %v5753_v27, %v5762_v47  ;;  %v12002_v27 = vld [vmem:[%s17434_s3 + $0xa0] sm:$0xff]  ;;  %v4593_v8 = vsel %vm1313_vm2, %v4588_v32, %v4592_v21  ;;  %v12001_v26 = vld [vmem:[%s17434_s3 + $0x98] sm:$0xff] }
 0x416   : > { %v15913_v11 = vpop.f32.mrf.mxu2  ;;  %v15915_v7 = vpop.f32.mrf.mxu3  ;;  %5995 = vmatmul.bf16.gmra.mxu1 %v5763_v36  ;;  %7074 = vmatpush.bf16.msrb.mxu0 %v12002_v27  ;;  %v11955_v36 = vld [vmem:[%s14151_s10 + $0xb8] sm:$0xff] }
 0x417   : > { %17487 = vst [vmem:[#allocation20_spill] sm:$0xff] %v15913_v11  ;;  %v4891_v46 = vadd.f32 %v15920_v33, %v4839_v14  ;;  %v15944_v32 = vld [vmem:[%s14151_s10 + $0xd4] sm:$0xff] }
 0x419   : > { %v4939_v16 = vmax.f32 %v4891_v46, 0.0 }
 0x41a   : > { %7075 = vmatpush.bf16.msrb.mxu0 %v12001_v26 }
 0x41b   : > { %v5275_v57 = vmul.f32 %v5138_v22, %v4939_v16  ;;  %6482 = vmatmul.bf16.gmra.mxu3 %v13575_v44  ;;  %v15926_v61 = vpop.f32.mrf.mxu1 }
 0x41c   : > { %v4759_v34 = vpop.f32.mrf.mxu0 }
 0x41d   : > { %v12446_v1 = vpack.c.bf16 %v5275_v57, %v5274_v52  ;;  %v4840_v43 = vadd.f32 %v4759_v34, %v15794_v48  ;;  %v12017_v48 = vld [vmem:[%s17434_s3 + $0x118] sm:$0xff]  ;;  %v4594_v34 = vshrl.u32 %v15904_v35, 16  ;;  %v12016_v35 = vld [vmem:[%s17434_s3 + $0x110] sm:$0xff] }
 0x41e   : > { %v15929_v12 = vpop.f32.mrf.mxu2  ;;  %v4157_v3 = vpop.f32.mrf.mxu3  ;;  %7076 = vmatpush.bf16.msrb.mxu0 %v12000_v30  ;;  %7963 = vmatpush.bf16.msrb.mxu2 %v12017_v48  ;;  %v11998_v48 = vld [vmem:[%s17434_s3 + $0x80] sm:$0xff] }
 0x41f   : > { %17488 = vst [vmem:[#allocation21_spill] sm:$0xff] %v15929_v12  ;;  %11022 = vmatmul.msk.bf16.gmra.mxu0 %vm477_vm1, %v4593_v8  ;;  %v15940_v14 = vadd.f32 %v4157_v3, %v15396_v58  ;;  %v5765_v37 = vshrl.u32 %v12446_v1, 16  ;;  %v5768_v46 = vshll.u32 %v12446_v1, 16  ;;  %v4219_v58 = vadd.f32 %v15820_v19, %v15272_v59  ;;  %v11999_v19 = vld [vmem:[%s17434_s3 + $0x88] sm:$0xff]  ;;  %v5143_v30 = vpop.permute.xlu2 %5142 }
 0x420   : > { %12995 = vst [vmem:[#allocation2 + $0x70] sm:$0xff] %v12446_v1   ;;  %v4892_v22 = vadd.f32 %v15920_v33, %v4840_v43  ;;  %v4598_v8 = vshll.u32 %v15944_v32, 16 }
 0x421   : > { %v5767_v16 = vrot.slane %v5765_v37, 3  ;;  %v5770_v44 = vrot.slane %v5768_v46, 4  ;;  %v13577_v46 = vld [vmem:[#allocation2 + $0x14] sm:$0xff]  }
 0x422   : > { %v4940_v53 = vmax.f32 %v4892_v22, 0.0  ;;  %v4600_v37 = vrot.slane %v4598_v8, 1  ;;  %7077 = vmatpush.bf16.msrb.mxu0 %v11999_v19  ;;  %7964 = vmatpush.bf16.msrb.mxu2 %v12016_v35  ;;  %v12014_v35 = vld [vmem:[%s17434_s3 + $0x100] sm:$0xff] }
 0x423   : > { %11174 = vmatmul.msk.bf16.gmra.mxu2 %vm477_vm1, %v11955_v36  ;;  %v15956_v27 = vpop.f32.mrf.mxu1  ;;  %v5771_v52 = vor.u32 %v5770_v44, %v5767_v16  ;;  %v4596_v36 = vor.u32 %v4594_v34, %v4592_v21  ;;  %v4288_v16 = vld [vmem:[%s14151_s10 + $0xdc] sm:$0x1]  ;;  %v5148_v44 = vpop.permute.xlu0 %5147 }
 0x424   : > { %v4761_v57 = vpop.f32.mrf.mxu0  ;;  %v5276_v22 = vmul.f32 %v5143_v30, %v4940_v53 }
 0x425   : > { %v4841_v1 = vadd.f32 %v4761_v57, %v4219_v58  ;;  %v5772_v3 = vsel %vm710_vm3, %v5762_v47, %v5771_v52  ;;  %v12015_v58 = vld [vmem:[%s17434_s3 + $0x108] sm:$0xff]  ;;  %v4601_v8 = vsel %vm1313_vm2, %v4596_v36, %v4600_v37  ;;  %v11956_v36 = vld [vmem:[%s14151_s10 + $0xc0] sm:$0xff] }
 0x426   : > { %v6309_v26 = vpop.f32.mrf.mxu2  ;;  %v15961_v59 = vpop.f32.mrf.mxu3  ;;  %6000 = vmatmul.bf16.gmra.mxu1 %v5772_v3  ;;  %7078 = vmatpush.bf16.msrb.mxu0 %v11998_v48  ;;  %v17490_v48 = vld [vmem:[#allocation7_spill] sm:$0xff] }
 0x427   : > { %v4893_v43 = vadd.f32 %v15920_v33, %v4841_v1  ;;  %v4388_v1 = vunpack.c.l.b16 %v4288_v16  ;;  %7965 = vmatpush.bf16.msrb.mxu2 %v12015_v58  ;;  %v4221_v58 = vadd.f32 %v15852_v55, %v17490_v48 }
 0x429   : > { %v4941_v47 = vmax.f32 %v4893_v43, 0.0  ;;  %v4413_v16 = vpack.c.b16 %v4388_v1, %v4388_v1 }
 0x42b   : > { %v5277_v57 = vmul.f32 %v5148_v44, %v4941_v47  ;;  %6486 = vmatmul.bf16.gmra.mxu3 %v13577_v46  ;;  %v5968_v21 = vpop.f32.mrf.mxu1  ;;  %7966 = vmatpush.bf16.msrb.mxu2 %v12014_v35 }
 0x42c   : > { %v4764_v34 = vpop.f32.mrf.mxu0 }
 0x42d   : > { %v12451_v3 = vpack.c.bf16 %v5277_v57, %v5276_v22  ;;  %v4842_v53 = vadd.f32 %v4764_v34, %v15836_v20  ;;  %v4606_v34 = vshll.u32 %v4413_v16, 16 }
 0x42e   : > { %v15978_v26 = vpop.f32.mrf.mxu2  ;;  %v4162_v19 = vpop.f32.mrf.mxu3 }
 0x42f   : > { %17489 = vst [vmem:[#allocation22_spill] sm:$0xff] %v15978_v26  ;;  %11023 = vmatmul.msk.bf16.gmra.mxu0 %vm477_vm1, %v4601_v8  ;;  %v15986_v43 = vadd.f32 %v4162_v19, %v15424_v17  ;;  %v5774_v47 = vshrl.u32 %v12451_v3, 16  ;;  %v5777_v46 = vshll.u32 %v12451_v3, 16  ;;  %v4894_v22 = vadd.f32 %v15920_v33, %v4842_v53 }
 0x430   : > { %12996 = vst [vmem:[#allocation2 + $0x78] sm:$0xff] %v12451_v3   ;;  %v4602_v17 = vshrl.u32 %v15944_v32, 16 }
 0x431   : > { %v5776_v44 = vrot.slane %v5774_v47, 3  ;;  %v5779_v30 = vrot.slane %v5777_v46, 4  ;;  %v4942_v55 = vmax.f32 %v4894_v22, 0.0  ;;  %v13579_v46 = vld [vmem:[#allocation2 + $0x1c] sm:$0xff]  }
 0x432   : > { %v4604_v53 = vor.u32 %v4602_v17, %v4600_v37  ;;  %v17492_v17 = vld [vmem:[#allocation11_spill] sm:$0xff] }
 0x433   : > { %11175 = vmatmul.msk.bf16.gmra.mxu2 %vm477_vm1, %v11956_v36  ;;  %v15993_v20 = vpop.f32.mrf.mxu1  ;;  %v5780_v57 = vor.u32 %v5779_v30, %v5776_v44  ;;  %v4608_v36 = vrot.slane %v4606_v34, 1  ;;  %v5153_v44 = vpop.permute.xlu1 %5152 }
 0x434   : > { %v4766_v21 = vpop.f32.mrf.mxu0  ;;  %v5158_v30 = vpop.permute.xlu2 %5157  ;;  %v5278_v32 = vmul.f32 %v5153_v44, %v4942_v55  ;;  %v6806_v44 = vshll.u32 %v11974_v54, 16 }
 0x435   : > { %v4843_v8 = vadd.f32 %v4766_v21, %v4221_v58  ;;  %v5781_v1 = vsel %vm710_vm3, %v5771_v52, %v5780_v57  ;;  %v4609_v58 = vsel %vm1313_vm2, %v4604_v53, %v4608_v36 }
 0x436   : > { %v15997_v3 = vpop.f32.mrf.mxu2  ;;  %v15999_v19 = vpop.f32.mrf.mxu3  ;;  %6004 = vmatmul.bf16.gmra.mxu1 %v5781_v1 }
 0x437   : > { %17491 = vst [vmem:[#allocation7_spill] sm:$0xff] %v15997_v3  ;;  %v4895_v35 = vadd.f32 %v15920_v33, %v4843_v8  ;;  %v11957_v8 = vld [vmem:[%s14151_s10 + $0xc8] sm:$0xff]  ;;  %s17380_s10 = scalar_lea.vmem [#allocation3], %s10511_s20  ;;  %s13994_s20 = scalar_lea.hbm %s17439_s8, 64 }
 0x438   : > { %s10442_s25 = sshll.u32 %s17380_s10, 4  ;;  %p13996_p1 = scmp.lt.s32.totalorder %s13994_s20, %s13990_s17  ;;  %s10443_s25 = int_to_ptr.vmem [resolvable:$true] %s10442_s25 }
 0x439   : > { %v4943_v47 = vmax.f32 %v4895_v35, 0.0 }
 0x43a   : > { %p13997_p2 = por %p13996_p1, %p13995_p0 }
 0x43b   : > { %v5279_v16 = vmul.f32 %v5158_v30, %v4943_v47  ;;  %6490 = vmatmul.bf16.gmra.mxu3 %v13579_v46  ;;  %v16002_v48 = vpop.f32.mrf.mxu1  ;;  %v12010_v47 = vld [vmem:[%s17434_s3 + $0xe0] sm:$0xff]  ;;  %v16014_v46 = vld [vmem:[#allocation2 + $0xc] sm:$0xff] }
 0x43c   : > { %v4769_v52 = vpop.f32.mrf.mxu0  ;;  %7704 = vmatpush.bf16.msrb.mxu1 %v12010_v47  ;;  %v17493_v30 = vld [vmem:[#allocation6_spill] sm:$0xff]  ;;  %v6811_v47 = vshll.u32 %v16014_v46, 16  ;;  %p13998_p3 = pnand %p13997_p2, %p13993_p13 }
 0x43d   : > { %v12456_v21 = vpack.c.bf16 %v5279_v16, %v5278_v32  ;;  %v4844_v37 = vadd.f32 %v4769_v52, %v15863_v31  ;;  %v4223_v31 = vadd.f32 %v15883_v29, %v17493_v30 }
 0x43e   : > { %v6315_v1 = vpop.f32.mrf.mxu2  ;;  %v4167_v22 = vpop.f32.mrf.mxu3 }
 0x43f   : > { %12997 = vst [vmem:[#allocation2 + $0x80] sm:$0xff] %v12456_v21   ;;  %11024 = vmatmul.msk.bf16.gmra.mxu0 %vm477_vm1, %v4609_v58  ;;  %v16008_v34 = vadd.f32 %v4167_v22, %v17492_v17  ;;  %v5783_v55 = vshrl.u32 %v12456_v21, 16  ;;  %v5786_v35 = vshll.u32 %v12456_v21, 16  ;;  %v4896_v32 = vadd.f32 %v15920_v33, %v4844_v37 }
 0x441   : > { %v5785_v53 = vrot.slane %v5783_v55, 3  ;;  %v5788_v36 = vrot.slane %v5786_v35, 4  ;;  %v6804_v55 = vshrl.u32 %v11974_v54, 16  ;;  %v6808_v35 = vrot.slane %v6806_v44, 1 }
 0x442   : > { %v4944_v29 = vmax.f32 %v4896_v32, 0.0 }
 0x443   : > { %11176 = vmatmul.msk.bf16.gmra.mxu2 %vm477_vm1, %v11957_v8  ;;  %v5975_v16 = vpop.f32.mrf.mxu1  ;;  %v5789_v52 = vor.u32 %v5788_v36, %v5785_v53  ;;  %v13581_v8 = vld [vmem:[#allocation2 + $0x24] sm:$0xff]   ;;  %v5168_v53 = vpop.permute.xlu1 %5167  ;;  %v6809_v36 = vor.u32 %v6808_v35, %v6804_v55 }
 0x444   : > { %v4771_v58 = vpop.f32.mrf.mxu0  ;;  %v5163_v16 = vpop.permute.xlu0 %5162 }
 0x445   : > { %v4845_v21 = vadd.f32 %v4771_v58, %v4223_v31  ;;  %v5790_v1 = vsel %vm710_vm3, %v5780_v57, %v5789_v52  ;;  %v6813_v31 = vrot.slane %v6811_v47, 1  ;;  %v5280_v58 = vmul.f32 %v5163_v16, %v4944_v29  ;;  %v17497_v16 = vld [vmem:[#allocation8_spill] sm:$0xff] }
 0x446   : > { %v16021_v22 = vpop.f32.mrf.mxu2  ;;  %v16023_v17 = vpop.f32.mrf.mxu3  ;;  %6008 = vmatmul.bf16.gmra.mxu1 %v5790_v1 }
 0x447   : > { %17494 = vst [vmem:[#allocation11_spill] sm:$0xff] %v16021_v22  ;;  %v4897_v37 = vadd.f32 %v15920_v33, %v4845_v21  ;;  %v6814_v44 = vsel %vm1313_vm2, %v6809_v36, %v6813_v31 }
 0x449   : > { %v4945_v30 = vmax.f32 %v4897_v37, 0.0  ;;  %v17496_v37 = vld [vmem:[#allocation13_spill] sm:$0xff] }
 0x44b   : > { %v5281_v57 = vmul.f32 %v5168_v53, %v4945_v30  ;;  %6495 = vmatmul.bf16.gmra.mxu3 %v13581_v8  ;;  %v16027_v26 = vpop.f32.mrf.mxu1  ;;  %v13140_v30 = vld [vmem:[#allocation2 + $0x10] sm:$0xff]   ;;  %v4225_v53 = vadd.f32 %v15915_v7, %v17497_v16 }
 0x44c   : > { %v4774_v12 = vpop.f32.mrf.mxu0  ;;  %v16036_v8 = vld [vmem:[#allocation2 + $0x14] sm:$0xff]  ;;  %v13583_v16 = vld [vmem:[#allocation2 + $0x2c] sm:$0xff]  }
 0x44d   : > { %v12461_v1 = vpack.c.bf16 %v5281_v57, %v5280_v58  ;;  %v4846_v21 = vadd.f32 %v4774_v12, %v15894_v25 }
 0x44e   : > { %v16029_v54 = vpop.f32.mrf.mxu2  ;;  %v4172_v32 = vpop.f32.mrf.mxu3 }
 0x44f   : > { %17495 = vst [vmem:[#allocation6_spill] sm:$0xff] %v16029_v54  ;;  %7079 = vmatmul.bf16.vlgmr.msrb.gmra.mxu0 %v6814_v44  ;;  %v16034_v22 = vadd.f32 %v4172_v32, %v17496_v37  ;;  %v5792_v55 = vshrl.u32 %v12461_v1, 16  ;;  %v5795_v35 = vshll.u32 %v12461_v1, 16  ;;  %v4898_v36 = vadd.f32 %v15920_v33, %v4846_v21  ;;  %v5178_v21 = vpop.permute.xlu0 %5177 }
 0x450   : > { %12998 = vst [vmem:[#allocation2 + $0x88] sm:$0xff] %v12461_v1   ;;  %v6819_v37 = vshll.u32 %v16036_v8, 16  ;;  %v6815_v54 = vshrl.u32 %v16014_v46, 16 }
 0x451   : > { %v5794_v47 = vrot.slane %v5792_v55, 3  ;;  %v5797_v29 = vrot.slane %v5795_v35, 4  ;;  %v4946_v55 = vmax.f32 %v4898_v36, 0.0 }
 0x453   : > { %7967 = vmatmul.bf16.vlgmr.msrb.gmra.mxu2 %v13140_v30  ;;  %v16041_v58 = vpop.f32.mrf.mxu1  ;;  %v5798_v25 = vor.u32 %v5797_v29, %v5794_v47  ;;  %v5173_v30 = vpop.permute.xlu2 %5172  ;;  %v6821_v47 = vrot.slane %v6819_v37, 1 }
 0x454   : > { %v4776_v12 = vpop.f32.mrf.mxu0  ;;  %v5282_v29 = vmul.f32 %v5173_v30, %v4946_v55 }
 0x455   : > { %v4847_v57 = vadd.f32 %v4776_v12, %v4225_v53  ;;  %v5799_v44 = vsel %vm710_vm3, %v5789_v52, %v5798_v25 }
 0x456   : > { %v6322_v32 = vpop.f32.mrf.mxu2  ;;  %v16044_v1 = vpop.f32.mrf.mxu3  ;;  %6013 = vmatmul.bf16.gmra.mxu1 %v5799_v44 }
 0x457   : > { %v4899_v35 = vadd.f32 %v15920_v33, %v4847_v57  ;;  %v6817_v32 = vor.u32 %v6815_v54, %v6813_v31  ;;  %v17500_v31 = vld [vmem:[#allocation9_spill] sm:$0xff] }
 0x458   : > { %v4227_v54 = vadd.f32 %v15961_v59, %v17500_v31 }
 0x459   : > { %v4947_v7 = vmax.f32 %v4899_v35, 0.0  ;;  %v6822_v36 = vsel %vm1313_vm2, %v6817_v32, %v6821_v47  ;;  %v17499_v35 = vld [vmem:[#allocation15_spill] sm:$0xff] }
 0x45b   : > { %v5283_v53 = vmul.f32 %v5178_v21, %v4947_v7  ;;  %6499 = vmatmul.bf16.gmra.mxu3 %v13583_v16  ;;  %v5981_v52 = vpop.f32.mrf.mxu1  ;;  %v13141_v16 = vld [vmem:[#allocation2 + $0x18] sm:$0xff]  }
 0x45c   : > { %v4779_v12 = vpop.f32.mrf.mxu0  ;;  %v16056_v21 = vld [vmem:[#allocation2 + $0x1c] sm:$0xff] }
 0x45d   : > { %v12466_v3 = vpack.c.bf16 %v5283_v53, %v5282_v29  ;;  %v4848_v57 = vadd.f32 %v4779_v12, %v15940_v14  ;;  %v6827_v32 = vshll.u32 %v16056_v21, 16 }
 0x45e   : > { %v16049_v44 = vpop.f32.mrf.mxu2  ;;  %v4177_v11 = vpop.f32.mrf.mxu3 }
 0x45f   : > { %17498 = vst [vmem:[#allocation13_spill] sm:$0xff] %v16049_v44  ;;  %7084 = vmatmul.bf16.gmra.mxu0 %v6822_v36  ;;  %v16054_v6 = vadd.f32 %v4177_v11, %v17499_v35  ;;  %v5801_v46 = vshrl.u32 %v12466_v3, 16  ;;  %v5804_v37 = vshll.u32 %v12466_v3, 16  ;;  %v4900_v30 = vadd.f32 %v15920_v33, %v4848_v57  ;;  %v13585_v57 = vld [vmem:[#allocation2 + $0x34] sm:$0xff]  }
 0x460   : > { %12999 = vst [vmem:[#allocation2 + $0x90] sm:$0xff] %v12466_v3  }
 0x461   : > { %v5803_v55 = vrot.slane %v5801_v46, 3  ;;  %v5806_v7 = vrot.slane %v5804_v37, 4  ;;  %v4948_v36 = vmax.f32 %v4900_v30, 0.0  ;;  %v5183_v46 = vpop.permute.xlu1 %5182  ;;  %v5188_v37 = vpop.permute.xlu2 %5187 }
 0x463   : > { %7972 = vmatmul.bf16.gmra.mxu2 %v13141_v16  ;;  %v16061_v29 = vpop.f32.mrf.mxu1  ;;  %v5807_v14 = vor.u32 %v5806_v7, %v5803_v55  ;;  %v6823_v55 = vshrl.u32 %v16036_v8, 16  ;;  %v6829_v7 = vrot.slane %v6827_v32, 1  ;;  %v5284_v16 = vmul.f32 %v5183_v46, %v4948_v36  ;;  %v12009_v36 = vld [vmem:[%s17434_s3 + $0xd8] sm:$0xff]  ;;  %v17502_v46 = vld [vmem:[#allocation10_spill] sm:$0xff] }
 0x464   : > { %v4781_v53 = vpop.f32.mrf.mxu0  ;;  %7705 = vmatpush.bf16.msrb.mxu1 %v12009_v36 }
 0x465   : > { %v4849_v52 = vadd.f32 %v4781_v53, %v4227_v54  ;;  %v5808_v11 = vsel %vm710_vm3, %v5798_v25, %v5807_v14  ;;  %v6825_v53 = vor.u32 %v6823_v55, %v6821_v47 }
 0x466   : > { %v16064_v12 = vpop.f32.mrf.mxu2  ;;  %v16066_v3 = vpop.f32.mrf.mxu3  ;;  %6017 = vmatmul.bf16.gmra.mxu1 %v5808_v11 }
 0x467   : > { %17501 = vst [vmem:[#allocation8_spill] sm:$0xff] %v16064_v12  ;;  %v4901_v59 = vadd.f32 %v15920_v33, %v4849_v52  ;;  %v6830_v30 = vsel %vm1313_vm2, %v6825_v53, %v6829_v7 }
 0x469   : > { %v4949_v35 = vmax.f32 %v4901_v59, 0.0  ;;  %v5198_v36 = vpop.permute.xlu1 %5197 }
 0x46b   : > { %v5285_v31 = vmul.f32 %v5188_v37, %v4949_v35  ;;  %6503 = vmatmul.bf16.gmra.mxu3 %v13585_v57  ;;  %v16071_v25 = vpop.f32.mrf.mxu1  ;;  %v16081_v57 = vld [vmem:[#allocation2 + $0x24] sm:$0xff]  ;;  %v4229_v37 = vadd.f32 %v15999_v19, %v17502_v46 }
 0x46c   : > { %v4784_v54 = vpop.f32.mrf.mxu0 }
 0x46d   : > { %v12471_v11 = vpack.c.bf16 %v5285_v31, %v5284_v16  ;;  %v4850_v52 = vadd.f32 %v4784_v54, %v15986_v43 }
 0x46e   : > { %v6328_v44 = vpop.f32.mrf.mxu2  ;;  %v4182_v12 = vpop.f32.mrf.mxu3 }
 0x46f   : > { %13000 = vst [vmem:[#allocation2 + $0x98] sm:$0xff] %v12471_v11   ;;  %7088 = vmatmul.bf16.gmra.mxu0 %v6830_v30  ;;  %v16076_v59 = vadd.f32 %v4182_v12, %v15521_v56  ;;  %v5810_v8 = vshrl.u32 %v12471_v11, 16  ;;  %v5813_v32 = vshll.u32 %v12471_v11, 16  ;;  %v13142_v44 = vld [vmem:[#allocation2 + $0x20] sm:$0xff]   ;;  %v4902_v43 = vadd.f32 %v15920_v33, %v4850_v52  ;;  %v5193_v52 = vpop.permute.xlu0 %5192 }
 0x470   : > { %v6835_v11 = vshll.u32 %v16081_v57, 16 }
 0x471   : > { %v5812_v35 = vrot.slane %v5810_v8, 3  ;;  %v5815_v47 = vrot.slane %v5813_v32, 4  ;;  %v4950_v30 = vmax.f32 %v4902_v43, 0.0  ;;  %v13587_v32 = vld [vmem:[#allocation2 + $0x3c] sm:$0xff]  }
 0x473   : > { %7976 = vmatmul.bf16.gmra.mxu2 %v13142_v44  ;;  %v5988_v56 = vpop.f32.mrf.mxu1  ;;  %v5816_v12 = vor.u32 %v5815_v47, %v5812_v35  ;;  %v6831_v35 = vshrl.u32 %v16056_v21, 16  ;;  %v6837_v47 = vrot.slane %v6835_v11, 1  ;;  %v5286_v44 = vmul.f32 %v5193_v52, %v4950_v30  ;;  %v13143_v52 = vld [vmem:[#allocation2 + $0x28] sm:$0xff]  }
 0x474   : > { %v4786_v55 = vpop.f32.mrf.mxu0 }
 0x475   : > { %v4851_v16 = vadd.f32 %v4786_v55, %v4229_v37  ;;  %v5817_v31 = vsel %vm710_vm3, %v5807_v14, %v5816_v12  ;;  %v6833_v56 = vor.u32 %v6831_v35, %v6829_v7  ;;  %v17505_v7 = vld [vmem:[#allocation12_spill] sm:$0xff] }
 0x476   : > { %v16087_v54 = vpop.f32.mrf.mxu2  ;;  %v16089_v53 = vpop.f32.mrf.mxu3  ;;  %6021 = vmatmul.bf16.gmra.mxu1 %v5817_v31  ;;  %v4231_v35 = vadd.f32 %v16023_v17, %v17505_v7  ;;  %v13589_v7 = vld [vmem:[#allocation2 + $0x44] sm:$0xff]  }
 0x477   : > { %17503 = vst [vmem:[#allocation15_spill] sm:$0xff] %v16087_v54  ;;  %v4903_v8 = vadd.f32 %v15920_v33, %v4851_v16  ;;  %v6838_v43 = vsel %vm1313_vm2, %v6833_v56, %v6837_v47 }
 0x479   : > { %v4951_v19 = vmax.f32 %v4903_v8, 0.0 }
 0x47b   : > { %v5287_v46 = vmul.f32 %v5198_v36, %v4951_v19  ;;  %6508 = vmatmul.bf16.gmra.mxu3 %v13587_v32  ;;  %v16094_v14 = vpop.f32.mrf.mxu1  ;;  %v16103_v36 = vld [vmem:[#allocation2 + $0x2c] sm:$0xff] }
 0x47c   : > { %v4789_v37 = vpop.f32.mrf.mxu0 }
 0x47d   : > { %v12476_v55 = vpack.c.bf16 %v5287_v46, %v5286_v44  ;;  %v4852_v8 = vadd.f32 %v4789_v37, %v16008_v34 }
 0x47e   : > { %v16096_v31 = vpop.f32.mrf.mxu2  ;;  %v4187_v16 = vpop.f32.mrf.mxu3 }
 0x47f   : > { %17504 = vst [vmem:[#allocation9_spill] sm:$0xff] %v16096_v31  ;;  %7092 = vmatmul.bf16.gmra.mxu0 %v6838_v43  ;;  %v16101_v21 = vadd.f32 %v4187_v16, %v15539_v28  ;;  %v5819_v11 = vshrl.u32 %v12476_v55, 16  ;;  %v5822_v30 = vshll.u32 %v12476_v55, 16  ;;  %v4904_v44 = vadd.f32 %v15920_v33, %v4852_v8  ;;  %v5208_v8 = vpop.permute.xlu0 %5207 }
 0x480   : > { %13001 = vst [vmem:[#allocation2 + $0xa0] sm:$0xff] %v12476_v55   ;;  %v6843_v16 = vshll.u32 %v16103_v36, 16  ;;  %v6839_v31 = vshrl.u32 %v16081_v57, 16 }
 0x481   : > { %v5821_v19 = vrot.slane %v5819_v11, 3  ;;  %v5824_v32 = vrot.slane %v5822_v30, 4  ;;  %v4952_v11 = vmax.f32 %v4904_v44, 0.0 }
 0x483   : > { %7980 = vmatmul.bf16.gmra.mxu2 %v13143_v52  ;;  %v16108_v46 = vpop.f32.mrf.mxu1  ;;  %v5825_v34 = vor.u32 %v5824_v32, %v5821_v19  ;;  %v5203_v52 = vpop.permute.xlu2 %5202  ;;  %v6845_v19 = vrot.slane %v6843_v16, 1 }
 0x484   : > { %17506 = vst [vmem:[#allocation10_spill] sm:$0xff] %v16108_v46  ;;  %v4791_v37 = vpop.f32.mrf.mxu0  ;;  %v5288_v32 = vmul.f32 %v5203_v52, %v4952_v11 }
 0x485   : > { %v4853_v56 = vadd.f32 %v4791_v37, %v4231_v35  ;;  %v5826_v28 = vsel %vm710_vm3, %v5816_v12, %v5825_v34 }
 0x486   : > { %v6335_v43 = vpop.f32.mrf.mxu2  ;;  %v16111_v55 = vpop.f32.mrf.mxu3  ;;  %6026 = vmatmul.bf16.gmra.mxu1 %v5826_v28  ;;  %v6253_v28 = vadd.f32 %v15562_v2, %v15753_v9  ;;  %v17508_v2 = vld [vmem:[#allocation14_spill] sm:$0xff] }
 0x487   : > { %v4905_v30 = vadd.f32 %v15920_v33, %v4853_v56  ;;  %v6841_v43 = vor.u32 %v6839_v31, %v6837_v47  ;;  %v13144_v47 = vld [vmem:[#allocation2 + $0x30] sm:$0xff]   ;;  %v4233_v9 = vadd.f32 %v16044_v1, %v17508_v2 }
 0x488   : > { %v16124_v31 = vld [vmem:[#allocation2 + $0x34] sm:$0xff] }
 0x489   : > { %v4953_v17 = vmax.f32 %v4905_v30, 0.0  ;;  %v6846_v56 = vsel %vm1313_vm2, %v6841_v43, %v6845_v19  ;;  %v6851_v43 = vshll.u32 %v16124_v31, 16 }
 0x48b   : > { %v5289_v35 = vmul.f32 %v5208_v8, %v4953_v17  ;;  %6512 = vmatmul.bf16.gmra.mxu3 %v13589_v7  ;;  %v5994_v12 = vpop.f32.mrf.mxu1 }
 0x48c   : > { %v4794_v37 = vpop.f32.mrf.mxu0 }
 0x48d   : > { %v12481_v54 = vpack.c.bf16 %v5289_v35, %v5288_v32  ;;  %v4854_v46 = vadd.f32 %v4794_v37, %v16034_v22 }
 0x48e   : > { %v16118_v44 = vpop.f32.mrf.mxu2  ;;  %v6478_v30 = vpop.f32.mrf.mxu3 }
 0x48f   : > { %17507 = vst [vmem:[#allocation12_spill] sm:$0xff] %v16118_v44  ;;  %7097 = vmatmul.bf16.gmra.mxu0 %v6846_v56  ;;  %v16122_v57 = vadd.f32 %v6478_v30, %v6253_v28  ;;  %v5828_v16 = vshrl.u32 %v12481_v54, 16  ;;  %v5831_v11 = vshll.u32 %v12481_v54, 16  ;;  %v4906_v8 = vadd.f32 %v15920_v33, %v4854_v46  ;;  %v13591_v46 = vld [vmem:[#allocation2 + $0x4c] sm:$0xff]   ;;  %v5213_v30 = vpop.permute.xlu1 %5212 }
 0x490   : > { %13002 = vst [vmem:[#allocation2 + $0xa8] sm:$0xff] %v12481_v54  }
 0x491   : > { %v5830_v17 = vrot.slane %v5828_v16, 3  ;;  %v5833_v7 = vrot.slane %v5831_v11, 4  ;;  %v4954_v28 = vmax.f32 %v4906_v8, 0.0  ;;  %v5218_v16 = vpop.permute.xlu2 %5217  ;;  %v6847_v11 = vshrl.u32 %v16103_v36, 16  ;;  %v12008_v36 = vld [vmem:[%s17434_s3 + $0xd0] sm:$0xff] }
 0x492   : > { %7706 = vmatpush.bf16.msrb.mxu1 %v12008_v36  ;;  %v5223_v36 = vpop.permute.xlu0 %5222 }
 0x493   : > { %7985 = vmatmul.bf16.gmra.mxu2 %v13144_v47  ;;  %v16129_v52 = vpop.f32.mrf.mxu1  ;;  %v5834_v32 = vor.u32 %v5833_v7, %v5830_v17  ;;  %v6853_v17 = vrot.slane %v6851_v43, 1  ;;  %v5290_v7 = vmul.f32 %v5213_v30, %v4954_v28 }
 0x494   : > { %v4796_v22 = vpop.f32.mrf.mxu0 }
 0x495   : > { %v4855_v35 = vadd.f32 %v4796_v22, %v4233_v9  ;;  %v5835_v12 = vsel %vm710_vm3, %v5825_v34, %v5834_v32  ;;  %v6849_v9 = vor.u32 %v6847_v11, %v6845_v19  ;;  %v16146_v19 = vld [vmem:[#allocation2 + $0x3c] sm:$0xff] }
 0x496   : > { %v16132_v37 = vpop.f32.mrf.mxu2  ;;  %v16134_v54 = vpop.f32.mrf.mxu3  ;;  %6030 = vmatmul.bf16.gmra.mxu1 %v5835_v12 }
 0x497   : > { %17509 = vst [vmem:[#allocation14_spill] sm:$0xff] %v16132_v37  ;;  %v4907_v1 = vadd.f32 %v15920_v33, %v4855_v35  ;;  %v6854_v8 = vsel %vm1313_vm2, %v6849_v9, %v6853_v17 }
 0x499   : > { %v4955_v56 = vmax.f32 %v4907_v1, 0.0 }
 0x49b   : > { %v5291_v47 = vmul.f32 %v5218_v16, %v4955_v56  ;;  %6516 = vmatmul.bf16.gmra.mxu3 %v13591_v46  ;;  %v16139_v34 = vpop.f32.mrf.mxu1  ;;  %v13145_v56 = vld [vmem:[#allocation2 + $0x38] sm:$0xff]   ;;  %v17510_v46 = vld [vmem:[#allocation16_spill] sm:$0xff] }
 0x49c   : > { %v4799_v2 = vpop.f32.mrf.mxu0  ;;  %v4235_v30 = vadd.f32 %v16066_v3, %v17510_v46 }
 0x49d   : > { %v12486_v22 = vpack.c.bf16 %v5291_v47, %v5290_v7  ;;  %v4856_v35 = vadd.f32 %v4799_v2, %v16054_v6  ;;  %v6259_v7 = vadd.f32 %v15591_v5, %v15828_v40  ;;  %v6855_v5 = vshrl.u32 %v16124_v31, 16 }
 0x49e   : > { %v6341_v12 = vpop.f32.mrf.mxu2  ;;  %v6483_v44 = vpop.f32.mrf.mxu3 }
 0x49f   : > { %13003 = vst [vmem:[#allocation2 + $0xb0] sm:$0xff] %v12486_v22   ;;  %7101 = vmatmul.bf16.gmra.mxu0 %v6854_v8  ;;  %v5837_v1 = vshrl.u32 %v12486_v22, 16  ;;  %v5840_v37 = vshll.u32 %v12486_v22, 16  ;;  %v4908_v44 = vadd.f32 %v15920_v33, %v4856_v35  ;;  %v6859_v22 = vshll.u32 %v16146_v19, 16 }
 0x4a1   : > { %v5839_v43 = vrot.slane %v5837_v1, 3  ;;  %v5842_v28 = vrot.slane %v5840_v37, 4  ;;  %v4956_v12 = vmax.f32 %v4908_v44, 0.0  ;;  %v13593_v1 = vld [vmem:[#allocation2 + $0x54] sm:$0xff]   ;;  %v6861_v40 = vrot.slane %v6859_v22, 1 }
 0x4a2   : > { %v6262_v44 = vadd.f32 %v15605_v0, %v15846_v39  ;;  %v13146_v39 = vld [vmem:[#allocation2 + $0x40] sm:$0xff]  }
 0x4a3   : > { %7989 = vmatmul.bf16.gmra.mxu2 %v13145_v56  ;;  %v6001_v6 = vpop.f32.mrf.mxu1  ;;  %v5843_v16 = vor.u32 %v5842_v28, %v5839_v43  ;;  %v5228_v43 = vpop.permute.xlu1 %5227  ;;  %v5292_v28 = vmul.f32 %v5223_v36, %v4956_v12  ;;  %v16176_v12 = vld [vmem:[#allocation2 + $0x44] sm:$0xff] }
 0x4a4   : > { %v4801_v11 = vpop.f32.mrf.mxu0 }
 0x4a5   : > { %v4857_v47 = vadd.f32 %v4801_v11, %v4235_v30  ;;  %v5844_v2 = vsel %vm710_vm3, %v5834_v32, %v5843_v16  ;;  %v6857_v30 = vor.u32 %v6855_v5, %v6853_v17 }
 0x4a6   : > { %v16154_v37 = vpop.f32.mrf.mxu2  ;;  %v6484_v9 = vpop.f32.mrf.mxu3  ;;  %6034 = vmatmul.bf16.gmra.mxu1 %v5844_v2 }
 0x4a7   : > { %v4909_v3 = vadd.f32 %v15920_v33, %v4857_v47  ;;  %v16158_v8 = vadd.f32 %v6484_v9, %v6259_v7  ;;  %v6862_v7 = vsel %vm1313_vm2, %v6857_v30, %v6861_v40 }
 0x4a9   : > { %v4957_v35 = vmax.f32 %v4909_v3, 0.0  ;;  %v4237_v3 = vadd.f32 %v16089_v53, %v15527_v45  ;;  %v12007_v53 = vld [vmem:[%s17434_s3 + $0xc8] sm:$0xff] }
 0x4aa   : > { %7707 = vmatpush.bf16.msrb.mxu1 %v12007_v53 }
 0x4ab   : > { %v5293_v32 = vmul.f32 %v5228_v43, %v4957_v35  ;;  %6521 = vmatmul.bf16.gmra.mxu3 %v13593_v1  ;;  %v16161_v56 = vpop.f32.mrf.mxu1 }
 0x4ac   : > { %v4804_v46 = vpop.f32.mrf.mxu0 }
 0x4ad   : > { %v16165_v6 = vpack.c.bf16 %v5293_v32, %v5292_v28  ;;  %v4858_v31 = vadd.f32 %v4804_v46, %v16076_v59  ;;  %v6867_v46 = vshll.u32 %v16176_v12, 16 }
 0x4ae   : > { %v16167_v11 = vpop.f32.mrf.mxu2  ;;  %v6487_v47 = vpop.f32.mrf.mxu3 }
 0x4af   : > { %13004 = vst [vmem:[#allocation2 + $0xb8] sm:$0xff] %v16165_v6   ;;  %7105 = vmatmul.bf16.gmra.mxu0 %v6862_v7  ;;  %v16172_v2 = vadd.f32 %v6487_v47, %v6262_v44  ;;  %v5846_v9 = vshrl.u32 %v16165_v6, 16  ;;  %v5849_v17 = vshll.u32 %v16165_v6, 16  ;;  %v4910_v35 = vadd.f32 %v15920_v33, %v4858_v31  ;;  %v13595_v7 = vld [vmem:[#allocation2 + $0x5c] sm:$0xff]   ;;  %v5238_v47 = vpop.permute.xlu0 %5237  ;;  %v5233_v31 = vpop.permute.xlu2 %5232 }
 0x4b1   : > { %v5848_v22 = vrot.slane %v5846_v9, 3  ;;  %v5851_v0 = vrot.slane %v5849_v17, 4  ;;  %v4958_v30 = vmax.f32 %v4910_v35, 0.0  ;;  %v6863_v9 = vshrl.u32 %v16146_v19, 16  ;;  %v12006_v19 = vld [vmem:[%s17434_s3 + $0xc0] sm:$0xff] }
 0x4b2   : > { %v6266_v35 = vadd.f32 %v15625_v42, %v15873_v60  ;;  %7708 = vmatpush.bf16.msrb.mxu1 %v12006_v19  ;;  %v4239_v42 = vadd.f32 %v16111_v55, %v15550_v13 }
 0x4b3   : > { %7993 = vmatmul.bf16.gmra.mxu2 %v13146_v39  ;;  %v16181_v1 = vpop.f32.mrf.mxu1  ;;  %v16183_v59 = vor.u32 %v5851_v0, %v5848_v22  ;;  %v5294_v17 = vmul.f32 %v5233_v31, %v4958_v30  ;;  %v16204_v30 = vld [vmem:[#allocation2 + $0x4c] sm:$0xff] }
 0x4b4   : > { %v4806_v36 = vpop.f32.mrf.mxu0  ;;  %v6875_v31 = vshll.u32 %v16204_v30, 16 }
 0x4b5   : > { %v4859_v43 = vadd.f32 %v4806_v36, %v4237_v3  ;;  %v5853_v5 = vsel %vm710_vm3, %v5843_v16, %v16183_v59  ;;  %v6869_v16 = vrot.slane %v6867_v46, 1  ;;  %v6865_v3 = vor.u32 %v6863_v9, %v6861_v40  ;;  %v13147_v40 = vld [vmem:[#allocation2 + $0x48] sm:$0xff]  }
 0x4b6   : > { %v6348_v28 = vpop.f32.mrf.mxu2  ;;  %v6489_v32 = vpop.f32.mrf.mxu3  ;;  %6039 = vmatmul.bf16.gmra.mxu1 %v5853_v5 }
 0x4b7   : > { %v4911_v45 = vadd.f32 %v15920_v33, %v4859_v43  ;;  %v6870_v5 = vsel %vm1313_vm2, %v6865_v3, %v6869_v16  ;;  %v13597_v3 = vld [vmem:[#allocation2 + $0x64] sm:$0xff]  }
 0x4b9   : > { %v4959_v44 = vmax.f32 %v4911_v45, 0.0 }
 0x4bb   : > { %v5295_v22 = vmul.f32 %v5238_v47, %v4959_v44  ;;  %6525 = vmatmul.bf16.gmra.mxu3 %v13595_v7  ;;  %v6007_v0 = vpop.f32.mrf.mxu1  ;;  %v6268_v44 = vadd.f32 %v15633_v63, %v15888_v15  ;;  %v5243_v63 = vpop.permute.xlu1 %5242 }
 0x4bc   : > { %v4809_v39 = vpop.f32.mrf.mxu0  ;;  %v5248_v15 = vpop.permute.xlu2 %5247 }
 0x4bd   : > { %v12496_v36 = vpack.c.bf16 %v5295_v22, %v5294_v17  ;;  %v4860_v32 = vadd.f32 %v4809_v39, %v16101_v21  ;;  %v12594_v17 = vunpack.c.h.b16 %v16165_v6 }
 0x4be   : > { %v16195_v43 = vpop.f32.mrf.mxu2  ;;  %v6491_v28 = vpop.f32.mrf.mxu3 }
 0x4bf   : > { %17511 = vst [vmem:[#allocation16_spill] sm:$0xff] %v16195_v43  ;;  %7110 = vmatmul.bf16.gmra.mxu0 %v6870_v5  ;;  %v16202_v46 = vadd.f32 %v6491_v28, %v6266_v35  ;;  %v4912_v60 = vadd.f32 %v15920_v33, %v4860_v32  ;;  %v6871_v5 = vshrl.u32 %v16176_v12, 16  ;;  %v6877_v28 = vrot.slane %v6875_v31, 1 }
 0x4c0   : > { %13005 = vst [vmem:[#allocation2 + $0xc0] sm:$0xff] %v12496_v36  }
 0x4c1   : > { %v4960_v22 = vmax.f32 %v4912_v60, 0.0  ;;  %v6873_v60 = vor.u32 %v6871_v5, %v6869_v16 }
 0x4c3   : > { %7998 = vmatmul.bf16.gmra.mxu2 %v13147_v40  ;;  %v16209_v45 = vpop.f32.mrf.mxu1  ;;  %v5296_v19 = vmul.f32 %v5243_v63, %v4960_v22  ;;  %v13619_v22 = vld [vmem:[#allocation2 + $0xc] sm:$0x8] }
 0x4c4   : > { %v4811_v53 = vpop.f32.mrf.mxu0 }
 0x4c5   : > { %v4861_v21 = vadd.f32 %v4811_v53, %v4239_v42 }
 0x4c6   : > { %v16213_v7 = vpop.f32.mrf.mxu2  ;;  %v6493_v47 = vpop.f32.mrf.mxu3 }
 0x4c7   : > { %v5499_v9 = vld [vmem:[#allocation2 + $0xc0] sm:$0xf]  ;;  %v4913_v13 = vadd.f32 %v15920_v33, %v4861_v21  ;;  %v16218_v55 = vadd.f32 %v6493_v47, %v6268_v44 }
 0x4c8   : > { %v5613_v0 = vunpack.c.l.b16 %v5499_v9 }
 0x4c9   : > { %v4961_v39 = vmax.f32 %v4913_v13, 0.0  ;;  %v13875_v13 = vld [vmem:[#allocation2 + $0xc] sm:$0xf0]  }
 0x4ca   : > { %v5638_v35 = vpack.c.b16 %v5613_v0, %v5613_v0  ;;  %v16220_v36 = vpack.c.b16 %v5613_v0, %v12594_v17  ;;  %v6878_v17 = vsel %vm1313_vm2, %v6873_v60, %v6877_v28  ;;  %v6255_v0 = vadd.f32 %v15570_v4, %v15783_v50 }
 0x4cb   : > { %v5297_v32 = vmul.f32 %v5248_v15, %v4961_v39  ;;  %6529 = vmatmul.bf16.gmra.mxu3 %v13597_v3  ;;  %v16223_v42 = vpop.f32.mrf.mxu1  ;;  %v13877_v39 = vld [vmem:[#allocation2 + $0x14] sm:$0xff]   ;;  %v13620_v15 = vor.u32 %v13875_v13, %v13619_v22  ;;  %v6275_v13 = vadd.f32 %v15687_v51, %v15956_v27 }
 0x4cc   : > { %v5855_v6 = vshrl.u32 %v5638_v35, 16  ;;  %v5858_v40 = vshll.u32 %v5638_v35, 16  ;;  %v7080_v33 = vpop.f32.mrf.mxu0  ;;  %v11984_v3 = vld [vmem:[#allocation2 + $0x54] sm:$0xff]  ;;  %v6583_v35 = vadd.f32 %v16134_v54, %v6255_v0  ;;  %v7417_v4 = vshll.u32 %v13877_v39, 16  ;;  %v13599_v54 = vld [vmem:[#allocation2 + $0x6c] sm:$0xff]  }
 0x4cd   : > { %v12501_v53 = vpack.c.bf16 %v5297_v32, %v5296_v19  ;;  %v16226_v44 = vadd.f32 %v7080_v33, %v16122_v57  ;;  %v13148_v57 = vld [vmem:[#allocation2 + $0x50] sm:$0xff]   ;;  %v6272_v19 = vadd.f32 %v15663_v18, %v15926_v61  ;;  %v7406_v60 = vshrl.u32 %v13620_v15, 16 }
 0x4ce   : > { %v5857_v21 = vrot.slane %v5855_v6, 3  ;;  %v5860_v47 = vrot.slane %v5858_v40, 4  ;;  %v6354_v9 = vpop.f32.mrf.mxu2  ;;  %v6496_v12 = vpop.f32.mrf.mxu3  ;;  %v7414_v6 = vshrl.u32 %v13877_v39, 16  ;;  %v6883_v40 = vshll.u32 %v11984_v3, 16 }
 0x4cf   : > { %13006 = vst [vmem:[#allocation2 + $0xc8] sm:$0xff] %v12501_v53   ;;  %7114 = vmatmul.bf16.gmra.mxu0 %v6878_v17  ;;  %v7409_v53 = vshll.u32 %v13620_v15, 16  ;;  %v6879_v9 = vshrl.u32 %v16204_v30, 16  ;;  %v7408_v18 = vrot.slane %v7406_v60, 3  ;;  %v13879_v15 = vld [vmem:[#allocation2 + $0x1c] sm:$0xff]  }
 0x4d0   : > { %v5861_v31 = vor.u32 %v5860_v47, %v5857_v21  ;;  %v7416_v21 = vrot.slane %v7414_v6, 3  ;;  %v7419_v47 = vrot.slane %v7417_v4, 4  ;;  %v6885_v17 = vrot.slane %v6883_v40, 1 }
 0x4d1   : > { %v7411_v61 = vrot.slane %v7409_v53, 4  ;;  %v6881_v22 = vor.u32 %v6879_v9, %v6877_v28  ;;  %v7423_v6 = vshrl.u32 %v13879_v15, 16  ;;  %v7426_v4 = vshll.u32 %v13879_v15, 16  ;;  %v13601_v53 = vld [vmem:[#allocation2 + $0x74] sm:$0xff]   ;;  %v13881_v15 = vld [vmem:[#allocation2 + $0x24] sm:$0xff]  }
 0x4d2   : > { %v5862_v16 = vsel %vm710_vm3, %v16183_v59, %v5861_v31  ;;  %v7420_v0 = vor.u32 %v7419_v47, %v7416_v21  ;;  %v6887_v47 = vshrl.u32 %v11984_v3, 16 }
 0x4d3   : > { %6043 = vmatmul.bf16.gmra.mxu1 %v5862_v16  ;;  %8002 = vmatmul.bf16.gmra.mxu2 %v13148_v57  ;;  %v6014_v63 = vpop.f32.mrf.mxu1  ;;  %v6886_v16 = vsel %vm1313_vm2, %v6881_v22, %v6885_v17  ;;  %v7412_v30 = vor.u32 %v7411_v61, %v7408_v18  ;;  %v7428_v21 = vrot.slane %v7426_v4, 4  ;;  %v6279_v22 = vadd.f32 %v15714_v62, %v15993_v20 }
 0x4d4   : > { %v7082_v5 = vpop.f32.mrf.mxu0 }
 0x4d5   : > { %v16236_v32 = vadd.f32 %v7082_v5, %v6583_v35  ;;  %v7421_v63 = vsel %vm710_vm3, %v7412_v30, %v7420_v0  ;;  %v13149_v5 = vld [vmem:[#allocation2 + $0x58] sm:$0xff]  }
 0x4d6   : > { %v16238_v50 = vpop.f32.mrf.mxu2  ;;  %v6497_v59 = vpop.f32.mrf.mxu3 }
 0x4d7   : > { %v16240_v33 = vadd.f32 %v6497_v59, %v6272_v19  ;;  %v11985_v19 = vld [vmem:[#allocation2 + $0x5c] sm:$0xff] }
 0x4d8   : > { %v6891_v60 = vshll.u32 %v11985_v19, 16 }
 0x4da   : > { %v6893_v9 = vrot.slane %v6891_v60, 1 }
 0x4db   : > { %6534 = vmatmul.bf16.gmra.mxu3 %v13599_v54  ;;  %v16243_v12 = vpop.f32.mrf.mxu1  ;;  %v7425_v54 = vrot.slane %v7423_v6, 3  ;;  %v7435_v6 = vshll.u32 %v13881_v15, 16 }
 0x4dc   : > { %v7085_v31 = vpop.f32.mrf.mxu0 }
 0x4dd   : > { %v6889_v31 = vor.u32 %v6887_v47, %v6885_v17  ;;  %v13150_v17 = vld [vmem:[#allocation2 + $0x60] sm:$0xff]  }
 0x4de   : > { %v16248_v39 = vpop.f32.mrf.mxu2  ;;  %v6500_v57 = vpop.f32.mrf.mxu3 }
 0x4df   : > { %7118 = vmatmul.bf16.gmra.mxu0 %v6886_v16  ;;  %v16250_v35 = vadd.f32 %v6500_v57, %v6275_v13  ;;  %v7429_v13 = vor.u32 %v7428_v21, %v7425_v54  ;;  %v6894_v16 = vsel %vm1313_vm2, %v6889_v31, %v6893_v9  ;;  %v7437_v54 = vrot.slane %v7435_v6, 4 }
 0x4e0   : > { %v6895_v21 = vshrl.u32 %v11985_v19, 16  ;;  %v13151_v19 = vld [vmem:[#allocation2 + $0x68] sm:$0xff]  }
 0x4e1   : > { %v7430_v3 = vsel %vm710_vm3, %v7420_v0, %v7429_v13  ;;  %v13603_v0 = vld [vmem:[#allocation2 + $0x7c] sm:$0xff]  }
 0x4e2   : > { %v6897_v31 = vor.u32 %v6895_v21, %v6893_v9  ;;  %v6285_v9 = vadd.f32 %v15745_v23, %v16027_v26 }
 0x4e3   : > { %7709 = vmatmul.bf16.vlgmr.msrb.gmra.mxu1 %v7421_v63  ;;  %8006 = vmatmul.bf16.gmra.mxu2 %v13149_v5  ;;  %v16253_v28 = vpop.f32.mrf.mxu1  ;;  %v11986_v5 = vld [vmem:[#allocation2 + $0x64] sm:$0xff] }
 0x4e4   : > { %v7086_v51 = vpop.f32.mrf.mxu0 }
 0x4e5   : > { %v16256_v27 = vadd.f32 %v7086_v51, %v16158_v8  ;;  %v7432_v51 = vshrl.u32 %v13881_v15, 16  ;;  %v13883_v15 = vld [vmem:[#allocation2 + $0x2c] sm:$0xff]  }
 0x4e6   : > { %v7973_v59 = vpop.f32.mrf.mxu2  ;;  %v6502_v40 = vpop.f32.mrf.mxu3  ;;  %v7444_v6 = vshll.u32 %v13883_v15, 16 }
 0x4e7   : > { %v6899_v40 = vshll.u32 %v11986_v5, 16 }
 0x4e8   : > { %v7446_v21 = vrot.slane %v7444_v6, 4 }
 0x4e9   : > { %v6901_v47 = vrot.slane %v6899_v40, 1 }
 0x4eb   : > { %6538 = vmatmul.bf16.gmra.mxu3 %v13601_v53  ;;  %v6020_v18 = vpop.f32.mrf.mxu1  ;;  %v7434_v53 = vrot.slane %v7432_v51, 3  ;;  %v7441_v51 = vshrl.u32 %v13883_v15, 16 }
 0x4ec   : > { %v7089_v61 = vpop.f32.mrf.mxu0 }
 0x4ed   : > { %v16261_v8 = vadd.f32 %v7089_v61, %v16172_v2  ;;  %v6281_v2 = vadd.f32 %v15722_v24, %v16002_v48  ;;  %v7438_v48 = vor.u32 %v7437_v54, %v7434_v53  ;;  %v13605_v53 = vld [vmem:[#allocation2 + $0x84] sm:$0xff]   ;;  %v7443_v54 = vrot.slane %v7441_v51, 3 }
 0x4ee   : > { %v16264_v57 = vpop.f32.mrf.mxu2  ;;  %v6504_v30 = vpop.f32.mrf.mxu3 }
 0x4ef   : > { %7123 = vmatmul.bf16.gmra.mxu0 %v6894_v16  ;;  %v16266_v63 = vadd.f32 %v6504_v30, %v6279_v22  ;;  %v6902_v22 = vsel %vm1313_vm2, %v6897_v31, %v6901_v47 }
 0x4f3   : > { %7714 = vmatmul.bf16.gmra.mxu1 %v7430_v3  ;;  %8011 = vmatmul.bf16.gmra.mxu2 %v13150_v17  ;;  %v16269_v62 = vpop.f32.mrf.mxu1  ;;  %v7439_v3 = vsel %vm710_vm3, %v7429_v13, %v7438_v48  ;;  %v11987_v17 = vld [vmem:[#allocation2 + $0x6c] sm:$0xff] }
 0x4f4   : > { %v7091_v20 = vpop.f32.mrf.mxu0 }
 0x4f6   : > { %v16273_v4 = vpop.f32.mrf.mxu2  ;;  %v6506_v59 = vpop.f32.mrf.mxu3 }
 0x4f7   : > { %17512 = vst [vmem:[#allocation23_spill] sm:$0xff] %v16273_v4  ;;  %v16275_v60 = vadd.f32 %v6506_v59, %v6281_v2  ;;  %v16494_v4 = vld [vmem:[#allocation2 + $0x20] sm:$0xff] }
 0x4fb   : > { %6542 = vmatmul.bf16.gmra.mxu3 %v13603_v0  ;;  %v16277_v18 = vpop.f32.mrf.mxu1  ;;  %v6907_v0 = vshll.u32 %v11987_v17, 16 }
 0x4fc   : > { %v7093_v61 = vpop.f32.mrf.mxu0 }
 0x4fd   : > { %v16280_v24 = vadd.f32 %v7093_v61, %v16202_v46  ;;  %v6903_v61 = vshrl.u32 %v11986_v5, 16  ;;  %v6909_v31 = vrot.slane %v6907_v0, 1 }
 0x4fe   : > { %v7979_v16 = vpop.f32.mrf.mxu2  ;;  %v6509_v30 = vpop.f32.mrf.mxu3 }
 0x4ff   : > { %7127 = vmatmul.bf16.gmra.mxu0 %v6902_v22  ;;  %v6905_v26 = vor.u32 %v6903_v61, %v6901_v47  ;;  %v7447_v16 = vor.u32 %v7446_v21, %v7443_v54  ;;  %v13607_v54 = vld [vmem:[#allocation2 + $0x8c] sm:$0xff]  }
 0x501   : > { %v6910_v30 = vsel %vm1313_vm2, %v6905_v26, %v6909_v31  ;;  %v7448_v5 = vsel %vm710_vm3, %v7438_v48, %v7447_v16  ;;  %v6911_v48 = vshrl.u32 %v11987_v17, 16 }
 0x503   : > { %7718 = vmatmul.bf16.gmra.mxu1 %v7439_v3  ;;  %8015 = vmatmul.bf16.gmra.mxu2 %v13151_v19  ;;  %v6027_v20 = vpop.f32.mrf.mxu1 }
 0x504   : > { %v7095_v2 = vpop.f32.mrf.mxu0  ;;  %v13885_v20 = vld [vmem:[#allocation2 + $0x34] sm:$0xff]  }
 0x505   : > { %v16287_v46 = vadd.f32 %v7095_v2, %v16218_v55  ;;  %v6288_v55 = vadd.f32 %v15774_v38, %v16041_v58  ;;  %v13152_v2 = vld [vmem:[#allocation2 + $0x70] sm:$0xff]   ;;  %v7450_v58 = vshrl.u32 %v13885_v20, 16  ;;  %v7453_v6 = vshll.u32 %v13885_v20, 16 }
 0x506   : > { %v16289_v59 = vpop.f32.mrf.mxu2  ;;  %v6510_v40 = vpop.f32.mrf.mxu3 }
 0x507   : > { %17513 = vst [vmem:[#allocation24_spill] sm:$0xff] %v16289_v59  ;;  %v16291_v13 = vadd.f32 %v6510_v40, %v6285_v9  ;;  %v11988_v9 = vld [vmem:[#allocation2 + $0x74] sm:$0xff]  ;;  %v7452_v21 = vrot.slane %v7450_v58, 3  ;;  %v7455_v61 = vrot.slane %v7453_v6, 4  ;;  %v13887_v6 = vld [vmem:[#allocation2 + $0x3c] sm:$0xff]  }
 0x509   : > { %v7456_v20 = vor.u32 %v7455_v61, %v7452_v21  ;;  %v7462_v21 = vshll.u32 %v13887_v6, 16 }
 0x50b   : > { %6547 = vmatmul.bf16.gmra.mxu3 %v13605_v53  ;;  %v16293_v22 = vpop.f32.mrf.mxu1  ;;  %v6915_v53 = vshll.u32 %v11988_v9, 16 }
 0x50c   : > { %v7098_v23 = vpop.f32.mrf.mxu0 }
 0x50d   : > { %v6917_v23 = vrot.slane %v6915_v53, 1  ;;  %v6294_v53 = vadd.f32 %v15831_v41, %v16071_v25  ;;  %v7464_v25 = vrot.slane %v7462_v21, 4  ;;  %v11990_v21 = vld [vmem:[#allocation2 + $0x84] sm:$0xff] }
 0x50e   : > { %v16298_v3 = vpop.f32.mrf.mxu2  ;;  %v6513_v15 = vpop.f32.mrf.mxu3 }
 0x50f   : > { %17514 = vst [vmem:[#allocation25_spill] sm:$0xff] %v16298_v3  ;;  %7131 = vmatmul.bf16.gmra.mxu0 %v6910_v30  ;;  %v16300_v19 = vadd.f32 %v6513_v15, %v6288_v55  ;;  %v6913_v30 = vor.u32 %v6911_v48, %v6909_v31  ;;  %v12053_v15 = vld [vmem:[%s17434_s3 + $0x178] sm:$0xff]  ;;  %v7457_v31 = vsel %vm710_vm3, %v7447_v16, %v7456_v20 }
 0x510   : > { %8561 = vmatpush.bf16.msra.mxu3 %v12053_v15  ;;  %v12061_v16 = vld [vmem:[%s17434_s3 + $0x1b8] sm:$0xff] }
 0x511   : > { %9191 = vmatpush.bf16.msra.mxu0 %v12061_v16  ;;  %v13609_v15 = vld [vmem:[#allocation2 + $0x94] sm:$0xff]  }
 0x513   : > { %7722 = vmatmul.bf16.gmra.mxu1 %v7448_v5  ;;  %8019 = vmatmul.bf16.gmra.mxu2 %v13152_v2  ;;  %v16303_v47 = vpop.f32.mrf.mxu1  ;;  %v6918_v2 = vsel %vm1313_vm2, %v6913_v30, %v6917_v23 }
 0x514   : > { %v7099_v51 = vpop.f32.mrf.mxu0 }
 0x515   : > { %v16306_v38 = vadd.f32 %v7099_v51, %v16240_v33  ;;  %v6292_v33 = vadd.f32 %v15818_v10, %v16061_v29  ;;  %v12101_v10 = vld [vmem:[%s17434_s3 + $0x238] sm:$0xff] }
 0x516   : > { %v7986_v40 = vpop.f32.mrf.mxu2  ;;  %v6515_v0 = vpop.f32.mrf.mxu3  ;;  %10051 = vmatpush.bf16.msra.mxu2 %v12101_v10 }
 0x517   : > { %v13153_v40 = vld [vmem:[#allocation2 + $0x78] sm:$0xff]  }
 0x518   : > { %v11989_v0 = vld [vmem:[#allocation2 + $0x7c] sm:$0xff] }
 0x51b   : > { %6551 = vmatmul.bf16.gmra.mxu3 %v13607_v54  ;;  %v6033_v26 = vpop.f32.mrf.mxu1  ;;  %v7459_v54 = vshrl.u32 %v13887_v6, 16 }
 0x51c   : > { %v7102_v55 = vpop.f32.mrf.mxu0  ;;  %v6923_v26 = vshll.u32 %v11989_v0, 16 }
 0x51d   : > { %v16314_v5 = vadd.f32 %v7102_v55, %v16250_v35  ;;  %v12069_v55 = vld [vmem:[%s17434_s3 + $0x1f8] sm:$0xff]  ;;  %v7461_v41 = vrot.slane %v7459_v54, 3  ;;  %v13889_v54 = vld [vmem:[#allocation2 + $0x44] sm:$0xff]  }
 0x51e   : > { %v16317_v51 = vpop.f32.mrf.mxu2  ;;  %v6517_v17 = vpop.f32.mrf.mxu3  ;;  %9449 = vmatpush.bf16.msra.mxu1 %v12069_v55 }
 0x51f   : > { %17515 = vst [vmem:[#allocation26_spill] sm:$0xff] %v16317_v51  ;;  %7136 = vmatmul.bf16.gmra.mxu0 %v6918_v2  ;;  %v16319_v58 = vadd.f32 %v6517_v17, %v6292_v33  ;;  %v6919_v33 = vshrl.u32 %v11988_v9, 16  ;;  %v6925_v2 = vrot.slane %v6923_v26, 1  ;;  %v7465_v10 = vor.u32 %v7464_v25, %v7461_v41  ;;  %v13154_v9 = vld [vmem:[#allocation2 + $0x80] sm:$0xff]  }
 0x520   : > { %v7471_v41 = vshll.u32 %v13889_v54, 16 }
 0x521   : > { %v6921_v6 = vor.u32 %v6919_v33, %v6917_v23  ;;  %v7466_v16 = vsel %vm710_vm3, %v7456_v20, %v7465_v10  ;;  %v6298_v23 = vadd.f32 %v15858_v49, %v16094_v14  ;;  %v17518_v49 = vld [vmem:[#allocation10_spill] sm:$0xff]  ;;  %v17519_v14 = vld [vmem:[#allocation19_spill] sm:$0xff] }
 0x523   : > { %7727 = vmatmul.bf16.gmra.mxu1 %v7457_v31  ;;  %8024 = vmatmul.bf16.gmra.mxu2 %v13153_v40  ;;  %v16325_v29 = vpop.f32.mrf.mxu1 }
 0x524   : > { %v7104_v35 = vpop.f32.mrf.mxu0 }
 0x525   : > { %v6926_v35 = vsel %vm1313_vm2, %v6921_v6, %v6925_v2  ;;  %v13611_v6 = vld [vmem:[#allocation2 + $0x9c] sm:$0xff]  }
 0x526   : > { %v16332_v61 = vpop.f32.mrf.mxu2  ;;  %v6519_v48 = vpop.f32.mrf.mxu3 }
 0x527   : > { %17516 = vst [vmem:[#allocation27_spill] sm:$0xff] %v16332_v61  ;;  %v16337_v30 = vadd.f32 %v6519_v48, %v6294_v53 }
 0x52b   : > { %6555 = vmatmul.bf16.gmra.mxu3 %v13609_v15  ;;  %v16339_v17 = vpop.f32.mrf.mxu1  ;;  %v7468_v15 = vshrl.u32 %v13889_v54, 16 }
 0x52c   : > { %v7106_v31 = vpop.f32.mrf.mxu0 }
 0x52d   : > { %v16342_v40 = vadd.f32 %v7106_v31, %v16266_v63  ;;  %v6931_v31 = vshll.u32 %v11990_v21, 16 }
 0x52e   : > { %v7992_v53 = vpop.f32.mrf.mxu2  ;;  %v6522_v48 = vpop.f32.mrf.mxu3 }
 0x52f   : > { %7140 = vmatmul.bf16.gmra.mxu0 %v6926_v35  ;;  %v7470_v35 = vrot.slane %v7468_v15, 3  ;;  %v7473_v53 = vrot.slane %v7471_v41, 4  ;;  %v6927_v48 = vshrl.u32 %v11989_v0, 16  ;;  %v13891_v41 = vld [vmem:[#allocation2 + $0x4c] sm:$0xff]  }
 0x530   : > { %v13155_v0 = vld [vmem:[#allocation2 + $0x88] sm:$0xff]  }
 0x533   : > { %7731 = vmatmul.bf16.gmra.mxu1 %v7466_v16  ;;  %8028 = vmatmul.bf16.gmra.mxu2 %v13154_v9  ;;  %v6040_v26 = vpop.f32.mrf.mxu1  ;;  %v6933_v16 = vrot.slane %v6931_v31, 1 }
 0x534   : > { %v7108_v55 = vpop.f32.mrf.mxu0  ;;  %v6929_v26 = vor.u32 %v6927_v48, %v6925_v2 }
 0x535   : > { %v16349_v63 = vadd.f32 %v7108_v55, %v16275_v60  ;;  %v6301_v60 = vadd.f32 %v17519_v14, %v17518_v49  ;;  %v7474_v55 = vor.u32 %v7473_v53, %v7470_v35  ;;  %v7480_v35 = vshll.u32 %v13891_v41, 16 }
 0x536   : > { %v16351_v25 = vpop.f32.mrf.mxu2  ;;  %v6523_v33 = vpop.f32.mrf.mxu3  ;;  %v6934_v54 = vsel %vm1313_vm2, %v6929_v26, %v6933_v16 }
 0x537   : > { %17517 = vst [vmem:[#allocation28_spill] sm:$0xff] %v16351_v25  ;;  %v16353_v20 = vadd.f32 %v6523_v33, %v6298_v23  ;;  %v7475_v15 = vsel %vm710_vm3, %v7465_v10, %v7474_v55  ;;  %v11991_v33 = vld [vmem:[#allocation2 + $0x8c] sm:$0xff]  ;;  %v7482_v14 = vrot.slane %v7480_v35, 4  ;;  %v6935_v10 = vshrl.u32 %v11990_v21, 16 }
 0x53b   : > { %6560 = vmatmul.bf16.gmra.mxu3 %v13611_v6  ;;  %v7477_v6 = vshrl.u32 %v13891_v41, 16  ;;  %v16366_v26 = vpop.f32.mrf.mxu1 }
 0x53c   : > { %v7111_v9 = vpop.f32.mrf.mxu0  ;;  %17521 = vst [vmem:[#allocation19_spill] sm:$0xff] %v16366_v26 }
 0x53d   : > { %v6939_v9 = vshll.u32 %v11991_v33, 16  ;;  %v7479_v49 = vrot.slane %v7477_v6, 3 }
 0x53e   : > { %v16358_v61 = vpop.f32.mrf.mxu2  ;;  %v6526_v25 = vpop.f32.mrf.mxu3 }
 0x53f   : > { %17520 = vst [vmem:[#allocation10_spill] sm:$0xff] %v16358_v61  ;;  %7144 = vmatmul.bf16.gmra.mxu0 %v6934_v54  ;;  %v16360_v23 = vadd.f32 %v6526_v25, %v6301_v60  ;;  %v13613_v25 = vld [vmem:[#allocation2 + $0xa4] sm:$0xff]   ;;  %v6941_v60 = vrot.slane %v6939_v9, 1 }
 0x543   : > { %7735 = vmatmul.bf16.gmra.mxu1 %v7475_v15  ;;  %8032 = vmatmul.bf16.gmra.mxu2 %v13155_v0  ;;  %v6937_v15 = vor.u32 %v6935_v10, %v6933_v16  ;;  %v17522_v0 = vld [vmem:[#allocation20_spill] sm:$0xff] }
 0x544   : > { %v7112_v2 = vpop.f32.mrf.mxu0  ;;  %v6305_v41 = vadd.f32 %v17522_v0, %v16129_v52  ;;  %v13156_v52 = vld [vmem:[#allocation2 + $0x90] sm:$0xff]  }
 0x545   : > { %v16364_v31 = vadd.f32 %v7112_v2, %v16291_v13  ;;  %v12052_v13 = vld [vmem:[%s17434_s3 + $0x170] sm:$0xff] }
 0x546   : > { %v7999_v53 = vpop.f32.mrf.mxu2  ;;  %v6528_v48 = vpop.f32.mrf.mxu3  ;;  %8562 = vmatpush.bf16.msra.mxu3 %v12052_v13  ;;  %v16384_v10 = vld [vmem:[#allocation2 + $0x94] sm:$0xff] }
 0x547   : > { %v7483_v53 = vor.u32 %v7482_v14, %v7479_v49  ;;  %v6942_v48 = vsel %vm1313_vm2, %v6937_v15, %v6941_v60  ;;  %v12060_v15 = vld [vmem:[%s17434_s3 + $0x1b0] sm:$0xff] }
 0x548   : > { %9192 = vmatpush.bf16.msra.mxu0 %v12060_v15 }
 0x549   : > { %v7484_v9 = vsel %vm710_vm3, %v7474_v55, %v7483_v53  ;;  %v12051_v55 = vld [vmem:[%s17434_s3 + $0x168] sm:$0xff] }
 0x54a   : > { %8563 = vmatpush.bf16.msra.mxu3 %v12051_v55 }
 0x54b   : > { %6564 = vmatmul.bf16.gmra.mxu3 %v13613_v25  ;;  %v13893_v25 = vld [vmem:[#allocation2 + $0x54] sm:$0xff]  }
 0x54c   : > { %v7115_v54 = vpop.f32.mrf.mxu0  ;;  %v7486_v14 = vshrl.u32 %v13893_v25, 16 }
 0x54d   : > { %v16374_v2 = vadd.f32 %v7115_v54, %v16300_v19  ;;  %v12100_v19 = vld [vmem:[%s17434_s3 + $0x230] sm:$0xff]  ;;  %v7489_v54 = vshll.u32 %v13893_v25, 16 }
 0x54e   : > { %v16377_v6 = vpop.f32.mrf.mxu2  ;;  %v6530_v21 = vpop.f32.mrf.mxu3  ;;  %10052 = vmatpush.bf16.msra.mxu2 %v12100_v19  ;;  %v13615_v25 = vld [vmem:[#allocation2 + $0xac] sm:$0xff]  }
 0x54f   : > { %17523 = vst [vmem:[#allocation20_spill] sm:$0xff] %v16377_v6  ;;  %7149 = vmatmul.bf16.gmra.mxu0 %v6942_v48  ;;  %v16381_v16 = vadd.f32 %v6530_v21, %v6305_v41  ;;  %v6947_v41 = vshll.u32 %v16384_v10, 16  ;;  %v12068_v21 = vld [vmem:[%s17434_s3 + $0x1f0] sm:$0xff]  ;;  %v7491_v19 = vrot.slane %v7489_v54, 4 }
 0x550   : > { %v16379_v35 = vpop.f32.mrf.mxu1  ;;  %9450 = vmatpush.bf16.msra.mxu1 %v12068_v21  ;;  %v12048_v21 = vld [vmem:[%s17434_s3 + $0x150] sm:$0xff] }
 0x553   : > { %7740 = vmatmul.bf16.gmra.mxu1 %v7484_v9  ;;  %8037 = vmatmul.bf16.gmra.mxu2 %v13156_v52  ;;  %v12050_v9 = vld [vmem:[%s17434_s3 + $0x160] sm:$0xff]  ;;  %v7488_v52 = vrot.slane %v7486_v14, 3 }
 0x554   : > { %v7117_v49 = vpop.f32.mrf.mxu0  ;;  %8564 = vmatpush.bf16.msra.mxu3 %v12050_v9 }
 0x555   : > { %v6943_v49 = vshrl.u32 %v11991_v33, 16  ;;  %v7492_v55 = vor.u32 %v7491_v19, %v7488_v52 }
 0x556   : > { %v16395_v13 = vpop.f32.mrf.mxu2  ;;  %v16397_v0 = vpop.f32.mrf.mxu3 }
 0x557   : > { %17524 = vst [vmem:[#allocation29_spill] sm:$0xff] %v16395_v13  ;;  %v6949_v13 = vrot.slane %v6947_v41, 1  ;;  %v6945_v61 = vor.u32 %v6943_v49, %v6941_v60  ;;  %v7493_v60 = vsel %vm710_vm3, %v7483_v53, %v7492_v55  ;;  %v13895_v41 = vld [vmem:[#allocation2 + $0x5c] sm:$0xff]  }
 0x558   : > { %v6046_v48 = vpop.f32.mrf.mxu1  ;;  %v7498_v53 = vshll.u32 %v13895_v41, 16 }
 0x559   : > { %v12049_v48 = vld [vmem:[%s17434_s3 + $0x158] sm:$0xff]  ;;  %v6950_v51 = vsel %vm1313_vm2, %v6945_v61, %v6949_v13 }
 0x55a   : > { %8565 = vmatpush.bf16.msra.mxu3 %v12049_v48  ;;  %v12046_v48 = vld [vmem:[%s17434_s3 + $0x140] sm:$0xff] }
 0x55b   : > { %6568 = vmatmul.bf16.gmra.mxu3 %v13615_v25 }
 0x55c   : > { %v7119_v6 = vpop.f32.mrf.mxu0 }
 0x55d   : > { %v16407_v15 = vadd.f32 %v7119_v6, %v16319_v58  ;;  %v13157_v58 = vld [vmem:[#allocation2 + $0x98] sm:$0xff]  }
 0x55e   : > { %v8005_v3 = vpop.f32.mrf.mxu2  ;;  %v6535_v14 = vpop.f32.mrf.mxu3  ;;  %v11993_v6 = vld [vmem:[#allocation2 + $0x9c] sm:$0xff]  ;;  %8566 = vmatpush.bf16.msra.mxu3 %v12048_v21 }
 0x55f   : > { %7153 = vmatmul.bf16.gmra.mxu0 %v6950_v51  ;;  %v12047_v3 = vld [vmem:[%s17434_s3 + $0x148] sm:$0xff]  ;;  %v7495_v51 = vshrl.u32 %v13895_v41, 16  ;;  %v6955_v52 = vshll.u32 %v11993_v6, 16  ;;  %v13616_v14 = vld [vmem:[#allocation2 + $0xb4] sm:$0xff]  }
 0x560   : > { %v7710_v33 = vpop.f32.mrf.mxu1 }
 0x561   : > { %v16414_v54 = vadd.f32 %v7710_v33, %v16226_v44  ;;  %v7497_v33 = vrot.slane %v7495_v51, 3  ;;  %v6957_v41 = vrot.slane %v6955_v52, 1  ;;  %v13158_v52 = vld [vmem:[#allocation2 + $0xa0] sm:$0xff]  }
 0x562   : > { %8567 = vmatpush.bf16.msra.mxu3 %v12047_v3 }
 0x563   : > { %7744 = vmatmul.bf16.gmra.mxu1 %v7493_v60  ;;  %8041 = vmatmul.bf16.gmra.mxu2 %v13157_v58  ;;  %v6951_v60 = vshrl.u32 %v16384_v10, 16 }
 0x564   : > { %v7121_v61 = vpop.f32.mrf.mxu0 }
 0x565   : > { %v16424_v44 = vadd.f32 %v7121_v61, %v16337_v30  ;;  %v7500_v30 = vrot.slane %v7498_v53, 4  ;;  %v6953_v21 = vor.u32 %v6951_v60, %v6949_v13  ;;  %v17526_v61 = vld [vmem:[#allocation7_spill] sm:$0xff] }
 0x566   : > { %v16426_v9 = vpop.f32.mrf.mxu2  ;;  %v16428_v25 = vpop.f32.mrf.mxu3  ;;  %8568 = vmatpush.bf16.msra.mxu3 %v12046_v48  ;;  %v13897_v53 = vld [vmem:[#allocation2 + $0x64] sm:$0xff]  }
 0x567   : > { %17525 = vst [vmem:[#allocation30_spill] sm:$0xff] %v16426_v9  ;;  %v6314_v9 = vadd.f32 %v17526_v61, %v16181_v1  ;;  %v6958_v3 = vsel %vm1313_vm2, %v6953_v21, %v6957_v41  ;;  %v16445_v13 = vld [vmem:[#allocation2 + $0xa4] sm:$0xff]  ;;  %v6959_v21 = vshrl.u32 %v11993_v6, 16 }
 0x568   : > { %v7712_v19 = vpop.f32.mrf.mxu1 }
 0x569   : > { %v16431_v49 = vadd.f32 %v7712_v19, %v16236_v32  ;;  %v7501_v32 = vor.u32 %v7500_v30, %v7497_v33  ;;  %v7507_v33 = vshll.u32 %v13897_v53, 16 }
 0x56b   : > { %6573 = vmatmul.bf16.gmra.mxu3 %v13616_v14  ;;  %v7502_v10 = vsel %vm710_vm3, %v7492_v55, %v7501_v32  ;;  %v7504_v14 = vshrl.u32 %v13897_v53, 16 }
 0x56c   : > { %v7124_v58 = vpop.f32.mrf.mxu0 }
 0x56d   : > { %v7506_v55 = vrot.slane %v7504_v14, 3  ;;  %v7509_v58 = vrot.slane %v7507_v33, 4  ;;  %v16463_v33 = vld [vmem:[#allocation2 + $0x18] sm:$0xff] }
 0x56e   : > { %v16440_v19 = vpop.f32.mrf.mxu2  ;;  %v6539_v59 = vpop.f32.mrf.mxu3 }
 0x56f   : > { %17527 = vst [vmem:[#allocation7_spill] sm:$0xff] %v16440_v19  ;;  %7157 = vmatmul.bf16.gmra.mxu0 %v6958_v3  ;;  %v16442_v51 = vadd.f32 %v6539_v59, %v6314_v9  ;;  %v6967_v19 = vshrl.u32 %v16445_v13, 16 }
 0x570   : > { %v7715_v43 = vpop.f32.mrf.mxu1 }
 0x571   : > { %v6963_v43 = vshll.u32 %v16445_v13, 16  ;;  %v17531_v13 = vld [vmem:[#allocation21_spill] sm:$0xff] }
 0x573   : > { %7748 = vmatmul.bf16.gmra.mxu1 %v7502_v10  ;;  %8045 = vmatmul.bf16.gmra.mxu2 %v13158_v52  ;;  %v6965_v61 = vrot.slane %v6963_v43, 1  ;;  %v6961_v10 = vor.u32 %v6959_v21, %v6957_v41  ;;  %v17528_v52 = vld [vmem:[#allocation11_spill] sm:$0xff] }
 0x574   : > { %v7125_v48 = vpop.f32.mrf.mxu0  ;;  %v6318_v53 = vadd.f32 %v17528_v52, %v16209_v45  ;;  %v12099_v21 = vld [vmem:[%s17434_s3 + $0x228] sm:$0xff] }
 0x575   : > { %v16448_v1 = vadd.f32 %v7125_v48, %v16353_v20  ;;  %v12022_v20 = vld [vmem:[#allocation2 + $0x10] sm:$0xff]  ;;  %10053 = vmatpush.bf16.msra.mxu2 %v12099_v21 }
 0x576   : > { %v8012_v30 = vpop.f32.mrf.mxu2  ;;  %v6541_v60 = vpop.f32.mrf.mxu3  ;;  %v8296_v43 = vshll.u32 %v12022_v20, 16 }
 0x577   : > { %v7510_v30 = vor.u32 %v7509_v58, %v7506_v55  ;;  %v6966_v60 = vsel %vm1313_vm2, %v6961_v10, %v6965_v61  ;;  %v8301_v55 = vshll.u32 %v16463_v33, 16  ;;  %v16472_v58 = vld [vmem:[#allocation2 + $0xac] sm:$0xff] }
 0x578   : > { %v7716_v59 = vpop.f32.mrf.mxu1  ;;  %v8298_v10 = vrot.slane %v8296_v43, 1  ;;  %v12067_v43 = vld [vmem:[%s17434_s3 + $0x1e8] sm:$0xff] }
 0x579   : > { %v16452_v9 = vadd.f32 %v7716_v59, %v16256_v27  ;;  %v7511_v45 = vsel %vm710_vm3, %v7501_v32, %v7510_v30  ;;  %v13159_v59 = vld [vmem:[#allocation2 + $0xa8] sm:$0xff]   ;;  %9451 = vmatpush.bf16.msra.mxu1 %v12067_v43  ;;  %v16503_v43 = vld [vmem:[#allocation2 + $0xb4] sm:$0xff] }
 0x57a   : > { %v12059_v32 = vld [vmem:[%s17434_s3 + $0x1a8] sm:$0xff] }
 0x57b   : > { %6577 = vmatmul.bf16.gmra.mxu3 %v16220_v36  ;;  %9193 = vmatpush.bf16.msra.mxu0 %v12059_v32 }
 0x57c   : > { %v7128_v3 = vpop.f32.mrf.mxu0 }
 0x57d   : > { %v16458_v48 = vadd.f32 %v7128_v3, %v16360_v23  ;;  %v13899_v23 = vld [vmem:[#allocation2 + $0x6c] sm:$0xff]  }
 0x57e   : > { %v16461_v27 = vpop.f32.mrf.mxu2  ;;  %v6543_v14 = vpop.f32.mrf.mxu3  ;;  %v7516_v52 = vshll.u32 %v13899_v23, 16 }
 0x57f   : > { %17529 = vst [vmem:[#allocation11_spill] sm:$0xff] %v16461_v27  ;;  %7162 = vmatmul.bf16.gmra.mxu0 %v6966_v60  ;;  %v16465_v36 = vadd.f32 %v6543_v14, %v6318_v53  ;;  %v8294_v14 = vshrl.u32 %v12022_v20, 16 }
 0x580   : > { %v7719_v6 = vpop.f32.mrf.mxu1  ;;  %v7518_v21 = vrot.slane %v7516_v52, 4 }
 0x581   : > { %v16468_v41 = vadd.f32 %v7719_v6, %v16261_v8  ;;  %v7513_v8 = vshrl.u32 %v13899_v23, 16  ;;  %v8303_v6 = vrot.slane %v8301_v55, 1  ;;  %v6969_v55 = vor.u32 %v6967_v19, %v6965_v61  ;;  %v13901_v61 = vld [vmem:[#allocation2 + $0x74] sm:$0xff]  }
 0x583   : > { %7753 = vmatmul.bf16.gmra.mxu1 %v7511_v45  ;;  %8050 = vmatmul.bf16.gmra.mxu2 %v13159_v59  ;;  %v6971_v45 = vshll.u32 %v16472_v58, 16  ;;  %v8299_v59 = vor.u32 %v8298_v10, %v8294_v14  ;;  %v7515_v23 = vrot.slane %v7513_v8, 3 }
 0x584   : > { %v7130_v3 = vpop.f32.mrf.mxu0 }
 0x585   : > { %v8304_v3 = vsel %vm1313_vm2, %v8299_v59, %v8303_v6  ;;  %v8309_v59 = vshll.u32 %v16494_v4, 16 }
 0x586   : > { %v16480_v53 = vpop.f32.mrf.mxu2  ;;  %v16482_v60 = vpop.f32.mrf.mxu3 }
 0x587   : > { %17530 = vst [vmem:[#allocation31_spill] sm:$0xff] %v16480_v53  ;;  %v6973_v53 = vrot.slane %v6971_v45, 1  ;;  %v6307_v45 = vadd.f32 %v17531_v13, %v16139_v34 }
 0x588   : > { %v7721_v27 = vpop.f32.mrf.mxu1 }
 0x589   : > { %v7519_v27 = vor.u32 %v7518_v21, %v7515_v23  ;;  %v6974_v10 = vsel %vm1313_vm2, %v6969_v55, %v6973_v53  ;;  %v6599_v23 = vadd.f32 %v16397_v0, %v6307_v45 }
 0x58b   : > { %8569 = vmatmul.bf16.vlgmr.msra.gmra.mxu3 %v8304_v3  ;;  %v7520_v19 = vsel %vm710_vm3, %v7510_v30, %v7519_v27  ;;  %v8305_v30 = vshrl.u32 %v16463_v33, 16  ;;  %v17534_v33 = vld [vmem:[#allocation8_spill] sm:$0xff] }
 0x58c   : > { %v7132_v20 = vpop.f32.mrf.mxu0 }
 0x58d   : > { %v16491_v26 = vadd.f32 %v7132_v20, %v16381_v16  ;;  %v13160_v16 = vld [vmem:[#allocation2 + $0xb0] sm:$0xff]   ;;  %v7525_v20 = vshll.u32 %v13901_v61, 16  ;;  %v8307_v0 = vor.u32 %v8305_v30, %v8303_v6  ;;  %v16529_v30 = vld [vmem:[#allocation2 + $0x28] sm:$0xff] }
 0x58e   : > { %v8018_v32 = vpop.f32.mrf.mxu2  ;;  %v6548_v14 = vpop.f32.mrf.mxu3 }
 0x58f   : > { %7166 = vmatmul.bf16.gmra.mxu0 %v6974_v10  ;;  %v8311_v10 = vrot.slane %v8309_v59, 1  ;;  %v6979_v32 = vshll.u32 %v16503_v43, 16  ;;  %v7527_v45 = vrot.slane %v7525_v20, 4  ;;  %v6327_v59 = vadd.f32 %v17534_v33, %v16253_v28  ;;  %v12057_v28 = vld [vmem:[%s17434_s3 + $0x198] sm:$0xff] }
 0x590   : > { %v7723_v8 = vpop.f32.mrf.mxu1 }
 0x591   : > { %v16497_v52 = vadd.f32 %v7723_v8, %v16280_v24  ;;  %v7522_v24 = vshrl.u32 %v13901_v61, 16  ;;  %v6975_v61 = vshrl.u32 %v16472_v58, 16 }
 0x593   : > { %7757 = vmatmul.bf16.gmra.mxu1 %v7520_v19  ;;  %8054 = vmatmul.bf16.gmra.mxu2 %v13160_v16  ;;  %v7524_v13 = vrot.slane %v7522_v24, 3  ;;  %v8312_v19 = vsel %vm1313_vm2, %v8307_v0, %v8311_v10  ;;  %v6981_v16 = vrot.slane %v6979_v32, 1 }
 0x594   : > { %v7134_v21 = vpop.f32.mrf.mxu0 }
 0x595   : > { %v16506_v3 = vadd.f32 %v7134_v21, %v6599_v23  ;;  %v6977_v21 = vor.u32 %v6975_v61, %v6973_v53  ;;  %v12098_v53 = vld [vmem:[%s17434_s3 + $0x220] sm:$0xff]  ;;  %v8317_v61 = vshll.u32 %v16529_v30, 16 }
 0x596   : > { %v16508_v55 = vpop.f32.mrf.mxu2  ;;  %v16510_v34 = vpop.f32.mrf.mxu3  ;;  %10054 = vmatpush.bf16.msra.mxu2 %v12098_v53  ;;  %v8313_v53 = vshrl.u32 %v16494_v4, 16 }
 0x597   : > { %17532 = vst [vmem:[#allocation21_spill] sm:$0xff] %v16508_v55  ;;  %v16521_v55 = vor.u32 %v7527_v45, %v7524_v13  ;;  %v6982_v6 = vsel %vm1313_vm2, %v6977_v21, %v6981_v16  ;;  %v13903_v45 = vld [vmem:[#allocation2 + $0x7c] sm:$0xff]  }
 0x598   : > { %v7725_v14 = vpop.f32.mrf.mxu1 }
 0x599   : > { %v16515_v8 = vadd.f32 %v7725_v14, %v16287_v46  ;;  %v12058_v46 = vld [vmem:[%s17434_s3 + $0x1a0] sm:$0xff]  ;;  %v7529_v13 = vsel %vm710_vm3, %v7519_v27, %v16521_v55  ;;  %v12056_v27 = vld [vmem:[%s17434_s3 + $0x190] sm:$0xff] }
 0x59a   : > { %9194 = vmatpush.bf16.msra.mxu0 %v12058_v46  ;;  %v17536_v14 = vld [vmem:[#allocation22_spill] sm:$0xff]  ;;  %v7531_v46 = vshrl.u32 %v13903_v45, 16 }
 0x59b   : > { %17533 = vst [vmem:[#allocation32_spill] sm:$0xff] %v16515_v8  ;;  %8574 = vmatmul.bf16.gmra.mxu3 %v8312_v19  ;;  %v6311_v0 = vadd.f32 %v17536_v14, %v16161_v56  ;;  %v13161_v19 = vld [vmem:[#allocation2 + $0xb8] sm:$0xff]   ;;  %v7534_v56 = vshll.u32 %v13903_v45, 16  ;;  %v12055_v45 = vld [vmem:[%s17434_s3 + $0x188] sm:$0xff] }
 0x59c   : > { %v7137_v23 = vpop.f32.mrf.mxu0 }
 0x59d   : > { %v16544_v23 = vld [vmem:[#allocation2 + $0xbc] sm:$0xff]  ;;  %v6600_v21 = vadd.f32 %v16428_v25, %v6311_v0  ;;  %v8319_v25 = vrot.slane %v8317_v61, 1  ;;  %v7536_v4 = vrot.slane %v7534_v56, 4  ;;  %v17538_v56 = vld [vmem:[#allocation15_spill] sm:$0xff] }
 0x59e   : > { %v16527_v24 = vpop.f32.mrf.mxu2  ;;  %v6552_v20 = vpop.f32.mrf.mxu3  ;;  %9195 = vmatpush.bf16.msra.mxu0 %v12057_v28  ;;  %v6987_v14 = vshll.u32 %v16544_v23, 16 }
 0x59f   : > { %17535 = vst [vmem:[#allocation8_spill] sm:$0xff] %v16527_v24  ;;  %7170 = vmatmul.bf16.gmra.mxu0 %v6982_v6  ;;  %v16531_v32 = vadd.f32 %v6552_v20, %v6327_v59  ;;  %v12097_v6 = vld [vmem:[%s17434_s3 + $0x218] sm:$0xff] }
 0x5a0   : > { %v7728_v58 = vpop.f32.mrf.mxu1  ;;  %10055 = vmatpush.bf16.msra.mxu2 %v12097_v6  ;;  %v6989_v6 = vrot.slane %v6987_v14, 1  ;;  %v16611_v24 = vld [vmem:[#allocation2 + $0x38] sm:$0xff] }
 0x5a2   : > { %9196 = vmatpush.bf16.msra.mxu0 %v12056_v27 }
 0x5a3   : > { %7761 = vmatmul.bf16.gmra.mxu1 %v7529_v13  ;;  %8058 = vmatmul.bf16.gmra.mxu2 %v13161_v19  ;;  %v8315_v13 = vor.u32 %v8313_v53, %v8311_v10  ;;  %v12096_v19 = vld [vmem:[%s17434_s3 + $0x210] sm:$0xff] }
 0x5a4   : > { %v7138_v33 = vpop.f32.mrf.mxu0  ;;  %10056 = vmatpush.bf16.msra.mxu2 %v12096_v19 }
 0x5a5   : > { %v16547_v59 = vadd.f32 %v7138_v33, %v6600_v21  ;;  %v7533_v21 = vrot.slane %v7531_v46, 3  ;;  %v8320_v61 = vsel %vm1313_vm2, %v8315_v13, %v8319_v25  ;;  %v6983_v33 = vshrl.u32 %v16503_v43, 16  ;;  %v12095_v46 = vld [vmem:[%s17434_s3 + $0x208] sm:$0xff]  ;;  %v16582_v13 = vld [vmem:[#allocation2 + $0x30] sm:$0xff] }
 0x5a6   : > { %v8025_v20 = vpop.f32.mrf.mxu2  ;;  %v6554_v58 = vpop.f32.mrf.mxu3  ;;  %9197 = vmatpush.bf16.msra.mxu0 %v12055_v45 }
 0x5a7   : > { %v6985_v27 = vor.u32 %v6983_v33, %v6981_v16  ;;  %v12054_v20 = vld [vmem:[%s17434_s3 + $0x180] sm:$0xff]  ;;  %v6331_v58 = vadd.f32 %v17538_v56, %v16269_v62  ;;  %v7537_v53 = vor.u32 %v7536_v4, %v7533_v21 }
 0x5a8   : > { %v7729_v28 = vpop.f32.mrf.mxu1  ;;  %10057 = vmatpush.bf16.msra.mxu2 %v12095_v46  ;;  %v12094_v62 = vld [vmem:[%s17434_s3 + $0x200] sm:$0xff] }
 0x5a9   : > { %v16558_v0 = vadd.f32 %v7729_v28, %v16306_v38  ;;  %v6662_v38 = vld [vmem:[#allocation2 + $0xc4] sm:$0x1]  ;;  %v6990_v14 = vsel %vm1313_vm2, %v6985_v27, %v6989_v6 }
 0x5aa   : > { %v6777_v45 = vunpack.c.l.b16 %v6662_v38  ;;  %9198 = vmatpush.bf16.msra.mxu0 %v12054_v20  ;;  %v13905_v21 = vld [vmem:[#allocation2 + $0x84] sm:$0xff]   ;;  %v8325_v38 = vshll.u32 %v16582_v13, 16 }
 0x5ab   : > { %17537 = vst [vmem:[#allocation22_spill] sm:$0xff] %v16558_v0  ;;  %8578 = vmatmul.bf16.gmra.mxu3 %v8320_v61  ;;  %v13162_v4 = vld [vmem:[#allocation2 + $0xc0] sm:$0xff]   ;;  %v7540_v46 = vshrl.u32 %v13905_v21, 16 }
 0x5ac   : > { %v7141_v10 = vpop.f32.mrf.mxu0  ;;  %10058 = vmatpush.bf16.msra.mxu2 %v12094_v62 }
 0x5ad   : > { %v16577_v43 = vadd.f32 %v7141_v10, %v16442_v51  ;;  %v7538_v51 = vsel %vm710_vm3, %v16521_v55, %v7537_v53  ;;  %v6802_v10 = vpack.c.b16 %v6777_v45, %v6777_v45  ;;  %v12066_v45 = vld [vmem:[%s17434_s3 + $0x1e0] sm:$0xff]  ;;  %v7542_v62 = vrot.slane %v7540_v46, 3 }
 0x5ae   : > { %v16580_v28 = vpop.f32.mrf.mxu2  ;;  %v6556_v16 = vpop.f32.mrf.mxu3  ;;  %9452 = vmatpush.bf16.msra.mxu1 %v12066_v45  ;;  %v13907_v45 = vld [vmem:[#allocation2 + $0x8c] sm:$0xff]  }
 0x5af   : > { %17539 = vst [vmem:[#allocation15_spill] sm:$0xff] %v16580_v28  ;;  %7175 = vmatmul.bf16.gmra.mxu0 %v6990_v14  ;;  %v16584_v61 = vadd.f32 %v6556_v16, %v6331_v58  ;;  %v8321_v58 = vshrl.u32 %v16529_v30, 16  ;;  %v8327_v14 = vrot.slane %v8325_v38, 1  ;;  %v6995_v16 = vshll.u32 %v6802_v10, 16  ;;  %v8706_v28 = vld [vmem:[#allocation2 + $0x18] sm:$0x8] }
 0x5b0   : > { %v7732_v19 = vpop.f32.mrf.mxu1  ;;  %v8821_v30 = vunpack.c.l.b16 %v8706_v28  ;;  %v17546_v28 = vld [vmem:[#allocation6_spill] sm:$0xff] }
 0x5b1   : > { %v16587_v33 = vadd.f32 %v7732_v19, %v16314_v5  ;;  %v7543_v5 = vshll.u32 %v13905_v21, 16  ;;  %v8323_v19 = vor.u32 %v8321_v58, %v8319_v25 }
 0x5b3   : > { %17540 = vst [vmem:[#allocation33_spill] sm:$0xff] %v16587_v33  ;;  %7766 = vmatmul.bf16.gmra.mxu1 %v7538_v51  ;;  %8063 = vmatmul.bf16.gmra.mxu2 %v13162_v4  ;;  %v6991_v51 = vshrl.u32 %v16544_v23, 16  ;;  %v7545_v4 = vrot.slane %v7543_v5, 4  ;;  %v8328_v21 = vsel %vm1313_vm2, %v8323_v19, %v8327_v14  ;;  %v17543_v5 = vld [vmem:[#allocation17_spill] sm:$0xff] }
 0x5b4   : > { %v7143_v27 = vpop.f32.mrf.mxu0 }
 0x5b5   : > { %v6993_v27 = vor.u32 %v6991_v51, %v6989_v6  ;;  %v16608_v25 = vor.u32 %v7545_v4, %v7542_v62  ;;  %v17544_v6 = vunpack.c.l.b16 %v17543_v5  ;;  %v8333_v62 = vshll.u32 %v16611_v24, 16  ;;  %v13973_v4 = vld [vmem:[#allocation2 + $0x20] sm:$0xff]  }
 0x5b6   : > { %v16595_v56 = vpop.f32.mrf.mxu2  ;;  %v16597_v20 = vpop.f32.mrf.mxu3 }
 0x5b7   : > { %17541 = vst [vmem:[#allocation34_spill] sm:$0xff] %v16595_v56  ;;  %v6997_v56 = vrot.slane %v6995_v16, 1  ;;  %v8870_v16 = vpack.c.b16 %v17544_v6, %v8821_v30  ;;  %v7547_v51 = vsel %vm710_vm3, %v7537_v53, %v16608_v25  ;;  %v7549_v53 = vshrl.u32 %v13907_v45, 16 }
 0x5b8   : > { %v7734_v55 = vpop.f32.mrf.mxu1  ;;  %v8329_v6 = vshrl.u32 %v16582_v13, 16 }
 0x5b9   : > { %v6998_v23 = vsel %vm1313_vm2, %v6993_v27, %v6997_v56  ;;  %v16622_v56 = vld [vmem:[#allocation2 + $0xc8] sm:$0xff]   ;;  %v8907_v27 = vshll.u32 %v13973_v4, 16 }
 0x5bb   : > { %8582 = vmatmul.bf16.gmra.mxu3 %v8328_v21  ;;  %v8904_v21 = vshrl.u32 %v13973_v4, 16  ;;  %v8909_v4 = vrot.slane %v8907_v27, 4 }
 0x5bc   : > { %v7145_v38 = vpop.f32.mrf.mxu0 }
 0x5bd   : > { %v16606_v10 = vadd.f32 %v7145_v38, %v16465_v36  ;;  %v6320_v36 = vadd.f32 %v17546_v28, %v16223_v42  ;;  %v12070_v42 = vld [vmem:[#allocation2 + $0x1c] sm:$0xff]  ;;  %v8335_v28 = vrot.slane %v8333_v62, 1 }
 0x5be   : > { %v8031_v58 = vpop.f32.mrf.mxu2  ;;  %v6561_v55 = vpop.f32.mrf.mxu3  ;;  %v9786_v33 = vshll.u32 %v12070_v42, 16 }
 0x5bf   : > { %17542 = vst [vmem:[#allocation35_spill] sm:$0xff] %v16606_v10  ;;  %7179 = vmatmul.bf16.gmra.mxu0 %v6998_v23  ;;  %v6603_v30 = vadd.f32 %v16482_v60, %v6320_v36  ;;  %v8899_v23 = vshll.u32 %v8870_v16, 16  ;;  %v7552_v55 = vshll.u32 %v13907_v45, 16  ;;  %v16634_v60 = vld [vmem:[#allocation2 + $0x24] sm:$0xff]  ;;  %v7551_v45 = vrot.slane %v7549_v53, 3 }
 0x5c0   : > { %v7736_v46 = vpop.f32.mrf.mxu1  ;;  %v9791_v13 = vshll.u32 %v16634_v60, 16  ;;  %v9788_v27 = vrot.slane %v9786_v33, 1  ;;  %v17549_v10 = vld [vmem:[#allocation14_spill] sm:$0xff]  ;;  %v9784_v53 = vshrl.u32 %v12070_v42, 16  ;;  %v17551_v33 = vld [vmem:[#allocation13_spill] sm:$0xff] }
 0x5c1   : > { %v16616_v19 = vadd.f32 %v7736_v46, %v16342_v40  ;;  %v8896_v40 = vshrl.u32 %v8870_v16, 16 }
 0x5c3   : > { %17545 = vst [vmem:[#allocation17_spill] sm:$0xff] %v16616_v19  ;;  %7770 = vmatmul.bf16.gmra.mxu1 %v7547_v51  ;;  %8067 = vmatmul.bf16.gmra.mxu2 %v16622_v56  ;;  %v8906_v51 = vrot.slane %v8904_v21, 3  ;;  %v8898_v19 = vrot.slane %v8896_v40, 3  ;;  %v6340_v40 = vadd.f32 %v17549_v10, %v16303_v47  ;;  %v13909_v10 = vld [vmem:[#allocation2 + $0x94] sm:$0xff]  }
 0x5c4   : > { %v7147_v38 = vpop.f32.mrf.mxu0 }
 0x5c5   : > { %v16627_v58 = vadd.f32 %v7147_v38, %v6603_v30  ;;  %v8331_v30 = vor.u32 %v8329_v6, %v8327_v14  ;;  %v8901_v38 = vrot.slane %v8899_v23, 4  ;;  %v8910_v0 = vor.u32 %v8909_v4, %v8906_v51  ;;  %v16646_v6 = vld [vmem:[#allocation2 + $0x40] sm:$0xff] }
 0x5c6   : > { %v16629_v46 = vpop.f32.mrf.mxu2  ;;  %v16631_v5 = vpop.f32.mrf.mxu3  ;;  %v8341_v42 = vshll.u32 %v16646_v6, 16 }
 0x5c7   : > { %17547 = vst [vmem:[#allocation6_spill] sm:$0xff] %v16627_v58  ;;  %v7554_v58 = vrot.slane %v7552_v55, 4  ;;  %v8902_v21 = vor.u32 %v8901_v38, %v8898_v19  ;;  %v9793_v55 = vrot.slane %v9791_v13, 1  ;;  %v9789_v19 = vor.u32 %v9788_v27, %v9784_v53 }
 0x5c8   : > { %17548 = vst [vmem:[#allocation36_spill] sm:$0xff] %v16629_v46  ;;  %v7738_v36 = vpop.f32.mrf.mxu1  ;;  %v8336_v46 = vsel %vm1313_vm2, %v8331_v30, %v8335_v28  ;;  %v7561_v27 = vshll.u32 %v13909_v10, 16 }
 0x5c9   : > { %v16637_v16 = vadd.f32 %v7738_v36, %v16349_v63  ;;  %v7555_v8 = vor.u32 %v7554_v58, %v7551_v45  ;;  %v8911_v14 = vsel %vm710_vm3, %v8902_v21, %v8910_v0  ;;  %v6324_v36 = vadd.f32 %v17551_v33, %v16243_v12 }
 0x5ca   : > { %v9794_v58 = vsel %vm1313_vm2, %v9789_v19, %v9793_v55  ;;  %v7558_v21 = vshrl.u32 %v13909_v10, 16 }
 0x5cb   : > { %8587 = vmatmul.bf16.gmra.mxu3 %v8336_v46  ;;  %v13165_v46 = vld [vmem:[#allocation2 + $0x28] sm:$0xff]   ;;  %v7556_v47 = vsel %vm710_vm3, %v16608_v25, %v7555_v8  ;;  %v6604_v45 = vadd.f32 %v16510_v34, %v6324_v36  ;;  %v8337_v25 = vshrl.u32 %v16611_v24, 16  ;;  %v7563_v36 = vrot.slane %v7561_v27, 4 }
 0x5cc   : > { %v7150_v62 = vpop.f32.mrf.mxu0  ;;  %v8913_v30 = vshrl.u32 %v13165_v46, 16  ;;  %v8916_v38 = vshll.u32 %v13165_v46, 16  ;;  %v7560_v33 = vrot.slane %v7558_v21, 3  ;;  %v6344_v24 = vadd.f32 %v16154_v37, %v16325_v29  ;;  %v16676_v27 = vld [vmem:[#allocation2 + $0x48] sm:$0xff] }
 0x5cd   : > { %v8339_v34 = vor.u32 %v8337_v25, %v8335_v28  ;;  %v13166_v25 = vld [vmem:[#allocation2 + $0x30] sm:$0xff]  }
 0x5ce   : > { %v16643_v63 = vpop.f32.mrf.mxu2  ;;  %v6565_v23 = vpop.f32.mrf.mxu3  ;;  %v8918_v53 = vrot.slane %v8916_v38, 4 }
 0x5cf   : > { %17550 = vst [vmem:[#allocation14_spill] sm:$0xff] %v16643_v63  ;;  %9199 = vmatmul.bf16.vlgmr.msra.gmra.mxu0 %v8911_v14  ;;  %v16648_v4 = vadd.f32 %v6565_v23, %v6340_v40  ;;  %v8343_v14 = vrot.slane %v8341_v42, 1  ;;  %v8915_v23 = vrot.slane %v8913_v30, 3  ;;  %v7564_v30 = vor.u32 %v7563_v36, %v7560_v33 }
 0x5d0   : > { %v7741_v51 = vpop.f32.mrf.mxu1 }
 0x5d1   : > { %v16660_v51 = vld [vmem:[#allocation2 + $0x2c] sm:$0xff] }
 0x5d2   : > { %v9799_v10 = vshll.u32 %v16660_v51, 16 }
 0x5d3   : > { %7774 = vmatmul.bf16.gmra.mxu1 %v7556_v47  ;;  %10059 = vmatmul.bf16.vlgmr.msra.gmra.mxu2 %v9794_v58  ;;  %v8344_v47 = vsel %vm1313_vm2, %v8339_v34, %v8343_v14  ;;  %v8919_v58 = vor.u32 %v8918_v53, %v8915_v23  ;;  %v13911_v23 = vld [vmem:[#allocation2 + $0x9c] sm:$0xff]   ;;  %v8922_v53 = vshrl.u32 %v13166_v25, 16 }
 0x5d4   : > { %v7151_v13 = vpop.f32.mrf.mxu0  ;;  %v9801_v21 = vrot.slane %v9799_v10, 1  ;;  %v7567_v33 = vshrl.u32 %v13911_v23, 16  ;;  %v7570_v36 = vshll.u32 %v13911_v23, 16 }
 0x5d5   : > { %v16657_v62 = vadd.f32 %v7151_v13, %v6604_v45  ;;  %v9795_v13 = vshrl.u32 %v16634_v60, 16  ;;  %v8349_v60 = vshll.u32 %v16676_v27, 16 }
 0x5d6   : > { %v8038_v12 = vpop.f32.mrf.mxu2  ;;  %v6567_v40 = vpop.f32.mrf.mxu3 }
 0x5d7   : > { %v9797_v29 = vor.u32 %v9795_v13, %v9793_v55  ;;  %v8351_v55 = vrot.slane %v8349_v60, 1  ;;  %v12065_v13 = vld [vmem:[%s17434_s3 + $0x1d8] sm:$0xff] }
 0x5d8   : > { %v7742_v19 = vpop.f32.mrf.mxu1  ;;  %9453 = vmatpush.bf16.msra.mxu1 %v12065_v13 }
 0x5d9   : > { %v16663_v46 = vadd.f32 %v7742_v19, %v16364_v31  ;;  %v8920_v31 = vsel %vm710_vm3, %v8910_v0, %v8919_v58  ;;  %v9802_v0 = vsel %vm1313_vm2, %v9797_v29, %v9801_v21  ;;  %v8925_v19 = vshll.u32 %v13166_v25, 16 }
 0x5da   : > { %v7572_v25 = vrot.slane %v7570_v36, 4  ;;  %v16703_v36 = vld [vmem:[#allocation2 + $0x50] sm:$0xff] }
 0x5db   : > { %8591 = vmatmul.bf16.gmra.mxu3 %v8344_v47 }
 0x5dc   : > { %v7154_v45 = vpop.f32.mrf.mxu0 }
 0x5dd   : > { %v16670_v42 = vadd.f32 %v7154_v45, %v16531_v32  ;;  %v7565_v32 = vsel %vm710_vm3, %v7555_v8, %v7564_v30  ;;  %v8924_v8 = vrot.slane %v8922_v53, 3  ;;  %v8927_v45 = vrot.slane %v8925_v19, 4 }
 0x5de   : > { %v16672_v38 = vpop.f32.mrf.mxu2  ;;  %v6569_v28 = vpop.f32.mrf.mxu3 }
 0x5df   : > { %9204 = vmatmul.bf16.gmra.mxu0 %v8920_v31  ;;  %v16678_v40 = vadd.f32 %v6569_v28, %v6344_v24  ;;  %v16691_v24 = vld [vmem:[#allocation2 + $0x34] sm:$0xff] }
 0x5e0   : > { %v7745_v12 = vpop.f32.mrf.mxu1  ;;  %v9807_v23 = vshll.u32 %v16691_v24, 16 }
 0x5e1   : > { %v16681_v37 = vadd.f32 %v7745_v12, %v16374_v2  ;;  %v8345_v2 = vshrl.u32 %v16646_v6, 16  ;;  %v7569_v12 = vrot.slane %v7567_v33, 3 }
 0x5e2   : > { %v9809_v33 = vrot.slane %v9807_v23, 1 }
 0x5e3   : > { %7779 = vmatmul.bf16.gmra.mxu1 %v7565_v32  ;;  %10064 = vmatmul.bf16.gmra.mxu2 %v9802_v0  ;;  %v8347_v28 = vor.u32 %v8345_v2, %v8343_v14  ;;  %v8928_v32 = vor.u32 %v8927_v45, %v8924_v8  ;;  %v7573_v60 = vor.u32 %v7572_v25, %v7569_v12  ;;  %v13167_v8 = vld [vmem:[#allocation2 + $0x38] sm:$0xff]   ;;  %v13913_v12 = vld [vmem:[#allocation2 + $0xa4] sm:$0xff]  }
 0x5e4   : > { %v7156_v34 = vpop.f32.mrf.mxu0  ;;  %v8931_v25 = vshrl.u32 %v13167_v8, 16 }
 0x5e5   : > { %v8352_v29 = vsel %vm1313_vm2, %v8347_v28, %v8351_v55  ;;  %v8929_v14 = vsel %vm710_vm3, %v8919_v58, %v8928_v32  ;;  %v9803_v34 = vshrl.u32 %v16660_v51, 16  ;;  %v7574_v13 = vsel %vm710_vm3, %v7564_v30, %v7573_v60 }
 0x5e6   : > { %v16686_v47 = vpop.f32.mrf.mxu2  ;;  %v16688_v10 = vpop.f32.mrf.mxu3  ;;  %v8357_v51 = vshll.u32 %v16703_v36, 16  ;;  %v8353_v30 = vshrl.u32 %v16676_v27, 16  ;;  %v6353_v27 = vadd.f32 %v16213_v7, %v16379_v35 }
 0x5e8   : > { %v7747_v31 = vpop.f32.mrf.mxu1 }
 0x5e9   : > { %v9805_v31 = vor.u32 %v9803_v34, %v9801_v21  ;;  %v7576_v21 = vshrl.u32 %v13913_v12, 16  ;;  %v8933_v34 = vrot.slane %v8931_v25, 3 }
 0x5eb   : > { %8595 = vmatmul.bf16.gmra.mxu3 %v8352_v29  ;;  %v9810_v58 = vsel %vm1313_vm2, %v9805_v31, %v9809_v33  ;;  %v8934_v29 = vshll.u32 %v13167_v8, 16  ;;  %v16721_v31 = vld [vmem:[#allocation2 + $0x3c] sm:$0xff] }
 0x5ec   : > { %v7158_v6 = vpop.f32.mrf.mxu0 }
 0x5ed   : > { %v16699_v0 = vadd.f32 %v7158_v6, %v16584_v61  ;;  %v17552_v61 = vld [vmem:[#allocation9_spill] sm:$0xff] }
 0x5ee   : > { %v8044_v53 = vpop.f32.mrf.mxu2  ;;  %v6574_v19 = vpop.f32.mrf.mxu3  ;;  %v6333_v28 = vadd.f32 %v17552_v61, %v16277_v18  ;;  %v8355_v61 = vor.u32 %v8353_v30, %v8351_v55  ;;  %v9811_v55 = vshrl.u32 %v16691_v24, 16 }
 0x5ef   : > { %9208 = vmatmul.bf16.gmra.mxu0 %v8929_v14  ;;  %v7579_v53 = vshll.u32 %v13913_v12, 16  ;;  %v8359_v19 = vrot.slane %v8357_v51, 1 }
 0x5f0   : > { %v7749_v2 = vpop.f32.mrf.mxu1  ;;  %v6607_v23 = vadd.f32 %v16597_v20, %v6333_v28  ;;  %v7578_v28 = vrot.slane %v7576_v21, 3 }
 0x5f1   : > { %v16706_v45 = vadd.f32 %v7749_v2, %v16407_v15  ;;  %v8936_v2 = vrot.slane %v8934_v29, 4  ;;  %v8360_v12 = vsel %vm1313_vm2, %v8355_v61, %v8359_v19  ;;  %v17554_v61 = vld [vmem:[#allocation12_spill] sm:$0xff] }
 0x5f2   : > { %v6337_v7 = vadd.f32 %v17554_v61, %v16293_v22 }
 0x5f3   : > { %7783 = vmatmul.bf16.gmra.mxu1 %v7574_v13  ;;  %10068 = vmatmul.bf16.gmra.mxu2 %v9810_v58  ;;  %v7581_v13 = vrot.slane %v7579_v53, 4  ;;  %v8937_v58 = vor.u32 %v8936_v2, %v8933_v34  ;;  %v16734_v53 = vld [vmem:[#allocation2 + $0x58] sm:$0xff]  ;;  %v13168_v2 = vld [vmem:[#allocation2 + $0x40] sm:$0xff]  }
 0x5f4   : > { %v7160_v6 = vpop.f32.mrf.mxu0  ;;  %v8365_v24 = vshll.u32 %v16734_v53, 16 }
 0x5f5   : > { %v16714_v15 = vadd.f32 %v7160_v6, %v6607_v23  ;;  %v9815_v23 = vshll.u32 %v16721_v31, 16  ;;  %v7582_v51 = vor.u32 %v7581_v13, %v7578_v28  ;;  %v8938_v29 = vsel %vm710_vm3, %v8928_v32, %v8937_v58  ;;  %v13915_v28 = vld [vmem:[#allocation2 + $0xac] sm:$0xff]  }
 0x5f6   : > { %v16716_v14 = vpop.f32.mrf.mxu2  ;;  %v16718_v18 = vpop.f32.mrf.mxu3  ;;  %v8940_v13 = vshrl.u32 %v13168_v2, 16 }
 0x5f7   : > { %v9817_v21 = vrot.slane %v9815_v23, 1  ;;  %v7583_v35 = vsel %vm710_vm3, %v7573_v60, %v7582_v51  ;;  %v6608_v23 = vadd.f32 %v16631_v5, %v6337_v7  ;;  %v8361_v60 = vshrl.u32 %v16703_v36, 16 }
 0x5f8   : > { %v7751_v8 = vpop.f32.mrf.mxu1 }
 0x5f9   : > { %v16724_v20 = vadd.f32 %v7751_v8, %v16424_v44  ;;  %v9813_v8 = vor.u32 %v9811_v55, %v9809_v33  ;;  %v7585_v33 = vshrl.u32 %v13915_v28, 16  ;;  %v8367_v55 = vrot.slane %v8365_v24, 1 }
 0x5fa   : > { %v8363_v5 = vor.u32 %v8361_v60, %v8359_v19  ;;  %v8072_v24 = vadd.f32 %v16238_v50, %v16414_v54 }
 0x5fb   : > { %8600 = vmatmul.bf16.gmra.mxu3 %v8360_v12  ;;  %v9818_v32 = vsel %vm1313_vm2, %v9813_v8, %v9817_v21  ;;  %v8943_v12 = vshll.u32 %v13168_v2, 16  ;;  %v16747_v8 = vld [vmem:[#allocation2 + $0x44] sm:$0xff]  ;;  %v7587_v7 = vrot.slane %v7585_v33, 3  ;;  %v9819_v33 = vshrl.u32 %v16721_v31, 16 }
 0x5fc   : > { %v7163_v6 = vpop.f32.mrf.mxu0 }
 0x5fd   : > { %v8945_v61 = vrot.slane %v8943_v12, 4  ;;  %v9821_v50 = vor.u32 %v9819_v33, %v9817_v21  ;;  %v16778_v33 = vld [vmem:[#allocation2 + $0x4c] sm:$0xff] }
 0x5fe   : > { %v16730_v25 = vpop.f32.mrf.mxu2  ;;  %v6578_v44 = vpop.f32.mrf.mxu3 }
 0x5ff   : > { %17553 = vst [vmem:[#allocation13_spill] sm:$0xff] %v16730_v25  ;;  %9212 = vmatmul.bf16.gmra.mxu0 %v8938_v29  ;;  %v16736_v34 = vadd.f32 %v6578_v44, %v6353_v27  ;;  %v7588_v29 = vshll.u32 %v13915_v28, 16  ;;  %v9823_v28 = vshll.u32 %v16747_v8, 16  ;;  %v17020_v25 = vld [vmem:[#allocation2 + $0xb0] sm:$0xff] }
 0x600   : > { %v7754_v30 = vpop.f32.mrf.mxu1 }
 0x601   : > { %v8942_v30 = vrot.slane %v8940_v13, 3 }
 0x603   : > { %7787 = vmatmul.bf16.gmra.mxu1 %v7583_v35  ;;  %10072 = vmatmul.bf16.gmra.mxu2 %v9818_v32  ;;  %v7590_v32 = vrot.slane %v7588_v29, 4  ;;  %v9825_v29 = vrot.slane %v9823_v28, 1 }
 0x604   : > { %v7164_v6 = vpop.f32.mrf.mxu0 }
 0x605   : > { %v16744_v27 = vadd.f32 %v7164_v6, %v6608_v23  ;;  %v8368_v23 = vsel %vm1313_vm2, %v8363_v5, %v8367_v55  ;;  %v8946_v6 = vor.u32 %v8945_v61, %v8942_v30  ;;  %v7591_v13 = vor.u32 %v7590_v32, %v7587_v7 }
 0x606   : > { %v8051_v44 = vpop.f32.mrf.mxu2  ;;  %v6580_v22 = vpop.f32.mrf.mxu3 }
 0x607   : > { %v16763_v22 = vld [vmem:[#allocation2 + $0x60] sm:$0xff]  ;;  %v7592_v54 = vsel %vm710_vm3, %v7582_v51, %v7591_v13  ;;  %v8369_v51 = vshrl.u32 %v16734_v53, 16  ;;  %v9831_v53 = vshll.u32 %v16778_v33, 16 }
 0x608   : > { %v7755_v35 = vpop.f32.mrf.mxu1  ;;  %v8373_v31 = vshll.u32 %v16763_v22, 16 }
 0x609   : > { %v16750_v2 = vadd.f32 %v7755_v35, %v16448_v1  ;;  %v8947_v1 = vsel %vm710_vm3, %v8937_v58, %v8946_v6  ;;  %v13917_v35 = vld [vmem:[#allocation2 + $0xb4] sm:$0xff]   ;;  %v9826_v58 = vsel %vm1313_vm2, %v9821_v50, %v9825_v29 }
 0x60a   : > { %v7594_v28 = vshrl.u32 %v13917_v35, 16 }
 0x60b   : > { %8604 = vmatmul.bf16.gmra.mxu3 %v8368_v23  ;;  %v8073_v23 = vadd.f32 %v16248_v39, %v16431_v49  ;;  %v12064_v39 = vld [vmem:[%s17434_s3 + $0x1d0] sm:$0xff] }
 0x60c   : > { %v7167_v44 = vpop.f32.mrf.mxu0  ;;  %v7596_v49 = vrot.slane %v7594_v28, 3  ;;  %9454 = vmatpush.bf16.msra.mxu1 %v12064_v39  ;;  %v9833_v28 = vrot.slane %v9831_v53, 1  ;;  %v13919_v39 = vld [vmem:[#allocation2 + $0xbc] sm:$0xff]  }
 0x60d   : > { %v16755_v36 = vadd.f32 %v7167_v44, %v16648_v4  ;;  %v13169_v4 = vld [vmem:[#allocation2 + $0x48] sm:$0xff]   ;;  %v7597_v44 = vshll.u32 %v13917_v35, 16 }
 0x60e   : > { %v16759_v12 = vpop.f32.mrf.mxu2  ;;  %v8570_v19 = vpop.f32.mrf.mxu3  ;;  %v8949_v5 = vshrl.u32 %v13169_v4, 16  ;;  %v8952_v7 = vshll.u32 %v13169_v4, 16  ;;  %v8371_v4 = vor.u32 %v8369_v51, %v8367_v55 }
 0x60f   : > { %17555 = vst [vmem:[#allocation9_spill] sm:$0xff] %v16759_v12  ;;  %9217 = vmatmul.bf16.gmra.mxu0 %v8947_v1  ;;  %v16765_v30 = vadd.f32 %v8570_v19, %v8072_v24  ;;  %v8375_v24 = vrot.slane %v8373_v31, 1 }
 0x610   : > { %v7758_v60 = vpop.f32.mrf.mxu1  ;;  %v8951_v1 = vrot.slane %v8949_v5, 3  ;;  %v8954_v19 = vrot.slane %v8952_v7, 4 }
 0x611   : > { %v16768_v61 = vadd.f32 %v7758_v60, %v16458_v48  ;;  %v8376_v35 = vsel %vm1313_vm2, %v8371_v4, %v8375_v24 }
 0x613   : > { %7792 = vmatmul.bf16.gmra.mxu1 %v7592_v54  ;;  %10077 = vmatmul.bf16.gmra.mxu2 %v9826_v58  ;;  %v7599_v54 = vrot.slane %v7597_v44, 4  ;;  %v8955_v58 = vor.u32 %v8954_v19, %v8951_v1  ;;  %v16792_v44 = vld [vmem:[#allocation2 + $0x68] sm:$0xff]  ;;  %v13170_v1 = vld [vmem:[#allocation2 + $0x50] sm:$0xff]  }
 0x614   : > { %v7169_v32 = vpop.f32.mrf.mxu0 }
 0x615   : > { %v7600_v7 = vor.u32 %v7599_v54, %v7596_v49  ;;  %v8956_v55 = vsel %vm710_vm3, %v8946_v6, %v8955_v58  ;;  %v8958_v49 = vshrl.u32 %v13170_v1, 16  ;;  %v8961_v54 = vshll.u32 %v13170_v1, 16 }
 0x616   : > { %v16775_v48 = vpop.f32.mrf.mxu2  ;;  %v8572_v21 = vpop.f32.mrf.mxu3 }
 0x617   : > { %17556 = vst [vmem:[#allocation12_spill] sm:$0xff] %v16775_v48  ;;  %v16780_v50 = vadd.f32 %v8572_v21, %v8073_v23  ;;  %v9827_v21 = vshrl.u32 %v16747_v8, 16  ;;  %v7601_v4 = vsel %vm710_vm3, %v7591_v13, %v7600_v7  ;;  %v8381_v8 = vshll.u32 %v16792_v44, 16 }
 0x618   : > { %v7760_v60 = vpop.f32.mrf.mxu1 }
 0x619   : > { %v9829_v60 = vor.u32 %v9827_v21, %v9825_v29  ;;  %v8074_v29 = vadd.f32 %v16264_v57, %v16452_v9  ;;  %v8963_v21 = vrot.slane %v8961_v54, 4 }
 0x61b   : > { %8608 = vmatmul.bf16.gmra.mxu3 %v8376_v35  ;;  %v9834_v6 = vsel %vm1313_vm2, %v9829_v60, %v9833_v28 }
 0x61c   : > { %v7171_v31 = vpop.f32.mrf.mxu0 }
 0x61d   : > { %v16788_v5 = vadd.f32 %v7171_v31, %v16678_v40  ;;  %v6346_v40 = vadd.f32 %v16167_v11, %v16339_v17  ;;  %v7603_v11 = vshrl.u32 %v13919_v39, 16  ;;  %v7606_v17 = vshll.u32 %v13919_v39, 16 }
 0x61e   : > { %v8057_v32 = vpop.f32.mrf.mxu2  ;;  %v8575_v23 = vpop.f32.mrf.mxu3 }
 0x61f   : > { %9221 = vmatmul.bf16.gmra.mxu0 %v8956_v55  ;;  %v6611_v35 = vadd.f32 %v16688_v10, %v6346_v40  ;;  %v8377_v32 = vshrl.u32 %v16763_v22, 16  ;;  %v8383_v55 = vrot.slane %v8381_v8, 1  ;;  %v8960_v23 = vrot.slane %v8958_v49, 3  ;;  %v17558_v8 = vld [vmem:[#allocation23_spill] sm:$0xff] }
 0x620   : > { %v7762_v51 = vpop.f32.mrf.mxu1  ;;  %v7605_v57 = vrot.slane %v7603_v11, 3  ;;  %v7608_v9 = vrot.slane %v7606_v17, 4  ;;  %v8075_v49 = vadd.f32 %v17558_v8, %v16468_v41  ;;  %v16827_v11 = vld [vmem:[#allocation2 + $0x70] sm:$0xff] }
 0x621   : > { %v16795_v19 = vadd.f32 %v7762_v51, %v16491_v26  ;;  %v16810_v51 = vld [vmem:[#allocation2 + $0x54] sm:$0xff]  ;;  %v8379_v40 = vor.u32 %v8377_v32, %v8375_v24  ;;  %v8964_v39 = vor.u32 %v8963_v21, %v8960_v23  ;;  %v9835_v24 = vshrl.u32 %v16778_v33, 16  ;;  %v17560_v21 = vld [vmem:[#allocation19_spill] sm:$0xff] }
 0x622   : > { %v16821_v54 = vor.u32 %v7608_v9, %v7605_v57  ;;  %v13171_v32 = vld [vmem:[#allocation2 + $0x58] sm:$0xff]   ;;  %v17561_v41 = vld [vmem:[#allocation16_spill] sm:$0xff]  ;;  %v13920_v57 = vld [vmem:[#allocation2 + $0xc4] sm:$0xff]   ;;  %v8389_v33 = vshll.u32 %v16827_v11, 16 }
 0x623   : > { %7796 = vmatmul.bf16.gmra.mxu1 %v7601_v4  ;;  %10081 = vmatmul.bf16.gmra.mxu2 %v9834_v6  ;;  %v8384_v4 = vsel %vm1313_vm2, %v8379_v40, %v8383_v55  ;;  %v9839_v6 = vshll.u32 %v16810_v51, 16  ;;  %v9837_v23 = vor.u32 %v9835_v24, %v9833_v28  ;;  %v8967_v9 = vshrl.u32 %v13171_v32, 16 }
 0x624   : > { %v7173_v53 = vpop.f32.mrf.mxu0  ;;  %v7610_v40 = vsel %vm710_vm3, %v7600_v7, %v16821_v54  ;;  %v7612_v28 = vshrl.u32 %v13920_v57, 16  ;;  %v8385_v7 = vshrl.u32 %v16792_v44, 16  ;;  %v8391_v24 = vrot.slane %v8389_v33, 1 }
 0x625   : > { %v16803_v26 = vadd.f32 %v7173_v53, %v6611_v35 }
 0x626   : > { %v16807_v13 = vpop.f32.mrf.mxu2  ;;  %v8576_v31 = vpop.f32.mrf.mxu3 }
 0x627   : > { %17557 = vst [vmem:[#allocation37_spill] sm:$0xff] %v16807_v13  ;;  %v16812_v1 = vadd.f32 %v8576_v31, %v8074_v29  ;;  %v9841_v29 = vrot.slane %v9839_v6, 1  ;;  %v12037_v13 = vld [vmem:[#allocation2 + $0x88] sm:$0xff] }
 0x628   : > { %v7764_v10 = vpop.f32.mrf.mxu1 }
 0x629   : > { %v16815_v60 = vadd.f32 %v7764_v10, %v16506_v3  ;;  %v8965_v3 = vsel %vm710_vm3, %v8955_v58, %v8964_v39  ;;  %v6350_v10 = vadd.f32 %v17561_v41, %v17560_v21  ;;  %v9842_v58 = vsel %vm1313_vm2, %v9837_v23, %v9841_v29  ;;  %v16841_v23 = vld [vmem:[#allocation2 + $0x5c] sm:$0xff] }
 0x62a   : > { %v9847_v44 = vshll.u32 %v16841_v23, 16 }
 0x62b   : > { %8613 = vmatmul.bf16.gmra.mxu3 %v8384_v4  ;;  %v8970_v4 = vshll.u32 %v13171_v32, 16  ;;  %v6612_v6 = vadd.f32 %v16718_v18, %v6350_v10  ;;  %v8387_v18 = vor.u32 %v8385_v7, %v8383_v55  ;;  %v12063_v10 = vld [vmem:[%s17434_s3 + $0x1c8] sm:$0xff]  ;;  %v17562_v55 = vld [vmem:[#allocation24_spill] sm:$0xff] }
 0x62c   : > { %v7176_v22 = vpop.f32.mrf.mxu0  ;;  %9455 = vmatpush.bf16.msra.mxu1 %v12063_v10  ;;  %v9849_v7 = vrot.slane %v9847_v44, 1 }
 0x62d   : > { %v8972_v21 = vrot.slane %v8970_v4, 4  ;;  %v8076_v4 = vadd.f32 %v17562_v55, %v16497_v52  ;;  %v12062_v52 = vld [vmem:[%s17434_s3 + $0x1c0] sm:$0xff] }
 0x62e   : > { %v16823_v35 = vpop.f32.mrf.mxu2  ;;  %v8579_v53 = vpop.f32.mrf.mxu3 }
 0x62f   : > { %17559 = vst [vmem:[#allocation23_spill] sm:$0xff] %v16823_v35  ;;  %9225 = vmatmul.bf16.gmra.mxu0 %v8965_v3  ;;  %v16829_v31 = vadd.f32 %v8579_v53, %v8075_v49  ;;  %v7615_v49 = vshll.u32 %v13920_v57, 16 }
 0x630   : > { %v7767_v17 = vpop.f32.mrf.mxu1  ;;  %9456 = vmatpush.bf16.msra.mxu1 %v12062_v52  ;;  %v12079_v52 = vld [vmem:[#allocation2 + $0x64] sm:$0xff] }
 0x631   : > { %v8969_v17 = vrot.slane %v8967_v9, 3  ;;  %v7617_v57 = vrot.slane %v7615_v49, 4  ;;  %v12690_v9 = vunpack.c.h.b16 %v16622_v56  ;;  %v9855_v35 = vshll.u32 %v12079_v52, 16 }
 0x633   : > { %7800 = vmatmul.bf16.gmra.mxu1 %v7610_v40  ;;  %10085 = vmatmul.bf16.gmra.mxu2 %v9842_v58  ;;  %v7614_v40 = vrot.slane %v7612_v28, 3  ;;  %v8392_v58 = vsel %vm1313_vm2, %v8387_v18, %v8391_v24 }
 0x634   : > { %v7177_v22 = vpop.f32.mrf.mxu0 }
 0x635   : > { %v16838_v8 = vadd.f32 %v7177_v22, %v6612_v6  ;;  %v8973_v6 = vor.u32 %v8972_v21, %v8969_v17  ;;  %v7618_v22 = vor.u32 %v7617_v57, %v7614_v40  ;;  %v16861_v17 = vld [vmem:[#allocation2 + $0x78] sm:$0xff] }
 0x636   : > { %v8064_v3 = vpop.f32.mrf.mxu2  ;;  %v8581_v53 = vpop.f32.mrf.mxu3  ;;  %v8397_v40 = vshll.u32 %v16861_v17, 16 }
 0x637   : > { %v8974_v28 = vsel %vm710_vm3, %v8964_v39, %v8973_v6  ;;  %v9843_v53 = vshrl.u32 %v16810_v51, 16  ;;  %v7404_v39 = vpack.c.b16 %v12690_v9, %v12690_v9  ;;  %v7619_v51 = vsel %vm710_vm3, %v16821_v54, %v7618_v22 }
 0x638   : > { %v7768_v41 = vpop.f32.mrf.mxu1  ;;  %v8393_v54 = vshrl.u32 %v16827_v11, 16 }
 0x639   : > { %v16844_v32 = vadd.f32 %v7768_v41, %v16547_v59  ;;  %v9845_v18 = vor.u32 %v9843_v53, %v9841_v29  ;;  %v7624_v55 = vshll.u32 %v7404_v39, 16 }
 0x63b   : > { %8617 = vmatmul.bf16.gmra.mxu3 %v8392_v58  ;;  %v9850_v10 = vsel %vm1313_vm2, %v9845_v18, %v9849_v7 }
 0x63c   : > { %v7180_v33 = vpop.f32.mrf.mxu0 }
 0x63d   : > { %v16853_v59 = vadd.f32 %v7180_v33, %v16736_v34  ;;  %v13172_v34 = vld [vmem:[#allocation2 + $0x60] sm:$0xff]   ;;  %v7621_v33 = vshrl.u32 %v7404_v39, 16 }
 0x63e   : > { %v16857_v3 = vpop.f32.mrf.mxu2  ;;  %v8583_v49 = vpop.f32.mrf.mxu3  ;;  %v8976_v57 = vshrl.u32 %v13172_v34, 16  ;;  %v8979_v58 = vshll.u32 %v13172_v34, 16  ;;  %v8395_v34 = vor.u32 %v8393_v54, %v8391_v24  ;;  %v12036_v24 = vld [vmem:[#allocation2 + $0x80] sm:$0xff]  ;;  %v17567_v54 = vld [vmem:[#allocation35_spill] sm:$0xff] }
 0x63f   : > { %17563 = vst [vmem:[#allocation19_spill] sm:$0xff] %v16857_v3  ;;  %9230 = vmatmul.bf16.gmra.mxu0 %v8974_v28  ;;  %v16863_v56 = vadd.f32 %v8583_v49, %v8076_v4  ;;  %v17564_v4 = vld [vmem:[#allocation32_spill] sm:$0xff]  ;;  %v8399_v49 = vrot.slane %v8397_v40, 1 }
 0x640   : > { %v7771_v21 = vpop.f32.mrf.mxu1  ;;  %v8978_v53 = vrot.slane %v8976_v57, 3 }
 0x641   : > { %v16869_v41 = vadd.f32 %v7771_v21, %v16577_v43  ;;  %v17565_v43 = vld [vmem:[#allocation25_spill] sm:$0xff]  ;;  %v8981_v21 = vrot.slane %v8979_v58, 4  ;;  %v8400_v39 = vsel %vm1313_vm2, %v8395_v34, %v8399_v49  ;;  %v8405_v34 = vshll.u32 %v12036_v24, 16 }
 0x642   : > { %v8077_v28 = vadd.f32 %v17565_v43, %v17564_v4 }
 0x643   : > { %7805 = vmatmul.bf16.gmra.mxu1 %v7619_v51  ;;  %10090 = vmatmul.bf16.gmra.mxu2 %v9850_v10  ;;  %v7623_v10 = vrot.slane %v7621_v33, 3  ;;  %v8982_v3 = vor.u32 %v8981_v21, %v8978_v53 }
 0x644   : > { %v7182_v44 = vpop.f32.mrf.mxu0 }
 0x645   : > { %v7626_v44 = vrot.slane %v7624_v55, 4  ;;  %v8983_v57 = vsel %vm710_vm3, %v8973_v6, %v8982_v3  ;;  %v13173_v55 = vld [vmem:[#allocation2 + $0x68] sm:$0xff]  }
 0x646   : > { %v16877_v29 = vpop.f32.mrf.mxu2  ;;  %v8585_v9 = vpop.f32.mrf.mxu3  ;;  %v8988_v6 = vshll.u32 %v13173_v55, 16 }
 0x647   : > { %17566 = vst [vmem:[#allocation16_spill] sm:$0xff] %v16877_v29  ;;  %v16880_v51 = vadd.f32 %v8585_v9, %v8077_v28  ;;  %v7627_v11 = vor.u32 %v7626_v44, %v7623_v10  ;;  %v9851_v28 = vshrl.u32 %v16841_v23, 16  ;;  %v9857_v9 = vrot.slane %v9855_v35, 1  ;;  %v17569_v23 = vld [vmem:[#allocation22_spill] sm:$0xff]  ;;  %v17574_v29 = vld [vmem:[#allocation27_spill] sm:$0xff] }
 0x648   : > { %v7773_v18 = vpop.f32.mrf.mxu1  ;;  %v8985_v10 = vshrl.u32 %v13173_v55, 16  ;;  %v17571_v55 = vld [vmem:[#allocation6_spill] sm:$0xff] }
 0x649   : > { %v9853_v21 = vor.u32 %v9851_v28, %v9849_v7  ;;  %v7628_v18 = vsel %vm710_vm3, %v7618_v22, %v7627_v11  ;;  %v8401_v7 = vshrl.u32 %v16861_v17, 16  ;;  %v8407_v22 = vrot.slane %v8405_v34, 1  ;;  %v12080_v28 = vld [vmem:[#allocation2 + $0x6c] sm:$0xff] }
 0x64a   : > { %v8987_v11 = vrot.slane %v8985_v10, 3 }
 0x64b   : > { %8621 = vmatmul.bf16.gmra.mxu3 %v8400_v39  ;;  %v17570_v39 = vld [vmem:[#allocation26_spill] sm:$0xff] }
 0x64c   : > { %v9200_v4 = vpop.f32.mrf.mxu0 }
 0x64d   : > { %v16884_v43 = vadd.f32 %v9200_v4, %v16765_v30  ;;  %v9858_v30 = vsel %vm1313_vm2, %v9853_v21, %v9857_v9  ;;  %v8078_v4 = vadd.f32 %v17570_v39, %v17569_v23  ;;  %v17573_v39 = vld [vmem:[#allocation33_spill] sm:$0xff] }
 0x64e   : > { %v8070_v40 = vpop.f32.mrf.mxu2  ;;  %v8588_v58 = vpop.f32.mrf.mxu3  ;;  %v8079_v17 = vadd.f32 %v17574_v29, %v17573_v39  ;;  %v8409_v39 = vshrl.u32 %v12036_v24, 16  ;;  %v17577_v24 = vld [vmem:[#allocation28_spill] sm:$0xff] }
 0x64f   : > { %9234 = vmatmul.bf16.gmra.mxu0 %v8983_v57  ;;  %v8990_v58 = vrot.slane %v8988_v6, 4 }
 0x650   : > { %v7775_v33 = vpop.f32.mrf.mxu1 }
 0x651   : > { %v16889_v53 = vadd.f32 %v7775_v33, %v17567_v54 }
 0x653   : > { %17568 = vst [vmem:[#allocation24_spill] sm:$0xff] %v16889_v53  ;;  %7809 = vmatmul.bf16.gmra.mxu1 %v7628_v18  ;;  %10094 = vmatmul.bf16.gmra.mxu2 %v9858_v30  ;;  %v8991_v30 = vor.u32 %v8990_v58, %v8987_v11  ;;  %v17575_v58 = vld [vmem:[#allocation18_spill] sm:$0xff] }
 0x654   : > { %v9202_v44 = vpop.f32.mrf.mxu0  ;;  %v16977_v53 = vld [vmem:[#allocation2 + $0xa0] sm:$0xff] }
 0x655   : > { %v16894_v35 = vadd.f32 %v9202_v44, %v16780_v50  ;;  %v8403_v50 = vor.u32 %v8401_v7, %v8399_v49  ;;  %v9863_v44 = vshll.u32 %v12080_v28, 16  ;;  %v8992_v34 = vsel %vm710_vm3, %v8982_v3, %v8991_v30  ;;  %v13174_v7 = vld [vmem:[#allocation2 + $0x70] sm:$0xff]  }
 0x656   : > { %v16898_v40 = vpop.f32.mrf.mxu2  ;;  %v8589_v57 = vpop.f32.mrf.mxu3  ;;  %v8994_v29 = vshrl.u32 %v13174_v7, 16 }
 0x657   : > { %v16901_v54 = vadd.f32 %v8589_v57, %v8078_v4  ;;  %v8408_v18 = vsel %vm1313_vm2, %v8403_v50, %v8407_v22  ;;  %v9859_v4 = vshrl.u32 %v12079_v52, 16  ;;  %v9865_v57 = vrot.slane %v9863_v44, 1 }
 0x658   : > { %v7777_v33 = vpop.f32.mrf.mxu1  ;;  %v8413_v50 = vshll.u32 %v12037_v13, 16 }
 0x659   : > { %v16904_v21 = vadd.f32 %v7777_v33, %v17571_v55  ;;  %v9861_v11 = vor.u32 %v9859_v4, %v9857_v9 }
 0x65b   : > { %17572 = vst [vmem:[#allocation32_spill] sm:$0xff] %v16904_v21  ;;  %8626 = vmatmul.bf16.gmra.mxu3 %v8408_v18  ;;  %v9866_v55 = vsel %vm1313_vm2, %v9861_v11, %v9865_v57  ;;  %v8997_v18 = vshll.u32 %v13174_v7, 16  ;;  %v8411_v11 = vor.u32 %v8409_v39, %v8407_v22  ;;  %v16931_v22 = vld [vmem:[#allocation2 + $0x90] sm:$0xff]  ;;  %v16951_v21 = vld [vmem:[#allocation2 + $0x98] sm:$0xff] }
 0x65c   : > { %v9205_v23 = vpop.f32.mrf.mxu0 }
 0x65e   : > { %v16910_v10 = vpop.f32.mrf.mxu2  ;;  %v8592_v6 = vpop.f32.mrf.mxu3 }
 0x65f   : > { %9238 = vmatmul.bf16.gmra.mxu0 %v8992_v34  ;;  %v16912_v49 = vadd.f32 %v8592_v6, %v8079_v17  ;;  %v8415_v34 = vrot.slane %v8413_v50, 1  ;;  %v8996_v17 = vrot.slane %v8994_v29, 3  ;;  %v8999_v6 = vrot.slane %v8997_v18, 4 }
 0x660   : > { %v7780_v33 = vpop.f32.mrf.mxu1 }
 0x661   : > { %v12081_v33 = vld [vmem:[#allocation2 + $0x74] sm:$0xff]  ;;  %v9000_v7 = vor.u32 %v8999_v6, %v8996_v17 }
 0x662   : > { %v13175_v6 = vld [vmem:[#allocation2 + $0x78] sm:$0xff]  }
 0x663   : > { %9457 = vmatmul.bf16.vlgmr.msra.gmra.mxu1 %v17575_v58  ;;  %10098 = vmatmul.bf16.gmra.mxu2 %v9866_v55  ;;  %v8416_v58 = vsel %vm1313_vm2, %v8411_v11, %v8415_v34  ;;  %v9871_v55 = vshll.u32 %v12081_v33, 16  ;;  %v9001_v29 = vsel %vm710_vm3, %v8991_v30, %v9000_v7  ;;  %v8421_v11 = vshll.u32 %v16931_v22, 16 }
 0x664   : > { %v9206_v3 = vpop.f32.mrf.mxu0 }
 0x665   : > { %v16917_v23 = vadd.f32 %v9206_v3, %v16812_v1  ;;  %v17576_v3 = vld [vmem:[#allocation17_spill] sm:$0xff] }
 0x666   : > { %v10065_v52 = vpop.f32.mrf.mxu2  ;;  %v8594_v44 = vpop.f32.mrf.mxu3  ;;  %v8080_v50 = vadd.f32 %v17577_v24, %v17576_v3  ;;  %v17578_v3 = vld [vmem:[#allocation10_spill] sm:$0xff] }
 0x667   : > { %v9873_v44 = vrot.slane %v9871_v55, 1  ;;  %v8081_v24 = vadd.f32 %v17578_v3, %v16637_v16 }
 0x668   : > { %v7781_v9 = vpop.f32.mrf.mxu1 }
 0x669   : > { %v16920_v4 = vadd.f32 %v7781_v9, %v16657_v62  ;;  %v9867_v62 = vshrl.u32 %v12080_v28, 16  ;;  %v9006_v28 = vshll.u32 %v13175_v6, 16 }
 0x66b   : > { %8630 = vmatmul.bf16.gmra.mxu3 %v8416_v58  ;;  %v9869_v9 = vor.u32 %v9867_v62, %v9865_v57  ;;  %v9003_v58 = vshrl.u32 %v13175_v6, 16  ;;  %v9008_v12 = vrot.slane %v9006_v28, 4  ;;  %v12082_v57 = vld [vmem:[#allocation2 + $0x7c] sm:$0xff] }
 0x66c   : > { %v9209_v48 = vpop.f32.mrf.mxu0 }
 0x66d   : > { %v16924_v1 = vadd.f32 %v9209_v48, %v16829_v31  ;;  %v13738_v31 = vld [vmem:[#allocation2 + $0x24] sm:$0xff]   ;;  %v9874_v30 = vsel %vm1313_vm2, %v9869_v9, %v9873_v44 }
 0x66e   : > { %v16929_v18 = vpop.f32.mrf.mxu2  ;;  %v8596_v52 = vpop.f32.mrf.mxu3 }
 0x66f   : > { %9243 = vmatmul.bf16.gmra.mxu0 %v9001_v29  ;;  %v16933_v17 = vadd.f32 %v8596_v52, %v8080_v50  ;;  %v8417_v52 = vshrl.u32 %v12037_v13, 16 }
 0x670   : > { %v7784_v39 = vpop.f32.mrf.mxu1 }
 0x671   : > { %v16936_v48 = vadd.f32 %v7784_v39, %v16670_v42  ;;  %v8423_v42 = vrot.slane %v8421_v11, 1  ;;  %v9005_v39 = vrot.slane %v9003_v58, 3  ;;  %v8419_v9 = vor.u32 %v8417_v52, %v8415_v34  ;;  %v13176_v34 = vld [vmem:[#allocation2 + $0x80] sm:$0xff]  }
 0x672   : > { %v9875_v58 = vshrl.u32 %v12081_v33, 16  ;;  %v8429_v52 = vshll.u32 %v16951_v21, 16 }
 0x673   : > { %9462 = vmatmul.bf16.gmra.mxu1 %v13738_v31  ;;  %10103 = vmatmul.bf16.gmra.mxu2 %v9874_v30  ;;  %v8424_v63 = vsel %vm1313_vm2, %v8419_v9, %v8423_v42  ;;  %v9009_v6 = vor.u32 %v9008_v12, %v9005_v39  ;;  %v9879_v30 = vshll.u32 %v12082_v57, 16  ;;  %v13740_v12 = vld [vmem:[#allocation2 + $0x2c] sm:$0xff]   ;;  %v9015_v39 = vshll.u32 %v13176_v34, 16 }
 0x674   : > { %v9211_v55 = vpop.f32.mrf.mxu0  ;;  %v17579_v9 = vld [vmem:[#allocation20_spill] sm:$0xff] }
 0x675   : > { %v9010_v3 = vsel %vm710_vm3, %v9000_v7, %v9009_v6  ;;  %v9881_v28 = vrot.slane %v9879_v30, 1  ;;  %v9012_v7 = vshrl.u32 %v13176_v34, 16  ;;  %v8082_v30 = vadd.f32 %v17579_v9, %v16663_v46  ;;  %v17580_v9 = vld [vmem:[#allocation29_spill] sm:$0xff] }
 0x676   : > { %v16942_v50 = vpop.f32.mrf.mxu2  ;;  %v8598_v29 = vpop.f32.mrf.mxu3 }
 0x677   : > { %v16944_v31 = vadd.f32 %v8598_v29, %v8081_v24 }
 0x678   : > { %v7786_v62 = vpop.f32.mrf.mxu1 }
 0x67b   : > { %8634 = vmatmul.bf16.gmra.mxu3 %v8424_v63  ;;  %v9877_v63 = vor.u32 %v9875_v58, %v9873_v44  ;;  %v8425_v44 = vshrl.u32 %v16931_v22, 16  ;;  %v12083_v58 = vld [vmem:[#allocation2 + $0x84] sm:$0xff]  ;;  %v8083_v22 = vadd.f32 %v17580_v9, %v16681_v37  ;;  %v8437_v37 = vshll.u32 %v16977_v53, 16 }
 0x67c   : > { %v9213_v55 = vpop.f32.mrf.mxu0  ;;  %v9887_v46 = vshll.u32 %v12083_v58, 16  ;;  %v8433_v9 = vshrl.u32 %v16951_v21, 16  ;;  %v17582_v21 = vld [vmem:[#allocation30_spill] sm:$0xff] }
 0x67d   : > { %v16948_v16 = vadd.f32 %v9213_v55, %v16863_v56  ;;  %v9882_v56 = vsel %vm1313_vm2, %v9877_v63, %v9881_v28 }
 0x67e   : > { %v10071_v13 = vpop.f32.mrf.mxu2  ;;  %v8601_v11 = vpop.f32.mrf.mxu3 }
 0x67f   : > { %9247 = vmatmul.bf16.gmra.mxu0 %v9010_v3  ;;  %v8431_v3 = vrot.slane %v8429_v52, 1  ;;  %v9014_v13 = vrot.slane %v9012_v7, 3  ;;  %v9017_v11 = vrot.slane %v9015_v39, 4 }
 0x680   : > { %v7788_v24 = vpop.f32.mrf.mxu1 }
 0x681   : > { %v16954_v29 = vadd.f32 %v7788_v24, %v16699_v0 }
 0x683   : > { %9466 = vmatmul.bf16.gmra.mxu1 %v13740_v12  ;;  %10107 = vmatmul.bf16.gmra.mxu2 %v9882_v56  ;;  %v9018_v56 = vor.u32 %v9017_v11, %v9014_v13  ;;  %v13742_v13 = vld [vmem:[#allocation2 + $0x34] sm:$0xff]  }
 0x684   : > { %v9215_v33 = vpop.f32.mrf.mxu0 }
 0x685   : > { %v16959_v62 = vadd.f32 %v9215_v33, %v16880_v51  ;;  %v8427_v51 = vor.u32 %v8425_v44, %v8423_v42  ;;  %v9019_v52 = vsel %vm710_vm3, %v9009_v6, %v9018_v56  ;;  %v13177_v44 = vld [vmem:[#allocation2 + $0x88] sm:$0xff]  }
 0x686   : > { %v16963_v55 = vpop.f32.mrf.mxu2  ;;  %v8602_v0 = vpop.f32.mrf.mxu3  ;;  %v9021_v6 = vshrl.u32 %v13177_v44, 16 }
 0x687   : > { %v16966_v12 = vadd.f32 %v8602_v0, %v8082_v30  ;;  %v8432_v63 = vsel %vm1313_vm2, %v8427_v51, %v8431_v3  ;;  %v9883_v30 = vshrl.u32 %v12082_v57, 16  ;;  %v9889_v0 = vrot.slane %v9887_v46, 1 }
 0x688   : > { %v7790_v24 = vpop.f32.mrf.mxu1  ;;  %v9024_v51 = vshll.u32 %v13177_v44, 16 }
 0x689   : > { %v16969_v34 = vadd.f32 %v7790_v24, %v16714_v15  ;;  %v9885_v11 = vor.u32 %v9883_v30, %v9881_v28  ;;  %v12084_v28 = vld [vmem:[#allocation2 + $0x8c] sm:$0xff] }
 0x68b   : > { %8639 = vmatmul.bf16.gmra.mxu3 %v8432_v63  ;;  %v9890_v24 = vsel %vm1313_vm2, %v9885_v11, %v9889_v0 }
 0x68c   : > { %v9218_v33 = vpop.f32.mrf.mxu0 }
 0x68e   : > { %v16975_v7 = vpop.f32.mrf.mxu2  ;;  %v8605_v39 = vpop.f32.mrf.mxu3 }
 0x68f   : > { %9251 = vmatmul.bf16.gmra.mxu0 %v9019_v52  ;;  %v16979_v42 = vadd.f32 %v8605_v39, %v8083_v22  ;;  %v8439_v22 = vrot.slane %v8437_v37, 1  ;;  %v9023_v52 = vrot.slane %v9021_v6, 3  ;;  %v9026_v39 = vrot.slane %v9024_v51, 4 }
 0x690   : > { %v7793_v15 = vpop.f32.mrf.mxu1  ;;  %v8084_v37 = vadd.f32 %v17582_v21, %v16706_v45 }
 0x691   : > { %v9027_v11 = vor.u32 %v9026_v39, %v9023_v52  ;;  %v13178_v39 = vld [vmem:[#allocation2 + $0x90] sm:$0xff]  }
 0x693   : > { %9470 = vmatmul.bf16.gmra.mxu1 %v13742_v13  ;;  %10111 = vmatmul.bf16.gmra.mxu2 %v9890_v24  ;;  %v8435_v13 = vor.u32 %v8433_v9, %v8431_v3  ;;  %v9895_v24 = vshll.u32 %v12084_v28, 16  ;;  %v9028_v6 = vsel %vm710_vm3, %v9018_v56, %v9027_v11  ;;  %v16999_v3 = vld [vmem:[#allocation2 + $0xa8] sm:$0xff] }
 0x694   : > { %v9219_v63 = vpop.f32.mrf.mxu0  ;;  %v8445_v56 = vshll.u32 %v16999_v3, 16 }
 0x695   : > { %v16984_v57 = vadd.f32 %v9219_v63, %v16901_v54  ;;  %v8440_v44 = vsel %vm1313_vm2, %v8435_v13, %v8439_v22 }
 0x696   : > { %v10078_v46 = vpop.f32.mrf.mxu2  ;;  %v8607_v33 = vpop.f32.mrf.mxu3 }
 0x697   : > { %v9897_v33 = vrot.slane %v9895_v24, 1 }
 0x698   : > { %v7794_v30 = vpop.f32.mrf.mxu1 }
 0x699   : > { %v16988_v15 = vadd.f32 %v7794_v30, %v16744_v27  ;;  %v9891_v27 = vshrl.u32 %v12083_v58, 16  ;;  %v13744_v30 = vld [vmem:[#allocation2 + $0x3c] sm:$0xff]   ;;  %v9033_v58 = vshll.u32 %v13178_v39, 16 }
 0x69b   : > { %17581 = vst [vmem:[#allocation25_spill] sm:$0xff] %v16988_v15  ;;  %8643 = vmatmul.bf16.gmra.mxu3 %v8440_v44  ;;  %v9893_v13 = vor.u32 %v9891_v27, %v9889_v0  ;;  %v9030_v44 = vshrl.u32 %v13178_v39, 16  ;;  %v9035_v0 = vrot.slane %v9033_v58, 4  ;;  %v12085_v27 = vld [vmem:[#allocation2 + $0x94] sm:$0xff] }
 0x69c   : > { %v9222_v54 = vpop.f32.mrf.mxu0 }
 0x69d   : > { %v16992_v63 = vadd.f32 %v9222_v54, %v16912_v49  ;;  %v9898_v45 = vsel %vm1313_vm2, %v9893_v13, %v9897_v33  ;;  %v17584_v54 = vld [vmem:[#allocation7_spill] sm:$0xff] }
 0x69e   : > { %v16997_v51 = vpop.f32.mrf.mxu2  ;;  %v8609_v46 = vpop.f32.mrf.mxu3  ;;  %v8085_v21 = vadd.f32 %v17584_v54, %v16724_v20 }
 0x69f   : > { %9256 = vmatmul.bf16.gmra.mxu0 %v9028_v6  ;;  %v17001_v52 = vadd.f32 %v8609_v46, %v8084_v37  ;;  %v8447_v46 = vrot.slane %v8445_v56, 1 }
 0x6a0   : > { %v7797_v9 = vpop.f32.mrf.mxu1 }
 0x6a1   : > { %v17004_v49 = vadd.f32 %v7797_v9, %v16755_v36  ;;  %v8441_v36 = vshrl.u32 %v16977_v53, 16  ;;  %v9032_v9 = vrot.slane %v9030_v44, 3  ;;  %v9899_v44 = vshrl.u32 %v12084_v28, 16 }
 0x6a3   : > { %17583 = vst [vmem:[#allocation35_spill] sm:$0xff] %v17004_v49  ;;  %9475 = vmatmul.bf16.gmra.mxu1 %v13744_v30  ;;  %10116 = vmatmul.bf16.gmra.mxu2 %v9898_v45  ;;  %v8443_v49 = vor.u32 %v8441_v36, %v8439_v22  ;;  %v9036_v45 = vor.u32 %v9035_v0, %v9032_v9  ;;  %v13179_v22 = vld [vmem:[#allocation2 + $0x98] sm:$0xff]  }
 0x6a4   : > { %v9224_v24 = vpop.f32.mrf.mxu0  ;;  %v9901_v36 = vor.u32 %v9899_v44, %v9897_v33  ;;  %v9042_v9 = vshll.u32 %v13179_v22, 16  ;;  %v8449_v33 = vshrl.u32 %v16999_v3, 16  ;;  %v12086_v44 = vld [vmem:[#allocation2 + $0x9c] sm:$0xff] }
 0x6a5   : > { %v8448_v39 = vsel %vm1313_vm2, %v8443_v49, %v8447_v46  ;;  %v9903_v24 = vshll.u32 %v12085_v27, 16  ;;  %v9037_v54 = vsel %vm710_vm3, %v9027_v11, %v9036_v45  ;;  %v9039_v11 = vshrl.u32 %v13179_v22, 16 }
 0x6a6   : > { %v17010_v37 = vpop.f32.mrf.mxu2  ;;  %v8611_v6 = vpop.f32.mrf.mxu3 }
 0x6a7   : > { %v17013_v13 = vadd.f32 %v8611_v6, %v8085_v21  ;;  %v9905_v58 = vrot.slane %v9903_v24, 1  ;;  %v13746_v6 = vld [vmem:[#allocation2 + $0x44] sm:$0xff]  }
 0x6a8   : > { %v7799_v30 = vpop.f32.mrf.mxu1 }
 0x6a9   : > { %v17586_v30 = vld [vmem:[#allocation11_spill] sm:$0xff] }
 0x6ab   : > { %8647 = vmatmul.bf16.gmra.mxu3 %v8448_v39  ;;  %v8086_v39 = vadd.f32 %v17586_v30, %v16750_v2  ;;  %v9911_v2 = vshll.u32 %v12086_v44, 16  ;;  %v17588_v30 = vld [vmem:[#allocation31_spill] sm:$0xff] }
 0x6ac   : > { %v9226_v15 = vpop.f32.mrf.mxu0  ;;  %v8087_v3 = vadd.f32 %v17588_v30, %v16768_v61  ;;  %v8457_v30 = vshrl.u32 %v17020_v25, 16 }
 0x6ad   : > { %v17017_v20 = vadd.f32 %v9226_v15, %v16933_v17  ;;  %v9906_v17 = vsel %vm1313_vm2, %v9901_v36, %v9905_v58  ;;  %v8453_v15 = vshll.u32 %v17020_v25, 16 }
 0x6ae   : > { %v10084_v53 = vpop.f32.mrf.mxu2  ;;  %v8614_v56 = vpop.f32.mrf.mxu3 }
 0x6af   : > { %9260 = vmatmul.bf16.gmra.mxu0 %v9037_v54  ;;  %v8455_v54 = vrot.slane %v8453_v15, 1  ;;  %v9041_v53 = vrot.slane %v9039_v11, 3  ;;  %v9044_v56 = vrot.slane %v9042_v9, 4 }
 0x6b0   : > { %v7801_v21 = vpop.f32.mrf.mxu1 }
 0x6b1   : > { %v17023_v49 = vadd.f32 %v7801_v21, %v16788_v5 }
 0x6b3   : > { %17585 = vst [vmem:[#allocation22_spill] sm:$0xff] %v17023_v49  ;;  %9479 = vmatmul.bf16.gmra.mxu1 %v13746_v6  ;;  %10120 = vmatmul.bf16.gmra.mxu2 %v9906_v17  ;;  %v9045_v17 = vor.u32 %v9044_v56, %v9041_v53  ;;  %v12043_v49 = vld [vmem:[#allocation2 + $0xb8] sm:$0xff]  ;;  %v13748_v53 = vld [vmem:[#allocation2 + $0x4c] sm:$0xff]  }
 0x6b4   : > { %v9228_v28 = vpop.f32.mrf.mxu0 }
 0x6b5   : > { %v17028_v0 = vadd.f32 %v9228_v28, %v16944_v31  ;;  %v8451_v31 = vor.u32 %v8449_v33, %v8447_v46  ;;  %v9046_v15 = vsel %vm710_vm3, %v9036_v45, %v9045_v17  ;;  %v13180_v33 = vld [vmem:[#allocation2 + $0xa0] sm:$0xff]  }
 0x6b6   : > { %v17032_v24 = vpop.f32.mrf.mxu2  ;;  %v8615_v5 = vpop.f32.mrf.mxu3  ;;  %v9048_v61 = vshrl.u32 %v13180_v33, 16 }
 0x6b7   : > { %v17035_v6 = vadd.f32 %v8615_v5, %v8086_v39  ;;  %v8456_v36 = vsel %vm1313_vm2, %v8451_v31, %v8455_v54  ;;  %v9907_v39 = vshrl.u32 %v12085_v27, 16  ;;  %v9913_v5 = vrot.slane %v9911_v2, 1 }
 0x6b8   : > { %v7803_v21 = vpop.f32.mrf.mxu1  ;;  %v8461_v31 = vshll.u32 %v12043_v49, 16 }
 0x6b9   : > { %v17038_v22 = vadd.f32 %v7803_v21, %v16803_v26  ;;  %v9909_v56 = vor.u32 %v9907_v39, %v9905_v58 }
 0x6bb   : > { %17587 = vst [vmem:[#allocation26_spill] sm:$0xff] %v17038_v22  ;;  %8652 = vmatmul.bf16.gmra.mxu3 %v8456_v36  ;;  %v9914_v21 = vsel %vm1313_vm2, %v9909_v56, %v9913_v5  ;;  %v9051_v36 = vshll.u32 %v13180_v33, 16 }
 0x6bc   : > { %v9231_v28 = vpop.f32.mrf.mxu0 }
 0x6be   : > { %v17044_v11 = vpop.f32.mrf.mxu2  ;;  %v8618_v9 = vpop.f32.mrf.mxu3 }
 0x6bf   : > { %17589 = vst [vmem:[#allocation6_spill] sm:$0xff] %v17044_v11  ;;  %9264 = vmatmul.bf16.gmra.mxu0 %v9046_v15  ;;  %v17046_v46 = vadd.f32 %v8618_v9, %v8087_v3  ;;  %v8463_v3 = vrot.slane %v8461_v31, 1  ;;  %v9050_v15 = vrot.slane %v9048_v61, 3  ;;  %v9053_v9 = vrot.slane %v9051_v36, 4 }
 0x6c0   : > { %v7806_v26 = vpop.f32.mrf.mxu1  ;;  %v9915_v36 = vshrl.u32 %v12086_v44, 16 }
 0x6c1   : > { %v12087_v26 = vld [vmem:[#allocation2 + $0xa4] sm:$0xff]  ;;  %v9054_v56 = vor.u32 %v9053_v9, %v9050_v15  ;;  %v13750_v15 = vld [vmem:[#allocation2 + $0x54] sm:$0xff]  }
 0x6c2   : > { %v9917_v9 = vor.u32 %v9915_v36, %v9913_v5 }
 0x6c3   : > { %9483 = vmatmul.bf16.gmra.mxu1 %v13748_v53  ;;  %10124 = vmatmul.bf16.gmra.mxu2 %v9914_v21  ;;  %v8459_v53 = vor.u32 %v8457_v30, %v8455_v54  ;;  %v9919_v21 = vshll.u32 %v12087_v26, 16  ;;  %v9055_v25 = vsel %vm710_vm3, %v9045_v17, %v9054_v56  ;;  %v13181_v54 = vld [vmem:[#allocation2 + $0xa8] sm:$0xff]  }
 0x6c4   : > { %v9232_v45 = vpop.f32.mrf.mxu0  ;;  %v9057_v17 = vshrl.u32 %v13181_v54, 16 }
 0x6c5   : > { %v17050_v28 = vadd.f32 %v9232_v45, %v16966_v12  ;;  %v8464_v33 = vsel %vm1313_vm2, %v8459_v53, %v8463_v3  ;;  %v9060_v53 = vshll.u32 %v13181_v54, 16 }
 0x6c6   : > { %v10091_v27 = vpop.f32.mrf.mxu2  ;;  %v8620_v2 = vpop.f32.mrf.mxu3 }
 0x6c7   : > { %v9921_v27 = vrot.slane %v9919_v21, 1  ;;  %v8465_v21 = vshrl.u32 %v12043_v49, 16  ;;  %v9062_v22 = vrot.slane %v9060_v53, 4  ;;  %v9923_v49 = vshrl.u32 %v12087_v26, 16 }
 0x6c8   : > { %v7807_v58 = vpop.f32.mrf.mxu1 }
 0x6c9   : > { %v17054_v39 = vadd.f32 %v7807_v58, %v16838_v8  ;;  %v12044_v8 = vld [vmem:[#allocation2 + $0xc0] sm:$0xff] }
 0x6ca   : > { %v8469_v58 = vshll.u32 %v12044_v8, 16 }
 0x6cb   : > { %17590 = vst [vmem:[#allocation33_spill] sm:$0xff] %v17054_v39  ;;  %8656 = vmatmul.bf16.gmra.mxu3 %v8464_v33  ;;  %v9059_v39 = vrot.slane %v9057_v17, 3  ;;  %v12045_v17 = vld [vmem:[#allocation2 + $0xc8] sm:$0xff] }
 0x6cc   : > { %v9235_v12 = vpop.f32.mrf.mxu0 }
 0x6cd   : > { %v17058_v45 = vadd.f32 %v9235_v12, %v16979_v42  ;;  %v9922_v42 = vsel %vm1313_vm2, %v9917_v9, %v9921_v27  ;;  %v9063_v36 = vor.u32 %v9062_v22, %v9059_v39  ;;  %v8477_v39 = vshll.u32 %v12045_v17, 16 }
 0x6ce   : > { %v17061_v31 = vpop.f32.mrf.mxu2  ;;  %v17063_v61 = vpop.f32.mrf.mxu3 }
 0x6cf   : > { %17591 = vst [vmem:[#allocation27_spill] sm:$0xff] %v17058_v45  ;;  %9269 = vmatmul.bf16.gmra.mxu0 %v9055_v25  ;;  %v8471_v25 = vrot.slane %v8469_v58, 1 }
 0x6d0   : > { %v7810_v2 = vpop.f32.mrf.mxu1 }
 0x6d1   : > { %v17066_v30 = vadd.f32 %v7810_v2, %v16853_v59  ;;  %v12088_v59 = vld [vmem:[#allocation2 + $0xac] sm:$0xff] }
 0x6d3   : > { %17592 = vst [vmem:[#allocation18_spill] sm:$0xff] %v17066_v30  ;;  %9488 = vmatmul.bf16.gmra.mxu1 %v13750_v15  ;;  %10129 = vmatmul.bf16.gmra.mxu2 %v9922_v42  ;;  %v8467_v30 = vor.u32 %v8465_v21, %v8463_v3  ;;  %v9927_v15 = vshll.u32 %v12088_v59, 16  ;;  %v9064_v42 = vsel %vm710_vm3, %v9054_v56, %v9063_v36  ;;  %v13752_v3 = vld [vmem:[#allocation2 + $0x5c] sm:$0xff]  }
 0x6d4   : > { %v9237_v33 = vpop.f32.mrf.mxu0  ;;  %v9925_v21 = vor.u32 %v9923_v49, %v9921_v27  ;;  %v17086_v27 = vld [vmem:[#allocation2 + $0xb4] sm:$0xff] }
 0x6d5   : > { %v8472_v5 = vsel %vm1313_vm2, %v8467_v30, %v8471_v25  ;;  %v9929_v58 = vrot.slane %v9927_v15, 1  ;;  %v8473_v15 = vshrl.u32 %v12044_v8, 16 }
 0x6d6   : > { %v17069_v12 = vpop.f32.mrf.mxu2  ;;  %v17071_v44 = vpop.f32.mrf.mxu3 }
 0x6d7   : > { %17593 = vst [vmem:[#allocation17_spill] sm:$0xff] %v17069_v12  ;;  %v9930_v22 = vsel %vm1313_vm2, %v9925_v21, %v9929_v58  ;;  %v8475_v21 = vor.u32 %v8473_v15, %v8471_v25  ;;  %v13183_v25 = vld [vmem:[#allocation2 + $0xb8] sm:$0xff]   ;;  %v13754_v15 = vld [vmem:[#allocation2 + $0x64] sm:$0xff]  }
 0x6d8   : > { %v7812_v2 = vpop.f32.mrf.mxu1 }
 0x6d9   : > { %v13182_v2 = vld [vmem:[#allocation2 + $0xb0] sm:$0xff]  }
 0x6da   : > { %v9066_v30 = vshrl.u32 %v13182_v2, 16 }
 0x6db   : > { %8660 = vmatmul.bf16.gmra.mxu3 %v8472_v5  ;;  %v9069_v5 = vshll.u32 %v13182_v2, 16 }
 0x6dc   : > { %v9239_v9 = vpop.f32.mrf.mxu0 }
 0x6dd   : > { %v17075_v54 = vadd.f32 %v9239_v9, %v17001_v52  ;;  %v8479_v9 = vrot.slane %v8477_v39, 1  ;;  %v9931_v39 = vshrl.u32 %v12088_v59, 16 }
 0x6de   : > { %v10097_v33 = vpop.f32.mrf.mxu2  ;;  %v8627_v12 = vpop.f32.mrf.mxu3 }
 0x6df   : > { %17594 = vst [vmem:[#allocation28_spill] sm:$0xff] %v17075_v54  ;;  %9273 = vmatmul.bf16.gmra.mxu0 %v9064_v42  ;;  %v9068_v42 = vrot.slane %v9066_v30, 3  ;;  %v9071_v33 = vrot.slane %v9069_v5, 4  ;;  %v8480_v2 = vsel %vm1313_vm2, %v8475_v21, %v8479_v9  ;;  %v9935_v54 = vshll.u32 %v17086_v27, 16 }
 0x6e0   : > { %v9458_v53 = vpop.f32.mrf.mxu1  ;;  %v9933_v21 = vor.u32 %v9931_v39, %v9929_v58  ;;  %v12090_v39 = vld [vmem:[#allocation2 + $0xbc] sm:$0xff] }
 0x6e1   : > { %v9937_v30 = vrot.slane %v9935_v54, 1 }
 0x6e3   : > { %9492 = vmatmul.bf16.gmra.mxu1 %v13752_v3  ;;  %10133 = vmatmul.bf16.gmra.mxu2 %v9930_v22  ;;  %v8152_v3 = vld [vmem:[#allocation2 + $0xd0] sm:$0x1]  ;;  %v9072_v22 = vor.u32 %v9071_v33, %v9068_v42  ;;  %v9938_v42 = vsel %vm1313_vm2, %v9933_v21, %v9937_v30 }
 0x6e4   : > { %v9241_v52 = vpop.f32.mrf.mxu0 }
 0x6e5   : > { %v17080_v56 = vadd.f32 %v9241_v52, %v17013_v13  ;;  %v8267_v13 = vunpack.c.l.b16 %v8152_v3  ;;  %v9075_v3 = vshrl.u32 %v13183_v25, 16 }
 0x6e6   : > { %v17082_v12 = vpop.f32.mrf.mxu2  ;;  %v17084_v26 = vpop.f32.mrf.mxu3 }
 0x6e7   : > { %17595 = vst [vmem:[#allocation10_spill] sm:$0xff] %v17080_v56  ;;  %v9073_v56 = vsel %vm710_vm3, %v9063_v36, %v9072_v22  ;;  %v8292_v5 = vpack.c.b16 %v8267_v13, %v8267_v13  ;;  %v9562_v36 = vadd.f32 %v9458_v53, %v16884_v43  ;;  %v9077_v11 = vrot.slane %v9075_v3, 3 }
 0x6e8   : > { %17596 = vst [vmem:[#allocation20_spill] sm:$0xff] %v17082_v12  ;;  %v9460_v49 = vpop.f32.mrf.mxu1 }
 0x6e9   : > { %v8485_v33 = vshll.u32 %v8292_v5, 16  ;;  %v10164_v5 = vadd.f32 %v16898_v40, %v9562_v36  ;;  %v9563_v21 = vadd.f32 %v9460_v49, %v16894_v35 }
 0x6eb   : > { %8665 = vmatmul.bf16.gmra.mxu3 %v8480_v2  ;;  %v9078_v2 = vshll.u32 %v13183_v25, 16  ;;  %v8487_v13 = vrot.slane %v8485_v33, 1  ;;  %v17104_v25 = vld [vmem:[%s17435_s4] ss:$0 sm:$0xff]  ;;  %v10165_v35 = vadd.f32 %v16910_v10, %v9563_v21 }
 0x6ec   : > { %v9244_v52 = vpop.f32.mrf.mxu0 }
 0x6ed   : > { %v9080_v58 = vrot.slane %v9078_v2, 4 }
 0x6ee   : > { %v17091_v12 = vpop.f32.mrf.mxu2  ;;  %v17093_v8 = vpop.f32.mrf.mxu3 }
 0x6ef   : > { %17597 = vst [vmem:[#allocation29_spill] sm:$0xff] %v17091_v12  ;;  %9277 = vmatmul.bf16.gmra.mxu0 %v9073_v56  ;;  %v8481_v12 = vshrl.u32 %v12045_v17, 16  ;;  %v9081_v53 = vor.u32 %v9080_v58, %v9077_v11  ;;  %v9939_v11 = vshrl.u32 %v17086_v27, 16  ;;  %v10201_v27 = vadd.f32 %v17104_v25, %v10165_v35 }
 0x6f0   : > { %v9463_v45 = vpop.f32.mrf.mxu1 }
 0x6f1   : > { %v8483_v45 = vor.u32 %v8481_v12, %v8479_v9  ;;  %v9943_v12 = vshll.u32 %v12090_v39, 16  ;;  %v10200_v9 = vadd.f32 %v17104_v25, %v10164_v5  ;;  %v9082_v3 = vsel %vm710_vm3, %v9072_v22, %v9081_v53 }
 0x6f3   : > { %9496 = vmatmul.bf16.gmra.mxu1 %v13754_v15  ;;  %10137 = vmatmul.bf16.gmra.mxu2 %v9938_v42  ;;  %v8488_v17 = vsel %vm1313_vm2, %v8483_v45, %v8487_v13  ;;  %v9945_v2 = vrot.slane %v9943_v12, 1  ;;  %v17598_v12 = vld [vmem:[#allocation21_spill] sm:$0xff] }
 0x6f4   : > { %v9245_v52 = vpop.f32.mrf.mxu0 }
 0x6f5   : > { %v17098_v59 = vadd.f32 %v9245_v52, %v17035_v6 }
 0x6f6   : > { %v10104_v54 = vpop.f32.mrf.mxu2  ;;  %v8633_v56 = vpop.f32.mrf.mxu3 }
 0x6f7   : > { %v13184_v54 = vld [vmem:[#allocation2 + $0xc0] sm:$0xff]   ;;  %v13756_v56 = vld [vmem:[#allocation2 + $0x6c] sm:$0xff]  }
 0x6f8   : > { %v9464_v15 = vpop.f32.mrf.mxu1  ;;  %v9084_v13 = vshrl.u32 %v13184_v54, 16  ;;  %v9087_v58 = vshll.u32 %v13184_v54, 16 }
 0x6f9   : > { %v9564_v43 = vadd.f32 %v9464_v15, %v16917_v23 }
 0x6fb   : > { %v10166_v6 = vadd.f32 %v16929_v18, %v9564_v43  ;;  %8669 = vmatmul.bf16.gmra.mxu3 %v8488_v17  ;;  %v12091_v17 = vld [vmem:[#allocation2 + $0xc4] sm:$0xff] }
 0x6fc   : > { %v9248_v42 = vpop.f32.mrf.mxu0 }
 0x6fd   : > { %v10202_v40 = vadd.f32 %v17104_v25, %v10166_v6  ;;  %v17113_v33 = vadd.f32 %v9248_v42, %v17046_v46  ;;  %v9941_v46 = vor.u32 %v9939_v11, %v9937_v30  ;;  %v9089_v30 = vrot.slane %v9087_v58, 4 }
 0x6fe   : > { %v17116_v23 = vpop.f32.mrf.mxu2  ;;  %v17118_v18 = vpop.f32.mrf.mxu3 }
 0x6ff   : > { %v10233_v36 = vadd.f32 %v10202_v40, %v10200_v9  ;;  %9282 = vmatmul.bf16.gmra.mxu0 %v9082_v3  ;;  %v9946_v22 = vsel %vm1313_vm2, %v9941_v46, %v9945_v2  ;;  %v8088_v9 = vadd.f32 %v17598_v12, %v16795_v19  ;;  %v9951_v40 = vshll.u32 %v12091_v17, 16  ;;  %v17599_v19 = vld [vmem:[#allocation8_spill] sm:$0xff] }
 0x700   : > { %v9467_v52 = vpop.f32.mrf.mxu1  ;;  %v12092_v12 = vld [vmem:[#allocation2 + $0xcc] sm:$0xff] }
 0x701   : > { %v9565_v49 = vadd.f32 %v9467_v52, %v16924_v1  ;;  %v9086_v1 = vrot.slane %v9084_v13, 3  ;;  %v8690_v42 = vadd.f32 %v17063_v61, %v8088_v9 }
 0x703   : > { %v10167_v45 = vadd.f32 %v16942_v50, %v9565_v49  ;;  %9501 = vmatmul.bf16.gmra.mxu1 %v13756_v56  ;;  %10142 = vmatmul.bf16.gmra.mxu2 %v9946_v22  ;;  %v9090_v21 = vor.u32 %v9089_v30, %v9086_v1  ;;  %v9947_v49 = vshrl.u32 %v12090_v39, 16  ;;  %v9953_v56 = vrot.slane %v9951_v40, 1  ;;  %v13758_v22 = vld [vmem:[#allocation2 + $0x74] sm:$0xff]  }
 0x704   : > { %v9250_v5 = vpop.f32.mrf.mxu0  ;;  %v8094_v39 = vadd.f32 %v16672_v38, %v16920_v4 }
 0x705   : > { %v10203_v15 = vadd.f32 %v17104_v25, %v10167_v45  ;;  %v9091_v52 = vsel %vm710_vm3, %v9081_v53, %v9090_v21  ;;  %v13185_v45 = vld [vmem:[#allocation2 + $0xc8] sm:$0xff]   ;;  %v9949_v13 = vor.u32 %v9947_v49, %v9945_v2 }
 0x706   : > { %v17127_v6 = vpop.f32.mrf.mxu2  ;;  %v17129_v10 = vpop.f32.mrf.mxu3  ;;  %v9093_v58 = vshrl.u32 %v13185_v45, 16 }
 0x707   : > { %v10234_v43 = vadd.f32 %v10203_v15, %v10201_v27  ;;  %v9954_v61 = vsel %vm1313_vm2, %v9949_v13, %v9953_v56  ;;  %v9096_v27 = vshll.u32 %v13185_v45, 16  ;;  %v17156_v45 = vld [vmem:[#allocation2 + $0xd0] sm:$0xff]  }
 0x708   : > { %v9469_v50 = vpop.f32.mrf.mxu1  ;;  %v9095_v1 = vrot.slane %v9093_v58, 3 }
 0x709   : > { %10253 = vmatpush.msrb.mxu3 %v10234_v43  ;;  %v9098_v30 = vrot.slane %v9096_v27, 4  ;;  %v8754_v27 = vld [vmem:[#allocation2 + $0xd8] sm:$0xf] }
 0x70b   : > { %10254 = vmatpush.msrb.mxu3 %v10233_v36  ;;  %v8089_v36 = vadd.f32 %v17599_v19, %v16815_v60  ;;  %v9099_v9 = vor.u32 %v9098_v30, %v9095_v1 }
 0x70c   : > { %v9252_v3 = vpop.f32.mrf.mxu0 }
 0x70d   : > { %v17134_v11 = vadd.f32 %v9252_v3, %v8690_v42  ;;  %v8691_v15 = vadd.f32 %v17071_v44, %v8089_v36  ;;  %v9955_v42 = vshrl.u32 %v12091_v17, 16  ;;  %v9959_v44 = vshll.u32 %v12092_v12, 16  ;;  %v17600_v17 = vld [vmem:[#allocation15_spill] sm:$0xff] }
 0x70e   : > { %v10110_v54 = vpop.f32.mrf.mxu2  ;;  %v8640_v35 = vpop.f32.mrf.mxu3  ;;  %v8095_v3 = vadd.f32 %v16686_v47, %v16936_v48  ;;  %v8090_v19 = vadd.f32 %v17600_v17, %v16844_v32  ;;  %v9102_v48 = vshrl.u32 %v17156_v45, 16 }
 0x70f   : > { %9286 = vmatmul.bf16.gmra.mxu0 %v9091_v52  ;;  %v9100_v52 = vsel %vm710_vm3, %v9090_v21, %v9099_v9  ;;  %v9957_v4 = vor.u32 %v9955_v42, %v9953_v56  ;;  %v9961_v13 = vrot.slane %v9959_v44, 1  ;;  %v9105_v21 = vshll.u32 %v17156_v45, 16 }
 0x710   : > { %v9471_v46 = vpop.f32.mrf.mxu1  ;;  %v8692_v56 = vadd.f32 %v17084_v26, %v8090_v19  ;;  %v17171_v42 = vunpack.c.l.b16 %v8754_v27  ;;  %v17601_v26 = vld [vmem:[#allocation34_spill] sm:$0xff] }
 0x711   : > { %v9962_v47 = vsel %vm1313_vm2, %v9957_v4, %v9961_v13  ;;  %v9566_v36 = vadd.f32 %v9471_v46, %v16948_v16  ;;  %v9107_v32 = vrot.slane %v9105_v21, 4  ;;  %v8091_v16 = vadd.f32 %v17601_v26, %v16869_v41 }
 0x712   : > { %v8096_v41 = vadd.f32 %v16716_v14, %v16954_v29 }
 0x713   : > { %9505 = vmatmul.bf16.gmra.mxu1 %v13758_v22  ;;  %10146 = vmatmul.bf16.gmra.mxu2 %v9954_v61  ;;  %v13760_v22 = vld [vmem:[#allocation2 + $0x7c] sm:$0xff]   ;;  %v10168_v30 = vadd.f32 %v16963_v55, %v9566_v36  ;;  %v13762_v36 = vld [vmem:[#allocation2 + $0x84] sm:$0xff]  }
 0x714   : > { %v9254_v53 = vpop.f32.mrf.mxu0 }
 0x715   : > { %v17141_v5 = vadd.f32 %v9254_v53, %v8691_v15  ;;  %v10204_v4 = vadd.f32 %v17104_v25, %v10168_v30 }
 0x716   : > { %v17145_v43 = vpop.f32.mrf.mxu2  ;;  %v8641_v2 = vpop.f32.mrf.mxu3 }
 0x717   : > { %v17147_v50 = vadd.f32 %v8641_v2, %v8094_v39  ;;  %v9104_v39 = vrot.slane %v9102_v48, 3  ;;  %v17167_v2 = vld [vmem:[#allocation2 + $0xd4] sm:$0xff] }
 0x718   : > { %v9473_v60 = vpop.f32.mrf.mxu1 }
 0x719   : > { %v9108_v44 = vor.u32 %v9107_v32, %v9104_v39 }
 0x71c   : > { %v9257_v40 = vpop.f32.mrf.mxu0 }
 0x71e   : > { %v17152_v54 = vpop.f32.mrf.mxu2  ;;  %v8644_v38 = vpop.f32.mrf.mxu3 }
 0x71f   : > { %9290 = vmatmul.bf16.gmra.mxu0 %v9100_v52  ;;  %v17154_v49 = vadd.f32 %v8644_v38, %v8095_v3  ;;  %v9967_v3 = vshll.u32 %v17167_v2, 16  ;;  %v8693_v52 = vadd.f32 %v17093_v8, %v8091_v16  ;;  %v9963_v38 = vshrl.u32 %v12092_v12, 16  ;;  %v17603_v16 = vld [vmem:[#allocation24_spill] sm:$0xff] }
 0x720   : > { %v9476_v35 = vpop.f32.mrf.mxu1 }
 0x721   : > { %v9567_v35 = vadd.f32 %v9473_v60, %v16959_v62  ;;  %v9965_v12 = vor.u32 %v9963_v38, %v9961_v13 }
 0x723   : > { %9509 = vmatmul.bf16.gmra.mxu1 %v13760_v22  ;;  %10150 = vmatmul.bf16.gmra.mxu2 %v9962_v47  ;;  %v8894_v22 = vpack.c.b16 %v17171_v42, %v17171_v42  ;;  %v17190_v47 = vrot.slane %v9967_v3, 1  ;;  %v10169_v21 = vadd.f32 %v16975_v7, %v9567_v35  ;;  %v17602_v7 = vld [vmem:[#allocation13_spill] sm:$0xff] }
 0x724   : > { %v9258_v61 = vpop.f32.mrf.mxu0 }
 0x725   : > { %v17165_v58 = vadd.f32 %v9258_v61, %v8692_v56  ;;  %v9111_v61 = vshrl.u32 %v8894_v22, 16  ;;  %v9114_v14 = vshll.u32 %v8894_v22, 16  ;;  %v10205_v13 = vadd.f32 %v17104_v25, %v10169_v21  ;;  %v13764_v22 = vld [vmem:[#allocation2 + $0x8c] sm:$0xff]   ;;  %v17608_v21 = vld [vmem:[#allocation9_spill] sm:$0xff] }
 0x726   : > { %v10117_v15 = vpop.f32.mrf.mxu2  ;;  %v8646_v53 = vpop.f32.mrf.mxu3 }
 0x727   : > { %v9113_v53 = vrot.slane %v9111_v61, 3  ;;  %v9116_v39 = vrot.slane %v9114_v14, 4 }
 0x728   : > { %v9477_v1 = vpop.f32.mrf.mxu1 }
 0x729   : > { %v9568_v40 = vadd.f32 %v9477_v1, %v16984_v57  ;;  %v9117_v26 = vor.u32 %v9116_v39, %v9113_v53 }
 0x72b   : > { %v10170_v46 = vadd.f32 %v16997_v51, %v9568_v40  ;;  %v9109_v51 = vsel %vm710_vm3, %v9099_v9, %v9108_v44  ;;  %v9970_v9 = vsel %vm1313_vm2, %v9965_v12, %v17190_v47 }
 0x72c   : > { %v9261_v57 = vpop.f32.mrf.mxu0 }
 0x72d   : > { %v10206_v55 = vadd.f32 %v17104_v25, %v10170_v46  ;;  %v17183_v17 = vadd.f32 %v9261_v57, %v8693_v52  ;;  %v17604_v46 = vld [vmem:[#allocation36_spill] sm:$0xff] }
 0x72e   : > { %v17188_v19 = vpop.f32.mrf.mxu2  ;;  %v8648_v8 = vpop.f32.mrf.mxu3  ;;  %v8092_v3 = vadd.f32 %v17604_v46, %v17603_v16 }
 0x72f   : > { %v10259_v62 = vadd.f32 %v10206_v55, %v10204_v4  ;;  %9295 = vmatmul.bf16.gmra.mxu0 %v9109_v51  ;;  %v17192_v48 = vadd.f32 %v8648_v8, %v8096_v41  ;;  %v9118_v4 = vsel %vm710_vm3, %v9108_v44, %v9117_v26  ;;  %v17605_v41 = vld [vmem:[#allocation32_spill] sm:$0xff]  ;;  %v17606_v51 = vld [vmem:[#allocation14_spill] sm:$0xff] }
 0x730   : > { %v9480_v60 = vpop.f32.mrf.mxu1  ;;  %v8694_v52 = vadd.f32 %v17118_v18, %v8092_v3  ;;  %v8093_v8 = vadd.f32 %v17606_v51, %v17605_v41  ;;  %v17607_v18 = vld [vmem:[#allocation25_spill] sm:$0xff] }
 0x731   : > { %v9569_v56 = vadd.f32 %v9480_v60, %v16992_v63  ;;  %v8097_v63 = vadd.f32 %v17602_v7, %v16969_v34 }
 0x732   : > { %v8695_v12 = vadd.f32 %v17129_v10, %v8093_v8 }
 0x733   : > { %v10171_v29 = vadd.f32 %v17010_v37, %v9569_v56  ;;  %9514 = vmatmul.bf16.gmra.mxu1 %v13762_v36  ;;  %10155 = vmatmul.bf16.gmra.mxu2 %v9970_v9  ;;  %v8098_v56 = vadd.f32 %v17608_v21, %v17607_v18  ;;  %v17609_v9 = vld [vmem:[#allocation35_spill] sm:$0xff]  ;;  %v13768_v21 = vld [vmem:[#allocation2 + $0x9c] sm:$0xff]  }
 0x734   : > { %v9263_v15 = vpop.f32.mrf.mxu0  ;;  %v17614_v18 = vld [vmem:[#allocation27_spill] sm:$0xff] }
 0x735   : > { %v10207_v27 = vadd.f32 %v17104_v25, %v10171_v29  ;;  %v17227_v29 = vld [vmem:[%s17438_s7] sm:$0xff] }
 0x736   : > { %v17203_v1 = vpop.f32.mrf.mxu2  ;;  %v8650_v30 = vpop.f32.mrf.mxu3  ;;  %11849 = vmatmul.msk.f32.vlgmr.msrb.gmra.mxu3 %vm10235_vm4, %v17227_v29 }
 0x737   : > { %v10260_v32 = vadd.f32 %v10207_v27, %v10205_v13  ;;  %v17205_v40 = vadd.f32 %v8650_v30, %v8097_v63  ;;  %v17610_v13 = vld [vmem:[#allocation12_spill] sm:$0xff] }
 0x738   : > { %v9482_v37 = vpop.f32.mrf.mxu1  ;;  %v8099_v27 = vadd.f32 %v17610_v13, %v17609_v9  ;;  %v13766_v63 = vld [vmem:[#allocation2 + $0x94] sm:$0xff]   ;;  %v17616_v9 = vld [vmem:[#allocation26_spill] sm:$0xff]  ;;  %v17617_v13 = vld [vmem:[#allocation23_spill] sm:$0xff] }
 0x739   : > { %10275 = vmatpush.msra.mxu3 %v10260_v32 }
 0x73b   : > { %10276 = vmatpush.msra.mxu3 %v10259_v62 }
 0x73c   : > { %v9265_v38 = vpop.f32.mrf.mxu0 }
 0x73d   : > { %v17211_v35 = vadd.f32 %v9265_v38, %v8694_v52 }
 0x73e   : > { %v10123_v34 = vpop.f32.mrf.mxu2  ;;  %v8653_v55 = vpop.f32.mrf.mxu3  ;;  %11850 = vmatmul.msk.f32.vlgmr.msra.gmra.mxu3 %vm10235_vm4, %v17227_v29 }
 0x73f   : > { %9299 = vmatmul.bf16.gmra.mxu0 %v9118_v4 }
 0x740   : > { %v9484_v57 = vpop.f32.mrf.mxu1 }
 0x741   : > { %v9570_v32 = vadd.f32 %v9484_v57, %v17017_v20 }
 0x743   : > { %9518 = vmatmul.bf16.gmra.mxu1 %v13764_v22  ;;  %v10172_v3 = vadd.f32 %v17032_v24, %v9570_v32  ;;  %v17612_v22 = vld [vmem:[#allocation37_spill] sm:$0xff] }
 0x744   : > { %v9267_v60 = vpop.f32.mrf.mxu0 }
 0x745   : > { %v17216_v62 = vadd.f32 %v9267_v60, %v8695_v12  ;;  %v10208_v4 = vadd.f32 %v17104_v25, %v10172_v3 }
 0x746   : > { %v17220_v44 = vpop.f32.mrf.mxu2  ;;  %v8654_v36 = vpop.f32.mrf.mxu3 }
 0x747   : > { %v17222_v14 = vadd.f32 %v8654_v36, %v8098_v56  ;;  %v17615_v56 = vld [vmem:[#allocation17_spill] sm:$0xff] }
 0x748   : > { %v9486_v61 = vpop.f32.mrf.mxu1 }
 0x749   : > { %v9571_v34 = vadd.f32 %v9486_v61, %v17028_v0 }
 0x74c   : > { %v9270_v10 = vpop.f32.mrf.mxu0 }
 0x74e   : > { %v17233_v15 = vpop.f32.mrf.mxu2  ;;  %v8657_v53 = vpop.f32.mrf.mxu3 }
 0x74f   : > { %v17235_v7 = vadd.f32 %v8657_v53, %v8099_v27  ;;  %v8101_v27 = vadd.f32 %v17617_v13, %v17616_v9 }
 0x750   : > { %v9489_v39 = vpop.f32.mrf.mxu1 }
 0x753   : > { %9522 = vmatmul.bf16.gmra.mxu1 %v13766_v63 }
 0x754   : > { %v9271_v30 = vpop.f32.mrf.mxu0 }
 0x755   : > { %v17241_v37 = vadd.f32 %v9271_v30, %v17147_v50  ;;  %v17611_v50 = vld [vmem:[#allocation22_spill] sm:$0xff] }
 0x756   : > { %v10130_v26 = vpop.f32.mrf.mxu2  ;;  %v8659_v16 = vpop.f32.mrf.mxu3  ;;  %v8100_v41 = vadd.f32 %v17612_v22, %v17611_v50 }
 0x758   : > { %v9490_v46 = vpop.f32.mrf.mxu1 }
 0x759   : > { %v9572_v52 = vadd.f32 %v9490_v46, %v17050_v28 }
 0x75b   : > { %v10174_v38 = vadd.f32 %v17061_v31, %v9572_v52  ;;  %v17613_v31 = vld [vmem:[#allocation6_spill] sm:$0xff] }
 0x75c   : > { %v9274_v20 = vpop.f32.mrf.mxu0  ;;  %v10173_v60 = vadd.f32 %v17613_v31, %v9571_v34  ;;  %v17621_v31 = vld [vmem:[#allocation16_spill] sm:$0xff] }
 0x75d   : > { %v10210_v55 = vadd.f32 %v17104_v25, %v10174_v38  ;;  %v17250_v57 = vadd.f32 %v9274_v20, %v17154_v49  ;;  %v13770_v38 = vld [vmem:[#allocation2 + $0xa4] sm:$0xff]  }
 0x75e   : > { %v17254_v51 = vpop.f32.mrf.mxu2  ;;  %v8661_v24 = vpop.f32.mrf.mxu3  ;;  %v10209_v49 = vadd.f32 %v17104_v25, %v10173_v60  ;;  %v17619_v20 = vld [vmem:[#allocation19_spill] sm:$0xff] }
 0x75f   : > { %v10281_v8 = vadd.f32 %v10210_v55, %v10208_v4  ;;  %v17256_v12 = vadd.f32 %v8661_v24, %v8100_v41  ;;  %v17618_v55 = vld [vmem:[#allocation33_spill] sm:$0xff] }
 0x760   : > { %v9493_v28 = vpop.f32.mrf.mxu1  ;;  %v8102_v50 = vadd.f32 %v17619_v20, %v17618_v55 }
 0x761   : > { %v9573_v0 = vadd.f32 %v9493_v28, %v17614_v18  ;;  %v17620_v28 = vld [vmem:[#allocation18_spill] sm:$0xff] }
 0x762   : > { %v8103_v60 = vadd.f32 %v17621_v31, %v17620_v28  ;;  %v13774_v28 = vld [vmem:[#allocation2 + $0xb4] sm:$0xff]  }
 0x763   : > { %v10175_v36 = vadd.f32 %v17615_v56, %v9573_v0  ;;  %9527 = vmatmul.bf16.gmra.mxu1 %v13768_v21 }
 0x764   : > { %v9276_v10 = vpop.f32.mrf.mxu0 }
 0x765   : > { %v10211_v61 = vadd.f32 %v17104_v25, %v10175_v36  ;;  %v17622_v36 = vld [vmem:[#allocation28_spill] sm:$0xff] }
 0x766   : > { %v17265_v39 = vpop.f32.mrf.mxu2  ;;  %v8663_v63 = vpop.f32.mrf.mxu3 }
 0x767   : > { %v10282_v53 = vadd.f32 %v10211_v61, %v10209_v49  ;;  %v17267_v30 = vadd.f32 %v8663_v63, %v8101_v27 }
 0x768   : > { %v9495_v32 = vpop.f32.mrf.mxu1 }
 0x769   : > { %10297 = vmatpush.msrb.mxu3 %v10282_v53  ;;  %v17623_v53 = vld [vmem:[#allocation20_spill] sm:$0xff] }
 0x76b   : > { %10298 = vmatpush.msrb.mxu3 %v10281_v8 }
 0x76c   : > { %11851 = vmatmul.msk.f32.vlgmr.msrb.gmra.mxu3 %vm10235_vm4, %v17227_v29  ;;  %v9278_v26 = vpop.f32.mrf.mxu0 }
 0x76d   : > { %v17272_v16 = vadd.f32 %v9278_v26, %v17192_v48 }
 0x76e   : > { %v10136_v46 = vpop.f32.mrf.mxu2  ;;  %v8666_v3 = vpop.f32.mrf.mxu3 }
 0x76f   : > { %v17624_v3 = vld [vmem:[#allocation10_spill] sm:$0xff] }
 0x770   : > { %v9497_v52 = vpop.f32.mrf.mxu1 }
 0x771   : > { %v9574_v49 = vadd.f32 %v9497_v52, %v17622_v36 }
 0x773   : > { %9531 = vmatmul.bf16.gmra.mxu1 %v13770_v38  ;;  %v10176_v63 = vadd.f32 %v17623_v53, %v9574_v49  ;;  %v13776_v49 = vld [vmem:[#allocation2 + $0xbc] sm:$0xff]  }
 0x774   : > { %v9280_v4 = vpop.f32.mrf.mxu0  ;;  %v9642_v53 = vld [vmem:[#allocation2 + $0xdc] sm:$0x1] }
 0x775   : > { %v17275_v34 = vadd.f32 %v9280_v4, %v17205_v40  ;;  %v13772_v40 = vld [vmem:[#allocation2 + $0xac] sm:$0xff]   ;;  %v10212_v46 = vadd.f32 %v17104_v25, %v10176_v63  ;;  %v9757_v63 = vunpack.c.l.b16 %v9642_v53 }
 0x776   : > { %v17279_v22 = vpop.f32.mrf.mxu2  ;;  %v8667_v41 = vpop.f32.mrf.mxu3 }
 0x777   : > { %v17281_v8 = vadd.f32 %v8667_v41, %v8102_v50  ;;  %v17625_v41 = vld [vmem:[#allocation29_spill] sm:$0xff] }
 0x778   : > { %v9499_v24 = vpop.f32.mrf.mxu1 }
 0x779   : > { %v9575_v38 = vadd.f32 %v9499_v24, %v17624_v3 }
 0x77c   : > { %v9283_v48 = vpop.f32.mrf.mxu0 }
 0x77d   : > { %v10177_v48 = vadd.f32 %v17625_v41, %v9575_v38 }
 0x77e   : > { %v17285_v18 = vpop.f32.mrf.mxu2  ;;  %v8670_v0 = vpop.f32.mrf.mxu3 }
 0x77f   : > { %v17287_v56 = vadd.f32 %v8670_v0, %v8103_v60  ;;  %v10213_v24 = vadd.f32 %v17104_v25, %v10177_v48 }
 0x780   : > { %v9502_v21 = vpop.f32.mrf.mxu1 }
 0x783   : > { %9535 = vmatmul.bf16.gmra.mxu1 %v13772_v40 }
 0x784   : > { %v9284_v61 = vpop.f32.mrf.mxu0 }
 0x785   : > { %v17291_v10 = vadd.f32 %v9284_v61, %v17222_v14 }
 0x786   : > { %v10143_v9 = vpop.f32.mrf.mxu2  ;;  %v8672_v13 = vpop.f32.mrf.mxu3 }
 0x788   : > { %v9503_v27 = vpop.f32.mrf.mxu1 }
 0x789   : > { %v9576_v32 = vadd.f32 %v9503_v27, %v17098_v59 }
 0x78b   : > { %v10178_v26 = vadd.f32 %v17116_v23, %v9576_v32  ;;  %v9782_v32 = vpack.c.b16 %v9757_v63, %v9757_v63 }
 0x78c   : > { %v9287_v52 = vpop.f32.mrf.mxu0 }
 0x78d   : > { %v10214_v4 = vadd.f32 %v17104_v25, %v10178_v26  ;;  %v17300_v55 = vadd.f32 %v9287_v52, %v17235_v7  ;;  %v9971_v26 = vshrl.u32 %v17167_v2, 16  ;;  %v9975_v3 = vshll.u32 %v9782_v32, 16 }
 0x78e   : > { %v17302_v14 = vpop.f32.mrf.mxu2 }
 0x78f   : > { %v10303_v20 = vadd.f32 %v10214_v4, %v10212_v46  ;;  %v9977_v4 = vrot.slane %v9975_v3, 1 }
 0x790   : > { %v9506_v50 = vpop.f32.mrf.mxu1 }
 0x791   : > { %v9577_v59 = vadd.f32 %v9506_v50, %v17113_v33 }
 0x793   : > { %v10179_v23 = vadd.f32 %v17127_v6, %v9577_v59  ;;  %9540 = vmatmul.bf16.gmra.mxu1 %v13774_v28 }
 0x794   : > { %v9289_v60 = vpop.f32.mrf.mxu0 }
 0x795   : > { %v10215_v31 = vadd.f32 %v17104_v25, %v10179_v23 }
 0x796   : > { %v17309_v7 = vpop.f32.mrf.mxu2 }
 0x797   : > { %v10304_v0 = vadd.f32 %v10215_v31, %v10213_v24 }
 0x798   : > { %v9508_v21 = vpop.f32.mrf.mxu1 }
 0x799   : > { %10319 = vmatpush.msra.mxu3 %v10304_v0 }
 0x79b   : > { %10320 = vmatpush.msra.mxu3 %v10303_v20  ;;  %v13778_v20 = vld [vmem:[#allocation2 + $0xc4] sm:$0xff]  }
 0x79c   : > { %11852 = vmatmul.msk.f32.vlgmr.msra.gmra.mxu3 %vm10235_vm4, %v17227_v29  ;;  %v9291_v40 = vpop.f32.mrf.mxu0 }
 0x79d   : > { %v17314_v33 = vadd.f32 %v9291_v40, %v17256_v12  ;;  %v9973_v12 = vor.u32 %v9971_v26, %v17190_v47 }
 0x79e   : > { %v10149_v6 = vpop.f32.mrf.mxu2 }
 0x79f   : > { %v13779_v6 = vld [vmem:[#allocation2 + $0xcc] sm:$0xff]  }
 0x7a0   : > { %v9510_v36 = vpop.f32.mrf.mxu1 }
 0x7a1   : > { %v9578_v50 = vadd.f32 %v9510_v36, %v17134_v11 }
 0x7a3   : > { %9544 = vmatmul.bf16.gmra.mxu1 %v13776_v49  ;;  %v10180_v47 = vadd.f32 %v17145_v43, %v9578_v50 }
 0x7a4   : > { %v9293_v61 = vpop.f32.mrf.mxu0 }
 0x7a5   : > { %v17317_v9 = vadd.f32 %v9293_v61, %v17267_v30  ;;  %v9978_v30 = vsel %vm1313_vm2, %v9973_v12, %v9977_v4  ;;  %v10216_v24 = vadd.f32 %v17104_v25, %v10180_v47 }
 0x7a6   : > { %v17319_v13 = vpop.f32.mrf.mxu2  ;;  %10159 = vmatmul.bf16.gmra.mxu2 %v9978_v30 }
 0x7a8   : > { %v9512_v27 = vpop.f32.mrf.mxu1 }
 0x7a9   : > { %v9579_v31 = vadd.f32 %v9512_v27, %v17141_v5 }
 0x7ab   : > { %v10181_v40 = vadd.f32 %v17152_v54, %v9579_v31 }
 0x7ac   : > { %v9296_v46 = vpop.f32.mrf.mxu0 }
 0x7ae   : > { %v17323_v38 = vpop.f32.mrf.mxu2 }
 0x7b0   : > { %v9515_v52 = vpop.f32.mrf.mxu1 }
 0x7b3   : > { %9548 = vmatmul.bf16.gmra.mxu1 %v13778_v20 }
 0x7b4   : > { %v9297_v41 = vpop.f32.mrf.mxu0 }
 0x7b5   : > { %v17328_v48 = vadd.f32 %v9297_v41, %v17281_v8 }
 0x7b6   : > { %v10156_v2 = vpop.f32.mrf.mxu2 }
 0x7b8   : > { %v9516_v59 = vpop.f32.mrf.mxu1 }
 0x7b9   : > { %v9580_v28 = vadd.f32 %v9516_v59, %v17165_v58 }
 0x7bb   : > { %v10182_v23 = vadd.f32 %v17188_v19, %v9580_v28  ;;  %v10217_v19 = vadd.f32 %v17104_v25, %v10181_v40 }
 0x7bc   : > { %v9300_v0 = vpop.f32.mrf.mxu0 }
 0x7bd   : > { %v10218_v60 = vadd.f32 %v17104_v25, %v10182_v23  ;;  %v17337_v11 = vadd.f32 %v9300_v0, %v17287_v56  ;;  %v12782_v56 = vunpack.c.h.b16 %v17156_v45 }
 0x7bf   : > { %v10325_v8 = vadd.f32 %v10218_v60, %v10216_v24  ;;  %v9376_v54 = vpack.c.b16 %v17171_v42, %v12782_v56 }
 0x7c0   : > { %v9519_v21 = vpop.f32.mrf.mxu1 }
 0x7c1   : > { %v9581_v43 = vadd.f32 %v9519_v21, %v17183_v17 }
 0x7c3   : > { %v10183_v58 = vadd.f32 %v17203_v1, %v9581_v43  ;;  %9553 = vmatmul.bf16.gmra.mxu1 %v13779_v6  ;;  %v10256_v43 = vpop.f32.mrf.mxu3 }
 0x7c4   : > { %v9302_v36 = vpop.f32.mrf.mxu0 }
 0x7c5   : > { %v10219_v5 = vadd.f32 %v17104_v25, %v10183_v58 }
 0x7c7   : > { %v10326_v49 = vadd.f32 %v10219_v5, %v10217_v19 }
 0x7c8   : > { %v9521_v61 = vpop.f32.mrf.mxu1 }
 0x7c9   : > { %10341 = vmatpush.msrb.mxu3 %v10326_v49 }
 0x7cb   : > { %10342 = vmatpush.msrb.mxu3 %v10325_v8  ;;  %v10278_v6 = vpop.f32.mrf.mxu3 }
 0x7cc   : > { %11853 = vmatmul.msk.f32.vlgmr.msrb.gmra.mxu3 %vm10235_vm4, %v17227_v29  ;;  %v12786_v19 = vpack.c.bf16 %v10278_v6, %v10256_v43 }
 0x7ce   : > { %12787 = vst [vmem:[%s17380_s10] sm:$0xff] %v12786_v19  }
 0x7d0   : > { %v9523_v17 = vpop.f32.mrf.mxu1 }
 0x7d1   : > { %v9582_v53 = vadd.f32 %v9523_v17, %v17211_v35 }
 0x7d3   : > { %9557 = vmatmul.bf16.gmra.mxu1 %v9376_v54  ;;  %v10184_v32 = vadd.f32 %v17220_v44, %v9582_v53 }
 0x7d5   : > { %v10220_v45 = vadd.f32 %v17104_v25, %v10184_v32 }
 0x7d8   : > { %v9525_v1 = vpop.f32.mrf.mxu1 }
 0x7d9   : > { %v9583_v12 = vadd.f32 %v9525_v1, %v17216_v62 }
 0x7db   : > { %v10185_v52 = vadd.f32 %v17233_v15, %v9583_v12 }
 0x7dd   : > { %v10221_v44 = vadd.f32 %v17104_v25, %v10185_v52 }
 0x7e0   : > { %v9528_v27 = vpop.f32.mrf.mxu1 }
 0x7e8   : > { %v9529_v63 = vpop.f32.mrf.mxu1 }
 0x7e9   : > { %v9584_v26 = vadd.f32 %v9529_v63, %v17241_v37 }
 0x7eb   : > { %v10186_v46 = vadd.f32 %v17254_v51, %v9584_v26 }
 0x7ed   : > { %v10222_v3 = vadd.f32 %v17104_v25, %v10186_v46 }
 0x7ef   : > { %v10347_v42 = vadd.f32 %v10222_v3, %v10220_v45  ;;  %v10300_v56 = vpop.f32.mrf.mxu3 }
 0x7f0   : > { %v9532_v4 = vpop.f32.mrf.mxu1 }
 0x7f1   : > { %v9585_v20 = vadd.f32 %v9532_v4, %v17250_v57 }
 0x7f3   : > { %v10187_v35 = vadd.f32 %v17265_v39, %v9585_v20 }
 0x7f5   : > { %v10223_v37 = vadd.f32 %v17104_v25, %v10187_v35 }
 0x7f7   : > { %v10348_v30 = vadd.f32 %v10223_v37, %v10221_v44 }
 0x7f8   : > { %v9534_v51 = vpop.f32.mrf.mxu1 }
 0x7f9   : > { %10363 = vmatpush.msra.mxu3 %v10348_v30 }
 0x7fb   : > { %10364 = vmatpush.msra.mxu3 %v10347_v42 }
 0x7fc   : > { %11854 = vmatmul.msk.f32.vlgmr.msra.gmra.mxu3 %vm10235_vm4, %v17227_v29 }
 0x800   : > { %v9536_v62 = vpop.f32.mrf.mxu1 }
 0x801   : > { %v9586_v15 = vadd.f32 %v9536_v62, %v17272_v16 }
 0x803   : > { %v10188_v57 = vadd.f32 %v17279_v22, %v9586_v15 }
 0x805   : > { %v10224_v47 = vadd.f32 %v17104_v25, %v10188_v57 }
 0x808   : > { %v9538_v50 = vpop.f32.mrf.mxu1 }
 0x809   : > { %v9587_v28 = vadd.f32 %v9538_v50, %v17275_v34  ;;  %v10157_v34 = vpop.f32.mrf.mxu2 }
 0x80b   : > { %v10189_v60 = vadd.f32 %v17285_v18, %v9587_v28 }
 0x80d   : > { %v10225_v22 = vadd.f32 %v17104_v25, %v10189_v60 }
 0x810   : > { %v9541_v41 = vpop.f32.mrf.mxu1 }
 0x818   : > { %v9542_v2 = vpop.f32.mrf.mxu1 }
 0x819   : > { %v9588_v39 = vadd.f32 %v9542_v2, %v17291_v10 }
 0x81b   : > { %v10190_v59 = vadd.f32 %v17302_v14, %v9588_v39 }
 0x81d   : > { %v10226_v23 = vadd.f32 %v17104_v25, %v10190_v59 }
 0x81f   : > { %v10369_v24 = vadd.f32 %v10226_v23, %v10224_v47 }
 0x820   : > { %v9545_v31 = vpop.f32.mrf.mxu1 }
 0x821   : > { %v9589_v16 = vadd.f32 %v9545_v31, %v17300_v55 }
 0x823   : > { %v10191_v0 = vadd.f32 %v17309_v7, %v9589_v16 }
 0x825   : > { %v10227_v10 = vadd.f32 %v17104_v25, %v10191_v0 }
 0x827   : > { %v10370_v14 = vadd.f32 %v10227_v10, %v10225_v22 }
 0x828   : > { %v9547_v8 = vpop.f32.mrf.mxu1 }
 0x829   : > { %10385 = vmatpush.msrb.mxu3 %v10370_v14  ;;  %v10160_v18 = vpop.f32.mrf.mxu2 }
 0x82b   : > { %10386 = vmatpush.msrb.mxu3 %v10369_v24 }
 0x82c   : > { %11855 = vmatmul.msk.f32.vlgmr.msrb.gmra.mxu3 %vm10235_vm4, %v17227_v29 }
 0x830   : > { %v9549_v21 = vpop.f32.mrf.mxu1 }
 0x831   : > { %v10162_v55 = vpop.f32.mrf.mxu2  ;;  %v9590_v58 = vadd.f32 %v9549_v21, %v17314_v33 }
 0x833   : > { %v10192_v36 = vadd.f32 %v17319_v13, %v9590_v58  ;;  %v10322_v13 = vpop.f32.mrf.mxu3 }
 0x834   : > { %v12791_v46 = vpack.c.bf16 %v10322_v13, %v10300_v56 }
 0x835   : > { %v10228_v54 = vadd.f32 %v17104_v25, %v10192_v36 }
 0x836   : > { %13297 = vst [vmem:[%s17380_s10 + $0x8] sm:$0xff] %v12791_v46  }
 0x838   : > { %v9551_v40 = vpop.f32.mrf.mxu1 }
 0x839   : > { %v9591_v17 = vadd.f32 %v9551_v40, %v17317_v9 }
 0x83b   : > { %v10193_v53 = vadd.f32 %v17323_v38, %v9591_v17 }
 0x840   : > { %v9554_v7 = vpop.f32.mrf.mxu1 }
 0x848   : > { %v9555_v5 = vpop.f32.mrf.mxu1 }
 0x849   : > { %v9592_v49 = vadd.f32 %v9555_v5, %v17328_v48  ;;  %v10229_v48 = vadd.f32 %v17104_v25, %v10193_v53 }
 0x84b   : > { %v10194_v61 = vadd.f32 %v10157_v34, %v9592_v49 }
 0x84d   : > { %v10230_v1 = vadd.f32 %v17104_v25, %v10194_v61 }
 0x84f   : > { %v10391_v33 = vadd.f32 %v10230_v1, %v10228_v54  ;;  %v10344_v38 = vpop.f32.mrf.mxu3 }
 0x850   : > { %v9558_v27 = vpop.f32.mrf.mxu1 }
 0x851   : > { %v9593_v63 = vadd.f32 %v9558_v27, %v17337_v11 }
 0x853   : > { %v10195_v32 = vadd.f32 %v10160_v18, %v9593_v63 }
 0x855   : > { %v10231_v26 = vadd.f32 %v17104_v25, %v10195_v32 }
 0x857   : > { %v10392_v45 = vadd.f32 %v10231_v26, %v10229_v48 }
 0x858   : > { %v9560_v9 = vpop.f32.mrf.mxu1 }
 0x859   : > { %10407 = vmatpush.msra.mxu3 %v10392_v45 }
 0x85b   : > { %10408 = vmatpush.msra.mxu3 %v10391_v33 }
 0x85c   : > { %11856 = vmatmul.msk.f32.vlgmr.msra.gmra.mxu3 %vm10235_vm4, %v17227_v29 }
 0x87f   : > { %v10366_v11 = vpop.f32.mrf.mxu3 }
 0x880   : > { %v12796_v12 = vpack.c.bf16 %v10366_v11, %v10344_v38 }
 0x882   : > { %13298 = vst [vmem:[%s17380_s10 + $0x10] sm:$0xff] %v12796_v12  }
 0x8af   : > { %v10388_v3 = vpop.f32.mrf.mxu3 }
 0x8df   : > { %v10410_v25 = vpop.f32.mrf.mxu3 }
 0x8e0   : > { %v12801_v42 = vpack.c.bf16 %v10410_v25, %v10388_v3 }
 0x8e2   : > { %13299 = vst [vmem:[%s17380_s10 + $0x18] sm:$0xff] %v12801_v42  }
 0x8e3   : > { %14001 = shalt.err (!%p13998_p3)
}
 0x8e4   : > { %s14039_s19 = smov 64   ;;  %s14040_s10 = smov 4  }
 0x8e5   : > { %13922 = dma.vmem_to_hbm [thread:$0]  (%p14124_p5), %s10443_s25, 512, %s10445_s26, %s10430_s12, %s14039_s19, %s14039_s19, %s14040_s10  }
 0x8e6 PF: > { %p13928_p4 = scmp.ge.s32.totalorder %s14036_s30, 2  ;;  %s10459_s23 = sand.u32 1, %s14024_s27  }
 0x8e7   : > { %s10460_s24 = scalar_lea.sflag [#allocation4], %s10459_s23 }
 0x8e8   : > { %p13925_p7 = pnand %p13928_p4, %p14128_p6 }
 0x8ea   : > { %p13926_p8 = pneg %p13925_p7 }
 0x8ec   : > { %14019 = dma.done.wait (%p13926_p8), %s10460_s24, 512  }
 0x8ed   : > { %14021 = vsyncadd (%p13926_p8), %s10460_s24, 4294966784  ;;  %p18_p9 = scmp.ge.s32.totalorder %s14111_s11, 4   ;;  %s17626_s27 = smov %s14028_s28 }
 0x8ee   : > { %s17627_s28 = smov %s14032_s29  ;;  %s17628_s29 = smov %s14122_s14 }
 0x8ef   : > { %s17629_s30 = smov %s14111_s11  ;;  %20 = sbr.rel (!%p18_p9) target bundleno = 3 (0x3), region = 103 }
 0x8f4   :  { %10466 = vsyncpa [#allocation4], 1 }
 0x8f5   :  { %10468 = vsyncpa [#allocation4 + $0x1], 1 }

</bundles_post_ra>
